<compile_context>
chip_gen: v7x
topology: tpu7x:2x2x1
jax: 0.10.0
libtpu: 0.0.40
codegen_flags: <defaults>
</compile_context>

<pallas_src>
import functools

import jax
import jax.numpy as jnp
from jax import lax
from jax.experimental import pallas as pl
from jax.experimental.pallas import tpu as pltpu

NDF = 64
NEG_SLOPE = 0.2


def _round_up(x, m):
    return ((x + m - 1) // m) * m


# ---------------------------------------------------------------------------
# Pallas kernel: (tm, tk) @ (tk, tn) accumulated over K, + bias, opt. LeakyReLU
# ---------------------------------------------------------------------------
def _matmul_bias_act_kernel(a_ref, w_ref, b_ref, o_ref, acc_ref, *, apply_lrelu):
    @pl.when(pl.program_id(2) == 0)
    def _init():
        acc_ref[...] = jnp.zeros_like(acc_ref)

    acc_ref[...] += jnp.dot(a_ref[...], w_ref[...],
                            preferred_element_type=jnp.float32)

    @pl.when(pl.program_id(2) == pl.num_programs(2) - 1)
    def _finalize():
        acc = acc_ref[...] + b_ref[...]
        if apply_lrelu:
            acc = jnp.maximum(acc, NEG_SLOPE * acc)
        o_ref[...] = acc.astype(o_ref.dtype)


def _choose_tile_m(m):
    # Largest tile (<=512) that divides m with >=2 grid steps; else pad.
    for t in (512, 256, 128):
        if m % t == 0 and m >= 2 * t:
            return t
    if m > 512:
        return 512
    return _round_up(m, 8)


def _choose_tile_n(n_padded):
    if n_padded >= 512 and n_padded % 256 == 0:
        return 256
    return 128


def _choose_tile_k(k):
    if k > 1024 and k % 1024 == 0:
        return 1024
    return k


def _pallas_matmul_bias_act(a_bf16, w_bf16, b_f32, apply_lrelu, out_dtype):
    """out = act(a @ w + b). a,w are bf16; acc in fp32; N must be lane-dense (x128)."""
    m, k = a_bf16.shape
    k2, n = w_bf16.shape
    assert k == k2 and n % 128 == 0

    tm = _choose_tile_m(m)
    tn = _choose_tile_n(n)
    tk = _choose_tile_k(k)

    m_pad = _round_up(m, tm)
    if m_pad != m:
        a_bf16 = jnp.pad(a_bf16, ((0, m_pad - m), (0, 0)))

    grid = (m_pad // tm, n // tn, k // tk)

    out = pl.pallas_call(
        functools.partial(_matmul_bias_act_kernel, apply_lrelu=apply_lrelu),
        out_shape=jax.ShapeDtypeStruct((m_pad, n), out_dtype),
        grid_spec=pltpu.PrefetchScalarGridSpec(
            num_scalar_prefetch=0,
            grid=grid,
            in_specs=[
                pl.BlockSpec((tm, tk), lambda i, j, kk: (i, kk)),
                pl.BlockSpec((tk, tn), lambda i, j, kk: (kk, j)),
                pl.BlockSpec((1, tn), lambda i, j, kk: (0, j)),
            ],
            out_specs=pl.BlockSpec((tm, tn), lambda i, j, kk: (i, j)),
            scratch_shapes=[pltpu.VMEM((tm, tn), jnp.float32)],
        ),
        compiler_params=pltpu.CompilerParams(
            dimension_semantics=("parallel", "parallel", "arbitrary"),
        ),
    )(a_bf16, w_bf16, b_f32.reshape(1, n))

    return out[:m] if m_pad != m else out


# ---------------------------------------------------------------------------
# Conv 4x4, stride 2, pad 1  (im2col glue in JAX, matmul in Pallas)
# ---------------------------------------------------------------------------
def _im2col(x_nhwc, k=4, s=2, p=1):
    n, h, w, c = x_nhwc.shape
    oh = (h + 2 * p - k) // s + 1
    ow = (w + 2 * p - k) // s + 1
    xp = jnp.pad(x_nhwc, ((0, 0), (p, p), (p, p), (0, 0)))
    cols = []
    for kh in range(k):
        for kw in range(k):
            cols.append(xp[:, kh:kh + s * oh:s, kw:kw + s * ow:s, :])
    # (n, oh, ow, k*k, c) -> (n*oh*ow, k*k*c), feature order (kh, kw, cin)
    patches = jnp.stack(cols, axis=3).reshape(n * oh * ow, k * k * c)
    return patches, (n, oh, ow)


def _conv4x4_s2_p1(x_nhwc, w_oihw, b, apply_lrelu, out_dtype=jnp.bfloat16):
    cout = w_oihw.shape[0]
    patches, (n, oh, ow) = _im2col(x_nhwc)
    patches = patches.astype(jnp.bfloat16)
    kk = patches.shape[1]

    n_pad = _round_up(cout, 128)   # lane-dense output (conv1: 64->128, cls: 1->128)
    # (Cout, Cin, KH, KW) -> (KH, KW, Cin, Cout) -> (K, Cout), bf16, zero-padded cols
    w_mat = jnp.transpose(w_oihw, (2, 3, 1, 0)).reshape(kk, cout).astype(jnp.bfloat16)
    w_mat = jnp.pad(w_mat, ((0, 0), (0, n_pad - cout)))
    b_pad = jnp.pad(b.astype(jnp.float32), (0, n_pad - cout))

    out = _pallas_matmul_bias_act(patches, w_mat, b_pad, apply_lrelu, out_dtype)
    out = out[:, :cout]
    return out.reshape(n, oh, ow, cout)


# ---------------------------------------------------------------------------
# Bilinear upsample (align_corners=True) — tiny, plain JAX
# ---------------------------------------------------------------------------
def _interp_matrix(out_size, in_size):
    if in_size == 1:
        return jnp.ones((out_size, 1), jnp.float32)
    pos = jnp.arange(out_size, dtype=jnp.float32) * (in_size - 1) / (out_size - 1)
    lo = jnp.clip(jnp.floor(pos).astype(jnp.int32), 0, in_size - 2)
    frac = pos - lo.astype(jnp.float32)
    m = jnp.zeros((out_size, in_size), jnp.float32)
    m = m.at[jnp.arange(out_size), lo].add(1.0 - frac)
    m = m.at[jnp.arange(out_size), lo + 1].add(frac)
    return m


# ---------------------------------------------------------------------------
# FCDiscriminator forward
# ---------------------------------------------------------------------------
def fc_discriminator_forward(params, task_pred_nchw):
    H, W = task_pred_nchw.shape[2], task_pred_nchw.shape[3]
    x = jnp.transpose(task_pred_nchw, (0, 2, 3, 1)).astype(jnp.bfloat16)  # NHWC, bf16
    for name in ("conv1", "conv2", "conv3", "conv4"):
        w, b = params[name]
        x = _conv4x4_s2_p1(x, w, b, apply_lrelu=True, out_dtype=jnp.bfloat16)
    w, b = params["classifier"]
    x = _conv4x4_s2_p1(x, w, b, apply_lrelu=False, out_dtype=jnp.float32)  # (N,h,w,1)
    x = jnp.transpose(x, (0, 3, 1, 2))                                     # NCHW fp32
    mh = _interp_matrix(H, x.shape[2])
    mw = _interp_matrix(W, x.shape[3])
    x = jnp.einsum("oh,nchw,pw->ncop", mh, x, mw)
    assert x.shape[2:] == task_pred_nchw.shape[2:]
    resulter = {"confidence": x}
    debugger = {}
    return resulter, debugger


# ---------------------------------------------------------------------------
# References for correctness checks
# ---------------------------------------------------------------------------
def _leaky(x):
    return jnp.where(x > 0, x, NEG_SLOPE * x)


def _ref_conv(x, w, b, w_dtype):
    y = lax.conv_general_dilated(
        x, w.astype(w_dtype), window_strides=(2, 2), padding=((1, 1), (1, 1)),
        dimension_numbers=("NCHW", "OIHW", "NCHW"),
        preferred_element_type=jnp.float32)
    return y + b.reshape(1, -1, 1, 1).astype(jnp.float32)


def _ref_upsample(x, H, W):
    mh = _interp_matrix(H, x.shape[2])
    mw = _interp_matrix(W, x.shape[3])
    return jnp.einsum("oh,nchw,pw->ncop", mh, x, mw)


def reference_forward_bf16(params, x_nchw):
    """lax.conv reference with the same bf16-in / fp32-acc numerics as the kernel."""
    x = x_nchw.astype(jnp.bfloat16)
    for name in ("conv1", "conv2", "conv3", "conv4"):
        w, b = params[name]
        x = _leaky(_ref_conv(x, w, b, jnp.bfloat16)).astype(jnp.bfloat16)
    w, b = params["classifier"]
    x = _ref_conv(x, w, b, jnp.bfloat16)
    return _ref_upsample(x, x_nchw.shape[2], x_nchw.shape[3])


def reference_forward_f32(params, x_nchw):
    """Pure fp32 reference of the PyTorch module semantics (loose sanity check)."""
    x = x_nchw
    for name in ("conv1", "conv2", "conv3", "conv4"):
        w, b = params[name]
        x = _leaky(_ref_conv(x, w, b, jnp.float32))
    w, b = params["classifier"]
    x = _ref_conv(x, w, b, jnp.float32)
    return _ref_upsample(x, x_nchw.shape[2], x_nchw.shape[3])


if __name__ == "__main__":
    key = jax.random.PRNGKey(0)
    # spatial must be >= 32 so five stride-2 convs keep a non-empty map; use 64.
    N, Cin, H, W = 2, 4, 64, 64
    kx, k1, k2, k3, k4, k5 = jax.random.split(key, 6)
    task_pred = jax.random.normal(kx, (N, Cin, H, W), jnp.float32)

    def init_conv(k, cout, cin):
        kw_, kb_ = jax.random.split(k)
        fan_in = float(cin * 16)
        w = jax.random.normal(kw_, (cout, cin, 4, 4), jnp.float32) / jnp.sqrt(fan_in)
        b = jax.random.normal(kb_, (cout,), jnp.float32) * 0.01
        return w, b

    params = {
        "conv1": init_conv(k1, NDF, Cin),
        "conv2": init_conv(k2, NDF * 2, NDF),
        "conv3": init_conv(k3, NDF * 4, NDF * 2),
        "conv4": init_conv(k4, NDF * 8, NDF * 4),
        "classifier": init_conv(k5, 1, NDF * 8),
    }

    resulter, debugger = jax.jit(fc_discriminator_forward)(params, task_pred)
    out = resulter["confidence"]
    jax.block_until_ready(out)
    assert out.shape == (N, 1, H, W), out.shape

    # Exact-numerics check: same bf16-in / fp32-acc math via lax.conv.
    ref_bf16 = reference_forward_bf16(params, task_pred)
    err = float(jnp.max(jnp.abs(out - ref_bf16)))
    assert jnp.allclose(out, ref_bf16, atol=2e-2, rtol=2e-2), err

    # Module-semantics sanity check vs fp32 convs (loose: bf16 precision gap only).
    ref_f32 = reference_forward_f32(params, task_pred)
    err32 = float(jnp.max(jnp.abs(out - ref_f32)))
    assert jnp.allclose(out, ref_f32, atol=2e-1, rtol=2e-1), err32

    print("KERNEL_OK")
</pallas_src>

<mosaic_0001>
module attributes {stable_mosaic.version = 11 : i64} {
  func.func private @main(%arg0: i32) attributes {dimension_semantics = [#tpu.dimension_semantics<core_parallel>], iteration_bounds = array<i64: 2>, tpu.core_type = #tpu.core_type<sc_scalar_subcore>, window_params = []} {
    return
  }
}

module attributes {stable_mosaic.version = 11 : i64} {
  func.func private @main(%arg0: i32) attributes {dimension_semantics = [#tpu.dimension_semantics<core_parallel>], iteration_bounds = array<i64: 2>, tpu.core_type = #tpu.core_type<sc_scalar_subcore>, window_params = []} {
    return
  }
}

module attributes {stable_mosaic.version = 11 : i64} {
  func.func @_matmul_bias_act_kernel(%arg0: i32, %arg1: i32, %arg2: i32, %arg3: memref<512x64xbf16, #tpu.memory_space<vmem>>, %arg4: memref<64x128xbf16, #tpu.memory_space<vmem>>, %arg5: memref<1x128xf32, #tpu.memory_space<vmem>>, %arg6: memref<512x128xbf16, #tpu.memory_space<vmem>>, %arg7: memref<512x128xf32, #tpu.memory_space<vmem>>) attributes {dimension_semantics = [#tpu.dimension_semantics<parallel>, #tpu.dimension_semantics<parallel>, #tpu.dimension_semantics<arbitrary>], iteration_bounds = array<i64: 4, 1, 1>, scalar_prefetch = 0 : i64, scratch_operands = 1 : i64, tpu.core_type = #tpu.core_type<tc>, window_params = [{transform_indices = @transform_0, window_bounds = array<i64: 512, 64>}, {transform_indices = @transform_1, window_bounds = array<i64: 64, 128>}, {transform_indices = @transform_2, window_bounds = array<i64: 1, 128>}, {transform_indices = @transform_3, window_bounds = array<i64: 512, 128>}]} {
    %c0_i32 = arith.constant 0 : i32
    %0 = arith.cmpi eq, %arg2, %c0_i32 : i32
    %1 = arith.extui %0 : i1 to i32
    %c0_i32_0 = arith.constant 0 : i32
    %2 = arith.cmpi ne, %1, %c0_i32_0 : i32
    scf.if %2 {
      %cst_10 = arith.constant 0.000000e+00 : f32
      %12 = vector.broadcast %cst_10 : f32 to vector<512x128xf32>
      %c0_11 = arith.constant 0 : index
      %c0_12 = arith.constant 0 : index
      %13 = vector.load %arg7[%c0_11, %c0_12] : memref<512x128xf32, #tpu.memory_space<vmem>>, vector<512x128xf32>
      tpu.vector_store %arg7[%c0_11, %c0_12], %12 {strides = array<i32>} : memref<512x128xf32, #tpu.memory_space<vmem>>, vector<512x128xf32>,
    } else {
    }
    %c0 = arith.constant 0 : index
    %c0_1 = arith.constant 0 : index
    %3 = vector.load %arg7[%c0, %c0_1] : memref<512x128xf32, #tpu.memory_space<vmem>>, vector<512x128xf32>
    %c0_2 = arith.constant 0 : index
    %c0_3 = arith.constant 0 : index
    %4 = vector.load %arg3[%c0_2, %c0_3] : memref<512x64xbf16, #tpu.memory_space<vmem>>, vector<512x64xbf16>
    %c0_4 = arith.constant 0 : index
    %c0_5 = arith.constant 0 : index
    %5 = vector.load %arg4[%c0_4, %c0_5] : memref<64x128xbf16, #tpu.memory_space<vmem>>, vector<64x128xbf16>
    %cst = arith.constant dense<0.000000e+00> : vector<512x128xf32>
    %6 = tpu.matmul %4, %5, %cst {dimension_numbers = #tpu.dot_dimension_numbers<[1], [0], [0], [1], [0, 0, 1, 1], [], []>} : vector<512x64xbf16>, vector<64x128xbf16>, vector<512x128xf32> -> vector<512x128xf32>
    %7 = arith.addf %3, %6 : vector<512x128xf32>
    %c0_6 = arith.constant 0 : index
    %c0_7 = arith.constant 0 : index
    %8 = vector.load %arg7[%c0_6, %c0_7] : memref<512x128xf32, #tpu.memory_space<vmem>>, vector<512x128xf32>
    tpu.vector_store %arg7[%c0_6, %c0_7], %7 {strides = array<i32>} : memref<512x128xf32, #tpu.memory_space<vmem>>, vector<512x128xf32>,
    %c0_i32_8 = arith.constant 0 : i32
    %9 = arith.cmpi eq, %arg2, %c0_i32_8 : i32
    %10 = arith.extui %9 : i1 to i32
    %c0_i32_9 = arith.constant 0 : i32
    %11 = arith.cmpi ne, %10, %c0_i32_9 : i32
    scf.if %11 {
      %c0_10 = arith.constant 0 : index
      %c0_11 = arith.constant 0 : index
      %12 = vector.load %arg7[%c0_10, %c0_11] : memref<512x128xf32, #tpu.memory_space<vmem>>, vector<512x128xf32>
      %c0_12 = arith.constant 0 : index
      %c0_13 = arith.constant 0 : index
      %13 = vector.load %arg5[%c0_12, %c0_13] : memref<1x128xf32, #tpu.memory_space<vmem>>, vector<1x128xf32>
      %14 = vector.broadcast %13 : vector<1x128xf32> to vector<512x128xf32>
      %15 = arith.addf %12, %14 : vector<512x128xf32>
      %cst_14 = arith.constant 2.000000e-01 : f32
      %16 = vector.broadcast %cst_14 : f32 to vector<512x128xf32>
      %17 = arith.mulf %16, %15 : vector<512x128xf32>
      %18 = arith.maximumf %15, %17 : vector<512x128xf32>
      %19 = arith.truncf %18 : vector<512x128xf32> to vector<512x128xbf16>
      %c0_15 = arith.constant 0 : index
      %c0_16 = arith.constant 0 : index
      %20 = vector.load %arg6[%c0_15, %c0_16] : memref<512x128xbf16, #tpu.memory_space<vmem>>, vector<512x128xbf16>
      tpu.vector_store %arg6[%c0_15, %c0_16], %19 {strides = array<i32>} : memref<512x128xbf16, #tpu.memory_space<vmem>>, vector<512x128xbf16>,
    } else {
    }
    return
  }
  func.func @transform_0(%arg0: i32, %arg1: i32, %arg2: i32) -> (i32, i32) {
    %c0_i32 = arith.constant 0 : i32
    return %arg0, %arg2 : i32, i32
  }
  func.func @transform_1(%arg0: i32, %arg1: i32, %arg2: i32) -> (i32, i32) {
    %c0_i32 = arith.constant 0 : i32
    return %arg2, %arg1 : i32, i32
  }
  func.func @transform_2(%arg0: i32, %arg1: i32, %arg2: i32) -> (i32, i32) {
    %c0_i32 = arith.constant 0 : i32
    %c0_i32_0 = arith.constant 0 : i32
    return %c0_i32, %arg1 : i32, i32
  }
  func.func @transform_3(%arg0: i32, %arg1: i32, %arg2: i32) -> (i32, i32) {
    %c0_i32 = arith.constant 0 : i32
    return %arg0, %arg1 : i32, i32
  }
}

module attributes {stable_mosaic.version = 11 : i64} {
  func.func @_matmul_bias_act_kernel(%arg0: i32, %arg1: i32, %arg2: i32, %arg3: memref<256x1024xbf16, #tpu.memory_space<vmem>>, %arg4: memref<1024x128xbf16, #tpu.memory_space<vmem>>, %arg5: memref<1x128xf32, #tpu.memory_space<vmem>>, %arg6: memref<256x128xbf16, #tpu.memory_space<vmem>>, %arg7: memref<256x128xf32, #tpu.memory_space<vmem>>) attributes {dimension_semantics = [#tpu.dimension_semantics<parallel>, #tpu.dimension_semantics<parallel>, #tpu.dimension_semantics<arbitrary>], iteration_bounds = array<i64: 2, 1, 1>, scalar_prefetch = 0 : i64, scratch_operands = 1 : i64, tpu.core_type = #tpu.core_type<tc>, window_params = [{transform_indices = @transform_0, window_bounds = array<i64: 256, 1024>}, {transform_indices = @transform_1, window_bounds = array<i64: 1024, 128>}, {transform_indices = @transform_2, window_bounds = array<i64: 1, 128>}, {transform_indices = @transform_3, window_bounds = array<i64: 256, 128>}]} {
    %c0_i32 = arith.constant 0 : i32
    %0 = arith.cmpi eq, %arg2, %c0_i32 : i32
    %1 = arith.extui %0 : i1 to i32
    %c0_i32_0 = arith.constant 0 : i32
    %2 = arith.cmpi ne, %1, %c0_i32_0 : i32
    scf.if %2 {
      %cst_10 = arith.constant 0.000000e+00 : f32
      %12 = vector.broadcast %cst_10 : f32 to vector<256x128xf32>
      %c0_11 = arith.constant 0 : index
      %c0_12 = arith.constant 0 : index
      %13 = vector.load %arg7[%c0_11, %c0_12] : memref<256x128xf32, #tpu.memory_space<vmem>>, vector<256x128xf32>
      tpu.vector_store %arg7[%c0_11, %c0_12], %12 {strides = array<i32>} : memref<256x128xf32, #tpu.memory_space<vmem>>, vector<256x128xf32>,
    } else {
    }
    %c0 = arith.constant 0 : index
    %c0_1 = arith.constant 0 : index
    %3 = vector.load %arg7[%c0, %c0_1] : memref<256x128xf32, #tpu.memory_space<vmem>>, vector<256x128xf32>
    %c0_2 = arith.constant 0 : index
    %c0_3 = arith.constant 0 : index
    %4 = vector.load %arg3[%c0_2, %c0_3] : memref<256x1024xbf16, #tpu.memory_space<vmem>>, vector<256x1024xbf16>
    %c0_4 = arith.constant 0 : index
    %c0_5 = arith.constant 0 : index
    %5 = vector.load %arg4[%c0_4, %c0_5] : memref<1024x128xbf16, #tpu.memory_space<vmem>>, vector<1024x128xbf16>
    %cst = arith.constant dense<0.000000e+00> : vector<256x128xf32>
    %6 = tpu.matmul %4, %5, %cst {dimension_numbers = #tpu.dot_dimension_numbers<[1], [0], [0], [1], [0, 0, 1, 1], [], []>} : vector<256x1024xbf16>, vector<1024x128xbf16>, vector<256x128xf32> -> vector<256x128xf32>
    %7 = arith.addf %3, %6 : vector<256x128xf32>
    %c0_6 = arith.constant 0 : index
    %c0_7 = arith.constant 0 : index
    %8 = vector.load %arg7[%c0_6, %c0_7] : memref<256x128xf32, #tpu.memory_space<vmem>>, vector<256x128xf32>
    tpu.vector_store %arg7[%c0_6, %c0_7], %7 {strides = array<i32>} : memref<256x128xf32, #tpu.memory_space<vmem>>, vector<256x128xf32>,
    %c0_i32_8 = arith.constant 0 : i32
    %9 = arith.cmpi eq, %arg2, %c0_i32_8 : i32
    %10 = arith.extui %9 : i1 to i32
    %c0_i32_9 = arith.constant 0 : i32
    %11 = arith.cmpi ne, %10, %c0_i32_9 : i32
    scf.if %11 {
      %c0_10 = arith.constant 0 : index
      %c0_11 = arith.constant 0 : index
      %12 = vector.load %arg7[%c0_10, %c0_11] : memref<256x128xf32, #tpu.memory_space<vmem>>, vector<256x128xf32>
      %c0_12 = arith.constant 0 : index
      %c0_13 = arith.constant 0 : index
      %13 = vector.load %arg5[%c0_12, %c0_13] : memref<1x128xf32, #tpu.memory_space<vmem>>, vector<1x128xf32>
      %14 = vector.broadcast %13 : vector<1x128xf32> to vector<256x128xf32>
      %15 = arith.addf %12, %14 : vector<256x128xf32>
      %cst_14 = arith.constant 2.000000e-01 : f32
      %16 = vector.broadcast %cst_14 : f32 to vector<256x128xf32>
      %17 = arith.mulf %16, %15 : vector<256x128xf32>
      %18 = arith.maximumf %15, %17 : vector<256x128xf32>
      %19 = arith.truncf %18 : vector<256x128xf32> to vector<256x128xbf16>
      %c0_15 = arith.constant 0 : index
      %c0_16 = arith.constant 0 : index
      %20 = vector.load %arg6[%c0_15, %c0_16] : memref<256x128xbf16, #tpu.memory_space<vmem>>, vector<256x128xbf16>
      tpu.vector_store %arg6[%c0_15, %c0_16], %19 {strides = array<i32>} : memref<256x128xbf16, #tpu.memory_space<vmem>>, vector<256x128xbf16>,
    } else {
    }
    return
  }
  func.func @transform_0(%arg0: i32, %arg1: i32, %arg2: i32) -> (i32, i32) {
    %c0_i32 = arith.constant 0 : i32
    return %arg0, %arg2 : i32, i32
  }
  func.func @transform_1(%arg0: i32, %arg1: i32, %arg2: i32) -> (i32, i32) {
    %c0_i32 = arith.constant 0 : i32
    return %arg2, %arg1 : i32, i32
  }
  func.func @transform_2(%arg0: i32, %arg1: i32, %arg2: i32) -> (i32, i32) {
    %c0_i32 = arith.constant 0 : i32
    %c0_i32_0 = arith.constant 0 : i32
    return %c0_i32, %arg1 : i32, i32
  }
  func.func @transform_3(%arg0: i32, %arg1: i32, %arg2: i32) -> (i32, i32) {
    %c0_i32 = arith.constant 0 : i32
    return %arg0, %arg1 : i32, i32
  }
}

module attributes {stable_mosaic.version = 11 : i64} {
  func.func @_matmul_bias_act_kernel(%arg0: i32, %arg1: i32, %arg2: i32, %arg3: memref<128x1024xbf16, #tpu.memory_space<vmem>>, %arg4: memref<1024x128xbf16, #tpu.memory_space<vmem>>, %arg5: memref<1x128xf32, #tpu.memory_space<vmem>>, %arg6: memref<128x128xbf16, #tpu.memory_space<vmem>>, %arg7: memref<128x128xf32, #tpu.memory_space<vmem>>) attributes {dimension_semantics = [#tpu.dimension_semantics<parallel>, #tpu.dimension_semantics<parallel>, #tpu.dimension_semantics<arbitrary>], iteration_bounds = array<i64: 1, 2, 2>, scalar_prefetch = 0 : i64, scratch_operands = 1 : i64, tpu.core_type = #tpu.core_type<tc>, window_params = [{transform_indices = @transform_0, window_bounds = array<i64: 128, 1024>}, {transform_indices = @transform_1, window_bounds = array<i64: 1024, 128>}, {transform_indices = @transform_2, window_bounds = array<i64: 1, 128>}, {transform_indices = @transform_3, window_bounds = array<i64: 128, 128>}]} {
    %c0_i32 = arith.constant 0 : i32
    %0 = arith.cmpi eq, %arg2, %c0_i32 : i32
    %1 = arith.extui %0 : i1 to i32
    %c0_i32_0 = arith.constant 0 : i32
    %2 = arith.cmpi ne, %1, %c0_i32_0 : i32
    scf.if %2 {
      %cst_9 = arith.constant 0.000000e+00 : f32
      %12 = vector.broadcast %cst_9 : f32 to vector<128x128xf32>
      %c0_10 = arith.constant 0 : index
      %c0_11 = arith.constant 0 : index
      %13 = vector.load %arg7[%c0_10, %c0_11] : memref<128x128xf32, #tpu.memory_space<vmem>>, vector<128x128xf32>
      tpu.vector_store %arg7[%c0_10, %c0_11], %12 {strides = array<i32>} : memref<128x128xf32, #tpu.memory_space<vmem>>, vector<128x128xf32>,
    } else {
    }
    %c0 = arith.constant 0 : index
    %c0_1 = arith.constant 0 : index
    %3 = vector.load %arg7[%c0, %c0_1] : memref<128x128xf32, #tpu.memory_space<vmem>>, vector<128x128xf32>
    %c0_2 = arith.constant 0 : index
    %c0_3 = arith.constant 0 : index
    %4 = vector.load %arg3[%c0_2, %c0_3] : memref<128x1024xbf16, #tpu.memory_space<vmem>>, vector<128x1024xbf16>
    %c0_4 = arith.constant 0 : index
    %c0_5 = arith.constant 0 : index
    %5 = vector.load %arg4[%c0_4, %c0_5] : memref<1024x128xbf16, #tpu.memory_space<vmem>>, vector<1024x128xbf16>
    %cst = arith.constant dense<0.000000e+00> : vector<128x128xf32>
    %6 = tpu.matmul %4, %5, %cst {dimension_numbers = #tpu.dot_dimension_numbers<[1], [0], [0], [1], [0, 0, 1, 1], [], []>} : vector<128x1024xbf16>, vector<1024x128xbf16>, vector<128x128xf32> -> vector<128x128xf32>
    %7 = arith.addf %3, %6 : vector<128x128xf32>
    %c0_6 = arith.constant 0 : index
    %c0_7 = arith.constant 0 : index
    %8 = vector.load %arg7[%c0_6, %c0_7] : memref<128x128xf32, #tpu.memory_space<vmem>>, vector<128x128xf32>
    tpu.vector_store %arg7[%c0_6, %c0_7], %7 {strides = array<i32>} : memref<128x128xf32, #tpu.memory_space<vmem>>, vector<128x128xf32>,
    %c1_i32 = arith.constant 1 : i32
    %9 = arith.cmpi eq, %arg2, %c1_i32 : i32
    %10 = arith.extui %9 : i1 to i32
    %c0_i32_8 = arith.constant 0 : i32
    %11 = arith.cmpi ne, %10, %c0_i32_8 : i32
    scf.if %11 {
      %c0_9 = arith.constant 0 : index
      %c0_10 = arith.constant 0 : index
      %12 = vector.load %arg7[%c0_9, %c0_10] : memref<128x128xf32, #tpu.memory_space<vmem>>, vector<128x128xf32>
      %c0_11 = arith.constant 0 : index
      %c0_12 = arith.constant 0 : index
      %13 = vector.load %arg5[%c0_11, %c0_12] : memref<1x128xf32, #tpu.memory_space<vmem>>, vector<1x128xf32>
      %14 = vector.broadcast %13 : vector<1x128xf32> to vector<128x128xf32>
      %15 = arith.addf %12, %14 : vector<128x128xf32>
      %cst_13 = arith.constant 2.000000e-01 : f32
      %16 = vector.broadcast %cst_13 : f32 to vector<128x128xf32>
      %17 = arith.mulf %16, %15 : vector<128x128xf32>
      %18 = arith.maximumf %15, %17 : vector<128x128xf32>
      %19 = arith.truncf %18 : vector<128x128xf32> to vector<128x128xbf16>
      %c0_14 = arith.constant 0 : index
      %c0_15 = arith.constant 0 : index
      %20 = vector.load %arg6[%c0_14, %c0_15] : memref<128x128xbf16, #tpu.memory_space<vmem>>, vector<128x128xbf16>
      tpu.vector_store %arg6[%c0_14, %c0_15], %19 {strides = array<i32>} : memref<128x128xbf16, #tpu.memory_space<vmem>>, vector<128x128xbf16>,
    } else {
    }
    return
  }
  func.func @transform_0(%arg0: i32, %arg1: i32, %arg2: i32) -> (i32, i32) {
    %c0_i32 = arith.constant 0 : i32
    return %arg0, %arg2 : i32, i32
  }
  func.func @transform_1(%arg0: i32, %arg1: i32, %arg2: i32) -> (i32, i32) {
    %c0_i32 = arith.constant 0 : i32
    return %arg2, %arg1 : i32, i32
  }
  func.func @transform_2(%arg0: i32, %arg1: i32, %arg2: i32) -> (i32, i32) {
    %c0_i32 = arith.constant 0 : i32
    %c0_i32_0 = arith.constant 0 : i32
    return %c0_i32, %arg1 : i32, i32
  }
  func.func @transform_3(%arg0: i32, %arg1: i32, %arg2: i32) -> (i32, i32) {
    %c0_i32 = arith.constant 0 : i32
    return %arg0, %arg1 : i32, i32
  }
}

module attributes {stable_mosaic.version = 11 : i64} {
  func.func @_matmul_bias_act_kernel(%arg0: i32, %arg1: i32, %arg2: i32, %arg3: memref<32x1024xbf16, #tpu.memory_space<vmem>>, %arg4: memref<1024x256xbf16, #tpu.memory_space<vmem>>, %arg5: memref<1x256xf32, #tpu.memory_space<vmem>>, %arg6: memref<32x256xbf16, #tpu.memory_space<vmem>>, %arg7: memref<32x256xf32, #tpu.memory_space<vmem>>) attributes {dimension_semantics = [#tpu.dimension_semantics<parallel>, #tpu.dimension_semantics<parallel>, #tpu.dimension_semantics<arbitrary>], iteration_bounds = array<i64: 1, 2, 4>, scalar_prefetch = 0 : i64, scratch_operands = 1 : i64, tpu.core_type = #tpu.core_type<tc>, window_params = [{transform_indices = @transform_0, window_bounds = array<i64: 32, 1024>}, {transform_indices = @transform_1, window_bounds = array<i64: 1024, 256>}, {transform_indices = @transform_2, window_bounds = array<i64: 1, 256>}, {transform_indices = @transform_3, window_bounds = array<i64: 32, 256>}]} {
    %c0_i32 = arith.constant 0 : i32
    %0 = arith.cmpi eq, %arg2, %c0_i32 : i32
    %1 = arith.extui %0 : i1 to i32
    %c0_i32_0 = arith.constant 0 : i32
    %2 = arith.cmpi ne, %1, %c0_i32_0 : i32
    scf.if %2 {
      %cst_9 = arith.constant 0.000000e+00 : f32
      %12 = vector.broadcast %cst_9 : f32 to vector<32x256xf32>
      %c0_10 = arith.constant 0 : index
      %c0_11 = arith.constant 0 : index
      %13 = vector.load %arg7[%c0_10, %c0_11] : memref<32x256xf32, #tpu.memory_space<vmem>>, vector<32x256xf32>
      tpu.vector_store %arg7[%c0_10, %c0_11], %12 {strides = array<i32>} : memref<32x256xf32, #tpu.memory_space<vmem>>, vector<32x256xf32>,
    } else {
    }
    %c0 = arith.constant 0 : index
    %c0_1 = arith.constant 0 : index
    %3 = vector.load %arg7[%c0, %c0_1] : memref<32x256xf32, #tpu.memory_space<vmem>>, vector<32x256xf32>
    %c0_2 = arith.constant 0 : index
    %c0_3 = arith.constant 0 : index
    %4 = vector.load %arg3[%c0_2, %c0_3] : memref<32x1024xbf16, #tpu.memory_space<vmem>>, vector<32x1024xbf16>
    %c0_4 = arith.constant 0 : index
    %c0_5 = arith.constant 0 : index
    %5 = vector.load %arg4[%c0_4, %c0_5] : memref<1024x256xbf16, #tpu.memory_space<vmem>>, vector<1024x256xbf16>
    %cst = arith.constant dense<0.000000e+00> : vector<32x256xf32>
    %6 = tpu.matmul %4, %5, %cst {dimension_numbers = #tpu.dot_dimension_numbers<[1], [0], [0], [1], [0, 0, 1, 1], [], []>} : vector<32x1024xbf16>, vector<1024x256xbf16>, vector<32x256xf32> -> vector<32x256xf32>
    %7 = arith.addf %3, %6 : vector<32x256xf32>
    %c0_6 = arith.constant 0 : index
    %c0_7 = arith.constant 0 : index
    %8 = vector.load %arg7[%c0_6, %c0_7] : memref<32x256xf32, #tpu.memory_space<vmem>>, vector<32x256xf32>
    tpu.vector_store %arg7[%c0_6, %c0_7], %7 {strides = array<i32>} : memref<32x256xf32, #tpu.memory_space<vmem>>, vector<32x256xf32>,
    %c3_i32 = arith.constant 3 : i32
    %9 = arith.cmpi eq, %arg2, %c3_i32 : i32
    %10 = arith.extui %9 : i1 to i32
    %c0_i32_8 = arith.constant 0 : i32
    %11 = arith.cmpi ne, %10, %c0_i32_8 : i32
    scf.if %11 {
      %c0_9 = arith.constant 0 : index
      %c0_10 = arith.constant 0 : index
      %12 = vector.load %arg7[%c0_9, %c0_10] : memref<32x256xf32, #tpu.memory_space<vmem>>, vector<32x256xf32>
      %c0_11 = arith.constant 0 : index
      %c0_12 = arith.constant 0 : index
      %13 = vector.load %arg5[%c0_11, %c0_12] : memref<1x256xf32, #tpu.memory_space<vmem>>, vector<1x256xf32>
      %14 = vector.broadcast %13 : vector<1x256xf32> to vector<32x256xf32>
      %15 = arith.addf %12, %14 : vector<32x256xf32>
      %cst_13 = arith.constant 2.000000e-01 : f32
      %16 = vector.broadcast %cst_13 : f32 to vector<32x256xf32>
      %17 = arith.mulf %16, %15 : vector<32x256xf32>
      %18 = arith.maximumf %15, %17 : vector<32x256xf32>
      %19 = arith.truncf %18 : vector<32x256xf32> to vector<32x256xbf16>
      %c0_14 = arith.constant 0 : index
      %c0_15 = arith.constant 0 : index
      %20 = vector.load %arg6[%c0_14, %c0_15] : memref<32x256xbf16, #tpu.memory_space<vmem>>, vector<32x256xbf16>
      tpu.vector_store %arg6[%c0_14, %c0_15], %19 {strides = array<i32>} : memref<32x256xbf16, #tpu.memory_space<vmem>>, vector<32x256xbf16>,
    } else {
    }
    return
  }
  func.func @transform_0(%arg0: i32, %arg1: i32, %arg2: i32) -> (i32, i32) {
    %c0_i32 = arith.constant 0 : i32
    return %arg0, %arg2 : i32, i32
  }
  func.func @transform_1(%arg0: i32, %arg1: i32, %arg2: i32) -> (i32, i32) {
    %c0_i32 = arith.constant 0 : i32
    return %arg2, %arg1 : i32, i32
  }
  func.func @transform_2(%arg0: i32, %arg1: i32, %arg2: i32) -> (i32, i32) {
    %c0_i32 = arith.constant 0 : i32
    %c0_i32_0 = arith.constant 0 : i32
    return %c0_i32, %arg1 : i32, i32
  }
  func.func @transform_3(%arg0: i32, %arg1: i32, %arg2: i32) -> (i32, i32) {
    %c0_i32 = arith.constant 0 : i32
    return %arg0, %arg1 : i32, i32
  }
}

module attributes {stable_mosaic.version = 11 : i64} {
  func.func @_matmul_bias_act_kernel(%arg0: i32, %arg1: i32, %arg2: i32, %arg3: memref<8x1024xbf16, #tpu.memory_space<vmem>>, %arg4: memref<1024x128xbf16, #tpu.memory_space<vmem>>, %arg5: memref<1x128xf32, #tpu.memory_space<vmem>>, %arg6: memref<8x128xf32, #tpu.memory_space<vmem>>, %arg7: memref<8x128xf32, #tpu.memory_space<vmem>>) attributes {dimension_semantics = [#tpu.dimension_semantics<parallel>, #tpu.dimension_semantics<parallel>, #tpu.dimension_semantics<arbitrary>], iteration_bounds = array<i64: 1, 1, 8>, scalar_prefetch = 0 : i64, scratch_operands = 1 : i64, tpu.core_type = #tpu.core_type<tc>, window_params = [{transform_indices = @transform_0, window_bounds = array<i64: 8, 1024>}, {transform_indices = @transform_1, window_bounds = array<i64: 1024, 128>}, {transform_indices = @transform_2, window_bounds = array<i64: 1, 128>}, {transform_indices = @transform_3, window_bounds = array<i64: 8, 128>}]} {
    %c0_i32 = arith.constant 0 : i32
    %0 = arith.cmpi eq, %arg2, %c0_i32 : i32
    %1 = arith.extui %0 : i1 to i32
    %c0_i32_0 = arith.constant 0 : i32
    %2 = arith.cmpi ne, %1, %c0_i32_0 : i32
    scf.if %2 {
      %cst_9 = arith.constant 0.000000e+00 : f32
      %12 = vector.broadcast %cst_9 : f32 to vector<8x128xf32>
      %c0_10 = arith.constant 0 : index
      %c0_11 = arith.constant 0 : index
      %13 = vector.load %arg7[%c0_10, %c0_11] : memref<8x128xf32, #tpu.memory_space<vmem>>, vector<8x128xf32>
      tpu.vector_store %arg7[%c0_10, %c0_11], %12 {strides = array<i32>} : memref<8x128xf32, #tpu.memory_space<vmem>>, vector<8x128xf32>,
    } else {
    }
    %c0 = arith.constant 0 : index
    %c0_1 = arith.constant 0 : index
    %3 = vector.load %arg7[%c0, %c0_1] : memref<8x128xf32, #tpu.memory_space<vmem>>, vector<8x128xf32>
    %c0_2 = arith.constant 0 : index
    %c0_3 = arith.constant 0 : index
    %4 = vector.load %arg3[%c0_2, %c0_3] : memref<8x1024xbf16, #tpu.memory_space<vmem>>, vector<8x1024xbf16>
    %c0_4 = arith.constant 0 : index
    %c0_5 = arith.constant 0 : index
    %5 = vector.load %arg4[%c0_4, %c0_5] : memref<1024x128xbf16, #tpu.memory_space<vmem>>, vector<1024x128xbf16>
    %cst = arith.constant dense<0.000000e+00> : vector<8x128xf32>
    %6 = tpu.matmul %4, %5, %cst {dimension_numbers = #tpu.dot_dimension_numbers<[1], [0], [0], [1], [0, 0, 1, 1], [], []>} : vector<8x1024xbf16>, vector<1024x128xbf16>, vector<8x128xf32> -> vector<8x128xf32>
    %7 = arith.addf %3, %6 : vector<8x128xf32>
    %c0_6 = arith.constant 0 : index
    %c0_7 = arith.constant 0 : index
    %8 = vector.load %arg7[%c0_6, %c0_7] : memref<8x128xf32, #tpu.memory_space<vmem>>, vector<8x128xf32>
    tpu.vector_store %arg7[%c0_6, %c0_7], %7 {strides = array<i32>} : memref<8x128xf32, #tpu.memory_space<vmem>>, vector<8x128xf32>,
    %c7_i32 = arith.constant 7 : i32
    %9 = arith.cmpi eq, %arg2, %c7_i32 : i32
    %10 = arith.extui %9 : i1 to i32
    %c0_i32_8 = arith.constant 0 : i32
    %11 = arith.cmpi ne, %10, %c0_i32_8 : i32
    scf.if %11 {
      %c0_9 = arith.constant 0 : index
      %c0_10 = arith.constant 0 : index
      %12 = vector.load %arg7[%c0_9, %c0_10] : memref<8x128xf32, #tpu.memory_space<vmem>>, vector<8x128xf32>
      %c0_11 = arith.constant 0 : index
      %c0_12 = arith.constant 0 : index
      %13 = vector.load %arg5[%c0_11, %c0_12] : memref<1x128xf32, #tpu.memory_space<vmem>>, vector<1x128xf32>
      %14 = vector.broadcast %13 : vector<1x128xf32> to vector<8x128xf32>
      %15 = arith.addf %12, %14 : vector<8x128xf32>
      %c0_13 = arith.constant 0 : index
      %c0_14 = arith.constant 0 : index
      %16 = vector.load %arg6[%c0_13, %c0_14] : memref<8x128xf32, #tpu.memory_space<vmem>>, vector<8x128xf32>
      tpu.vector_store %arg6[%c0_13, %c0_14], %15 {strides = array<i32>} : memref<8x128xf32, #tpu.memory_space<vmem>>, vector<8x128xf32>,
    } else {
    }
    return
  }
  func.func @transform_0(%arg0: i32, %arg1: i32, %arg2: i32) -> (i32, i32) {
    %c0_i32 = arith.constant 0 : i32
    return %arg0, %arg2 : i32, i32
  }
  func.func @transform_1(%arg0: i32, %arg1: i32, %arg2: i32) -> (i32, i32) {
    %c0_i32 = arith.constant 0 : i32
    return %arg2, %arg1 : i32, i32
  }
  func.func @transform_2(%arg0: i32, %arg1: i32, %arg2: i32) -> (i32, i32) {
    %c0_i32 = arith.constant 0 : i32
    %c0_i32_0 = arith.constant 0 : i32
    return %c0_i32, %arg1 : i32, i32
  }
  func.func @transform_3(%arg0: i32, %arg1: i32, %arg2: i32) -> (i32, i32) {
    %c0_i32 = arith.constant 0 : i32
    return %arg0, %arg1 : i32, i32
  }
}

</mosaic_0001>

<bundles_post_ra>
// kernel: fc_discriminator_forward.5
= control target key start
LH: loop header
LB: loop body
LE: loop exit
PB: predicated region body
PF: predicated region fallthrough
CT: control target
= control target key end

     0   :  { %s2480_s12 = smov 0   ;;  %s2482_s13 = smov 0   ;;  %s2701_s0 = inlined_call_operand.vmem [shape: bf16[2048,64], index: 0, kind: input, shape index: {}]   ;;  %s2702_s1 = inlined_call_operand.vmem [shape: bf16[64,128], index: 1, kind: input, shape index: {}]   ;;  %s2703_s2 = inlined_call_operand.vmem [shape: f32[1,128], index: 2, kind: input, shape index: {}]   ;;  %s2704_s3 = inlined_call_operand.vmem [shape: bf16[2048,128], index: 3, kind: output, shape index: {}]  }
   0x1   :  { %s2484_s14 = smov 0  }
   0x2 LB: > { %s32_s15 = sadd.s32 1, %s2454_s13  ;;  %p1865_p0 = scmp.ge.s32.totalorder %s2458_s14, 1  ;;  %s2458_s14 = sphi %s2484_s14, %s13_s14   ;;  %s2454_s13 = sphi %s2482_s13, %s2706_s13   ;;  %s2450_s12 = sphi %s2480_s12, %s2705_s12  }
   0x3   : > { %p34_p1 = scmp.ge.s32.totalorder %s32_s15, 4  ;;  %p188_p2 = scmp.lt.s32.totalorder %s2458_s14, 5 }
   0x5   : > { %s2708_s15 = smov (%p34_p1, %s32_s15), 0  ;;  %p189_p3 = pnand %p1865_p0, %p188_p2 }
   0x6   : > { %v2400_v0 = vld [vmem:[%s2702_s1] sm:$0xff] (!%p189_p3)   ;;  %s1866_s18 = sshll.u32 (!%p189_p3), %s2450_s12, 6  ;;  %v2401_v1 = vld [vmem:[%s2702_s1 + $0x8] sm:$0xff] (!%p189_p3)   ;;  %v2402_v2 = vld [vmem:[%s2702_s1 + $0x10] sm:$0xff] (!%p189_p3)   ;;  %vm648_vm0 = vcmask (!%p189_p3), 523264  }
   0x7   : > { %192 = sbr.rel (%p189_p3) target bundleno = 304 (0x130), region = 32  ;;  %p230_p4 = scmp.lt.s32.totalorder (!%p189_p3), %s1866_s18, 255  ;;  %2296 = vmatprep.subr.bf16.mxu0 (!%p189_p3), %v2400_v0  ;;  %2368 = vmatprep.subr.bf16.mxu1 (!%p189_p3), %v2400_v0  ;;  %v2403_v3 = vld [vmem:[%s2702_s1 + $0x18] sm:$0xff] (!%p189_p3)   ;;  %v2587_v36 = vld [vmem:[%s2703_s2] ss:$0 sm:$0xff] (!%p189_p3) }
   0x8   : > { %2297 = vmatpush3.bf16.msra.mxu0 (!%p189_p3), %v2400_v0  ;;  %2372 = vmatpush3.bf16.msra.mxu1 (!%p189_p3), %v2400_v0 }
   0x9   : > { %2298 = vmatprep.subr.bf16.mxu0 (!%p189_p3), %v2401_v1  ;;  %2369 = vmatprep.subr.bf16.mxu1 (!%p189_p3), %v2401_v1 }
   0xc   : > { %2299 = vmatpush3.bf16.msra.mxu0 (!%p189_p3), %v2401_v1  ;;  %2373 = vmatpush3.bf16.msra.mxu1 (!%p189_p3), %v2401_v1 }
   0xd   : > { %2300 = vmatprep.subr.bf16.mxu0 (!%p189_p3), %v2402_v2  ;;  %2370 = vmatprep.subr.bf16.mxu1 (!%p189_p3), %v2402_v2 }
   0xe   : > { %s2710_s18 = smov (!%p230_p4, %s1866_s18), 255 }
   0xf   : > { %s1867_s23 = sshll.u32 %s2710_s18, 2 }
  0x10   : > { %s2518_s28 = scalar_lea.vmem %s2701_s0, %s1867_s23  ;;  %2301 = vmatpush3.bf16.msra.mxu0 %v2402_v2  ;;  %2374 = vmatpush3.bf16.msra.mxu1 %v2402_v2  ;;  %s2602_s6 = scalar_lea.vmem %s2704_s3, %s1867_s23 }
  0x11   : > { %v2404_v4 = vld [vmem:[%s2518_s28] sm:$0xff]   ;;  %2302 = vmatprep.subr.bf16.mxu0 %v2403_v3  ;;  %2371 = vmatprep.subr.bf16.mxu1 %v2403_v3  ;;  %v2406_v6 = vld [vmem:[%s2518_s28 + $0x8] sm:$0xff]   ;;  %v2408_v8 = vld [vmem:[%s2518_s28 + $0x10] sm:$0xff]  }
  0x12   : > { %v2405_v5 = vld [vmem:[%s2518_s28 + $0x80] sm:$0xff]   ;;  %2304 = vmatprep.mubr.msk.bf16.mxu0 %vm648_vm0, %v2404_v4  ;;  %v2407_v7 = vld [vmem:[%s2518_s28 + $0x88] sm:$0xff]   ;;  %v2409_v9 = vld [vmem:[%s2518_s28 + $0x90] sm:$0xff]  }
  0x13   : > { %2336 = vmatprep.mubr.msk.bf16.mxu1 %vm648_vm0, %v2405_v5  ;;  %v2410_v10 = vld [vmem:[%s2518_s28 + $0x18] sm:$0xff]   ;;  %v2412_v12 = vld [vmem:[%s2518_s28 + $0x20] sm:$0xff]   ;;  %v2414_v14 = vld [vmem:[%s2518_s28 + $0x28] sm:$0xff]  }
  0x14   : > { %2303 = vmatpush3.bf16.msra.mxu0 %v2403_v3  ;;  %2375 = vmatpush3.bf16.msra.mxu1 %v2403_v3  ;;  %v2411_v11 = vld [vmem:[%s2518_s28 + $0x98] sm:$0xff]   ;;  %v2413_v13 = vld [vmem:[%s2518_s28 + $0xa0] sm:$0xff]   ;;  %v2415_v15 = vld [vmem:[%s2518_s28 + $0xa8] sm:$0xff]  }
  0x15   : > { %v2416_v16 = vld [vmem:[%s2518_s28 + $0x30] sm:$0xff]   ;;  %v2418_v18 = vld [vmem:[%s2518_s28 + $0x38] sm:$0xff]   ;;  %v2420_v20 = vld [vmem:[%s2518_s28 + $0x40] sm:$0xff]  }
  0x16   : > { %v2417_v17 = vld [vmem:[%s2518_s28 + $0xb0] sm:$0xff]   ;;  %v2419_v19 = vld [vmem:[%s2518_s28 + $0xb8] sm:$0xff]   ;;  %v2421_v21 = vld [vmem:[%s2518_s28 + $0xc0] sm:$0xff]  }
  0x17   : > { %2305 = vmatmul.mubr.msk.bf16.vlgmr.msra.gmra.mrb[0].mxu0 %vm648_vm0, %v2406_v6  ;;  %2337 = vmatmul.mubr.msk.bf16.vlgmr.msra.gmra.mrb[0].mxu1 %vm648_vm0, %v2407_v7  ;;  %v2422_v22 = vld [vmem:[%s2518_s28 + $0x48] sm:$0xff]   ;;  %v2424_v24 = vld [vmem:[%s2518_s28 + $0x50] sm:$0xff]   ;;  %v2426_v26 = vld [vmem:[%s2518_s28 + $0x58] sm:$0xff]  }
  0x18   : > { %2308 = vmatprep.mubr.msk.bf16.mxu0 %vm648_vm0, %v2408_v8  ;;  %2340 = vmatprep.mubr.msk.bf16.mxu1 %vm648_vm0, %v2409_v9  ;;  %v2423_v23 = vld [vmem:[%s2518_s28 + $0xc8] sm:$0xff]   ;;  %v2425_v25 = vld [vmem:[%s2518_s28 + $0xd0] sm:$0xff]   ;;  %v2427_v27 = vld [vmem:[%s2518_s28 + $0xd8] sm:$0xff]  }
  0x19   : > { %v2428_v28 = vld [vmem:[%s2518_s28 + $0x60] sm:$0xff]   ;;  %v2430_v30 = vld [vmem:[%s2518_s28 + $0x68] sm:$0xff]   ;;  %v2432_v32 = vld [vmem:[%s2518_s28 + $0x70] sm:$0xff]  }
  0x1a   : > { %v2429_v29 = vld [vmem:[%s2518_s28 + $0xe0] sm:$0xff]   ;;  %v2431_v31 = vld [vmem:[%s2518_s28 + $0xe8] sm:$0xff]   ;;  %v2433_v33 = vld [vmem:[%s2518_s28 + $0xf0] sm:$0xff]  }
  0x1b   : > { %v2434_v34 = vld [vmem:[%s2518_s28 + $0x78] sm:$0xff]  }
  0x1c   : > { %v2435_v35 = vld [vmem:[%s2518_s28 + $0xf8] sm:$0xff]  }
  0x1f   : > { %2309 = vmatmul.mubr.msk.bf16.gmra.mrb[4].mxu0 %vm648_vm0, %v2410_v10  ;;  %2341 = vmatmul.mubr.msk.bf16.gmra.mrb[4].mxu1 %vm648_vm0, %v2411_v11 }
  0x20   : > { %2312 = vmatprep.mubr.msk.bf16.mxu0 %vm648_vm0, %v2412_v12  ;;  %2344 = vmatprep.mubr.msk.bf16.mxu1 %vm648_vm0, %v2413_v13 }
  0x27   : > { %2313 = vmatmul.mubr.msk.bf16.gmra.mrb[8].mxu0 %vm648_vm0, %v2414_v14  ;;  %2345 = vmatmul.mubr.msk.bf16.gmra.mrb[8].mxu1 %vm648_vm0, %v2415_v15 }
  0x28   : > { %2316 = vmatprep.mubr.msk.bf16.mxu0 %vm648_vm0, %v2416_v16  ;;  %2348 = vmatprep.mubr.msk.bf16.mxu1 %vm648_vm0, %v2417_v17 }
  0x2f   : > { %2317 = vmatmul.mubr.msk.bf16.gmra.mrb[12].mxu0 %vm648_vm0, %v2418_v18  ;;  %2349 = vmatmul.mubr.msk.bf16.gmra.mrb[12].mxu1 %vm648_vm0, %v2419_v19 }
  0x30   : > { %2320 = vmatprep.mubr.msk.bf16.mxu0 %vm648_vm0, %v2420_v20  ;;  %2352 = vmatprep.mubr.msk.bf16.mxu1 %vm648_vm0, %v2421_v21 }
  0x37   : > { %2321 = vmatmul.mubr.msk.bf16.gmra.mrb[16].mxu0 %vm648_vm0, %v2422_v22  ;;  %2353 = vmatmul.mubr.msk.bf16.gmra.mrb[16].mxu1 %vm648_vm0, %v2423_v23 }
  0x38   : > { %2324 = vmatprep.mubr.msk.bf16.mxu0 %vm648_vm0, %v2424_v24  ;;  %2356 = vmatprep.mubr.msk.bf16.mxu1 %vm648_vm0, %v2425_v25 }
  0x3f   : > { %2325 = vmatmul.mubr.msk.bf16.gmra.mrb[20].mxu0 %vm648_vm0, %v2426_v26  ;;  %2357 = vmatmul.mubr.msk.bf16.gmra.mrb[20].mxu1 %vm648_vm0, %v2427_v27 }
  0x40   : > { %2328 = vmatprep.mubr.msk.bf16.mxu0 %vm648_vm0, %v2428_v28  ;;  %2360 = vmatprep.mubr.msk.bf16.mxu1 %vm648_vm0, %v2429_v29 }
  0x47   : > { %2329 = vmatmul.mubr.msk.bf16.gmra.mrb[24].mxu0 %vm648_vm0, %v2430_v30  ;;  %2361 = vmatmul.mubr.msk.bf16.gmra.mrb[24].mxu1 %vm648_vm0, %v2431_v31 }
  0x48   : > { %2332 = vmatprep.mubr.msk.bf16.mxu0 %vm648_vm0, %v2432_v32  ;;  %2364 = vmatprep.mubr.msk.bf16.mxu1 %vm648_vm0, %v2433_v33 }
  0x4f   : > { %2333 = vmatmul.mubr.msk.bf16.gmra.mrb[28].mxu0 %vm648_vm0, %v2434_v34  ;;  %2365 = vmatmul.mubr.msk.bf16.gmra.mrb[28].mxu1 %vm648_vm0, %v2435_v35 }
  0xea   : > { %v2306_v37 = vpop.f32.mrb[0].mxu0  ;;  %v2338_v38 = vpop.f32.mrb[0].mxu1 }
  0xeb   : > { %v1238_v39 = vadd.f32 %v2306_v37, %v2587_v36  ;;  %v1270_v40 = vadd.f32 %v2338_v38, %v2587_v36  ;;  %v779_v41 = vpop.f32.mrb[1].mxu0  ;;  %v907_v42 = vpop.f32.mrb[1].mxu1 }
  0xec   : > { %v1236_v43 = vadd.f32 %v2587_v36, %v779_v41  ;;  %v1268_v44 = vadd.f32 %v2587_v36, %v907_v42  ;;  %v2307_v45 = vpop.f32.mrb[2].mxu0  ;;  %v2339_v46 = vpop.f32.mrb[2].mxu1 }
  0xed   : > { %v1302_v47 = vmul.f32 0.2, %v1238_v39  ;;  %v1334_v48 = vmul.f32 0.2, %v1270_v40  ;;  %v1239_v49 = vadd.f32 %v2307_v45, %v2587_v36  ;;  %v1271_v50 = vadd.f32 %v2339_v46, %v2587_v36  ;;  %v782_v51 = vpop.f32.mrb[3].mxu0  ;;  %v910_v52 = vpop.f32.mrb[3].mxu1 }
  0xee   : > { %v1300_v53 = vmul.f32 0.2, %v1236_v43  ;;  %v1332_v54 = vmul.f32 0.2, %v1268_v44  ;;  %v1237_v55 = vadd.f32 %v2587_v36, %v782_v51  ;;  %v1269_v56 = vadd.f32 %v2587_v36, %v910_v52 }
  0xef   : > { %v1303_v57 = vmul.f32 0.2, %v1239_v49  ;;  %v1335_v58 = vmul.f32 0.2, %v1271_v50  ;;  %v1366_v61 = vmax.f32 %v1238_v39, %v1302_v47  ;;  %v1398_v62 = vmax.f32 %v1270_v40, %v1334_v48 }
  0xf0   : > { %v1301_v59 = vmul.f32 0.2, %v1237_v55  ;;  %v1333_v60 = vmul.f32 0.2, %v1269_v56  ;;  %v1364_v1 = vmax.f32 %v1236_v43, %v1300_v53  ;;  %v1396_v2 = vmax.f32 %v1268_v44, %v1332_v54 }
  0xf1   : > { %v1367_v63 = vmax.f32 %v1239_v49, %v1303_v57  ;;  %v1399_v0 = vmax.f32 %v1271_v50, %v1335_v58 }
  0xf2   : > { %v1365_v3 = vmax.f32 %v1237_v55, %v1301_v59  ;;  %v1397_v4 = vmax.f32 %v1269_v56, %v1333_v60  ;;  %v2310_v5 = vpop.f32.mrb[4].mxu0  ;;  %v2342_v6 = vpop.f32.mrb[4].mxu1 }
  0xf3   : > { %v2077_v7 = vpack.c.bf16 %v1367_v63, %v1366_v61  ;;  %v2157_v8 = vpack.c.bf16 %v1399_v0, %v1398_v62  ;;  %v1242_v9 = vadd.f32 %v2310_v5, %v2587_v36  ;;  %v1274_v10 = vadd.f32 %v2342_v6, %v2587_v36  ;;  %v795_v11 = vpop.f32.mrb[5].mxu0  ;;  %v923_v12 = vpop.f32.mrb[5].mxu1 }
  0xf4   : > { %v2072_v13 = vpack.c.bf16 %v1365_v3, %v1364_v1  ;;  %v2152_v14 = vpack.c.bf16 %v1397_v4, %v1396_v2  ;;  %v1240_v15 = vadd.f32 %v2587_v36, %v795_v11  ;;  %v1272_v16 = vadd.f32 %v2587_v36, %v923_v12  ;;  %v2311_v17 = vpop.f32.mrb[6].mxu0  ;;  %v2343_v18 = vpop.f32.mrb[6].mxu1 }
  0xf5   : > { %2229 = vst [vmem:[%s2602_s6 + $0x8] sm:$0xff] %v2077_v7   ;;  %2245 = vst [vmem:[%s2602_s6 + $0x88] sm:$0xff] %v2157_v8   ;;  %v1306_v19 = vmul.f32 0.2, %v1242_v9  ;;  %v1338_v20 = vmul.f32 0.2, %v1274_v10  ;;  %v1243_v21 = vadd.f32 %v2311_v17, %v2587_v36  ;;  %v1275_v22 = vadd.f32 %v2343_v18, %v2587_v36 }
  0xf6   : > { %v798_v23 = vpop.f32.mrb[7].mxu0  ;;  %v926_v24 = vpop.f32.mrb[7].mxu1  ;;  %2073 = vst [vmem:[%s2602_s6] sm:$0xff] %v2072_v13   ;;  %2244 = vst [vmem:[%s2602_s6 + $0x80] sm:$0xff] %v2152_v14   ;;  %v1304_v25 = vmul.f32 0.2, %v1240_v15 }
  0xf7   : > { %v1336_v26 = vmul.f32 0.2, %v1272_v16  ;;  %v1241_v27 = vadd.f32 %v2587_v36, %v798_v23  ;;  %v1273_v28 = vadd.f32 %v2587_v36, %v926_v24  ;;  %v1307_v29 = vmul.f32 0.2, %v1243_v21 }
  0xf8   : > { %v1339_v30 = vmul.f32 0.2, %v1275_v22  ;;  %v1370_v33 = vmax.f32 %v1242_v9, %v1306_v19  ;;  %v1402_v34 = vmax.f32 %v1274_v10, %v1338_v20  ;;  %v1368_v38 = vmax.f32 %v1240_v15, %v1304_v25 }
  0xf9   : > { %v1305_v31 = vmul.f32 0.2, %v1241_v27  ;;  %v1337_v32 = vmul.f32 0.2, %v1273_v28  ;;  %v1371_v35 = vmax.f32 %v1243_v21, %v1307_v29  ;;  %v1400_v39 = vmax.f32 %v1272_v16, %v1336_v26 }
  0xfa   : > { %v1403_v37 = vmax.f32 %v1275_v22, %v1339_v30  ;;  %v2314_v42 = vpop.f32.mrb[8].mxu0  ;;  %v2346_v43 = vpop.f32.mrb[8].mxu1 }
  0xfb   : > { %v1369_v40 = vmax.f32 %v1241_v27, %v1305_v31  ;;  %v1401_v41 = vmax.f32 %v1273_v28, %v1337_v32  ;;  %v2087_v44 = vpack.c.bf16 %v1371_v35, %v1370_v33  ;;  %v1246_v46 = vadd.f32 %v2314_v42, %v2587_v36  ;;  %v811_v48 = vpop.f32.mrb[9].mxu0  ;;  %v939_v49 = vpop.f32.mrb[9].mxu1 }
  0xfc   : > { %v2167_v45 = vpack.c.bf16 %v1403_v37, %v1402_v34  ;;  %v1278_v47 = vadd.f32 %v2346_v43, %v2587_v36  ;;  %v1244_v52 = vadd.f32 %v2587_v36, %v811_v48  ;;  %v1276_v53 = vadd.f32 %v2587_v36, %v939_v49  ;;  %v2315_v54 = vpop.f32.mrb[10].mxu0  ;;  %v2347_v55 = vpop.f32.mrb[10].mxu1 }
  0xfd   : > { %v2082_v50 = vpack.c.bf16 %v1369_v40, %v1368_v38  ;;  %v2162_v51 = vpack.c.bf16 %v1401_v41, %v1400_v39  ;;  %2231 = vst [vmem:[%s2602_s6 + $0x18] sm:$0xff] %v2087_v44   ;;  %v1310_v56 = vmul.f32 0.2, %v1246_v46  ;;  %v1247_v58 = vadd.f32 %v2315_v54, %v2587_v36  ;;  %v814_v60 = vpop.f32.mrb[11].mxu0  ;;  %v942_v61 = vpop.f32.mrb[11].mxu1 }
  0xfe   : > { %2247 = vst [vmem:[%s2602_s6 + $0x98] sm:$0xff] %v2167_v45   ;;  %v1342_v57 = vmul.f32 0.2, %v1278_v47  ;;  %v1279_v59 = vadd.f32 %v2347_v55, %v2587_v36  ;;  %v1308_v62 = vmul.f32 0.2, %v1244_v52  ;;  %v1245_v0 = vadd.f32 %v2587_v36, %v814_v60 }
  0xff   : > { %2230 = vst [vmem:[%s2602_s6 + $0x10] sm:$0xff] %v2082_v50   ;;  %2246 = vst [vmem:[%s2602_s6 + $0x90] sm:$0xff] %v2162_v51   ;;  %v1340_v63 = vmul.f32 0.2, %v1276_v53  ;;  %v1277_v1 = vadd.f32 %v2587_v36, %v942_v61  ;;  %v1311_v2 = vmul.f32 0.2, %v1247_v58  ;;  %v1374_v6 = vmax.f32 %v1246_v46, %v1310_v56 }
 0x100   : > { %v1343_v3 = vmul.f32 0.2, %v1279_v59  ;;  %v1309_v4 = vmul.f32 0.2, %v1245_v0  ;;  %v1406_v7 = vmax.f32 %v1278_v47, %v1342_v57  ;;  %v1372_v10 = vmax.f32 %v1244_v52, %v1308_v62 }
 0x101   : > { %v1341_v5 = vmul.f32 0.2, %v1277_v1  ;;  %v1375_v8 = vmax.f32 %v1247_v58, %v1311_v2  ;;  %v1404_v11 = vmax.f32 %v1276_v53, %v1340_v63 }
 0x102   : > { %v1407_v9 = vmax.f32 %v1279_v59, %v1343_v3  ;;  %v1373_v12 = vmax.f32 %v1245_v0, %v1309_v4  ;;  %v2318_v14 = vpop.f32.mrb[12].mxu0  ;;  %v2350_v15 = vpop.f32.mrb[12].mxu1 }
 0x103   : > { %v1405_v13 = vmax.f32 %v1277_v1, %v1341_v5  ;;  %v2097_v16 = vpack.c.bf16 %v1375_v8, %v1374_v6  ;;  %v1250_v18 = vadd.f32 %v2318_v14, %v2587_v36  ;;  %v1282_v19 = vadd.f32 %v2350_v15, %v2587_v36  ;;  %v827_v20 = vpop.f32.mrb[13].mxu0  ;;  %v955_v21 = vpop.f32.mrb[13].mxu1 }
 0x104   : > { %v2177_v17 = vpack.c.bf16 %v1407_v9, %v1406_v7  ;;  %v2092_v22 = vpack.c.bf16 %v1373_v12, %v1372_v10  ;;  %v1248_v24 = vadd.f32 %v2587_v36, %v827_v20  ;;  %v1280_v25 = vadd.f32 %v2587_v36, %v955_v21  ;;  %v2319_v26 = vpop.f32.mrb[14].mxu0  ;;  %v2351_v27 = vpop.f32.mrb[14].mxu1 }
 0x105   : > { %v2172_v23 = vpack.c.bf16 %v1405_v13, %v1404_v11  ;;  %2233 = vst [vmem:[%s2602_s6 + $0x28] sm:$0xff] %v2097_v16   ;;  %v1314_v28 = vmul.f32 0.2, %v1250_v18  ;;  %v1346_v29 = vmul.f32 0.2, %v1282_v19  ;;  %v1251_v30 = vadd.f32 %v2319_v26, %v2587_v36  ;;  %v830_v32 = vpop.f32.mrb[15].mxu0 }
 0x106   : > { %2249 = vst [vmem:[%s2602_s6 + $0xa8] sm:$0xff] %v2177_v17   ;;  %v1283_v31 = vadd.f32 %v2351_v27, %v2587_v36  ;;  %v958_v33 = vpop.f32.mrb[15].mxu1  ;;  %2232 = vst [vmem:[%s2602_s6 + $0x20] sm:$0xff] %v2092_v22   ;;  %v1312_v34 = vmul.f32 0.2, %v1248_v24  ;;  %v1249_v37 = vadd.f32 %v2587_v36, %v830_v32 }
 0x107   : > { %2248 = vst [vmem:[%s2602_s6 + $0xa0] sm:$0xff] %v2172_v23   ;;  %v1344_v35 = vmul.f32 0.2, %v1280_v25  ;;  %v1281_v38 = vadd.f32 %v2587_v36, %v958_v33  ;;  %v1315_v39 = vmul.f32 0.2, %v1251_v30  ;;  %v1378_v43 = vmax.f32 %v1250_v18, %v1314_v28 }
 0x108   : > { %v1347_v40 = vmul.f32 0.2, %v1283_v31  ;;  %v1313_v41 = vmul.f32 0.2, %v1249_v37  ;;  %v1410_v44 = vmax.f32 %v1282_v19, %v1346_v29  ;;  %v1376_v47 = vmax.f32 %v1248_v24, %v1312_v34 }
 0x109   : > { %v1345_v42 = vmul.f32 0.2, %v1281_v38  ;;  %v1379_v45 = vmax.f32 %v1251_v30, %v1315_v39  ;;  %v1408_v48 = vmax.f32 %v1280_v25, %v1344_v35 }
 0x10a   : > { %v1411_v46 = vmax.f32 %v1283_v31, %v1347_v40  ;;  %v1377_v49 = vmax.f32 %v1249_v37, %v1313_v41  ;;  %v2322_v51 = vpop.f32.mrb[16].mxu0  ;;  %v2354_v52 = vpop.f32.mrb[16].mxu1 }
 0x10b   : > { %v1409_v50 = vmax.f32 %v1281_v38, %v1345_v42  ;;  %v2107_v53 = vpack.c.bf16 %v1379_v45, %v1378_v43  ;;  %v1254_v55 = vadd.f32 %v2322_v51, %v2587_v36  ;;  %v1286_v56 = vadd.f32 %v2354_v52, %v2587_v36  ;;  %v843_v57 = vpop.f32.mrb[17].mxu0  ;;  %v971_v58 = vpop.f32.mrb[17].mxu1 }
 0x10c   : > { %v2187_v54 = vpack.c.bf16 %v1411_v46, %v1410_v44  ;;  %v2102_v59 = vpack.c.bf16 %v1377_v49, %v1376_v47  ;;  %v1252_v61 = vadd.f32 %v2587_v36, %v843_v57  ;;  %v1284_v62 = vadd.f32 %v2587_v36, %v971_v58  ;;  %v2323_v63 = vpop.f32.mrb[18].mxu0  ;;  %v2355_v0 = vpop.f32.mrb[18].mxu1 }
 0x10d   : > { %v2182_v60 = vpack.c.bf16 %v1409_v50, %v1408_v48  ;;  %2235 = vst [vmem:[%s2602_s6 + $0x38] sm:$0xff] %v2107_v53   ;;  %v1318_v1 = vmul.f32 0.2, %v1254_v55  ;;  %v1350_v2 = vmul.f32 0.2, %v1286_v56  ;;  %v1255_v3 = vadd.f32 %v2323_v63, %v2587_v36  ;;  %v846_v5 = vpop.f32.mrb[19].mxu0 }
 0x10e   : > { %2251 = vst [vmem:[%s2602_s6 + $0xb8] sm:$0xff] %v2187_v54   ;;  %v1287_v4 = vadd.f32 %v2355_v0, %v2587_v36  ;;  %v974_v6 = vpop.f32.mrb[19].mxu1  ;;  %2234 = vst [vmem:[%s2602_s6 + $0x30] sm:$0xff] %v2102_v59   ;;  %v1316_v7 = vmul.f32 0.2, %v1252_v61  ;;  %v1253_v9 = vadd.f32 %v2587_v36, %v846_v5 }
 0x10f   : > { %2250 = vst [vmem:[%s2602_s6 + $0xb0] sm:$0xff] %v2182_v60   ;;  %v1348_v8 = vmul.f32 0.2, %v1284_v62  ;;  %v1285_v10 = vadd.f32 %v2587_v36, %v974_v6  ;;  %v1319_v11 = vmul.f32 0.2, %v1255_v3  ;;  %v1382_v15 = vmax.f32 %v1254_v55, %v1318_v1 }
 0x110   : > { %v1351_v12 = vmul.f32 0.2, %v1287_v4  ;;  %v1317_v13 = vmul.f32 0.2, %v1253_v9  ;;  %v1414_v16 = vmax.f32 %v1286_v56, %v1350_v2  ;;  %v1380_v19 = vmax.f32 %v1252_v61, %v1316_v7 }
 0x111   : > { %v1349_v14 = vmul.f32 0.2, %v1285_v10  ;;  %v1383_v17 = vmax.f32 %v1255_v3, %v1319_v11  ;;  %v1412_v20 = vmax.f32 %v1284_v62, %v1348_v8 }
 0x112   : > { %v1415_v18 = vmax.f32 %v1287_v4, %v1351_v12  ;;  %v1381_v21 = vmax.f32 %v1253_v9, %v1317_v13  ;;  %v2326_v23 = vpop.f32.mrb[20].mxu0  ;;  %v2358_v24 = vpop.f32.mrb[20].mxu1 }
 0x113   : > { %v1413_v22 = vmax.f32 %v1285_v10, %v1349_v14  ;;  %v2117_v25 = vpack.c.bf16 %v1383_v17, %v1382_v15  ;;  %v1258_v27 = vadd.f32 %v2326_v23, %v2587_v36  ;;  %v1290_v28 = vadd.f32 %v2358_v24, %v2587_v36  ;;  %v859_v29 = vpop.f32.mrb[21].mxu0  ;;  %v987_v30 = vpop.f32.mrb[21].mxu1 }
 0x114   : > { %v2197_v26 = vpack.c.bf16 %v1415_v18, %v1414_v16  ;;  %v2112_v31 = vpack.c.bf16 %v1381_v21, %v1380_v19  ;;  %v1256_v33 = vadd.f32 %v2587_v36, %v859_v29  ;;  %v1288_v34 = vadd.f32 %v2587_v36, %v987_v30  ;;  %v2327_v35 = vpop.f32.mrb[22].mxu0  ;;  %v2359_v37 = vpop.f32.mrb[22].mxu1 }
 0x115   : > { %v2192_v32 = vpack.c.bf16 %v1413_v22, %v1412_v20  ;;  %2237 = vst [vmem:[%s2602_s6 + $0x48] sm:$0xff] %v2117_v25   ;;  %v1322_v38 = vmul.f32 0.2, %v1258_v27  ;;  %v1354_v39 = vmul.f32 0.2, %v1290_v28  ;;  %v1259_v40 = vadd.f32 %v2327_v35, %v2587_v36  ;;  %v862_v42 = vpop.f32.mrb[23].mxu0 }
 0x116   : > { %2253 = vst [vmem:[%s2602_s6 + $0xc8] sm:$0xff] %v2197_v26   ;;  %v1291_v41 = vadd.f32 %v2359_v37, %v2587_v36  ;;  %v990_v43 = vpop.f32.mrb[23].mxu1  ;;  %2236 = vst [vmem:[%s2602_s6 + $0x40] sm:$0xff] %v2112_v31   ;;  %v1320_v44 = vmul.f32 0.2, %v1256_v33  ;;  %v1257_v46 = vadd.f32 %v2587_v36, %v862_v42 }
 0x117   : > { %2252 = vst [vmem:[%s2602_s6 + $0xc0] sm:$0xff] %v2192_v32   ;;  %v1352_v45 = vmul.f32 0.2, %v1288_v34  ;;  %v1289_v47 = vadd.f32 %v2587_v36, %v990_v43  ;;  %v1323_v48 = vmul.f32 0.2, %v1259_v40  ;;  %v1386_v52 = vmax.f32 %v1258_v27, %v1322_v38 }
 0x118   : > { %v1355_v49 = vmul.f32 0.2, %v1291_v41  ;;  %v1321_v50 = vmul.f32 0.2, %v1257_v46  ;;  %v1418_v53 = vmax.f32 %v1290_v28, %v1354_v39  ;;  %v1384_v56 = vmax.f32 %v1256_v33, %v1320_v44 }
 0x119   : > { %v1353_v51 = vmul.f32 0.2, %v1289_v47  ;;  %v1387_v54 = vmax.f32 %v1259_v40, %v1323_v48  ;;  %v1416_v57 = vmax.f32 %v1288_v34, %v1352_v45 }
 0x11a   : > { %v1419_v55 = vmax.f32 %v1291_v41, %v1355_v49  ;;  %v1385_v58 = vmax.f32 %v1257_v46, %v1321_v50  ;;  %v2330_v60 = vpop.f32.mrb[24].mxu0  ;;  %v2362_v61 = vpop.f32.mrb[24].mxu1 }
 0x11b   : > { %v1417_v59 = vmax.f32 %v1289_v47, %v1353_v51  ;;  %v2127_v62 = vpack.c.bf16 %v1387_v54, %v1386_v52  ;;  %v1262_v0 = vadd.f32 %v2330_v60, %v2587_v36  ;;  %v1294_v1 = vadd.f32 %v2362_v61, %v2587_v36  ;;  %v875_v2 = vpop.f32.mrb[25].mxu0  ;;  %v1003_v3 = vpop.f32.mrb[25].mxu1 }
 0x11c   : > { %v2207_v63 = vpack.c.bf16 %v1419_v55, %v1418_v53  ;;  %v2122_v4 = vpack.c.bf16 %v1385_v58, %v1384_v56  ;;  %v1260_v6 = vadd.f32 %v2587_v36, %v875_v2  ;;  %v1292_v7 = vadd.f32 %v2587_v36, %v1003_v3  ;;  %v2331_v8 = vpop.f32.mrb[26].mxu0  ;;  %v2363_v9 = vpop.f32.mrb[26].mxu1 }
 0x11d   : > { %v2202_v5 = vpack.c.bf16 %v1417_v59, %v1416_v57  ;;  %2239 = vst [vmem:[%s2602_s6 + $0x58] sm:$0xff] %v2127_v62   ;;  %v1326_v10 = vmul.f32 0.2, %v1262_v0  ;;  %v1358_v11 = vmul.f32 0.2, %v1294_v1  ;;  %v1263_v12 = vadd.f32 %v2331_v8, %v2587_v36  ;;  %v878_v14 = vpop.f32.mrb[27].mxu0 }
 0x11e   : > { %2255 = vst [vmem:[%s2602_s6 + $0xd8] sm:$0xff] %v2207_v63   ;;  %v1295_v13 = vadd.f32 %v2363_v9, %v2587_v36  ;;  %v1006_v15 = vpop.f32.mrb[27].mxu1  ;;  %2238 = vst [vmem:[%s2602_s6 + $0x50] sm:$0xff] %v2122_v4   ;;  %v1324_v16 = vmul.f32 0.2, %v1260_v6  ;;  %v1261_v18 = vadd.f32 %v2587_v36, %v878_v14 }
 0x11f   : > { %2254 = vst [vmem:[%s2602_s6 + $0xd0] sm:$0xff] %v2202_v5   ;;  %v1356_v17 = vmul.f32 0.2, %v1292_v7  ;;  %v1293_v19 = vadd.f32 %v2587_v36, %v1006_v15  ;;  %v1327_v20 = vmul.f32 0.2, %v1263_v12  ;;  %v1390_v24 = vmax.f32 %v1262_v0, %v1326_v10 }
 0x120   : > { %v1359_v21 = vmul.f32 0.2, %v1295_v13  ;;  %v1325_v22 = vmul.f32 0.2, %v1261_v18  ;;  %v1422_v25 = vmax.f32 %v1294_v1, %v1358_v11  ;;  %v1388_v28 = vmax.f32 %v1260_v6, %v1324_v16 }
 0x121   : > { %v1357_v23 = vmul.f32 0.2, %v1293_v19  ;;  %v1391_v26 = vmax.f32 %v1263_v12, %v1327_v20  ;;  %v1420_v29 = vmax.f32 %v1292_v7, %v1356_v17 }
 0x122   : > { %v1423_v27 = vmax.f32 %v1295_v13, %v1359_v21  ;;  %v1389_v30 = vmax.f32 %v1261_v18, %v1325_v22  ;;  %v2334_v32 = vpop.f32.mrb[28].mxu0  ;;  %v2366_v33 = vpop.f32.mrb[28].mxu1 }
 0x123   : > { %v1421_v31 = vmax.f32 %v1293_v19, %v1357_v23  ;;  %v2137_v34 = vpack.c.bf16 %v1391_v26, %v1390_v24  ;;  %v1266_v37 = vadd.f32 %v2334_v32, %v2587_v36  ;;  %v1298_v38 = vadd.f32 %v2366_v33, %v2587_v36  ;;  %v891_v39 = vpop.f32.mrb[29].mxu0  ;;  %v1019_v40 = vpop.f32.mrb[29].mxu1 }
 0x124   : > { %v2217_v35 = vpack.c.bf16 %v1423_v27, %v1422_v25  ;;  %v2132_v41 = vpack.c.bf16 %v1389_v30, %v1388_v28  ;;  %v1264_v43 = vadd.f32 %v2587_v36, %v891_v39  ;;  %v1296_v44 = vadd.f32 %v2587_v36, %v1019_v40  ;;  %v2335_v45 = vpop.f32.mrb[30].mxu0  ;;  %v2367_v46 = vpop.f32.mrb[30].mxu1 }
 0x125   : > { %v2212_v42 = vpack.c.bf16 %v1421_v31, %v1420_v29  ;;  %2241 = vst [vmem:[%s2602_s6 + $0x68] sm:$0xff] %v2137_v34   ;;  %v1330_v47 = vmul.f32 0.2, %v1266_v37  ;;  %v1362_v48 = vmul.f32 0.2, %v1298_v38  ;;  %v1267_v49 = vadd.f32 %v2335_v45, %v2587_v36  ;;  %v894_v51 = vpop.f32.mrb[31].mxu0 }
 0x126   : > { %2257 = vst [vmem:[%s2602_s6 + $0xe8] sm:$0xff] %v2217_v35   ;;  %v1299_v50 = vadd.f32 %v2367_v46, %v2587_v36  ;;  %v1022_v52 = vpop.f32.mrb[31].mxu1  ;;  %2240 = vst [vmem:[%s2602_s6 + $0x60] sm:$0xff] %v2132_v41   ;;  %v1328_v53 = vmul.f32 0.2, %v1264_v43  ;;  %v1265_v55 = vadd.f32 %v2587_v36, %v894_v51 }
 0x127   : > { %2256 = vst [vmem:[%s2602_s6 + $0xe0] sm:$0xff] %v2212_v42   ;;  %v1360_v54 = vmul.f32 0.2, %v1296_v44  ;;  %v1297_v56 = vadd.f32 %v2587_v36, %v1022_v52  ;;  %v1331_v57 = vmul.f32 0.2, %v1267_v49  ;;  %v1394_v61 = vmax.f32 %v1266_v37, %v1330_v47 }
 0x128   : > { %v1363_v58 = vmul.f32 0.2, %v1299_v50  ;;  %v1329_v59 = vmul.f32 0.2, %v1265_v55  ;;  %v1426_v62 = vmax.f32 %v1298_v38, %v1362_v48  ;;  %v1392_v1 = vmax.f32 %v1264_v43, %v1328_v53 }
 0x129   : > { %v1361_v60 = vmul.f32 0.2, %v1297_v56  ;;  %v1395_v63 = vmax.f32 %v1267_v49, %v1331_v57  ;;  %v1424_v2 = vmax.f32 %v1296_v44, %v1360_v54 }
 0x12a   : > { %v1427_v0 = vmax.f32 %v1299_v50, %v1363_v58  ;;  %v1393_v3 = vmax.f32 %v1265_v55, %v1329_v59 }
 0x12b   : > { %v1425_v4 = vmax.f32 %v1297_v56, %v1361_v60  ;;  %v2147_v5 = vpack.c.bf16 %v1395_v63, %v1394_v61 }
 0x12c   : > { %v2227_v6 = vpack.c.bf16 %v1427_v0, %v1426_v62  ;;  %v2142_v7 = vpack.c.bf16 %v1393_v3, %v1392_v1 }
 0x12d   : > { %v2222_v36 = vpack.c.bf16 %v1425_v4, %v1424_v2  ;;  %2243 = vst [vmem:[%s2602_s6 + $0x78] sm:$0xff] %v2147_v5  }
 0x12e   : > { %2259 = vst [vmem:[%s2602_s6 + $0xf8] sm:$0xff] %v2227_v6   ;;  %2242 = vst [vmem:[%s2602_s6 + $0x70] sm:$0xff] %v2142_v7  }
 0x12f   : > { %2258 = vst [vmem:[%s2602_s6 + $0xf0] sm:$0xff] %v2222_v36  }
 0x130 PF: > { %s13_s14 = sadd.s32 1, %s2458_s14   ;;  %s2705_s12 = smov %s2454_s13 }
 0x131   : > { %p10_p5 = scmp.ge.s32.totalorder %s13_s14, 6   ;;  %s2706_s13 = smov %s2708_s15 }
 0x133   :  { %12 = sbr.rel (!%p10_p5) target bundleno = 2 (0x2), region = 76 }

// kernel: fc_discriminator_forward.6
= control target key start
LH: loop header
LB: loop body
LE: loop exit
PB: predicated region body
PF: predicated region fallthrough
CT: control target
= control target key end

     0   :  { %s3683_s12 = smov 0   ;;  %s3685_s13 = smov 0   ;;  %s4196_s0 = inlined_call_operand.vmem [shape: bf16[512,1024], index: 0, kind: input, shape index: {}]   ;;  %s4197_s1 = inlined_call_operand.vmem [shape: bf16[1024,128], index: 1, kind: input, shape index: {}]   ;;  %s4198_s2 = inlined_call_operand.vmem [shape: f32[1,128], index: 2, kind: input, shape index: {}]   ;;  %s4199_s3 = inlined_call_operand.vmem [shape: bf16[512,128], index: 3, kind: output, shape index: {}]  }
   0x1   :  { %s3687_s14 = smov 0  }
   0x2 LB: > { %s32_s15 = sadd.s32 1, %s3657_s13  ;;  %p2742_p0 = scmp.ge.s32.totalorder %s3661_s14, 1  ;;  %s3661_s14 = sphi %s3687_s14, %s13_s14   ;;  %s3657_s13 = sphi %s3685_s13, %s4201_s13   ;;  %s3653_s12 = sphi %s3683_s12, %s4200_s12  }
   0x3   : > { %p34_p1 = scmp.ge.s32.totalorder %s32_s15, 2  ;;  %p191_p2 = scmp.lt.s32.totalorder %s3661_s14, 3 }
   0x5   : > { %s4203_s15 = smov (%p34_p1, %s32_s15), 0  ;;  %p192_p3 = pnand %p2742_p0, %p191_p2 }
   0x6   : > { %v3575_v0 = vld [vmem:[%s4197_s1 + $0x40] sm:$0xff] (!%p192_p3)   ;;  %v3579_v4 = vld [vmem:[%s4197_s1 + $0x48] sm:$0xff] (!%p192_p3)   ;;  %v3583_v8 = vld [vmem:[%s4197_s1 + $0x50] sm:$0xff] (!%p192_p3)   ;;  %s2743_s25 = sshll.u32 (!%p192_p3), %s3653_s12, 5 }
   0x7   : > { %195 = sbr.rel (%p192_p3) target bundleno = 518 (0x206), region = 32  ;;  %v3576_v1 = vld [vmem:[%s4197_s1 + $0xc0] sm:$0xff] (!%p192_p3)   ;;  %3103 = vmatprep.subr.bf16.mxu0 (!%p192_p3), %v3575_v0  ;;  %v3580_v5 = vld [vmem:[%s4197_s1 + $0xc8] sm:$0xff] (!%p192_p3)   ;;  %v3584_v9 = vld [vmem:[%s4197_s1 + $0xd0] sm:$0xff] (!%p192_p3)   ;;  %p236_p4 = scmp.lt.s32.totalorder (!%p192_p3), %s2743_s25, 63 }
   0x8   : > { %v3577_v2 = vld [vmem:[%s4197_s1] sm:$0xff] (!%p192_p3)   ;;  %3215 = vmatprep.subr.bf16.mxu1 (!%p192_p3), %v3576_v1  ;;  %v3581_v6 = vld [vmem:[%s4197_s1 + $0x8] sm:$0xff] (!%p192_p3)   ;;  %v3585_v10 = vld [vmem:[%s4197_s1 + $0x10] sm:$0xff] (!%p192_p3)  }
   0x9   : > { %v3578_v3 = vld [vmem:[%s4197_s1 + $0x80] sm:$0xff] (!%p192_p3)   ;;  %3104 = vmatpush3.bf16.msra.mxu0 (!%p192_p3), %v3577_v2  ;;  %v3582_v7 = vld [vmem:[%s4197_s1 + $0x88] sm:$0xff] (!%p192_p3)   ;;  %v3586_v11 = vld [vmem:[%s4197_s1 + $0x90] sm:$0xff] (!%p192_p3)  }
   0xa   : > { %3216 = vmatpush3.bf16.msra.mxu1 (!%p192_p3), %v3578_v3  ;;  %3105 = vmatprep.subr.bf16.mxu0 (!%p192_p3), %v3579_v4  ;;  %v3587_v12 = vld [vmem:[%s4197_s1 + $0x58] sm:$0xff] (!%p192_p3)   ;;  %v3591_v16 = vld [vmem:[%s4197_s1 + $0x60] sm:$0xff] (!%p192_p3)   ;;  %v3595_v20 = vld [vmem:[%s4197_s1 + $0x68] sm:$0xff] (!%p192_p3)  }
   0xb   : > { %3217 = vmatprep.subr.bf16.mxu1 (!%p192_p3), %v3580_v5  ;;  %v3588_v13 = vld [vmem:[%s4197_s1 + $0xd8] sm:$0xff] (!%p192_p3)   ;;  %v3592_v17 = vld [vmem:[%s4197_s1 + $0xe0] sm:$0xff] (!%p192_p3)   ;;  %v3596_v21 = vld [vmem:[%s4197_s1 + $0xe8] sm:$0xff] (!%p192_p3)  }
   0xc   : > { %v3589_v14 = vld [vmem:[%s4197_s1 + $0x18] sm:$0xff] (!%p192_p3)   ;;  %v3593_v18 = vld [vmem:[%s4197_s1 + $0x20] sm:$0xff] (!%p192_p3)   ;;  %v3597_v22 = vld [vmem:[%s4197_s1 + $0x28] sm:$0xff] (!%p192_p3)  }
   0xd   : > { %3106 = vmatpush3.bf16.msra.mxu0 (!%p192_p3), %v3581_v6  ;;  %v3590_v15 = vld [vmem:[%s4197_s1 + $0x98] sm:$0xff] (!%p192_p3)   ;;  %v3594_v19 = vld [vmem:[%s4197_s1 + $0xa0] sm:$0xff] (!%p192_p3)   ;;  %v3598_v23 = vld [vmem:[%s4197_s1 + $0xa8] sm:$0xff] (!%p192_p3)  }
   0xe   : > { %3218 = vmatpush3.bf16.msra.mxu1 %v3582_v7  ;;  %3107 = vmatprep.subr.bf16.mxu0 %v3583_v8  ;;  %s4205_s25 = smov (!%p236_p4, %s2743_s25), 63  ;;  %v3599_v24 = vld [vmem:[%s4197_s1 + $0x70] sm:$0xff]   ;;  %v3603_v28 = vld [vmem:[%s4197_s1 + $0x78] sm:$0xff]   ;;  %v3607_v40 = vld [vmem:[%s4197_s1 + $0x140] sm:$0xff]  }
   0xf   : > { %3219 = vmatprep.subr.bf16.mxu1 %v3584_v9  ;;  %v3600_v25 = vld [vmem:[%s4197_s1 + $0xf0] sm:$0xff]   ;;  %s2975_s24 = sshll.u32 %s4205_s25, 5  ;;  %v3604_v29 = vld [vmem:[%s4197_s1 + $0xf8] sm:$0xff]   ;;  %v3608_v41 = vld [vmem:[%s4197_s1 + $0x100] sm:$0xff]   ;;  %s2747_s10 = sshll.u32 %s4205_s25, 2 }
  0x10   : > { %v3601_v26 = vld [vmem:[%s4197_s1 + $0x30] sm:$0xff]   ;;  %s3800_s12 = scalar_lea.vmem %s4196_s0, %s2975_s24  ;;  %v3605_v30 = vld [vmem:[%s4197_s1 + $0x38] sm:$0xff]   ;;  %v3609_v42 = vld [vmem:[%s4197_s1 + $0x1c0] sm:$0xff]   ;;  %s4111_s17 = scalar_lea.vmem %s4199_s3, %s2747_s10 }
  0x11   : > { %3108 = vmatpush3.bf16.msra.mxu0 %v3585_v10  ;;  %v3602_v27 = vld [vmem:[%s4197_s1 + $0xb0] sm:$0xff]   ;;  %v3606_v31 = vld [vmem:[%s4197_s1 + $0xb8] sm:$0xff]   ;;  %v336_v32 = vld [vmem:[%s3800_s12] sm:$0xff] }
  0x12   : > { %3220 = vmatpush3.bf16.msra.mxu1 %v3586_v11  ;;  %3109 = vmatprep.subr.bf16.mxu0 %v3587_v12  ;;  %v340_v33 = vld [vmem:[%s3800_s12 + $0x20] sm:$0xff]  ;;  %v337_v34 = vld [vmem:[%s3800_s12 + $0x8] sm:$0xff]  ;;  %v3615_v2 = vld [vmem:[%s4197_s1 + $0x150] sm:$0xff]  }
  0x13   : > { %3221 = vmatprep.subr.bf16.mxu1 %v3588_v13  ;;  %v2748_v35 = vcombine.low %v336_v32, %v340_v33  ;;  %v2749_v36 = vcombine.high %v336_v32, %v340_v33  ;;  %v341_v37 = vld [vmem:[%s3800_s12 + $0x28] sm:$0xff]  ;;  %v3610_v43 = vld [vmem:[%s4197_s1 + $0x180] sm:$0xff]   ;;  %v3616_v4 = vld [vmem:[%s4197_s1 + $0x110] sm:$0xff]  }
  0x14   : > { %v2750_v38 = vcombine.low %v337_v34, %v341_v37  ;;  %v2751_v39 = vcombine.high %v337_v34, %v341_v37  ;;  %v344_v44 = vld [vmem:[%s3800_s12 + $0x40] sm:$0xff]  ;;  %v345_v47 = vld [vmem:[%s3800_s12 + $0x48] sm:$0xff]  ;;  %v3617_v7 = vld [vmem:[%s4197_s1 + $0x1d0] sm:$0xff]  }
  0x15   : > { %3110 = vmatpush3.bf16.msra.mxu0 %v3589_v14  ;;  %1648 = vmatprep.mubr.bf16.mxu0 %v2749_v36  ;;  %v348_v45 = vld [vmem:[%s3800_s12 + $0x60] sm:$0xff]  ;;  %v349_v48 = vld [vmem:[%s3800_s12 + $0x68] sm:$0xff]  ;;  %v3618_v9 = vld [vmem:[%s4197_s1 + $0x190] sm:$0xff]  }
  0x16   : > { %3222 = vmatpush3.bf16.msra.mxu1 %v3590_v15  ;;  %3111 = vmatprep.subr.bf16.mxu0 %v3591_v16  ;;  %v2757_v46 = vcombine.high %v344_v44, %v348_v45  ;;  %v352_v49 = vld [vmem:[%s3800_s12 + $0x80] sm:$0xff]  ;;  %v2759_v50 = vcombine.high %v345_v47, %v349_v48  ;;  %v353_v52 = vld [vmem:[%s3800_s12 + $0x88] sm:$0xff]  ;;  %v2756_v54 = vcombine.low %v344_v44, %v348_v45  ;;  %v3619_v14 = vld [vmem:[%s4197_s1 + $0x158] sm:$0xff]  }
  0x17   : > { %3223 = vmatprep.subr.bf16.mxu1 %v3592_v17  ;;  %1809 = vmatprep.mubr.bf16.mxu1 %v2751_v39  ;;  %v356_v51 = vld [vmem:[%s3800_s12 + $0xa0] sm:$0xff]  ;;  %v357_v53 = vld [vmem:[%s3800_s12 + $0xa8] sm:$0xff]  ;;  %v2758_v56 = vcombine.low %v345_v47, %v349_v48  ;;  %v3620_v15 = vld [vmem:[%s4197_s1 + $0x118] sm:$0xff]  }
  0x18   : > { %v3611_v55 = vld [vmem:[%s4197_s1 + $0x148] sm:$0xff]   ;;  %v2765_v57 = vcombine.high %v352_v49, %v356_v51  ;;  %v2767_v59 = vcombine.high %v353_v52, %v357_v53  ;;  %v360_v62 = vld [vmem:[%s3800_s12 + $0xc0] sm:$0xff]  ;;  %v2764_v3 = vcombine.low %v352_v49, %v356_v51  ;;  %v2766_v5 = vcombine.low %v353_v52, %v357_v53  ;;  %v3621_v17 = vld [vmem:[%s4197_s1 + $0x1d8] sm:$0xff]  }
  0x19   : > { %3112 = vmatpush3.bf16.msra.mxu0 %v3593_v18  ;;  %v3612_v58 = vld [vmem:[%s4197_s1 + $0x108] sm:$0xff]   ;;  %v364_v63 = vld [vmem:[%s3800_s12 + $0xe0] sm:$0xff]  ;;  %v3632_v47 = vld [vmem:[%s4197_s1 + $0x130] sm:$0xff]  }
  0x1a   : > { %3224 = vmatpush3.bf16.msra.mxu1 %v3594_v19  ;;  %3113 = vmatprep.subr.bf16.mxu0 %v3595_v20  ;;  %v3613_v60 = vld [vmem:[%s4197_s1 + $0x1c8] sm:$0xff]   ;;  %v2773_v6 = vcombine.high %v360_v62, %v364_v63  ;;  %v368_v10 = vld [vmem:[%s3800_s12 + $0x100] sm:$0xff]  ;;  %v2772_v16 = vcombine.low %v360_v62, %v364_v63  ;;  %v3622_v20 = vld [vmem:[%s4197_s1 + $0x198] sm:$0xff]  }
  0x1b   : > { %3225 = vmatprep.subr.bf16.mxu1 %v3596_v21  ;;  %v3614_v61 = vld [vmem:[%s4197_s1 + $0x188] sm:$0xff]   ;;  %v372_v11 = vld [vmem:[%s3800_s12 + $0x120] sm:$0xff]  ;;  %v3633_v48 = vld [vmem:[%s4197_s1 + $0x1f0] sm:$0xff]  }
  0x1c   : > { %v361_v0 = vld [vmem:[%s3800_s12 + $0xc8] sm:$0xff]  ;;  %v2781_v19 = vcombine.high %v368_v10, %v372_v11  ;;  %v3634_v49 = vld [vmem:[%s4197_s1 + $0x1b0] sm:$0xff]   ;;  %v396_v51 = vld [vmem:[%s3800_s12 + $0x1e0] sm:$0xff] }
  0x1d   : > { %3114 = vmatpush3.bf16.msra.mxu0 %v3597_v22  ;;  %v365_v1 = vld [vmem:[%s3800_s12 + $0xe8] sm:$0xff]  ;;  %v376_v22 = vld [vmem:[%s3800_s12 + $0x140] sm:$0xff] }
  0x1e   : > { %3226 = vmatpush3.bf16.msra.mxu1 %v3598_v23  ;;  %3115 = vmatprep.subr.bf16.mxu0 %v3599_v24  ;;  %v2775_v8 = vcombine.high %v361_v0, %v365_v1  ;;  %v369_v12 = vld [vmem:[%s3800_s12 + $0x108] sm:$0xff]  ;;  %v2774_v18 = vcombine.low %v361_v0, %v365_v1  ;;  %v380_v23 = vld [vmem:[%s3800_s12 + $0x160] sm:$0xff] }
  0x1f   : > { %3227 = vmatprep.subr.bf16.mxu1 %v3600_v25  ;;  %v373_v13 = vld [vmem:[%s3800_s12 + $0x128] sm:$0xff]  ;;  %v3623_v24 = vld [vmem:[%s4197_s1 + $0x160] sm:$0xff]   ;;  %v2789_v32 = vcombine.high %v376_v22, %v380_v23 }
  0x20   : > { %v2783_v21 = vcombine.high %v369_v12, %v373_v13  ;;  %v377_v25 = vld [vmem:[%s3800_s12 + $0x148] sm:$0xff]  ;;  %v400_v62 = vld [vmem:[%s3800_s12 + $0x200] sm:$0xff] }
  0x21   : > { %3116 = vmatpush3.bf16.msra.mxu0 %v3601_v26  ;;  %v381_v26 = vld [vmem:[%s3800_s12 + $0x168] sm:$0xff]  ;;  %v404_v63 = vld [vmem:[%s3800_s12 + $0x220] sm:$0xff] }
  0x22   : > { %3228 = vmatpush3.bf16.msra.mxu1 %v3602_v27  ;;  %3117 = vmatprep.subr.bf16.mxu0 %v3603_v28  ;;  %v3624_v27 = vld [vmem:[%s4197_s1 + $0x120] sm:$0xff]   ;;  %v2791_v33 = vcombine.high %v377_v25, %v381_v26  ;;  %v3627_v34 = vld [vmem:[%s4197_s1 + $0x168] sm:$0xff]  }
  0x23   : > { %3229 = vmatprep.subr.bf16.mxu1 %v3604_v29  ;;  %v3625_v28 = vld [vmem:[%s4197_s1 + $0x1e0] sm:$0xff]   ;;  %v3628_v36 = vld [vmem:[%s4197_s1 + $0x128] sm:$0xff]  }
  0x24   : > { %v3626_v29 = vld [vmem:[%s4197_s1 + $0x1a0] sm:$0xff]   ;;  %v3629_v37 = vld [vmem:[%s4197_s1 + $0x1e8] sm:$0xff]  }
  0x25   : > { %3118 = vmatpush3.bf16.msra.mxu0 %v3605_v30  ;;  %v2780_v30 = vcombine.low %v368_v10, %v372_v11  ;;  %v3630_v39 = vld [vmem:[%s4197_s1 + $0x1a8] sm:$0xff]   ;;  %v2812_v10 = vcombine.low %v400_v62, %v404_v63 }
  0x26   : > { %3230 = vmatpush3.bf16.msra.mxu1 %v3606_v31  ;;  %3327 = vmatprep.subr.bf16.mxu0 %v3607_v40  ;;  %v2782_v31 = vcombine.low %v369_v12, %v373_v13  ;;  %v385_v40 = vld [vmem:[%s3800_s12 + $0x188] sm:$0xff] }
  0x27   : > { %3439 = vmatprep.subr.bf16.mxu1 %v3609_v42  ;;  %v2788_v42 = vcombine.low %v376_v22, %v380_v23  ;;  %v393_v52 = vld [vmem:[%s3800_s12 + $0x1c8] sm:$0xff]  ;;  %v424_v22 = vld [vmem:[%s3800_s12 + $0x2c0] sm:$0xff] }
  0x28   : > { %1649 = vmatmul.mubr.bf16.vlgmr.msra.gmra.mrb[0].mxu0 %v2748_v35  ;;  %v384_v35 = vld [vmem:[%s3800_s12 + $0x180] sm:$0xff]  ;;  %v397_v53 = vld [vmem:[%s3800_s12 + $0x1e8] sm:$0xff] }
  0x29   : > { %1810 = vmatmul.mubr.bf16.vlgmr.msra.gmra.mrb[0].mxu1 %v2750_v38  ;;  %3328 = vmatpush3.bf16.msra.mxu0 %v3608_v41  ;;  %v388_v38 = vld [vmem:[%s3800_s12 + $0x1a0] sm:$0xff]  ;;  %v389_v41 = vld [vmem:[%s3800_s12 + $0x1a8] sm:$0xff] }
  0x2a   : > { %3440 = vmatpush3.bf16.msra.mxu1 %v3610_v43  ;;  %1656 = vmatprep.mubr.bf16.mxu0 %v2757_v46  ;;  %v2790_v43 = vcombine.low %v377_v25, %v381_v26  ;;  %v2797_v44 = vcombine.high %v384_v35, %v388_v38  ;;  %v2799_v45 = vcombine.high %v385_v40, %v389_v41  ;;  %v3631_v46 = vld [vmem:[%s4197_s1 + $0x170] sm:$0xff]   ;;  %v401_v0 = vld [vmem:[%s3800_s12 + $0x208] sm:$0xff]  ;;  %v428_v23 = vld [vmem:[%s3800_s12 + $0x2e0] sm:$0xff] }
  0x2b   : > { %1817 = vmatprep.mubr.bf16.mxu1 %v2759_v50  ;;  %3329 = vmatprep.subr.bf16.mxu0 %v3611_v55  ;;  %v392_v50 = vld [vmem:[%s3800_s12 + $0x1c0] sm:$0xff]  ;;  %v3635_v55 = vld [vmem:[%s4197_s1 + $0x178] sm:$0xff]   ;;  %v405_v1 = vld [vmem:[%s3800_s12 + $0x228] sm:$0xff] }
  0x2c   : > { %3441 = vmatprep.subr.bf16.mxu1 %v3613_v60  ;;  %v3637_v60 = vld [vmem:[%s4197_s1 + $0x1f8] sm:$0xff]   ;;  %v2814_v11 = vcombine.low %v401_v0, %v405_v1  ;;  %v429_v25 = vld [vmem:[%s3800_s12 + $0x2e8] sm:$0xff] }
  0x2d   : > { %3330 = vmatpush3.bf16.msra.mxu0 %v3612_v58  ;;  %v3636_v58 = vld [vmem:[%s4197_s1 + $0x138] sm:$0xff]  }
  0x2e   : > { %3442 = vmatpush3.bf16.msra.mxu1 %v3614_v61  ;;  %3331 = vmatprep.subr.bf16.mxu0 %v3615_v2  ;;  %v3638_v61 = vld [vmem:[%s4197_s1 + $0x1b8] sm:$0xff]   ;;  %v2804_v2 = vcombine.low %v392_v50, %v396_v51 }
  0x2f   : > { %3443 = vmatprep.subr.bf16.mxu1 %v3617_v7  ;;  %v412_v7 = vld [vmem:[%s3800_s12 + $0x260] sm:$0xff] }
  0x30   : > { %1657 = vmatmul.mubr.bf16.gmra.mrb[4].mxu0 %v2756_v54  ;;  %v2796_v54 = vcombine.low %v384_v35, %v388_v38  ;;  %v440_v38 = vld [vmem:[%s3800_s12 + $0x340] sm:$0xff] }
  0x31   : > { %1818 = vmatmul.mubr.bf16.gmra.mrb[4].mxu1 %v2758_v56  ;;  %1664 = vmatprep.mubr.bf16.mxu0 %v2765_v57  ;;  %v2798_v56 = vcombine.low %v385_v40, %v389_v41  ;;  %v2805_v57 = vcombine.high %v392_v50, %v396_v51  ;;  %v441_v40 = vld [vmem:[%s3800_s12 + $0x348] sm:$0xff] }
  0x32   : > { %1825 = vmatprep.mubr.bf16.mxu1 %v2767_v59  ;;  %3332 = vmatpush3.bf16.msra.mxu0 %v3616_v4  ;;  %v2807_v59 = vcombine.high %v393_v52, %v397_v53  ;;  %v2813_v4 = vcombine.high %v400_v62, %v404_v63  ;;  %v445_v41 = vld [vmem:[%s3800_s12 + $0x368] sm:$0xff]  ;;  %v338_v62 = vld [vmem:[%s3800_s12 + $0x10] sm:$0xff] }
  0x33   : > { %3444 = vmatpush3.bf16.msra.mxu1 %v3618_v9  ;;  %3333 = vmatprep.subr.bf16.mxu0 %v3619_v14  ;;  %v413_v9 = vld [vmem:[%s3800_s12 + $0x268] sm:$0xff]  ;;  %v416_v14 = vld [vmem:[%s3800_s12 + $0x280] sm:$0xff]  ;;  %v2854_v51 = vcombine.low %v441_v40, %v445_v41  ;;  %v342_v63 = vld [vmem:[%s3800_s12 + $0x30] sm:$0xff] }
  0x34   : > { %3445 = vmatprep.subr.bf16.mxu1 %v3621_v17  ;;  %v421_v17 = vld [vmem:[%s3800_s12 + $0x2a8] sm:$0xff] }
  0x36   : > { %3334 = vmatpush3.bf16.msra.mxu0 %v3620_v15  ;;  %v420_v15 = vld [vmem:[%s3800_s12 + $0x2a0] sm:$0xff] }
  0x37   : > { %3446 = vmatpush3.bf16.msra.mxu1 %v3622_v20  ;;  %3335 = vmatprep.subr.bf16.mxu0 %v3623_v24  ;;  %v2829_v20 = vcombine.high %v416_v14, %v420_v15  ;;  %v425_v24 = vld [vmem:[%s3800_s12 + $0x2c8] sm:$0xff]  ;;  %v2828_v26 = vcombine.low %v416_v14, %v420_v15  ;;  %v354_v14 = vld [vmem:[%s3800_s12 + $0x90] sm:$0xff] }
  0x38   : > { %1665 = vmatmul.mubr.bf16.gmra.mrb[8].mxu0 %v2764_v3  ;;  %3447 = vmatprep.subr.bf16.mxu1 %v3625_v28  ;;  %v2806_v3 = vcombine.low %v393_v52, %v397_v53  ;;  %v2837_v28 = vcombine.high %v424_v22, %v428_v23  ;;  %v2838_v35 = vcombine.low %v425_v24, %v429_v25  ;;  %v358_v15 = vld [vmem:[%s3800_s12 + $0xb0] sm:$0xff] }
  0x39   : > { %1826 = vmatmul.mubr.bf16.gmra.mrb[8].mxu1 %v2766_v5  ;;  %1672 = vmatprep.mubr.bf16.mxu0 %v2773_v6  ;;  %v2815_v5 = vcombine.high %v401_v0, %v405_v1  ;;  %v408_v6 = vld [vmem:[%s3800_s12 + $0x240] sm:$0xff]  ;;  %v339_v0 = vld [vmem:[%s3800_s12 + $0x18] sm:$0xff] }
  0x3a   : > { %1833 = vmatprep.mubr.bf16.mxu1 %v2775_v8  ;;  %3336 = vmatpush3.bf16.msra.mxu0 %v3624_v27  ;;  %v409_v8 = vld [vmem:[%s3800_s12 + $0x248] sm:$0xff]  ;;  %v2821_v12 = vcombine.high %v408_v6, %v412_v7  ;;  %v343_v1 = vld [vmem:[%s3800_s12 + $0x38] sm:$0xff] }
  0x3b   : > { %3448 = vmatpush3.bf16.msra.mxu1 %v3626_v29  ;;  %3337 = vmatprep.subr.bf16.mxu0 %v3627_v34  ;;  %v2823_v13 = vcombine.high %v409_v8, %v413_v9  ;;  %v2839_v29 = vcombine.high %v425_v24, %v429_v25  ;;  %v2836_v34 = vcombine.low %v424_v22, %v428_v23  ;;  %v362_v22 = vld [vmem:[%s3800_s12 + $0xd0] sm:$0xff]  ;;  %v363_v24 = vld [vmem:[%s3800_s12 + $0xd8] sm:$0xff] }
  0x3c   : > { %3449 = vmatprep.subr.bf16.mxu1 %v3629_v37  ;;  %v366_v23 = vld [vmem:[%s3800_s12 + $0xf0] sm:$0xff]  ;;  %v367_v25 = vld [vmem:[%s3800_s12 + $0xf8] sm:$0xff] }
  0x3e   : > { %3338 = vmatpush3.bf16.msra.mxu0 %v3628_v36 }
  0x3f   : > { %3450 = vmatpush3.bf16.msra.mxu1 %v3630_v39  ;;  %3339 = vmatprep.subr.bf16.mxu0 %v3631_v46  ;;  %v444_v39 = vld [vmem:[%s3800_s12 + $0x360] sm:$0xff] }
  0x40   : > { %1673 = vmatmul.mubr.bf16.gmra.mrb[12].mxu0 %v2772_v16  ;;  %3451 = vmatprep.subr.bf16.mxu1 %v3633_v48  ;;  %v417_v16 = vld [vmem:[%s3800_s12 + $0x288] sm:$0xff]  ;;  %v448_v46 = vld [vmem:[%s3800_s12 + $0x380] sm:$0xff]  ;;  %v2852_v50 = vcombine.low %v440_v38, %v444_v39 }
  0x41   : > { %1834 = vmatmul.mubr.bf16.gmra.mrb[12].mxu1 %v2774_v18  ;;  %1680 = vmatprep.mubr.bf16.mxu0 %v2781_v19  ;;  %v2820_v18 = vcombine.low %v408_v6, %v412_v7  ;;  %v2822_v19 = vcombine.low %v409_v8, %v413_v9  ;;  %v2830_v27 = vcombine.low %v417_v16, %v421_v17  ;;  %v449_v48 = vld [vmem:[%s3800_s12 + $0x388] sm:$0xff]  ;;  %v346_v6 = vld [vmem:[%s3800_s12 + $0x50] sm:$0xff]  ;;  %v347_v8 = vld [vmem:[%s3800_s12 + $0x58] sm:$0xff] }
  0x42   : > { %1841 = vmatprep.mubr.bf16.mxu1 %v2783_v21  ;;  %3340 = vmatpush3.bf16.msra.mxu0 %v3632_v47  ;;  %v2831_v21 = vcombine.high %v417_v16, %v421_v17  ;;  %v452_v47 = vld [vmem:[%s3800_s12 + $0x3a0] sm:$0xff]  ;;  %v350_v7 = vld [vmem:[%s3800_s12 + $0x70] sm:$0xff]  ;;  %v351_v9 = vld [vmem:[%s3800_s12 + $0x78] sm:$0xff] }
  0x43   : > { %3452 = vmatpush3.bf16.msra.mxu1 %v3634_v49  ;;  %3341 = vmatprep.subr.bf16.mxu0 %v3635_v55  ;;  %v453_v49 = vld [vmem:[%s3800_s12 + $0x3a8] sm:$0xff]  ;;  %v2861_v52 = vcombine.high %v448_v46, %v452_v47  ;;  %v460_v55 = vld [vmem:[%s3800_s12 + $0x3e0] sm:$0xff]  ;;  %v355_v16 = vld [vmem:[%s3800_s12 + $0x98] sm:$0xff] }
  0x44   : > { %3453 = vmatprep.subr.bf16.mxu1 %v3637_v60  ;;  %v2863_v53 = vcombine.high %v449_v48, %v453_v49  ;;  %v359_v17 = vld [vmem:[%s3800_s12 + $0xb8] sm:$0xff] }
  0x46   : > { %3342 = vmatpush3.bf16.msra.mxu0 %v3636_v58  ;;  %v2860_v58 = vcombine.low %v448_v46, %v452_v47  ;;  %v386_v46 = vld [vmem:[%s3800_s12 + $0x190] sm:$0xff] }
  0x47   : > { %3454 = vmatpush3.bf16.msra.mxu1 %v3638_v61  ;;  %v390_v47 = vld [vmem:[%s3800_s12 + $0x1b0] sm:$0xff] }
  0x48   : > { %1681 = vmatmul.mubr.bf16.gmra.mrb[16].mxu0 %v2780_v30  ;;  %v432_v30 = vld [vmem:[%s3800_s12 + $0x300] sm:$0xff] }
  0x49   : > { %1842 = vmatmul.mubr.bf16.gmra.mrb[16].mxu1 %v2782_v31  ;;  %1688 = vmatprep.mubr.bf16.mxu0 %v2789_v32  ;;  %v436_v31 = vld [vmem:[%s3800_s12 + $0x320] sm:$0xff]  ;;  %v433_v32 = vld [vmem:[%s3800_s12 + $0x308] sm:$0xff] }
  0x4a   : > { %1849 = vmatprep.mubr.bf16.mxu1 %v2791_v33  ;;  %v437_v33 = vld [vmem:[%s3800_s12 + $0x328] sm:$0xff]  ;;  %v2845_v36 = vcombine.high %v432_v30, %v436_v31 }
  0x4b   : > { %v2847_v37 = vcombine.high %v433_v32, %v437_v33 }
  0x50   : > { %1689 = vmatmul.mubr.bf16.gmra.mrb[20].mxu0 %v2788_v42  ;;  %v2844_v42 = vcombine.low %v432_v30, %v436_v31  ;;  %v370_v30 = vld [vmem:[%s3800_s12 + $0x110] sm:$0xff] }
  0x51   : > { %1850 = vmatmul.mubr.bf16.gmra.mrb[20].mxu1 %v2790_v43  ;;  %1696 = vmatprep.mubr.bf16.mxu0 %v2797_v44  ;;  %v2846_v43 = vcombine.low %v433_v32, %v437_v33  ;;  %v2853_v44 = vcombine.high %v440_v38, %v444_v39  ;;  %v374_v31 = vld [vmem:[%s3800_s12 + $0x130] sm:$0xff]  ;;  %v371_v32 = vld [vmem:[%s3800_s12 + $0x118] sm:$0xff] }
  0x52   : > { %1857 = vmatprep.mubr.bf16.mxu1 %v2799_v45  ;;  %v2855_v45 = vcombine.high %v441_v40, %v445_v41  ;;  %v375_v33 = vld [vmem:[%s3800_s12 + $0x138] sm:$0xff]  ;;  %v378_v38 = vld [vmem:[%s3800_s12 + $0x150] sm:$0xff] }
  0x53   : > { %v382_v39 = vld [vmem:[%s3800_s12 + $0x170] sm:$0xff]  ;;  %v379_v40 = vld [vmem:[%s3800_s12 + $0x158] sm:$0xff] }
  0x54   : > { %v383_v41 = vld [vmem:[%s3800_s12 + $0x178] sm:$0xff] }
  0x58   : > { %1697 = vmatmul.mubr.bf16.gmra.mrb[24].mxu0 %v2796_v54  ;;  %v456_v54 = vld [vmem:[%s3800_s12 + $0x3c0] sm:$0xff] }
  0x59   : > { %1858 = vmatmul.mubr.bf16.gmra.mrb[24].mxu1 %v2798_v56  ;;  %1704 = vmatprep.mubr.bf16.mxu0 %v2805_v57  ;;  %v457_v56 = vld [vmem:[%s3800_s12 + $0x3c8] sm:$0xff]  ;;  %v2869_v60 = vcombine.high %v456_v54, %v460_v55 }
  0x5a   : > { %1865 = vmatprep.mubr.bf16.mxu1 %v2807_v59  ;;  %v461_v57 = vld [vmem:[%s3800_s12 + $0x3e8] sm:$0xff]  ;;  %v2862_v59 = vcombine.low %v449_v48, %v453_v49  ;;  %v387_v48 = vld [vmem:[%s3800_s12 + $0x198] sm:$0xff] }
  0x5b   : > { %v2871_v61 = vcombine.high %v457_v56, %v461_v57  ;;  %v391_v49 = vld [vmem:[%s3800_s12 + $0x1b8] sm:$0xff] }
  0x60   : > { %1705 = vmatmul.mubr.bf16.gmra.mrb[28].mxu0 %v2804_v2  ;;  %v2868_v2 = vcombine.low %v456_v54, %v460_v55  ;;  %v394_v54 = vld [vmem:[%s3800_s12 + $0x1d0] sm:$0xff] }
  0x61   : > { %1866 = vmatmul.mubr.bf16.gmra.mrb[28].mxu1 %v2806_v3  ;;  %1712 = vmatprep.mubr.bf16.mxu0 %v2813_v4  ;;  %v2870_v3 = vcombine.low %v457_v56, %v461_v57  ;;  %v2753_v4 = vcombine.high %v338_v62, %v342_v63  ;;  %v398_v55 = vld [vmem:[%s3800_s12 + $0x1f0] sm:$0xff]  ;;  %v395_v56 = vld [vmem:[%s3800_s12 + $0x1d8] sm:$0xff] }
  0x62   : > { %1873 = vmatprep.mubr.bf16.mxu1 %v2815_v5  ;;  %v2755_v5 = vcombine.high %v339_v0, %v343_v1  ;;  %v399_v57 = vld [vmem:[%s3800_s12 + $0x1f8] sm:$0xff] }
  0x68   : > { %1713 = vmatmul.mubr.bf16.gmra.mrb[32].mxu0 %v2812_v10  ;;  %v2752_v10 = vcombine.low %v338_v62, %v342_v63  ;;  %v402_v62 = vld [vmem:[%s3800_s12 + $0x210] sm:$0xff] }
  0x69   : > { %1874 = vmatmul.mubr.bf16.gmra.mrb[32].mxu1 %v2814_v11  ;;  %1720 = vmatprep.mubr.bf16.mxu0 %v2821_v12  ;;  %v2754_v11 = vcombine.low %v339_v0, %v343_v1  ;;  %v2761_v12 = vcombine.high %v346_v6, %v350_v7  ;;  %v406_v63 = vld [vmem:[%s3800_s12 + $0x230] sm:$0xff]  ;;  %v403_v0 = vld [vmem:[%s3800_s12 + $0x218] sm:$0xff] }
  0x6a   : > { %1881 = vmatprep.mubr.bf16.mxu1 %v2823_v13  ;;  %v2763_v13 = vcombine.high %v347_v8, %v351_v9  ;;  %v407_v1 = vld [vmem:[%s3800_s12 + $0x238] sm:$0xff] }
  0x70   : > { %1721 = vmatmul.mubr.bf16.gmra.mrb[36].mxu0 %v2820_v18  ;;  %v2760_v18 = vcombine.low %v346_v6, %v350_v7  ;;  %v410_v6 = vld [vmem:[%s3800_s12 + $0x250] sm:$0xff] }
  0x71   : > { %1882 = vmatmul.mubr.bf16.gmra.mrb[36].mxu1 %v2822_v19  ;;  %1728 = vmatprep.mubr.bf16.mxu0 %v2829_v20  ;;  %v2762_v19 = vcombine.low %v347_v8, %v351_v9  ;;  %v2769_v20 = vcombine.high %v354_v14, %v358_v15  ;;  %v414_v7 = vld [vmem:[%s3800_s12 + $0x270] sm:$0xff]  ;;  %v411_v8 = vld [vmem:[%s3800_s12 + $0x258] sm:$0xff] }
  0x72   : > { %1889 = vmatprep.mubr.bf16.mxu1 %v2831_v21  ;;  %v2771_v21 = vcombine.high %v355_v16, %v359_v17  ;;  %v415_v9 = vld [vmem:[%s3800_s12 + $0x278] sm:$0xff] }
  0x78   : > { %1729 = vmatmul.mubr.bf16.gmra.mrb[40].mxu0 %v2828_v26  ;;  %v2768_v26 = vcombine.low %v354_v14, %v358_v15  ;;  %v418_v14 = vld [vmem:[%s3800_s12 + $0x290] sm:$0xff] }
  0x79   : > { %1890 = vmatmul.mubr.bf16.gmra.mrb[40].mxu1 %v2830_v27  ;;  %1736 = vmatprep.mubr.bf16.mxu0 %v2837_v28  ;;  %v2770_v27 = vcombine.low %v355_v16, %v359_v17  ;;  %v2777_v28 = vcombine.high %v362_v22, %v366_v23  ;;  %v422_v15 = vld [vmem:[%s3800_s12 + $0x2b0] sm:$0xff]  ;;  %v419_v16 = vld [vmem:[%s3800_s12 + $0x298] sm:$0xff] }
  0x7a   : > { %1897 = vmatprep.mubr.bf16.mxu1 %v2839_v29  ;;  %v2779_v29 = vcombine.high %v363_v24, %v367_v25  ;;  %v423_v17 = vld [vmem:[%s3800_s12 + $0x2b8] sm:$0xff] }
  0x80   : > { %1737 = vmatmul.mubr.bf16.gmra.mrb[44].mxu0 %v2836_v34  ;;  %v2776_v34 = vcombine.low %v362_v22, %v366_v23  ;;  %v426_v22 = vld [vmem:[%s3800_s12 + $0x2d0] sm:$0xff] }
  0x81   : > { %1898 = vmatmul.mubr.bf16.gmra.mrb[44].mxu1 %v2838_v35  ;;  %1744 = vmatprep.mubr.bf16.mxu0 %v2845_v36  ;;  %v2778_v35 = vcombine.low %v363_v24, %v367_v25  ;;  %v2785_v36 = vcombine.high %v370_v30, %v374_v31  ;;  %v430_v23 = vld [vmem:[%s3800_s12 + $0x2f0] sm:$0xff]  ;;  %v427_v24 = vld [vmem:[%s3800_s12 + $0x2d8] sm:$0xff] }
  0x82   : > { %1905 = vmatprep.mubr.bf16.mxu1 %v2847_v37  ;;  %v2787_v37 = vcombine.high %v371_v32, %v375_v33  ;;  %v431_v25 = vld [vmem:[%s3800_s12 + $0x2f8] sm:$0xff] }
  0x88   : > { %1745 = vmatmul.mubr.bf16.gmra.mrb[48].mxu0 %v2844_v42  ;;  %v2784_v42 = vcombine.low %v370_v30, %v374_v31  ;;  %v434_v30 = vld [vmem:[%s3800_s12 + $0x310] sm:$0xff] }
  0x89   : > { %1906 = vmatmul.mubr.bf16.gmra.mrb[48].mxu1 %v2846_v43  ;;  %1752 = vmatprep.mubr.bf16.mxu0 %v2853_v44  ;;  %v2786_v43 = vcombine.low %v371_v32, %v375_v33  ;;  %v2793_v44 = vcombine.high %v378_v38, %v382_v39  ;;  %v438_v31 = vld [vmem:[%s3800_s12 + $0x330] sm:$0xff]  ;;  %v435_v33 = vld [vmem:[%s3800_s12 + $0x318] sm:$0xff] }
  0x8a   : > { %1913 = vmatprep.mubr.bf16.mxu1 %v2855_v45  ;;  %v2795_v45 = vcombine.high %v379_v40, %v383_v41 }
  0x90   : > { %1753 = vmatmul.mubr.bf16.gmra.mrb[52].mxu0 %v2852_v50  ;;  %v2792_v50 = vcombine.low %v378_v38, %v382_v39 }
  0x91   : > { %1914 = vmatmul.mubr.bf16.gmra.mrb[52].mxu1 %v2854_v51  ;;  %1760 = vmatprep.mubr.bf16.mxu0 %v2861_v52  ;;  %v2794_v51 = vcombine.low %v379_v40, %v383_v41  ;;  %v2801_v52 = vcombine.high %v386_v46, %v390_v47  ;;  %v2842_v41 = vcombine.low %v427_v24, %v431_v25 }
  0x92   : > { %1921 = vmatprep.mubr.bf16.mxu1 %v2863_v53  ;;  %v2803_v53 = vcombine.high %v387_v48, %v391_v49 }
  0x98   : > { %1761 = vmatmul.mubr.bf16.gmra.mrb[56].mxu0 %v2860_v58  ;;  %v2800_v58 = vcombine.low %v386_v46, %v390_v47 }
  0x99   : > { %1922 = vmatmul.mubr.bf16.gmra.mrb[56].mxu1 %v2862_v59  ;;  %1768 = vmatprep.mubr.bf16.mxu0 %v2869_v60  ;;  %v2802_v59 = vcombine.low %v387_v48, %v391_v49  ;;  %v2809_v60 = vcombine.high %v394_v54, %v398_v55 }
  0x9a   : > { %1929 = vmatprep.mubr.bf16.mxu1 %v2871_v61  ;;  %v2811_v61 = vcombine.high %v395_v56, %v399_v57 }
  0xa0   : > { %1769 = vmatmul.mubr.bf16.gmra.mrb[60].mxu0 %v2868_v2  ;;  %v2808_v2 = vcombine.low %v394_v54, %v398_v55  ;;  %v443_v55 = vld [vmem:[%s3800_s12 + $0x358] sm:$0xff] }
  0xa1   : > { %1930 = vmatmul.mubr.bf16.gmra.mrb[60].mxu1 %v2870_v3  ;;  %1970 = vmatprep.mubr.bf16.mxu0 %v2753_v4  ;;  %v2810_v3 = vcombine.low %v395_v56, %v399_v57  ;;  %v2817_v4 = vcombine.high %v402_v62, %v406_v63  ;;  %v447_v56 = vld [vmem:[%s3800_s12 + $0x378] sm:$0xff] }
  0xa2   : > { %2131 = vmatprep.mubr.bf16.mxu1 %v2755_v5  ;;  %v2819_v5 = vcombine.high %v403_v0, %v407_v1 }
  0xa8   : > { %1971 = vmatmul.mubr.bf16.vlgmr.msra.gmra.mrb[64].mxu0 %v2752_v10  ;;  %v2816_v10 = vcombine.low %v402_v62, %v406_v63 }
  0xa9   : > { %2132 = vmatmul.mubr.bf16.vlgmr.msra.gmra.mrb[64].mxu1 %v2754_v11  ;;  %1978 = vmatprep.mubr.bf16.mxu0 %v2761_v12  ;;  %v2818_v11 = vcombine.low %v403_v0, %v407_v1  ;;  %v2825_v12 = vcombine.high %v410_v6, %v414_v7 }
  0xaa   : > { %2139 = vmatprep.mubr.bf16.mxu1 %v2763_v13  ;;  %v2827_v13 = vcombine.high %v411_v8, %v415_v9 }
  0xb0   : > { %1979 = vmatmul.mubr.bf16.gmra.mrb[68].mxu0 %v2760_v18  ;;  %v2824_v18 = vcombine.low %v410_v6, %v414_v7 }
  0xb1   : > { %2140 = vmatmul.mubr.bf16.gmra.mrb[68].mxu1 %v2762_v19  ;;  %1986 = vmatprep.mubr.bf16.mxu0 %v2769_v20  ;;  %v2826_v19 = vcombine.low %v411_v8, %v415_v9  ;;  %v2833_v20 = vcombine.high %v418_v14, %v422_v15 }
  0xb2   : > { %2147 = vmatprep.mubr.bf16.mxu1 %v2771_v21  ;;  %v2835_v21 = vcombine.high %v419_v16, %v423_v17 }
  0xb8   : > { %1987 = vmatmul.mubr.bf16.gmra.mrb[72].mxu0 %v2768_v26  ;;  %v2832_v26 = vcombine.low %v418_v14, %v422_v15  ;;  %v455_v14 = vld [vmem:[%s3800_s12 + $0x3b8] sm:$0xff] }
  0xb9   : > { %2148 = vmatmul.mubr.bf16.gmra.mrb[72].mxu1 %v2770_v27  ;;  %1994 = vmatprep.mubr.bf16.mxu0 %v2777_v28  ;;  %v2834_v27 = vcombine.low %v419_v16, %v423_v17  ;;  %v2841_v28 = vcombine.high %v426_v22, %v430_v23 }
  0xba   : > { %2155 = vmatprep.mubr.bf16.mxu1 %v2779_v29  ;;  %v2843_v29 = vcombine.high %v427_v24, %v431_v25 }
  0xc0   : > { %1995 = vmatmul.mubr.bf16.gmra.mrb[76].mxu0 %v2776_v34  ;;  %v439_v34 = vld [vmem:[%s3800_s12 + $0x338] sm:$0xff] }
  0xc1   : > { %2156 = vmatmul.mubr.bf16.gmra.mrb[76].mxu1 %v2778_v35  ;;  %2002 = vmatprep.mubr.bf16.mxu0 %v2785_v36  ;;  %v2851_v46 = vcombine.high %v435_v33, %v439_v34  ;;  %v2850_v63 = vcombine.low %v435_v33, %v439_v34  ;;  %v462_v33 = vld [vmem:[%s3800_s12 + $0x3f0] sm:$0xff] }
  0xc2   : > { %2163 = vmatprep.mubr.bf16.mxu1 %v2787_v37  ;;  %v2840_v37 = vcombine.low %v426_v22, %v430_v23 }
  0xc8   : > { %2003 = vmatmul.mubr.bf16.gmra.mrb[80].mxu0 %v2784_v42  ;;  %v2849_v42 = vcombine.high %v434_v30, %v438_v31 }
  0xc9   : > { %2164 = vmatmul.mubr.bf16.gmra.mrb[80].mxu1 %v2786_v43  ;;  %2010 = vmatprep.mubr.bf16.mxu0 %v2793_v44 }
  0xca   : > { %2171 = vmatprep.mubr.bf16.mxu1 %v2795_v45 }
  0xd0   : > { %2011 = vmatmul.mubr.bf16.gmra.mrb[84].mxu0 %v2792_v50 }
  0xd1   : > { %2172 = vmatmul.mubr.bf16.gmra.mrb[84].mxu1 %v2794_v51  ;;  %2018 = vmatprep.mubr.bf16.mxu0 %v2801_v52  ;;  %v442_v52 = vld [vmem:[%s3800_s12 + $0x350] sm:$0xff] }
  0xd2   : > { %2179 = vmatprep.mubr.bf16.mxu1 %v2803_v53  ;;  %v446_v53 = vld [vmem:[%s3800_s12 + $0x370] sm:$0xff] }
  0xd3   : > { %v2857_v0 = vcombine.high %v442_v52, %v446_v53  ;;  %v2856_v17 = vcombine.low %v442_v52, %v446_v53 }
  0xd8   : > { %2019 = vmatmul.mubr.bf16.gmra.mrb[88].mxu0 %v2800_v58 }
  0xd9   : > { %2180 = vmatmul.mubr.bf16.gmra.mrb[88].mxu1 %v2802_v59  ;;  %2026 = vmatprep.mubr.bf16.mxu0 %v2809_v60  ;;  %v2848_v59 = vcombine.low %v434_v30, %v438_v31 }
  0xda   : > { %2187 = vmatprep.mubr.bf16.mxu1 %v2811_v61 }
  0xe0   : > { %2027 = vmatmul.mubr.bf16.gmra.mrb[92].mxu0 %v2808_v2 }
  0xe1   : > { %2188 = vmatmul.mubr.bf16.gmra.mrb[92].mxu1 %v2810_v3  ;;  %2034 = vmatprep.mubr.bf16.mxu0 %v2817_v4  ;;  %v2859_v4 = vcombine.high %v443_v55, %v447_v56 }
  0xe2   : > { %2195 = vmatprep.mubr.bf16.mxu1 %v2819_v5 }
  0xe8   : > { %2035 = vmatmul.mubr.bf16.gmra.mrb[96].mxu0 %v2816_v10  ;;  %v450_v10 = vld [vmem:[%s3800_s12 + $0x390] sm:$0xff] }
  0xe9   : > { %2196 = vmatmul.mubr.bf16.gmra.mrb[96].mxu1 %v2818_v11  ;;  %2042 = vmatprep.mubr.bf16.mxu0 %v2825_v12  ;;  %v454_v11 = vld [vmem:[%s3800_s12 + $0x3b0] sm:$0xff] }
  0xea   : > { %2203 = vmatprep.mubr.bf16.mxu1 %v2827_v13  ;;  %v451_v13 = vld [vmem:[%s3800_s12 + $0x398] sm:$0xff]  ;;  %v2865_v22 = vcombine.high %v450_v10, %v454_v11 }
  0xf0   : > { %2043 = vmatmul.mubr.bf16.gmra.mrb[100].mxu0 %v2824_v18 }
  0xf1   : > { %2204 = vmatmul.mubr.bf16.gmra.mrb[100].mxu1 %v2826_v19  ;;  %2050 = vmatprep.mubr.bf16.mxu0 %v2833_v20 }
  0xf2   : > { %2211 = vmatprep.mubr.bf16.mxu1 %v2835_v21  ;;  %v2858_v21 = vcombine.low %v443_v55, %v447_v56 }
  0xf8   : > { %2051 = vmatmul.mubr.bf16.gmra.mrb[104].mxu0 %v2832_v26  ;;  %v2867_v26 = vcombine.high %v451_v13, %v455_v14 }
  0xf9   : > { %2212 = vmatmul.mubr.bf16.gmra.mrb[104].mxu1 %v2834_v27  ;;  %2058 = vmatprep.mubr.bf16.mxu0 %v2841_v28 }
  0xfa   : > { %2219 = vmatprep.mubr.bf16.mxu1 %v2843_v29 }
  0xfb   : > { %v3119_v32 = vpop.f32.mrb[0].mxu0 }
  0xfc   : > { %v3231_v35 = vpop.f32.mrb[0].mxu1  ;;  %v3120_v36 = vpop.f32.mrb[1].mxu0 }
  0xfd   : > { %v3121_v38 = vadd.f32 %v3120_v36, %v3119_v32  ;;  %v3232_v39 = vpop.f32.mrb[1].mxu1  ;;  %v3122_v40 = vpop.f32.mrb[2].mxu0  ;;  %v458_v32 = vld [vmem:[%s3800_s12 + $0x3d0] sm:$0xff]  ;;  %v463_v36 = vld [vmem:[%s3800_s12 + $0x3f8] sm:$0xff] }
  0xfe   : > { %v3233_v43 = vadd.f32 %v3232_v39, %v3231_v35  ;;  %v3234_v44 = vpop.f32.mrb[2].mxu1  ;;  %v3123_v45 = vpop.f32.mrb[3].mxu0  ;;  %v459_v35 = vld [vmem:[%s3800_s12 + $0x3d8] sm:$0xff]  ;;  %v2864_v39 = vcombine.low %v450_v10, %v454_v11 }
  0xff   : > { %v3124_v47 = vadd.f32 %v3123_v45, %v3122_v40  ;;  %v3235_v48 = vpop.f32.mrb[3].mxu1 }
 0x100   : > { %v4020_v49 = vadd.f32 %v3233_v43, %v3121_v38  ;;  %v3236_v50 = vadd.f32 %v3235_v48, %v3234_v44  ;;  %2059 = vmatmul.mubr.bf16.gmra.mrb[108].mxu0 %v2840_v37  ;;  %v2866_v43 = vcombine.low %v451_v13, %v455_v14  ;;  %v2873_v44 = vcombine.high %v458_v32, %v462_v33 }
 0x101   : > { %2220 = vmatmul.mubr.bf16.gmra.mrb[108].mxu1 %v2842_v41  ;;  %2066 = vmatprep.mubr.bf16.mxu0 %v2849_v42  ;;  %v2875_v48 = vcombine.high %v459_v35, %v463_v36 }
 0x102   : > { %v4022_v51 = vadd.f32 %v3236_v50, %v3124_v47  ;;  %2227 = vmatprep.mubr.bf16.mxu1 %v2851_v46 }
 0x103   : > { %v3125_v54 = vpop.f32.mrb[4].mxu0 }
 0x104   : > { %v3237_v57 = vpop.f32.mrb[4].mxu1  ;;  %v3126_v58 = vpop.f32.mrb[5].mxu0 }
 0x105   : > { %v3127_v60 = vadd.f32 %v3126_v58, %v3125_v54  ;;  %v3238_v61 = vpop.f32.mrb[5].mxu1  ;;  %v3128_v62 = vpop.f32.mrb[6].mxu0 }
 0x106   : > { %v3239_v1 = vadd.f32 %v3238_v61, %v3237_v57  ;;  %v3240_v2 = vpop.f32.mrb[6].mxu1  ;;  %v3129_v3 = vpop.f32.mrb[7].mxu0 }
 0x107   : > { %v3130_v5 = vadd.f32 %v3129_v3, %v3128_v62  ;;  %v3241_v6 = vpop.f32.mrb[7].mxu1 }
 0x108   : > { %v4028_v7 = vadd.f32 %v3239_v1, %v3127_v60  ;;  %v3242_v8 = vadd.f32 %v3241_v6, %v3240_v2  ;;  %2067 = vmatmul.mubr.bf16.gmra.mrb[112].mxu0 %v2848_v59  ;;  %v2872_v59 = vcombine.low %v458_v32, %v462_v33 }
 0x109   : > { %2228 = vmatmul.mubr.bf16.gmra.mrb[112].mxu1 %v2850_v63  ;;  %2074 = vmatprep.mubr.bf16.mxu0 %v2857_v0  ;;  %v2874_v63 = vcombine.low %v459_v35, %v463_v36 }
 0x10a   : > { %v4030_v9 = vadd.f32 %v3242_v8, %v3130_v5  ;;  %2235 = vmatprep.mubr.bf16.mxu1 %v2859_v4 }
 0x10b   : > { %v3131_v12 = vpop.f32.mrb[8].mxu0 }
 0x10c   : > { %v3243_v15 = vpop.f32.mrb[8].mxu1  ;;  %v3132_v16 = vpop.f32.mrb[9].mxu0 }
 0x10d   : > { %v3133_v18 = vadd.f32 %v3132_v16, %v3131_v12  ;;  %v3244_v19 = vpop.f32.mrb[9].mxu1  ;;  %v3134_v20 = vpop.f32.mrb[10].mxu0 }
 0x10e   : > { %v3245_v23 = vadd.f32 %v3244_v19, %v3243_v15  ;;  %v3246_v24 = vpop.f32.mrb[10].mxu1  ;;  %v3135_v25 = vpop.f32.mrb[11].mxu0 }
 0x10f   : > { %v3136_v27 = vadd.f32 %v3135_v25, %v3134_v20  ;;  %v3247_v28 = vpop.f32.mrb[11].mxu1 }
 0x110   : > { %v4036_v29 = vadd.f32 %v3245_v23, %v3133_v18  ;;  %v3248_v30 = vadd.f32 %v3247_v28, %v3246_v24  ;;  %2075 = vmatmul.mubr.bf16.gmra.mrb[116].mxu0 %v2856_v17 }
 0x111   : > { %2236 = vmatmul.mubr.bf16.gmra.mrb[116].mxu1 %v2858_v21  ;;  %2082 = vmatprep.mubr.bf16.mxu0 %v2865_v22 }
 0x112   : > { %v4038_v31 = vadd.f32 %v3248_v30, %v3136_v27  ;;  %2243 = vmatprep.mubr.bf16.mxu1 %v2867_v26 }
 0x113   : > { %v3137_v34 = vpop.f32.mrb[12].mxu0 }
 0x114   : > { %v3249_v37 = vpop.f32.mrb[12].mxu1  ;;  %v3138_v38 = vpop.f32.mrb[13].mxu0 }
 0x115   : > { %v3139_v40 = vadd.f32 %v3138_v38, %v3137_v34  ;;  %v3250_v41 = vpop.f32.mrb[13].mxu1  ;;  %v3140_v42 = vpop.f32.mrb[14].mxu0 }
 0x116   : > { %v3251_v45 = vadd.f32 %v3250_v41, %v3249_v37  ;;  %v3252_v46 = vpop.f32.mrb[14].mxu1  ;;  %v3141_v47 = vpop.f32.mrb[15].mxu0 }
 0x117   : > { %v3142_v50 = vadd.f32 %v3141_v47, %v3140_v42  ;;  %v3253_v52 = vpop.f32.mrb[15].mxu1 }
 0x118   : > { %v4044_v53 = vadd.f32 %v3251_v45, %v3139_v40  ;;  %v3254_v54 = vadd.f32 %v3253_v52, %v3252_v46  ;;  %2083 = vmatmul.mubr.bf16.gmra.mrb[120].mxu0 %v2864_v39 }
 0x119   : > { %2244 = vmatmul.mubr.bf16.gmra.mrb[120].mxu1 %v2866_v43  ;;  %2090 = vmatprep.mubr.bf16.mxu0 %v2873_v44 }
 0x11a   : > { %v4046_v55 = vadd.f32 %v3254_v54, %v3142_v50  ;;  %2251 = vmatprep.mubr.bf16.mxu1 %v2875_v48 }
 0x11b   : > { %v3143_v56 = vpop.f32.mrb[16].mxu0 }
 0x11c   : > { %v3255_v57 = vpop.f32.mrb[16].mxu1  ;;  %v3144_v58 = vpop.f32.mrb[17].mxu0 }
 0x11d   : > { %v3145_v60 = vadd.f32 %v3144_v58, %v3143_v56  ;;  %v3256_v61 = vpop.f32.mrb[17].mxu1  ;;  %v3146_v62 = vpop.f32.mrb[18].mxu0 }
 0x11e   : > { %v3257_v0 = vadd.f32 %v3256_v61, %v3255_v57  ;;  %v3258_v1 = vpop.f32.mrb[18].mxu1  ;;  %v3147_v2 = vpop.f32.mrb[19].mxu0 }
 0x11f   : > { %v3148_v3 = vadd.f32 %v3147_v2, %v3146_v62  ;;  %v3259_v4 = vpop.f32.mrb[19].mxu1 }
 0x120   : > { %v4048_v5 = vadd.f32 %v3257_v0, %v3145_v60  ;;  %v3260_v6 = vadd.f32 %v3259_v4, %v3258_v1  ;;  %2091 = vmatmul.mubr.bf16.gmra.mrb[124].mxu0 %v2872_v59 }
 0x121   : > { %2252 = vmatmul.mubr.bf16.gmra.mrb[124].mxu1 %v2874_v63 }
 0x122   : > { %v4050_v8 = vadd.f32 %v3260_v6, %v3148_v3 }
 0x123   : > { %v3149_v10 = vpop.f32.mrb[20].mxu0 }
 0x124   : > { %v3261_v11 = vpop.f32.mrb[20].mxu1  ;;  %v3150_v12 = vpop.f32.mrb[21].mxu0 }
 0x125   : > { %v3151_v13 = vadd.f32 %v3150_v12, %v3149_v10  ;;  %v3262_v14 = vpop.f32.mrb[21].mxu1  ;;  %v3152_v15 = vpop.f32.mrb[22].mxu0 }
 0x126   : > { %v3263_v16 = vadd.f32 %v3262_v14, %v3261_v11  ;;  %v3264_v17 = vpop.f32.mrb[22].mxu1  ;;  %v3153_v18 = vpop.f32.mrb[23].mxu0 }
 0x127   : > { %v3154_v19 = vadd.f32 %v3153_v18, %v3152_v15  ;;  %v3265_v20 = vpop.f32.mrb[23].mxu1 }
 0x128   : > { %v4052_v21 = vadd.f32 %v3263_v16, %v3151_v13  ;;  %v3266_v22 = vadd.f32 %v3265_v20, %v3264_v17 }
 0x12a   : > { %v4054_v23 = vadd.f32 %v3266_v22, %v3154_v19 }
 0x12b   : > { %v3155_v24 = vpop.f32.mrb[24].mxu0 }
 0x12c   : > { %v3267_v25 = vpop.f32.mrb[24].mxu1  ;;  %v3156_v26 = vpop.f32.mrb[25].mxu0 }
 0x12d   : > { %v3157_v27 = vadd.f32 %v3156_v26, %v3155_v24  ;;  %v3268_v28 = vpop.f32.mrb[25].mxu1  ;;  %v3158_v30 = vpop.f32.mrb[26].mxu0 }
 0x12e   : > { %v3269_v32 = vadd.f32 %v3268_v28, %v3267_v25  ;;  %v3270_v33 = vpop.f32.mrb[26].mxu1  ;;  %v3159_v34 = vpop.f32.mrb[27].mxu0 }
 0x12f   : > { %v3160_v35 = vadd.f32 %v3159_v34, %v3158_v30  ;;  %v3271_v36 = vpop.f32.mrb[27].mxu1 }
 0x130   : > { %v4056_v37 = vadd.f32 %v3269_v32, %v3157_v27  ;;  %v3272_v38 = vadd.f32 %v3271_v36, %v3270_v33 }
 0x132   : > { %v4058_v39 = vadd.f32 %v3272_v38, %v3160_v35 }
 0x133   : > { %v3161_v40 = vpop.f32.mrb[28].mxu0 }
 0x134   : > { %v3273_v41 = vpop.f32.mrb[28].mxu1  ;;  %v3162_v42 = vpop.f32.mrb[29].mxu0 }
 0x135   : > { %v3163_v43 = vadd.f32 %v3162_v42, %v3161_v40  ;;  %v3274_v44 = vpop.f32.mrb[29].mxu1  ;;  %v3164_v45 = vpop.f32.mrb[30].mxu0 }
 0x136   : > { %v3275_v46 = vadd.f32 %v3274_v44, %v3273_v41  ;;  %v3276_v47 = vpop.f32.mrb[30].mxu1  ;;  %v3165_v48 = vpop.f32.mrb[31].mxu0 }
 0x137   : > { %v3166_v50 = vadd.f32 %v3165_v48, %v3164_v45  ;;  %v3277_v52 = vpop.f32.mrb[31].mxu1 }
 0x138   : > { %v4060_v54 = vadd.f32 %v3275_v46, %v3163_v43  ;;  %v3278_v56 = vadd.f32 %v3277_v52, %v3276_v47 }
 0x13a   : > { %v4062_v57 = vadd.f32 %v3278_v56, %v3166_v50 }
 0x13b   : > { %v3167_v58 = vpop.f32.mrb[32].mxu0 }
 0x13c   : > { %v3279_v59 = vpop.f32.mrb[32].mxu1  ;;  %v3168_v60 = vpop.f32.mrb[33].mxu0 }
 0x13d   : > { %v3169_v61 = vadd.f32 %v3168_v60, %v3167_v58  ;;  %v3280_v62 = vpop.f32.mrb[33].mxu1  ;;  %v3170_v63 = vpop.f32.mrb[34].mxu0 }
 0x13e   : > { %v3281_v0 = vadd.f32 %v3280_v62, %v3279_v59  ;;  %v3282_v1 = vpop.f32.mrb[34].mxu1  ;;  %v3171_v2 = vpop.f32.mrb[35].mxu0 }
 0x13f   : > { %v3172_v3 = vadd.f32 %v3171_v2, %v3170_v63  ;;  %v3283_v4 = vpop.f32.mrb[35].mxu1 }
 0x140   : > { %v4064_v6 = vadd.f32 %v3281_v0, %v3169_v61  ;;  %v3284_v10 = vadd.f32 %v3283_v4, %v3282_v1 }
 0x142   : > { %v4066_v11 = vadd.f32 %v3284_v10, %v3172_v3 }
 0x143   : > { %v3173_v12 = vpop.f32.mrb[36].mxu0 }
 0x144   : > { %v3285_v13 = vpop.f32.mrb[36].mxu1  ;;  %v3174_v14 = vpop.f32.mrb[37].mxu0 }
 0x145   : > { %v3175_v15 = vadd.f32 %v3174_v14, %v3173_v12  ;;  %v3286_v16 = vpop.f32.mrb[37].mxu1  ;;  %v3176_v17 = vpop.f32.mrb[38].mxu0 }
 0x146   : > { %v3287_v18 = vadd.f32 %v3286_v16, %v3285_v13  ;;  %v3288_v19 = vpop.f32.mrb[38].mxu1  ;;  %v3177_v20 = vpop.f32.mrb[39].mxu0 }
 0x147   : > { %v3178_v22 = vadd.f32 %v3177_v20, %v3176_v17  ;;  %v3289_v24 = vpop.f32.mrb[39].mxu1 }
 0x148   : > { %v4068_v25 = vadd.f32 %v3287_v18, %v3175_v15  ;;  %v3290_v26 = vadd.f32 %v3289_v24, %v3288_v19 }
 0x14a   : > { %v4070_v27 = vadd.f32 %v3290_v26, %v3178_v22 }
 0x14b   : > { %v3179_v28 = vpop.f32.mrb[40].mxu0 }
 0x14c   : > { %v3291_v30 = vpop.f32.mrb[40].mxu1  ;;  %v3180_v32 = vpop.f32.mrb[41].mxu0 }
 0x14d   : > { %v3181_v33 = vadd.f32 %v3180_v32, %v3179_v28  ;;  %v3292_v34 = vpop.f32.mrb[41].mxu1  ;;  %v3182_v35 = vpop.f32.mrb[42].mxu0 }
 0x14e   : > { %v3293_v36 = vadd.f32 %v3292_v34, %v3291_v30  ;;  %v3294_v38 = vpop.f32.mrb[42].mxu1  ;;  %v3183_v40 = vpop.f32.mrb[43].mxu0 }
 0x14f   : > { %v3184_v41 = vadd.f32 %v3183_v40, %v3182_v35  ;;  %v3295_v42 = vpop.f32.mrb[43].mxu1 }
 0x150   : > { %v4072_v43 = vadd.f32 %v3293_v36, %v3181_v33  ;;  %v3296_v44 = vadd.f32 %v3295_v42, %v3294_v38 }
 0x152   : > { %v4074_v45 = vadd.f32 %v3296_v44, %v3184_v41 }
 0x153   : > { %v3185_v46 = vpop.f32.mrb[44].mxu0 }
 0x154   : > { %v3297_v47 = vpop.f32.mrb[44].mxu1  ;;  %v3186_v48 = vpop.f32.mrb[45].mxu0 }
 0x155   : > { %v3187_v50 = vadd.f32 %v3186_v48, %v3185_v46  ;;  %v3298_v52 = vpop.f32.mrb[45].mxu1  ;;  %v3188_v56 = vpop.f32.mrb[46].mxu0 }
 0x156   : > { %v3299_v58 = vadd.f32 %v3298_v52, %v3297_v47  ;;  %v3300_v59 = vpop.f32.mrb[46].mxu1  ;;  %v3189_v60 = vpop.f32.mrb[47].mxu0 }
 0x157   : > { %v3190_v61 = vadd.f32 %v3189_v60, %v3188_v56  ;;  %v3301_v62 = vpop.f32.mrb[47].mxu1 }
 0x158   : > { %v4076_v63 = vadd.f32 %v3299_v58, %v3187_v50  ;;  %v3302_v0 = vadd.f32 %v3301_v62, %v3300_v59 }
 0x15a   : > { %v4078_v1 = vadd.f32 %v3302_v0, %v3190_v61 }
 0x15b   : > { %v3191_v2 = vpop.f32.mrb[48].mxu0 }
 0x15c   : > { %v3303_v3 = vpop.f32.mrb[48].mxu1  ;;  %v3192_v4 = vpop.f32.mrb[49].mxu0 }
 0x15d   : > { %v3193_v10 = vadd.f32 %v3192_v4, %v3191_v2  ;;  %v3304_v12 = vpop.f32.mrb[49].mxu1  ;;  %v3194_v13 = vpop.f32.mrb[50].mxu0 }
 0x15e   : > { %v3305_v14 = vadd.f32 %v3304_v12, %v3303_v3  ;;  %v3306_v15 = vpop.f32.mrb[50].mxu1  ;;  %v3195_v16 = vpop.f32.mrb[51].mxu0 }
 0x15f   : > { %v3196_v17 = vadd.f32 %v3195_v16, %v3194_v13  ;;  %v3307_v18 = vpop.f32.mrb[51].mxu1 }
 0x160   : > { %v4080_v19 = vadd.f32 %v3305_v14, %v3193_v10  ;;  %v3308_v20 = vadd.f32 %v3307_v18, %v3306_v15 }
 0x162   : > { %v4082_v22 = vadd.f32 %v3308_v20, %v3196_v17 }
 0x163   : > { %v3197_v24 = vpop.f32.mrb[52].mxu0 }
 0x164   : > { %v3309_v26 = vpop.f32.mrb[52].mxu1  ;;  %v3198_v28 = vpop.f32.mrb[53].mxu0 }
 0x165   : > { %v3199_v30 = vadd.f32 %v3198_v28, %v3197_v24  ;;  %v3310_v32 = vpop.f32.mrb[53].mxu1  ;;  %v3200_v33 = vpop.f32.mrb[54].mxu0 }
 0x166   : > { %v3311_v34 = vadd.f32 %v3310_v32, %v3309_v26  ;;  %v3312_v35 = vpop.f32.mrb[54].mxu1  ;;  %v3201_v36 = vpop.f32.mrb[55].mxu0 }
 0x167   : > { %v3202_v38 = vadd.f32 %v3201_v36, %v3200_v33  ;;  %v3313_v40 = vpop.f32.mrb[55].mxu1 }
 0x168   : > { %v4084_v41 = vadd.f32 %v3311_v34, %v3199_v30  ;;  %v3314_v42 = vadd.f32 %v3313_v40, %v3312_v35 }
 0x16a   : > { %v4086_v44 = vadd.f32 %v3314_v42, %v3202_v38 }
 0x16b   : > { %v3203_v46 = vpop.f32.mrb[56].mxu0 }
 0x16c   : > { %v3315_v47 = vpop.f32.mrb[56].mxu1  ;;  %v3204_v48 = vpop.f32.mrb[57].mxu0 }
 0x16d   : > { %v3205_v50 = vadd.f32 %v3204_v48, %v3203_v46  ;;  %v3316_v52 = vpop.f32.mrb[57].mxu1  ;;  %v3206_v56 = vpop.f32.mrb[58].mxu0 }
 0x16e   : > { %v3317_v58 = vadd.f32 %v3316_v52, %v3315_v47  ;;  %v3318_v59 = vpop.f32.mrb[58].mxu1  ;;  %v3207_v60 = vpop.f32.mrb[59].mxu0  ;;  %v4100_v52 = vld [vmem:[%s4198_s2] ss:$0 sm:$0xff] }
 0x16f   : > { %v3208_v61 = vadd.f32 %v3207_v60, %v3206_v56  ;;  %v3319_v62 = vpop.f32.mrb[59].mxu1 }
 0x170   : > { %v4088_v0 = vadd.f32 %v3317_v58, %v3205_v50  ;;  %v3320_v2 = vadd.f32 %v3319_v62, %v3318_v59 }
 0x172   : > { %v4090_v3 = vadd.f32 %v3320_v2, %v3208_v61 }
 0x173   : > { %v3209_v4 = vpop.f32.mrb[60].mxu0 }
 0x174   : > { %v3321_v10 = vpop.f32.mrb[60].mxu1  ;;  %v3210_v12 = vpop.f32.mrb[61].mxu0 }
 0x175   : > { %v3211_v13 = vadd.f32 %v3210_v12, %v3209_v4  ;;  %v3322_v14 = vpop.f32.mrb[61].mxu1  ;;  %v3212_v15 = vpop.f32.mrb[62].mxu0 }
 0x176   : > { %v3323_v16 = vadd.f32 %v3322_v14, %v3321_v10  ;;  %v3324_v17 = vpop.f32.mrb[62].mxu1  ;;  %v3213_v18 = vpop.f32.mrb[63].mxu0 }
 0x177   : > { %v3214_v20 = vadd.f32 %v3213_v18, %v3212_v15  ;;  %v3325_v24 = vpop.f32.mrb[63].mxu1 }
 0x178   : > { %v4092_v26 = vadd.f32 %v3323_v16, %v3211_v13  ;;  %v3326_v28 = vadd.f32 %v3325_v24, %v3324_v17 }
 0x17a   : > { %v4094_v30 = vadd.f32 %v3326_v28, %v3214_v20 }
 0x17b   : > { %v3343_v32 = vpop.f32.mrb[64].mxu0 }
 0x17c   : > { %v3455_v33 = vpop.f32.mrb[64].mxu1  ;;  %v3344_v34 = vpop.f32.mrb[65].mxu0 }
 0x17d   : > { %v3345_v35 = vadd.f32 %v3344_v34, %v3343_v32  ;;  %v3456_v36 = vpop.f32.mrb[65].mxu1  ;;  %v3346_v38 = vpop.f32.mrb[66].mxu0 }
 0x17e   : > { %v3457_v40 = vadd.f32 %v3456_v36, %v3455_v33  ;;  %v3458_v42 = vpop.f32.mrb[66].mxu1  ;;  %v3347_v46 = vpop.f32.mrb[67].mxu0 }
 0x17f   : > { %v1973_v47 = vadd.f32 %v3345_v35, %v4020_v49  ;;  %v3348_v48 = vadd.f32 %v3347_v46, %v3346_v38  ;;  %v3459_v50 = vpop.f32.mrb[67].mxu1 }
 0x180   : > { %v3460_v56 = vadd.f32 %v3459_v50, %v3458_v42 }
 0x181   : > { %v2134_v58 = vadd.f32 %v3457_v40, %v1973_v47  ;;  %v1976_v59 = vadd.f32 %v3348_v48, %v4022_v51 }
 0x183   : > { %v2366_v60 = vadd.f32 %v4100_v52, %v2134_v58  ;;  %v2137_v61 = vadd.f32 %v3460_v56, %v1976_v59  ;;  %v3349_v62 = vpop.f32.mrb[68].mxu0 }
 0x184   : > { %v3461_v2 = vpop.f32.mrb[68].mxu1  ;;  %v3350_v4 = vpop.f32.mrb[69].mxu0 }
 0x185   : > { %v2398_v10 = vmul.f32 0.2, %v2366_v60  ;;  %v2367_v49 = vadd.f32 %v4100_v52, %v2137_v61  ;;  %v3351_v12 = vadd.f32 %v3350_v4, %v3349_v62  ;;  %v3462_v13 = vpop.f32.mrb[69].mxu1  ;;  %v3352_v14 = vpop.f32.mrb[70].mxu0 }
 0x186   : > { %v3463_v15 = vadd.f32 %v3462_v13, %v3461_v2  ;;  %v3464_v16 = vpop.f32.mrb[70].mxu1  ;;  %v3353_v17 = vpop.f32.mrb[71].mxu0 }
 0x187   : > { %v2399_v18 = vmul.f32 0.2, %v2367_v49  ;;  %v1981_v20 = vadd.f32 %v3351_v12, %v4028_v7  ;;  %v3354_v51 = vadd.f32 %v3353_v17, %v3352_v14  ;;  %v3465_v24 = vpop.f32.mrb[71].mxu1  ;;  %v2430_v32 = vmax.f32 %v2366_v60, %v2398_v10 }
 0x188   : > { %v3466_v28 = vadd.f32 %v3465_v24, %v3464_v16 }
 0x189   : > { %v2431_v33 = vmax.f32 %v2367_v49, %v2399_v18  ;;  %v2142_v34 = vadd.f32 %v3463_v15, %v1981_v20  ;;  %v1984_v35 = vadd.f32 %v3354_v51, %v4030_v9 }
 0x18b   : > { %v3011_v36 = vpack.c.bf16 %v2431_v33, %v2430_v32  ;;  %v2368_v38 = vadd.f32 %v4100_v52, %v2142_v34  ;;  %v2145_v40 = vadd.f32 %v3466_v28, %v1984_v35  ;;  %v3355_v42 = vpop.f32.mrb[72].mxu0 }
 0x18c   : > { %v3467_v7 = vpop.f32.mrb[72].mxu1  ;;  %v3356_v46 = vpop.f32.mrb[73].mxu0 }
 0x18d   : > { %3012 = vst [vmem:[%s4111_s17] sm:$0xff] %v3011_v36   ;;  %v2400_v47 = vmul.f32 0.2, %v2368_v38  ;;  %v2369_v48 = vadd.f32 %v4100_v52, %v2145_v40  ;;  %v3357_v50 = vadd.f32 %v3356_v46, %v3355_v42  ;;  %v3468_v56 = vpop.f32.mrb[73].mxu1  ;;  %v3358_v9 = vpop.f32.mrb[74].mxu0 }
 0x18e   : > { %v3469_v58 = vadd.f32 %v3468_v56, %v3467_v7  ;;  %v3470_v59 = vpop.f32.mrb[74].mxu1  ;;  %v3359_v60 = vpop.f32.mrb[75].mxu0 }
 0x18f   : > { %v2401_v61 = vmul.f32 0.2, %v2369_v48  ;;  %v1989_v62 = vadd.f32 %v3357_v50, %v4036_v29  ;;  %v3360_v2 = vadd.f32 %v3359_v60, %v3358_v9  ;;  %v3471_v4 = vpop.f32.mrb[75].mxu1  ;;  %v2432_v49 = vmax.f32 %v2368_v38, %v2400_v47 }
 0x190   : > { %v3472_v10 = vadd.f32 %v3471_v4, %v3470_v59 }
 0x191   : > { %v2433_v12 = vmax.f32 %v2369_v48, %v2401_v61  ;;  %v2150_v13 = vadd.f32 %v3469_v58, %v1989_v62  ;;  %v1992_v14 = vadd.f32 %v3360_v2, %v4038_v31 }
 0x193   : > { %v3016_v15 = vpack.c.bf16 %v2433_v12, %v2432_v49  ;;  %v2370_v16 = vadd.f32 %v4100_v52, %v2150_v13  ;;  %v2153_v17 = vadd.f32 %v3472_v10, %v1992_v14  ;;  %v3361_v18 = vpop.f32.mrb[76].mxu0 }
 0x194   : > { %v3473_v20 = vpop.f32.mrb[76].mxu1  ;;  %v3362_v51 = vpop.f32.mrb[77].mxu0 }
 0x195   : > { %3088 = vst [vmem:[%s4111_s17 + $0x8] sm:$0xff] %v3016_v15   ;;  %v2402_v24 = vmul.f32 0.2, %v2370_v16  ;;  %v2371_v28 = vadd.f32 %v4100_v52, %v2153_v17  ;;  %v3363_v29 = vadd.f32 %v3362_v51, %v3361_v18  ;;  %v3474_v32 = vpop.f32.mrb[77].mxu1  ;;  %v3364_v33 = vpop.f32.mrb[78].mxu0 }
 0x196   : > { %v3475_v34 = vadd.f32 %v3474_v32, %v3473_v20  ;;  %v3476_v35 = vpop.f32.mrb[78].mxu1  ;;  %v3365_v36 = vpop.f32.mrb[79].mxu0 }
 0x197   : > { %v2403_v38 = vmul.f32 0.2, %v2371_v28  ;;  %v1997_v31 = vadd.f32 %v3363_v29, %v4044_v53  ;;  %v3366_v40 = vadd.f32 %v3365_v36, %v3364_v33  ;;  %v3477_v42 = vpop.f32.mrb[79].mxu1  ;;  %v2434_v46 = vmax.f32 %v2370_v16, %v2402_v24 }
 0x198   : > { %v3478_v7 = vadd.f32 %v3477_v42, %v3476_v35 }
 0x199   : > { %v2435_v47 = vmax.f32 %v2371_v28, %v2403_v38  ;;  %v2158_v48 = vadd.f32 %v3475_v34, %v1997_v31  ;;  %v2000_v50 = vadd.f32 %v3366_v40, %v4046_v55 }
 0x19b   : > { %v3021_v56 = vpack.c.bf16 %v2435_v47, %v2434_v46  ;;  %v2372_v9 = vadd.f32 %v4100_v52, %v2158_v48  ;;  %v2161_v58 = vadd.f32 %v3478_v7, %v2000_v50  ;;  %v3367_v59 = vpop.f32.mrb[80].mxu0 }
 0x19c   : > { %v3479_v60 = vpop.f32.mrb[80].mxu1  ;;  %v3368_v61 = vpop.f32.mrb[81].mxu0 }
 0x19d   : > { %3089 = vst [vmem:[%s4111_s17 + $0x10] sm:$0xff] %v3021_v56   ;;  %v2404_v62 = vmul.f32 0.2, %v2372_v9  ;;  %v2373_v2 = vadd.f32 %v4100_v52, %v2161_v58  ;;  %v3369_v53 = vadd.f32 %v3368_v61, %v3367_v59  ;;  %v3480_v4 = vpop.f32.mrb[81].mxu1  ;;  %v3370_v10 = vpop.f32.mrb[82].mxu0 }
 0x19e   : > { %v3481_v49 = vadd.f32 %v3480_v4, %v3479_v60  ;;  %v3482_v12 = vpop.f32.mrb[82].mxu1  ;;  %v3371_v13 = vpop.f32.mrb[83].mxu0 }
 0x19f   : > { %v2405_v14 = vmul.f32 0.2, %v2373_v2  ;;  %v2005_v55 = vadd.f32 %v3369_v53, %v4048_v5  ;;  %v3372_v15 = vadd.f32 %v3371_v13, %v3370_v10  ;;  %v3483_v16 = vpop.f32.mrb[83].mxu1  ;;  %v2436_v18 = vmax.f32 %v2372_v9, %v2404_v62 }
 0x1a0   : > { %v3484_v17 = vadd.f32 %v3483_v16, %v3482_v12 }
 0x1a1   : > { %v2437_v20 = vmax.f32 %v2373_v2, %v2405_v14  ;;  %v2166_v51 = vadd.f32 %v3481_v49, %v2005_v55  ;;  %v2008_v24 = vadd.f32 %v3372_v15, %v4050_v8 }
 0x1a3   : > { %v3026_v28 = vpack.c.bf16 %v2437_v20, %v2436_v18  ;;  %v2374_v29 = vadd.f32 %v4100_v52, %v2166_v51  ;;  %v2169_v32 = vadd.f32 %v3484_v17, %v2008_v24  ;;  %v3373_v33 = vpop.f32.mrb[84].mxu0 }
 0x1a4   : > { %v3485_v34 = vpop.f32.mrb[84].mxu1  ;;  %v3374_v35 = vpop.f32.mrb[85].mxu0 }
 0x1a5   : > { %3090 = vst [vmem:[%s4111_s17 + $0x18] sm:$0xff] %v3026_v28   ;;  %v2406_v36 = vmul.f32 0.2, %v2374_v29  ;;  %v2375_v38 = vadd.f32 %v4100_v52, %v2169_v32  ;;  %v3375_v5 = vadd.f32 %v3374_v35, %v3373_v33  ;;  %v3486_v31 = vpop.f32.mrb[85].mxu1  ;;  %v3376_v40 = vpop.f32.mrb[86].mxu0 }
 0x1a6   : > { %v3487_v42 = vadd.f32 %v3486_v31, %v3485_v34  ;;  %v3488_v7 = vpop.f32.mrb[86].mxu1  ;;  %v3377_v46 = vpop.f32.mrb[87].mxu0 }
 0x1a7   : > { %v2407_v47 = vmul.f32 0.2, %v2375_v38  ;;  %v2013_v8 = vadd.f32 %v3375_v5, %v4052_v21  ;;  %v3378_v48 = vadd.f32 %v3377_v46, %v3376_v40  ;;  %v3489_v50 = vpop.f32.mrb[87].mxu1  ;;  %v2438_v9 = vmax.f32 %v2374_v29, %v2406_v36 }
 0x1a8   : > { %v3490_v56 = vadd.f32 %v3489_v50, %v3488_v7 }
 0x1a9   : > { %v2439_v58 = vmax.f32 %v2375_v38, %v2407_v47  ;;  %v2174_v59 = vadd.f32 %v3487_v42, %v2013_v8  ;;  %v2016_v60 = vadd.f32 %v3378_v48, %v4054_v23 }
 0x1ab   : > { %v3031_v61 = vpack.c.bf16 %v2439_v58, %v2438_v9  ;;  %v2376_v62 = vadd.f32 %v4100_v52, %v2174_v59  ;;  %v2177_v2 = vadd.f32 %v3490_v56, %v2016_v60  ;;  %v3379_v53 = vpop.f32.mrb[88].mxu0 }
 0x1ac   : > { %v3491_v4 = vpop.f32.mrb[88].mxu1  ;;  %v3380_v10 = vpop.f32.mrb[89].mxu0 }
 0x1ad   : > { %3091 = vst [vmem:[%s4111_s17 + $0x20] sm:$0xff] %v3031_v61   ;;  %v2408_v49 = vmul.f32 0.2, %v2376_v62  ;;  %v2377_v12 = vadd.f32 %v4100_v52, %v2177_v2  ;;  %v3381_v21 = vadd.f32 %v3380_v10, %v3379_v53  ;;  %v3492_v13 = vpop.f32.mrb[89].mxu1  ;;  %v3382_v14 = vpop.f32.mrb[90].mxu0 }
 0x1ae   : > { %v3493_v55 = vadd.f32 %v3492_v13, %v3491_v4  ;;  %v3494_v15 = vpop.f32.mrb[90].mxu1  ;;  %v3383_v16 = vpop.f32.mrb[91].mxu0 }
 0x1af   : > { %v2409_v17 = vmul.f32 0.2, %v2377_v12  ;;  %v2021_v23 = vadd.f32 %v3381_v21, %v4056_v37  ;;  %v3384_v18 = vadd.f32 %v3383_v16, %v3382_v14  ;;  %v3495_v20 = vpop.f32.mrb[91].mxu1  ;;  %v2440_v24 = vmax.f32 %v2376_v62, %v2408_v49 }
 0x1b0   : > { %v3496_v51 = vadd.f32 %v3495_v20, %v3494_v15 }
 0x1b1   : > { %v2441_v28 = vmax.f32 %v2377_v12, %v2409_v17  ;;  %v2182_v29 = vadd.f32 %v3493_v55, %v2021_v23  ;;  %v2024_v32 = vadd.f32 %v3384_v18, %v4058_v39 }
 0x1b3   : > { %v3036_v33 = vpack.c.bf16 %v2441_v28, %v2440_v24  ;;  %v2378_v34 = vadd.f32 %v4100_v52, %v2182_v29  ;;  %v2185_v35 = vadd.f32 %v3496_v51, %v2024_v32  ;;  %v3385_v36 = vpop.f32.mrb[92].mxu0 }
 0x1b4   : > { %v3497_v38 = vpop.f32.mrb[92].mxu1  ;;  %v3386_v5 = vpop.f32.mrb[93].mxu0 }
 0x1b5   : > { %3092 = vst [vmem:[%s4111_s17 + $0x28] sm:$0xff] %v3036_v33   ;;  %v2410_v31 = vmul.f32 0.2, %v2378_v34  ;;  %v2379_v40 = vadd.f32 %v4100_v52, %v2185_v35  ;;  %v3387_v37 = vadd.f32 %v3386_v5, %v3385_v36  ;;  %v3498_v42 = vpop.f32.mrb[93].mxu1  ;;  %v3388_v7 = vpop.f32.mrb[94].mxu0 }
 0x1b6   : > { %v3499_v46 = vadd.f32 %v3498_v42, %v3497_v38  ;;  %v3500_v47 = vpop.f32.mrb[94].mxu1  ;;  %v3389_v8 = vpop.f32.mrb[95].mxu0 }
 0x1b7   : > { %v2411_v48 = vmul.f32 0.2, %v2379_v40  ;;  %v2029_v39 = vadd.f32 %v3387_v37, %v4060_v54  ;;  %v3390_v50 = vadd.f32 %v3389_v8, %v3388_v7  ;;  %v3501_v56 = vpop.f32.mrb[95].mxu1  ;;  %v2442_v58 = vmax.f32 %v2378_v34, %v2410_v31 }
 0x1b8   : > { %v3502_v9 = vadd.f32 %v3501_v56, %v3500_v47 }
 0x1b9   : > { %v2443_v59 = vmax.f32 %v2379_v40, %v2411_v48  ;;  %v2190_v60 = vadd.f32 %v3499_v46, %v2029_v39  ;;  %v2032_v61 = vadd.f32 %v3390_v50, %v4062_v57 }
 0x1bb   : > { %v3041_v62 = vpack.c.bf16 %v2443_v59, %v2442_v58  ;;  %v2380_v2 = vadd.f32 %v4100_v52, %v2190_v60  ;;  %v2193_v53 = vadd.f32 %v3502_v9, %v2032_v61  ;;  %v3391_v4 = vpop.f32.mrb[96].mxu0 }
 0x1bc   : > { %v3503_v10 = vpop.f32.mrb[96].mxu1  ;;  %v3392_v49 = vpop.f32.mrb[97].mxu0 }
 0x1bd   : > { %3093 = vst [vmem:[%s4111_s17 + $0x30] sm:$0xff] %v3041_v62   ;;  %v2412_v12 = vmul.f32 0.2, %v2380_v2  ;;  %v2381_v21 = vadd.f32 %v4100_v52, %v2193_v53  ;;  %v3393_v54 = vadd.f32 %v3392_v49, %v3391_v4  ;;  %v3504_v13 = vpop.f32.mrb[97].mxu1  ;;  %v3394_v14 = vpop.f32.mrb[98].mxu0 }
 0x1be   : > { %v3505_v55 = vadd.f32 %v3504_v13, %v3503_v10  ;;  %v3506_v15 = vpop.f32.mrb[98].mxu1  ;;  %v3395_v16 = vpop.f32.mrb[99].mxu0 }
 0x1bf   : > { %v2413_v17 = vmul.f32 0.2, %v2381_v21  ;;  %v2037_v57 = vadd.f32 %v3393_v54, %v4064_v6  ;;  %v3396_v23 = vadd.f32 %v3395_v16, %v3394_v14  ;;  %v3507_v18 = vpop.f32.mrb[99].mxu1  ;;  %v2444_v51 = vmax.f32 %v2380_v2, %v2412_v12 }
 0x1c0   : > { %v3508_v20 = vadd.f32 %v3507_v18, %v3506_v15 }
 0x1c1   : > { %v2445_v24 = vmax.f32 %v2381_v21, %v2413_v17  ;;  %v2198_v28 = vadd.f32 %v3505_v55, %v2037_v57  ;;  %v2040_v29 = vadd.f32 %v3396_v23, %v4066_v11 }
 0x1c3   : > { %v3046_v32 = vpack.c.bf16 %v2445_v24, %v2444_v51  ;;  %v2382_v33 = vadd.f32 %v4100_v52, %v2198_v28  ;;  %v2201_v34 = vadd.f32 %v3508_v20, %v2040_v29  ;;  %v3397_v35 = vpop.f32.mrb[100].mxu0 }
 0x1c4   : > { %v3509_v36 = vpop.f32.mrb[100].mxu1  ;;  %v3398_v38 = vpop.f32.mrb[101].mxu0 }
 0x1c5   : > { %3094 = vst [vmem:[%s4111_s17 + $0x38] sm:$0xff] %v3046_v32   ;;  %v2414_v5 = vmul.f32 0.2, %v2382_v33  ;;  %v2383_v31 = vadd.f32 %v4100_v52, %v2201_v34  ;;  %v3399_v6 = vadd.f32 %v3398_v38, %v3397_v35  ;;  %v3510_v40 = vpop.f32.mrb[101].mxu1  ;;  %v3400_v37 = vpop.f32.mrb[102].mxu0 }
 0x1c6   : > { %v3511_v42 = vadd.f32 %v3510_v40, %v3509_v36  ;;  %v3512_v7 = vpop.f32.mrb[102].mxu1  ;;  %v3401_v46 = vpop.f32.mrb[103].mxu0 }
 0x1c7   : > { %v2415_v47 = vmul.f32 0.2, %v2383_v31  ;;  %v2045_v11 = vadd.f32 %v3399_v6, %v4068_v25  ;;  %v3402_v8 = vadd.f32 %v3401_v46, %v3400_v37  ;;  %v3513_v48 = vpop.f32.mrb[103].mxu1  ;;  %v2446_v50 = vmax.f32 %v2382_v33, %v2414_v5 }
 0x1c8   : > { %v3514_v39 = vadd.f32 %v3513_v48, %v3512_v7 }
 0x1c9   : > { %v2447_v56 = vmax.f32 %v2383_v31, %v2415_v47  ;;  %v2206_v9 = vadd.f32 %v3511_v42, %v2045_v11  ;;  %v2048_v58 = vadd.f32 %v3402_v8, %v4070_v27 }
 0x1cb   : > { %v3051_v59 = vpack.c.bf16 %v2447_v56, %v2446_v50  ;;  %v2384_v60 = vadd.f32 %v4100_v52, %v2206_v9  ;;  %v2209_v61 = vadd.f32 %v3514_v39, %v2048_v58  ;;  %v3403_v62 = vpop.f32.mrb[104].mxu0 }
 0x1cc   : > { %v3515_v2 = vpop.f32.mrb[104].mxu1  ;;  %v3404_v53 = vpop.f32.mrb[105].mxu0 }
 0x1cd   : > { %3095 = vst [vmem:[%s4111_s17 + $0x40] sm:$0xff] %v3051_v59   ;;  %v2416_v4 = vmul.f32 0.2, %v2384_v60  ;;  %v2385_v10 = vadd.f32 %v4100_v52, %v2209_v61  ;;  %v3405_v25 = vadd.f32 %v3404_v53, %v3403_v62  ;;  %v3516_v49 = vpop.f32.mrb[105].mxu1  ;;  %v3406_v12 = vpop.f32.mrb[106].mxu0 }
 0x1ce   : > { %v3517_v21 = vadd.f32 %v3516_v49, %v3515_v2  ;;  %v3518_v54 = vpop.f32.mrb[106].mxu1  ;;  %v3407_v13 = vpop.f32.mrb[107].mxu0 }
 0x1cf   : > { %v2417_v14 = vmul.f32 0.2, %v2385_v10  ;;  %v2053_v27 = vadd.f32 %v3405_v25, %v4072_v43  ;;  %v3408_v55 = vadd.f32 %v3407_v13, %v3406_v12  ;;  %v3519_v15 = vpop.f32.mrb[107].mxu1  ;;  %v2448_v17 = vmax.f32 %v2384_v60, %v2416_v4 }
 0x1d0   : > { %v3520_v16 = vadd.f32 %v3519_v15, %v3518_v54 }
 0x1d1   : > { %v2449_v57 = vmax.f32 %v2385_v10, %v2417_v14  ;;  %v2214_v23 = vadd.f32 %v3517_v21, %v2053_v27  ;;  %v2056_v18 = vadd.f32 %v3408_v55, %v4074_v45 }
 0x1d3   : > { %v3056_v20 = vpack.c.bf16 %v2449_v57, %v2448_v17  ;;  %v2386_v51 = vadd.f32 %v4100_v52, %v2214_v23  ;;  %v2217_v24 = vadd.f32 %v3520_v16, %v2056_v18  ;;  %v3409_v28 = vpop.f32.mrb[108].mxu0 }
 0x1d4   : > { %v3521_v29 = vpop.f32.mrb[108].mxu1  ;;  %v3410_v32 = vpop.f32.mrb[109].mxu0 }
 0x1d5   : > { %3096 = vst [vmem:[%s4111_s17 + $0x48] sm:$0xff] %v3056_v20   ;;  %v2418_v33 = vmul.f32 0.2, %v2386_v51  ;;  %v2387_v34 = vadd.f32 %v4100_v52, %v2217_v24  ;;  %v3411_v43 = vadd.f32 %v3410_v32, %v3409_v28  ;;  %v3522_v35 = vpop.f32.mrb[109].mxu1  ;;  %v3412_v36 = vpop.f32.mrb[110].mxu0 }
 0x1d6   : > { %v3523_v38 = vadd.f32 %v3522_v35, %v3521_v29  ;;  %v3524_v5 = vpop.f32.mrb[110].mxu1  ;;  %v3413_v31 = vpop.f32.mrb[111].mxu0 }
 0x1d7   : > { %v2419_v6 = vmul.f32 0.2, %v2387_v34  ;;  %v2061_v45 = vadd.f32 %v3411_v43, %v4076_v63  ;;  %v3414_v40 = vadd.f32 %v3413_v31, %v3412_v36  ;;  %v3525_v37 = vpop.f32.mrb[111].mxu1  ;;  %v2450_v7 = vmax.f32 %v2386_v51, %v2418_v33 }
 0x1d8   : > { %v3526_v42 = vadd.f32 %v3525_v37, %v3524_v5 }
 0x1d9   : > { %v2451_v46 = vmax.f32 %v2387_v34, %v2419_v6  ;;  %v2222_v47 = vadd.f32 %v3523_v38, %v2061_v45  ;;  %v2064_v11 = vadd.f32 %v3414_v40, %v4078_v1 }
 0x1db   : > { %v3061_v8 = vpack.c.bf16 %v2451_v46, %v2450_v7  ;;  %v2388_v48 = vadd.f32 %v4100_v52, %v2222_v47  ;;  %v2225_v39 = vadd.f32 %v3526_v42, %v2064_v11  ;;  %v3415_v50 = vpop.f32.mrb[112].mxu0 }
 0x1dc   : > { %v3527_v56 = vpop.f32.mrb[112].mxu1  ;;  %v3416_v9 = vpop.f32.mrb[113].mxu0 }
 0x1dd   : > { %3097 = vst [vmem:[%s4111_s17 + $0x50] sm:$0xff] %v3061_v8   ;;  %v2420_v58 = vmul.f32 0.2, %v2388_v48  ;;  %v2389_v59 = vadd.f32 %v4100_v52, %v2225_v39  ;;  %v3417_v63 = vadd.f32 %v3416_v9, %v3415_v50  ;;  %v3528_v60 = vpop.f32.mrb[113].mxu1  ;;  %v3418_v61 = vpop.f32.mrb[114].mxu0 }
 0x1de   : > { %v3529_v62 = vadd.f32 %v3528_v60, %v3527_v56  ;;  %v3530_v2 = vpop.f32.mrb[114].mxu1  ;;  %v3419_v53 = vpop.f32.mrb[115].mxu0 }
 0x1df   : > { %v2421_v4 = vmul.f32 0.2, %v2389_v59  ;;  %v2069_v1 = vadd.f32 %v3417_v63, %v4080_v19  ;;  %v3420_v10 = vadd.f32 %v3419_v53, %v3418_v61  ;;  %v3531_v25 = vpop.f32.mrb[115].mxu1  ;;  %v2452_v12 = vmax.f32 %v2388_v48, %v2420_v58 }
 0x1e0   : > { %v3532_v49 = vadd.f32 %v3531_v25, %v3530_v2 }
 0x1e1   : > { %v2453_v21 = vmax.f32 %v2389_v59, %v2421_v4  ;;  %v2230_v54 = vadd.f32 %v3529_v62, %v2069_v1  ;;  %v2072_v13 = vadd.f32 %v3420_v10, %v4082_v22 }
 0x1e3   : > { %v3066_v14 = vpack.c.bf16 %v2453_v21, %v2452_v12  ;;  %v2390_v27 = vadd.f32 %v4100_v52, %v2230_v54  ;;  %v2233_v55 = vadd.f32 %v3532_v49, %v2072_v13  ;;  %v3421_v15 = vpop.f32.mrb[116].mxu0 }
 0x1e4   : > { %v3533_v16 = vpop.f32.mrb[116].mxu1  ;;  %v3422_v17 = vpop.f32.mrb[117].mxu0 }
 0x1e5   : > { %3098 = vst [vmem:[%s4111_s17 + $0x58] sm:$0xff] %v3066_v14   ;;  %v2422_v57 = vmul.f32 0.2, %v2390_v27  ;;  %v2391_v23 = vadd.f32 %v4100_v52, %v2233_v55  ;;  %v3423_v19 = vadd.f32 %v3422_v17, %v3421_v15  ;;  %v3534_v18 = vpop.f32.mrb[117].mxu1  ;;  %v3424_v20 = vpop.f32.mrb[118].mxu0 }
 0x1e6   : > { %v3535_v51 = vadd.f32 %v3534_v18, %v3533_v16  ;;  %v3536_v24 = vpop.f32.mrb[118].mxu1  ;;  %v3425_v28 = vpop.f32.mrb[119].mxu0 }
 0x1e7   : > { %v2423_v29 = vmul.f32 0.2, %v2391_v23  ;;  %v2077_v22 = vadd.f32 %v3423_v19, %v4084_v41  ;;  %v3426_v32 = vadd.f32 %v3425_v28, %v3424_v20  ;;  %v3537_v33 = vpop.f32.mrb[119].mxu1  ;;  %v2454_v43 = vmax.f32 %v2390_v27, %v2422_v57 }
 0x1e8   : > { %v3538_v34 = vadd.f32 %v3537_v33, %v3536_v24 }
 0x1e9   : > { %v2455_v35 = vmax.f32 %v2391_v23, %v2423_v29  ;;  %v2238_v36 = vadd.f32 %v3535_v51, %v2077_v22  ;;  %v2080_v38 = vadd.f32 %v3426_v32, %v4086_v44 }
 0x1eb   : > { %v3071_v5 = vpack.c.bf16 %v2455_v35, %v2454_v43  ;;  %v2392_v31 = vadd.f32 %v4100_v52, %v2238_v36  ;;  %v2241_v6 = vadd.f32 %v3538_v34, %v2080_v38  ;;  %v3427_v45 = vpop.f32.mrb[120].mxu0 }
 0x1ec   : > { %v3539_v40 = vpop.f32.mrb[120].mxu1  ;;  %v3428_v37 = vpop.f32.mrb[121].mxu0 }
 0x1ed   : > { %3099 = vst [vmem:[%s4111_s17 + $0x60] sm:$0xff] %v3071_v5   ;;  %v2424_v42 = vmul.f32 0.2, %v2392_v31  ;;  %v2393_v7 = vadd.f32 %v4100_v52, %v2241_v6  ;;  %v3429_v41 = vadd.f32 %v3428_v37, %v3427_v45  ;;  %v3540_v46 = vpop.f32.mrb[121].mxu1  ;;  %v3430_v47 = vpop.f32.mrb[122].mxu0 }
 0x1ee   : > { %v3541_v11 = vadd.f32 %v3540_v46, %v3539_v40  ;;  %v3542_v8 = vpop.f32.mrb[122].mxu1  ;;  %v3431_v48 = vpop.f32.mrb[123].mxu0 }
 0x1ef   : > { %v2425_v39 = vmul.f32 0.2, %v2393_v7  ;;  %v2085_v44 = vadd.f32 %v3429_v41, %v4088_v0  ;;  %v3432_v50 = vadd.f32 %v3431_v48, %v3430_v47  ;;  %v3543_v56 = vpop.f32.mrb[123].mxu1  ;;  %v2456_v58 = vmax.f32 %v2392_v31, %v2424_v42 }
 0x1f0   : > { %v3544_v9 = vadd.f32 %v3543_v56, %v3542_v8 }
 0x1f1   : > { %v2457_v59 = vmax.f32 %v2393_v7, %v2425_v39  ;;  %v2246_v63 = vadd.f32 %v3541_v11, %v2085_v44  ;;  %v2088_v60 = vadd.f32 %v3432_v50, %v4090_v3 }
 0x1f3   : > { %v3076_v61 = vpack.c.bf16 %v2457_v59, %v2456_v58  ;;  %v2394_v62 = vadd.f32 %v4100_v52, %v2246_v63  ;;  %v2249_v2 = vadd.f32 %v3544_v9, %v2088_v60  ;;  %v3433_v53 = vpop.f32.mrb[124].mxu0 }
 0x1f4   : > { %v3545_v4 = vpop.f32.mrb[124].mxu1  ;;  %v3434_v1 = vpop.f32.mrb[125].mxu0 }
 0x1f5   : > { %3100 = vst [vmem:[%s4111_s17 + $0x68] sm:$0xff] %v3076_v61   ;;  %v2426_v10 = vmul.f32 0.2, %v2394_v62  ;;  %v2395_v25 = vadd.f32 %v4100_v52, %v2249_v2  ;;  %v3435_v0 = vadd.f32 %v3434_v1, %v3433_v53  ;;  %v3546_v49 = vpop.f32.mrb[125].mxu1  ;;  %v3436_v12 = vpop.f32.mrb[126].mxu0 }
 0x1f6   : > { %v3547_v21 = vadd.f32 %v3546_v49, %v3545_v4  ;;  %v3548_v54 = vpop.f32.mrb[126].mxu1  ;;  %v3437_v13 = vpop.f32.mrb[127].mxu0 }
 0x1f7   : > { %v2427_v14 = vmul.f32 0.2, %v2395_v25  ;;  %v2093_v3 = vadd.f32 %v3435_v0, %v4092_v26  ;;  %v3438_v27 = vadd.f32 %v3437_v13, %v3436_v12  ;;  %v3549_v55 = vpop.f32.mrb[127].mxu1  ;;  %v2458_v16 = vmax.f32 %v2394_v62, %v2426_v10 }
 0x1f8   : > { %v3550_v15 = vadd.f32 %v3549_v55, %v3548_v54 }
 0x1f9   : > { %v2459_v17 = vmax.f32 %v2395_v25, %v2427_v14  ;;  %v2254_v57 = vadd.f32 %v3547_v21, %v2093_v3  ;;  %v2096_v23 = vadd.f32 %v3438_v27, %v4094_v30 }
 0x1fb   : > { %v3081_v19 = vpack.c.bf16 %v2459_v17, %v2458_v16  ;;  %v2396_v18 = vadd.f32 %v4100_v52, %v2254_v57  ;;  %v2257_v20 = vadd.f32 %v3550_v15, %v2096_v23 }
 0x1fd   : > { %3101 = vst [vmem:[%s4111_s17 + $0x70] sm:$0xff] %v3081_v19   ;;  %v2428_v51 = vmul.f32 0.2, %v2396_v18  ;;  %v2397_v24 = vadd.f32 %v4100_v52, %v2257_v20 }
 0x1ff   : > { %v2429_v28 = vmul.f32 0.2, %v2397_v24  ;;  %v2460_v29 = vmax.f32 %v2396_v18, %v2428_v51 }
 0x201   : > { %v2461_v26 = vmax.f32 %v2397_v24, %v2429_v28 }
 0x203   : > { %v3086_v22 = vpack.c.bf16 %v2461_v26, %v2460_v29 }
 0x205   : > { %3102 = vst [vmem:[%s4111_s17 + $0x78] sm:$0xff] %v3086_v22  }
 0x206 PF: > { %s13_s14 = sadd.s32 1, %s3661_s14   ;;  %s4200_s12 = smov %s3657_s13 }
 0x207   : > { %p10_p5 = scmp.ge.s32.totalorder %s13_s14, 4   ;;  %s4201_s13 = smov %s4203_s15 }
 0x209   :  { %12 = sbr.rel (!%p10_p5) target bundleno = 2 (0x2), region = 76 }

// kernel: fc_discriminator_forward.7
= control target key start
LH: loop header
LB: loop body
LE: loop exit
PB: predicated region body
PF: predicated region fallthrough
CT: control target
= control target key end

     0   :  { %s4191_s0 = inlined_call_operand.vmem [shape: bf16[128,2048], index: 0, kind: input, shape index: {}]   ;;  %s4192_s1 = inlined_call_operand.vmem [shape: bf16[2048,256], index: 1, kind: input, shape index: {}]   ;;  %s4193_s2 = inlined_call_operand.vmem [shape: f32[1,256], index: 2, kind: input, shape index: {}]   ;;  %s4194_s3 = inlined_call_operand.vmem [shape: bf16[128,256], index: 3, kind: output, shape index: {}]  }
   0x1   :  { %4196 = sst [smem:[#allocation7_spill]] %s4191_s0 }
   0x2   :  { %4197 = sst [smem:[#allocation8_spill]] %s4192_s1 }
   0x3   :  { %s3402_s12 = smov 0   ;;  %s3404_s13 = smov 0  }
   0x4   :  { %s3406_s14 = smov 0   ;;  %s3408_s15 = smov 0  }
   0x5   :  { %s3410_s16 = smov 0   ;;  %s3412_s17 = smov 0  }
   0x6   :  { %s3414_s18 = smov 0   ;;  %s3416_s19 = smov 0  }
   0x7   :  { %s3418_s20 = smov 0   ;;  %s3420_s21 = smov 0  }
   0x8   :  { %s3422_s22 = smov 0  }
   0x9 LB: > { %s2653_s23 = sadd.s32 4294967295, %s3379_s22   ;;  %s25_s24 = sadd.s32 1, %s3371_s20  ;;  %s3379_s22 = sphi %s3422_s22, %s13_s22   ;;  %s3375_s21 = sphi %s3420_s21, %s4214_s21   ;;  %s3371_s20 = sphi %s3418_s20, %s4213_s20   ;;  %s3367_s19 = sphi %s3416_s19, %s4212_s19   ;;  %s3363_s18 = sphi %s3414_s18, %s4211_s18   ;;  %s3359_s17 = sphi %s3412_s17, %s4210_s17   ;;  %s3355_s16 = sphi %s3410_s16, %s4209_s16   ;;  %s3351_s15 = sphi %s3408_s15, %s4208_s15   ;;  %s3347_s14 = sphi %s3406_s14, %s4207_s14   ;;  %s3343_s13 = sphi %s3404_s13, %s4206_s13   ;;  %s3339_s12 = sphi %s3402_s12, %s4205_s12  }
   0xa   : > { %p26_p0 = scmp.ge.s32.totalorder %s25_s24, 2  ;;  %s28_s25 = sadd.s32 1, %s3375_s21 }
   0xb   : > { %s41_s26 = sadd.s32 1, %s3359_s17  ;;  %p48_p1 = scmp.ne.s32.totalorder %s3359_s17, %s3355_s16 }
   0xc   : > { %s4216_s24 = smov (%p26_p0, %s25_s24), 0  ;;  %s4218_s25 = smov (!%p26_p0, %s28_s25), %s3375_s21 }
   0xd   : > { %s37_s27 = ssub.s32 %s3371_s20, %s4216_s24  ;;  %p49_p2 = scmp.eq.s32.totalorder %s3379_s22, 0 }
   0xe   : > { %p30_p3 = scmp.ge.s32.totalorder %s4218_s25, 2  ;;  %p39_p4 = scmp.eq.s32.totalorder %s37_s27, 0 }
   0xf   : > { %p3469_p5 = por %p49_p2, %p48_p1  ;;  %s69_s29 = sadd.s32 1, %s3351_s15 }
  0x10   : > { %s4220_s25 = smov (%p30_p3, %s4218_s25), 0  ;;  %p76_p6 = scmp.ne.s32.totalorder %s3351_s15, %s3347_s14 }
  0x11   : > { %4199 = sst [smem:[#allocation6_spill]] %s4220_s25  ;;  %s65_s4 = ssub.s32 %s3375_s21, %s4220_s25 }
  0x12   : > { %s3477_s30 = scalar_select %p39_p4, %s3359_s17, %s41_s26  }
  0x13   : > { %s66_s5 = sor.u32 %s65_s4, %s37_s27  ;;  %p121_p7 = scmp.eq.s32.totalorder %s65_s4, 0 }
  0x14   : > { %p67_p8 = scmp.eq.s32.totalorder %s66_s5, 0  ;;  %p3483_p9 = por %p76_p6, %p49_p2 }
  0x15   : > { %s123_s7 = sadd.s32 1, %s3343_s13  ;;  %p133_p10 = scmp.ne.s32.totalorder %s3343_s13, %s3339_s12 }
  0x16   : > { %s3491_s8 = scalar_select %p67_p8, %s3351_s15, %s69_s29  }
  0x17   : > { %s3494_s9 = scalar_select %p121_p7, %s3343_s13, %s123_s7  }
  0x18   : > { %p134_p11 = scmp.eq.s32.totalorder %s2653_s23, 3  ;;  %p2656_p13 = scmp.ge.s32.totalorder %s3379_s22, 4 }
  0x1a   : > { %p3496_p12 = por %p134_p11, %p133_p10  ;;  %156 = sbr.rel (%p2656_p13) target bundleno = 170 (0xaa), region = 16 }
  0x21   : > { %159 = sbr.rel (!%p3469_p5) target bundleno = 75 (0x4b), region = 20  ;;  %s161_s11 = sand.u32 (%p3469_p5), 1, %s3359_s17  }
  0x22   : > { %s2819_s26 = sshll.u32 (%p3469_p5), %s3371_s20, 5  ;;  %s2657_s27 = sshll.u32 (%p3469_p5), %s161_s11, 9 }
  0x23   : > { %s4202_s0 = sld [smem:[#allocation7_spill]] (%p3469_p5)  ;;  %s3513_s23 = scalar_lea.vmem (%p3469_p5), [#allocation3], %s2657_s27 }
  0x29   : > { %s3508_s5 = scalar_lea.vmem %s4202_s0, %s2819_s26 }
  0x2a   : > { %v182_v0 = vld [vmem:[%s3508_s5] sm:$0xff]  ;;  %v184_v1 = vld [vmem:[%s3508_s5 + $0x8] sm:$0xff]  ;;  %v186_v2 = vld [vmem:[%s3508_s5 + $0x10] sm:$0xff] }
  0x2b   : > { %183 = vst [vmem:[%s3513_s23] sm:$0xff] %v182_v0  ;;  %185 = vst [vmem:[%s3513_s23 + $0x8] sm:$0xff] %v184_v1  ;;  %v188_v3 = vld [vmem:[%s3508_s5 + $0x18] sm:$0xff]  ;;  %v190_v4 = vld [vmem:[%s3508_s5 + $0x40] sm:$0xff] }
  0x2c   : > { %187 = vst [vmem:[%s3513_s23 + $0x10] sm:$0xff] %v186_v2  ;;  %v192_v5 = vld [vmem:[%s3508_s5 + $0x48] sm:$0xff]  ;;  %189 = vst [vmem:[%s3513_s23 + $0x18] sm:$0xff] %v188_v3  ;;  %v194_v6 = vld [vmem:[%s3508_s5 + $0x50] sm:$0xff] }
  0x2d   : > { %191 = vst [vmem:[%s3513_s23 + $0x20] sm:$0xff] %v190_v4  ;;  %193 = vst [vmem:[%s3513_s23 + $0x28] sm:$0xff] %v192_v5  ;;  %v196_v7 = vld [vmem:[%s3508_s5 + $0x58] sm:$0xff]  ;;  %v198_v8 = vld [vmem:[%s3508_s5 + $0x80] sm:$0xff] }
  0x2e   : > { %195 = vst [vmem:[%s3513_s23 + $0x30] sm:$0xff] %v194_v6  ;;  %197 = vst [vmem:[%s3513_s23 + $0x38] sm:$0xff] %v196_v7  ;;  %v200_v9 = vld [vmem:[%s3508_s5 + $0x88] sm:$0xff]  ;;  %v202_v10 = vld [vmem:[%s3508_s5 + $0x90] sm:$0xff] }
  0x2f   : > { %199 = vst [vmem:[%s3513_s23 + $0x40] sm:$0xff] %v198_v8  ;;  %v204_v11 = vld [vmem:[%s3508_s5 + $0x98] sm:$0xff]  ;;  %201 = vst [vmem:[%s3513_s23 + $0x48] sm:$0xff] %v200_v9  ;;  %v206_v12 = vld [vmem:[%s3508_s5 + $0xc0] sm:$0xff] }
  0x30   : > { %203 = vst [vmem:[%s3513_s23 + $0x50] sm:$0xff] %v202_v10  ;;  %205 = vst [vmem:[%s3513_s23 + $0x58] sm:$0xff] %v204_v11  ;;  %v208_v13 = vld [vmem:[%s3508_s5 + $0xc8] sm:$0xff]  ;;  %v210_v14 = vld [vmem:[%s3508_s5 + $0xd0] sm:$0xff] }
  0x31   : > { %207 = vst [vmem:[%s3513_s23 + $0x60] sm:$0xff] %v206_v12  ;;  %209 = vst [vmem:[%s3513_s23 + $0x68] sm:$0xff] %v208_v13  ;;  %v212_v15 = vld [vmem:[%s3508_s5 + $0xd8] sm:$0xff]  ;;  %v214_v16 = vld [vmem:[%s3508_s5 + $0x100] sm:$0xff] }
  0x32   : > { %211 = vst [vmem:[%s3513_s23 + $0x70] sm:$0xff] %v210_v14  ;;  %v216_v17 = vld [vmem:[%s3508_s5 + $0x108] sm:$0xff]  ;;  %213 = vst [vmem:[%s3513_s23 + $0x78] sm:$0xff] %v212_v15  ;;  %v218_v18 = vld [vmem:[%s3508_s5 + $0x110] sm:$0xff] }
  0x33   : > { %215 = vst [vmem:[%s3513_s23 + $0x80] sm:$0xff] %v214_v16  ;;  %217 = vst [vmem:[%s3513_s23 + $0x88] sm:$0xff] %v216_v17  ;;  %v220_v19 = vld [vmem:[%s3508_s5 + $0x118] sm:$0xff]  ;;  %v222_v20 = vld [vmem:[%s3508_s5 + $0x140] sm:$0xff] }
  0x34   : > { %219 = vst [vmem:[%s3513_s23 + $0x90] sm:$0xff] %v218_v18  ;;  %221 = vst [vmem:[%s3513_s23 + $0x98] sm:$0xff] %v220_v19  ;;  %v224_v21 = vld [vmem:[%s3508_s5 + $0x148] sm:$0xff]  ;;  %v226_v22 = vld [vmem:[%s3508_s5 + $0x150] sm:$0xff] }
  0x35   : > { %223 = vst [vmem:[%s3513_s23 + $0xa0] sm:$0xff] %v222_v20  ;;  %v228_v23 = vld [vmem:[%s3508_s5 + $0x158] sm:$0xff]  ;;  %225 = vst [vmem:[%s3513_s23 + $0xa8] sm:$0xff] %v224_v21  ;;  %v230_v24 = vld [vmem:[%s3508_s5 + $0x180] sm:$0xff] }
  0x36   : > { %227 = vst [vmem:[%s3513_s23 + $0xb0] sm:$0xff] %v226_v22  ;;  %229 = vst [vmem:[%s3513_s23 + $0xb8] sm:$0xff] %v228_v23  ;;  %v232_v25 = vld [vmem:[%s3508_s5 + $0x188] sm:$0xff]  ;;  %v234_v26 = vld [vmem:[%s3508_s5 + $0x190] sm:$0xff] }
  0x37   : > { %231 = vst [vmem:[%s3513_s23 + $0xc0] sm:$0xff] %v230_v24  ;;  %233 = vst [vmem:[%s3513_s23 + $0xc8] sm:$0xff] %v232_v25  ;;  %v236_v27 = vld [vmem:[%s3508_s5 + $0x198] sm:$0xff]  ;;  %v238_v28 = vld [vmem:[%s3508_s5 + $0x1c0] sm:$0xff] }
  0x38   : > { %235 = vst [vmem:[%s3513_s23 + $0xd0] sm:$0xff] %v234_v26  ;;  %v240_v29 = vld [vmem:[%s3508_s5 + $0x1c8] sm:$0xff]  ;;  %237 = vst [vmem:[%s3513_s23 + $0xd8] sm:$0xff] %v236_v27  ;;  %v242_v30 = vld [vmem:[%s3508_s5 + $0x1d0] sm:$0xff] }
  0x39   : > { %239 = vst [vmem:[%s3513_s23 + $0xe0] sm:$0xff] %v238_v28  ;;  %241 = vst [vmem:[%s3513_s23 + $0xe8] sm:$0xff] %v240_v29  ;;  %v244_v31 = vld [vmem:[%s3508_s5 + $0x1d8] sm:$0xff]  ;;  %v246_v32 = vld [vmem:[%s3508_s5 + $0x200] sm:$0xff] }
  0x3a   : > { %243 = vst [vmem:[%s3513_s23 + $0xf0] sm:$0xff] %v242_v30  ;;  %245 = vst [vmem:[%s3513_s23 + $0xf8] sm:$0xff] %v244_v31  ;;  %v248_v33 = vld [vmem:[%s3508_s5 + $0x208] sm:$0xff]  ;;  %v250_v34 = vld [vmem:[%s3508_s5 + $0x210] sm:$0xff] }
  0x3b   : > { %247 = vst [vmem:[%s3513_s23 + $0x100] sm:$0xff] %v246_v32  ;;  %v252_v35 = vld [vmem:[%s3508_s5 + $0x218] sm:$0xff]  ;;  %249 = vst [vmem:[%s3513_s23 + $0x108] sm:$0xff] %v248_v33  ;;  %v254_v36 = vld [vmem:[%s3508_s5 + $0x240] sm:$0xff] }
  0x3c   : > { %251 = vst [vmem:[%s3513_s23 + $0x110] sm:$0xff] %v250_v34  ;;  %253 = vst [vmem:[%s3513_s23 + $0x118] sm:$0xff] %v252_v35  ;;  %v256_v37 = vld [vmem:[%s3508_s5 + $0x248] sm:$0xff]  ;;  %v258_v38 = vld [vmem:[%s3508_s5 + $0x250] sm:$0xff] }
  0x3d   : > { %255 = vst [vmem:[%s3513_s23 + $0x120] sm:$0xff] %v254_v36  ;;  %257 = vst [vmem:[%s3513_s23 + $0x128] sm:$0xff] %v256_v37  ;;  %v260_v39 = vld [vmem:[%s3508_s5 + $0x258] sm:$0xff]  ;;  %v262_v40 = vld [vmem:[%s3508_s5 + $0x280] sm:$0xff] }
  0x3e   : > { %259 = vst [vmem:[%s3513_s23 + $0x130] sm:$0xff] %v258_v38  ;;  %v264_v41 = vld [vmem:[%s3508_s5 + $0x288] sm:$0xff]  ;;  %261 = vst [vmem:[%s3513_s23 + $0x138] sm:$0xff] %v260_v39  ;;  %v266_v42 = vld [vmem:[%s3508_s5 + $0x290] sm:$0xff] }
  0x3f   : > { %263 = vst [vmem:[%s3513_s23 + $0x140] sm:$0xff] %v262_v40  ;;  %265 = vst [vmem:[%s3513_s23 + $0x148] sm:$0xff] %v264_v41  ;;  %v268_v43 = vld [vmem:[%s3508_s5 + $0x298] sm:$0xff]  ;;  %v270_v44 = vld [vmem:[%s3508_s5 + $0x2c0] sm:$0xff] }
  0x40   : > { %267 = vst [vmem:[%s3513_s23 + $0x150] sm:$0xff] %v266_v42  ;;  %269 = vst [vmem:[%s3513_s23 + $0x158] sm:$0xff] %v268_v43  ;;  %v272_v45 = vld [vmem:[%s3508_s5 + $0x2c8] sm:$0xff]  ;;  %v274_v46 = vld [vmem:[%s3508_s5 + $0x2d0] sm:$0xff] }
  0x41   : > { %271 = vst [vmem:[%s3513_s23 + $0x160] sm:$0xff] %v270_v44  ;;  %v276_v47 = vld [vmem:[%s3508_s5 + $0x2d8] sm:$0xff]  ;;  %273 = vst [vmem:[%s3513_s23 + $0x168] sm:$0xff] %v272_v45  ;;  %v278_v48 = vld [vmem:[%s3508_s5 + $0x300] sm:$0xff] }
  0x42   : > { %275 = vst [vmem:[%s3513_s23 + $0x170] sm:$0xff] %v274_v46  ;;  %277 = vst [vmem:[%s3513_s23 + $0x178] sm:$0xff] %v276_v47  ;;  %v280_v49 = vld [vmem:[%s3508_s5 + $0x308] sm:$0xff]  ;;  %v282_v50 = vld [vmem:[%s3508_s5 + $0x310] sm:$0xff] }
  0x43   : > { %279 = vst [vmem:[%s3513_s23 + $0x180] sm:$0xff] %v278_v48  ;;  %281 = vst [vmem:[%s3513_s23 + $0x188] sm:$0xff] %v280_v49  ;;  %v284_v51 = vld [vmem:[%s3508_s5 + $0x318] sm:$0xff]  ;;  %v286_v52 = vld [vmem:[%s3508_s5 + $0x340] sm:$0xff] }
  0x44   : > { %283 = vst [vmem:[%s3513_s23 + $0x190] sm:$0xff] %v282_v50  ;;  %v288_v53 = vld [vmem:[%s3508_s5 + $0x348] sm:$0xff]  ;;  %285 = vst [vmem:[%s3513_s23 + $0x198] sm:$0xff] %v284_v51  ;;  %v290_v54 = vld [vmem:[%s3508_s5 + $0x350] sm:$0xff] }
  0x45   : > { %287 = vst [vmem:[%s3513_s23 + $0x1a0] sm:$0xff] %v286_v52  ;;  %289 = vst [vmem:[%s3513_s23 + $0x1a8] sm:$0xff] %v288_v53  ;;  %v292_v55 = vld [vmem:[%s3508_s5 + $0x358] sm:$0xff]  ;;  %v294_v56 = vld [vmem:[%s3508_s5 + $0x380] sm:$0xff] }
  0x46   : > { %291 = vst [vmem:[%s3513_s23 + $0x1b0] sm:$0xff] %v290_v54  ;;  %293 = vst [vmem:[%s3513_s23 + $0x1b8] sm:$0xff] %v292_v55  ;;  %v296_v57 = vld [vmem:[%s3508_s5 + $0x388] sm:$0xff]  ;;  %v298_v58 = vld [vmem:[%s3508_s5 + $0x390] sm:$0xff] }
  0x47   : > { %295 = vst [vmem:[%s3513_s23 + $0x1c0] sm:$0xff] %v294_v56  ;;  %v300_v59 = vld [vmem:[%s3508_s5 + $0x398] sm:$0xff]  ;;  %297 = vst [vmem:[%s3513_s23 + $0x1c8] sm:$0xff] %v296_v57  ;;  %v302_v60 = vld [vmem:[%s3508_s5 + $0x3c0] sm:$0xff] }
  0x48   : > { %299 = vst [vmem:[%s3513_s23 + $0x1d0] sm:$0xff] %v298_v58  ;;  %301 = vst [vmem:[%s3513_s23 + $0x1d8] sm:$0xff] %v300_v59  ;;  %v304_v61 = vld [vmem:[%s3508_s5 + $0x3c8] sm:$0xff]  ;;  %v306_v62 = vld [vmem:[%s3508_s5 + $0x3d0] sm:$0xff] }
  0x49   : > { %303 = vst [vmem:[%s3513_s23 + $0x1e0] sm:$0xff] %v302_v60  ;;  %305 = vst [vmem:[%s3513_s23 + $0x1e8] sm:$0xff] %v304_v61  ;;  %v308_v63 = vld [vmem:[%s3508_s5 + $0x3d8] sm:$0xff] }
  0x4a   : > { %307 = vst [vmem:[%s3513_s23 + $0x1f0] sm:$0xff] %v306_v62  ;;  %309 = vst [vmem:[%s3513_s23 + $0x1f8] sm:$0xff] %v308_v63 }
  0x4b PF: > { %315 = sbr.rel (!%p3483_p9) target bundleno = 170 (0xaa), region = 43  ;;  %s317_s28 = sand.u32 (%p3483_p9), 1, %s3351_s15  }
  0x4c   : > { %s2820_s7 = sshll.u32 (%p3483_p9), %s3371_s20, 8  ;;  %s2660_s11 = sshll.u32 (%p3483_p9), %s317_s28, 9 }
  0x4d   : > { %s322_s26 = sadd.s32 (%p3483_p9), %s3375_s21, %s2820_s7  ;;  %s4203_s1 = sld [smem:[#allocation8_spill]] (%p3483_p9) }
  0x4e   : > { %s2663_s27 = sshll.u32 (%p3483_p9), %s322_s26, 2  ;;  %s3653_s6 = scalar_lea.vmem (%p3483_p9), [#allocation4], %s2660_s11 }
  0x53   : > { %s3648_s0 = scalar_lea.vmem %s4203_s1, %s2663_s27 }
  0x54   : > { %v340_v0 = vld [vmem:[%s3648_s0] sm:$0xf]  ;;  %v342_v1 = vld [vmem:[%s3648_s0 + $0x8] sm:$0xf]  ;;  %v344_v2 = vld [vmem:[%s3648_s0 + $0x10] sm:$0xf] }
  0x55   : > { %341 = vst [vmem:[%s3653_s6] sm:$0xf] %v340_v0  ;;  %343 = vst [vmem:[%s3653_s6 + $0x4] sm:$0xf] %v342_v1  ;;  %v346_v3 = vld [vmem:[%s3648_s0 + $0x18] sm:$0xf] }
  0x56   : > { %345 = vst [vmem:[%s3653_s6 + $0x8] sm:$0xf] %v344_v2  ;;  %v348_v4 = vld [vmem:[%s3648_s0 + $0x20] sm:$0xf]  ;;  %v350_v5 = vld [vmem:[%s3648_s0 + $0x28] sm:$0xf] }
  0x57   : > { %347 = vst [vmem:[%s3653_s6 + $0xc] sm:$0xf] %v346_v3  ;;  %349 = vst [vmem:[%s3653_s6 + $0x10] sm:$0xf] %v348_v4  ;;  %v352_v6 = vld [vmem:[%s3648_s0 + $0x30] sm:$0xf] }
  0x58   : > { %351 = vst [vmem:[%s3653_s6 + $0x14] sm:$0xf] %v350_v5  ;;  %v354_v7 = vld [vmem:[%s3648_s0 + $0x38] sm:$0xf]  ;;  %v356_v8 = vld [vmem:[%s3648_s0 + $0x40] sm:$0xf] }
  0x59   : > { %353 = vst [vmem:[%s3653_s6 + $0x18] sm:$0xf] %v352_v6  ;;  %355 = vst [vmem:[%s3653_s6 + $0x1c] sm:$0xf] %v354_v7  ;;  %v358_v9 = vld [vmem:[%s3648_s0 + $0x48] sm:$0xf] }
  0x5a   : > { %357 = vst [vmem:[%s3653_s6 + $0x20] sm:$0xf] %v356_v8  ;;  %v360_v10 = vld [vmem:[%s3648_s0 + $0x50] sm:$0xf]  ;;  %v362_v11 = vld [vmem:[%s3648_s0 + $0x58] sm:$0xf] }
  0x5b   : > { %359 = vst [vmem:[%s3653_s6 + $0x24] sm:$0xf] %v358_v9  ;;  %361 = vst [vmem:[%s3653_s6 + $0x28] sm:$0xf] %v360_v10  ;;  %v364_v12 = vld [vmem:[%s3648_s0 + $0x60] sm:$0xf] }
  0x5c   : > { %363 = vst [vmem:[%s3653_s6 + $0x2c] sm:$0xf] %v362_v11  ;;  %v366_v13 = vld [vmem:[%s3648_s0 + $0x68] sm:$0xf]  ;;  %v368_v14 = vld [vmem:[%s3648_s0 + $0x70] sm:$0xf] }
  0x5d   : > { %365 = vst [vmem:[%s3653_s6 + $0x30] sm:$0xf] %v364_v12  ;;  %367 = vst [vmem:[%s3653_s6 + $0x34] sm:$0xf] %v366_v13  ;;  %v370_v15 = vld [vmem:[%s3648_s0 + $0x78] sm:$0xf] }
  0x5e   : > { %369 = vst [vmem:[%s3653_s6 + $0x38] sm:$0xf] %v368_v14  ;;  %v372_v16 = vld [vmem:[%s3648_s0 + $0x80] sm:$0xf]  ;;  %v374_v17 = vld [vmem:[%s3648_s0 + $0x88] sm:$0xf] }
  0x5f   : > { %371 = vst [vmem:[%s3653_s6 + $0x3c] sm:$0xf] %v370_v15  ;;  %373 = vst [vmem:[%s3653_s6 + $0x40] sm:$0xf] %v372_v16  ;;  %v376_v18 = vld [vmem:[%s3648_s0 + $0x90] sm:$0xf] }
  0x60   : > { %375 = vst [vmem:[%s3653_s6 + $0x44] sm:$0xf] %v374_v17  ;;  %v378_v19 = vld [vmem:[%s3648_s0 + $0x98] sm:$0xf]  ;;  %v380_v20 = vld [vmem:[%s3648_s0 + $0xa0] sm:$0xf] }
  0x61   : > { %377 = vst [vmem:[%s3653_s6 + $0x48] sm:$0xf] %v376_v18  ;;  %379 = vst [vmem:[%s3653_s6 + $0x4c] sm:$0xf] %v378_v19  ;;  %v382_v21 = vld [vmem:[%s3648_s0 + $0xa8] sm:$0xf] }
  0x62   : > { %381 = vst [vmem:[%s3653_s6 + $0x50] sm:$0xf] %v380_v20  ;;  %v384_v22 = vld [vmem:[%s3648_s0 + $0xb0] sm:$0xf]  ;;  %v386_v23 = vld [vmem:[%s3648_s0 + $0xb8] sm:$0xf] }
  0x63   : > { %383 = vst [vmem:[%s3653_s6 + $0x54] sm:$0xf] %v382_v21  ;;  %385 = vst [vmem:[%s3653_s6 + $0x58] sm:$0xf] %v384_v22  ;;  %v388_v24 = vld [vmem:[%s3648_s0 + $0xc0] sm:$0xf] }
  0x64   : > { %387 = vst [vmem:[%s3653_s6 + $0x5c] sm:$0xf] %v386_v23  ;;  %v390_v25 = vld [vmem:[%s3648_s0 + $0xc8] sm:$0xf]  ;;  %v392_v26 = vld [vmem:[%s3648_s0 + $0xd0] sm:$0xf] }
  0x65   : > { %389 = vst [vmem:[%s3653_s6 + $0x60] sm:$0xf] %v388_v24  ;;  %391 = vst [vmem:[%s3653_s6 + $0x64] sm:$0xf] %v390_v25  ;;  %v394_v27 = vld [vmem:[%s3648_s0 + $0xd8] sm:$0xf] }
  0x66   : > { %393 = vst [vmem:[%s3653_s6 + $0x68] sm:$0xf] %v392_v26  ;;  %v396_v28 = vld [vmem:[%s3648_s0 + $0xe0] sm:$0xf]  ;;  %v398_v29 = vld [vmem:[%s3648_s0 + $0xe8] sm:$0xf] }
  0x67   : > { %395 = vst [vmem:[%s3653_s6 + $0x6c] sm:$0xf] %v394_v27  ;;  %397 = vst [vmem:[%s3653_s6 + $0x70] sm:$0xf] %v396_v28  ;;  %v400_v30 = vld [vmem:[%s3648_s0 + $0xf0] sm:$0xf] }
  0x68   : > { %399 = vst [vmem:[%s3653_s6 + $0x74] sm:$0xf] %v398_v29  ;;  %v402_v31 = vld [vmem:[%s3648_s0 + $0xf8] sm:$0xf]  ;;  %v404_v32 = vld [vmem:[%s3648_s0 + $0x100] sm:$0xf] }
  0x69   : > { %401 = vst [vmem:[%s3653_s6 + $0x78] sm:$0xf] %v400_v30  ;;  %403 = vst [vmem:[%s3653_s6 + $0x7c] sm:$0xf] %v402_v31  ;;  %v406_v33 = vld [vmem:[%s3648_s0 + $0x108] sm:$0xf] }
  0x6a   : > { %405 = vst [vmem:[%s3653_s6 + $0x80] sm:$0xf] %v404_v32  ;;  %v408_v34 = vld [vmem:[%s3648_s0 + $0x110] sm:$0xf]  ;;  %v410_v35 = vld [vmem:[%s3648_s0 + $0x118] sm:$0xf] }
  0x6b   : > { %407 = vst [vmem:[%s3653_s6 + $0x84] sm:$0xf] %v406_v33  ;;  %409 = vst [vmem:[%s3653_s6 + $0x88] sm:$0xf] %v408_v34  ;;  %v412_v36 = vld [vmem:[%s3648_s0 + $0x120] sm:$0xf] }
  0x6c   : > { %411 = vst [vmem:[%s3653_s6 + $0x8c] sm:$0xf] %v410_v35  ;;  %v414_v37 = vld [vmem:[%s3648_s0 + $0x128] sm:$0xf]  ;;  %v416_v38 = vld [vmem:[%s3648_s0 + $0x130] sm:$0xf] }
  0x6d   : > { %413 = vst [vmem:[%s3653_s6 + $0x90] sm:$0xf] %v412_v36  ;;  %415 = vst [vmem:[%s3653_s6 + $0x94] sm:$0xf] %v414_v37  ;;  %v418_v39 = vld [vmem:[%s3648_s0 + $0x138] sm:$0xf] }
  0x6e   : > { %417 = vst [vmem:[%s3653_s6 + $0x98] sm:$0xf] %v416_v38  ;;  %v420_v40 = vld [vmem:[%s3648_s0 + $0x140] sm:$0xf]  ;;  %v422_v41 = vld [vmem:[%s3648_s0 + $0x148] sm:$0xf] }
  0x6f   : > { %419 = vst [vmem:[%s3653_s6 + $0x9c] sm:$0xf] %v418_v39  ;;  %421 = vst [vmem:[%s3653_s6 + $0xa0] sm:$0xf] %v420_v40  ;;  %v424_v42 = vld [vmem:[%s3648_s0 + $0x150] sm:$0xf] }
  0x70   : > { %423 = vst [vmem:[%s3653_s6 + $0xa4] sm:$0xf] %v422_v41  ;;  %v426_v43 = vld [vmem:[%s3648_s0 + $0x158] sm:$0xf]  ;;  %v428_v44 = vld [vmem:[%s3648_s0 + $0x160] sm:$0xf] }
  0x71   : > { %425 = vst [vmem:[%s3653_s6 + $0xa8] sm:$0xf] %v424_v42  ;;  %427 = vst [vmem:[%s3653_s6 + $0xac] sm:$0xf] %v426_v43  ;;  %v430_v45 = vld [vmem:[%s3648_s0 + $0x168] sm:$0xf] }
  0x72   : > { %429 = vst [vmem:[%s3653_s6 + $0xb0] sm:$0xf] %v428_v44  ;;  %v432_v46 = vld [vmem:[%s3648_s0 + $0x170] sm:$0xf]  ;;  %v434_v47 = vld [vmem:[%s3648_s0 + $0x178] sm:$0xf] }
  0x73   : > { %431 = vst [vmem:[%s3653_s6 + $0xb4] sm:$0xf] %v430_v45  ;;  %433 = vst [vmem:[%s3653_s6 + $0xb8] sm:$0xf] %v432_v46  ;;  %v436_v48 = vld [vmem:[%s3648_s0 + $0x180] sm:$0xf] }
  0x74   : > { %435 = vst [vmem:[%s3653_s6 + $0xbc] sm:$0xf] %v434_v47  ;;  %v438_v49 = vld [vmem:[%s3648_s0 + $0x188] sm:$0xf]  ;;  %v440_v50 = vld [vmem:[%s3648_s0 + $0x190] sm:$0xf] }
  0x75   : > { %437 = vst [vmem:[%s3653_s6 + $0xc0] sm:$0xf] %v436_v48  ;;  %439 = vst [vmem:[%s3653_s6 + $0xc4] sm:$0xf] %v438_v49  ;;  %v442_v51 = vld [vmem:[%s3648_s0 + $0x198] sm:$0xf] }
  0x76   : > { %441 = vst [vmem:[%s3653_s6 + $0xc8] sm:$0xf] %v440_v50  ;;  %v444_v52 = vld [vmem:[%s3648_s0 + $0x1a0] sm:$0xf]  ;;  %v446_v53 = vld [vmem:[%s3648_s0 + $0x1a8] sm:$0xf] }
  0x77   : > { %443 = vst [vmem:[%s3653_s6 + $0xcc] sm:$0xf] %v442_v51  ;;  %445 = vst [vmem:[%s3653_s6 + $0xd0] sm:$0xf] %v444_v52  ;;  %v448_v54 = vld [vmem:[%s3648_s0 + $0x1b0] sm:$0xf] }
  0x78   : > { %447 = vst [vmem:[%s3653_s6 + $0xd4] sm:$0xf] %v446_v53  ;;  %v450_v55 = vld [vmem:[%s3648_s0 + $0x1b8] sm:$0xf]  ;;  %v452_v56 = vld [vmem:[%s3648_s0 + $0x1c0] sm:$0xf] }
  0x79   : > { %449 = vst [vmem:[%s3653_s6 + $0xd8] sm:$0xf] %v448_v54  ;;  %451 = vst [vmem:[%s3653_s6 + $0xdc] sm:$0xf] %v450_v55  ;;  %v454_v57 = vld [vmem:[%s3648_s0 + $0x1c8] sm:$0xf] }
  0x7a   : > { %453 = vst [vmem:[%s3653_s6 + $0xe0] sm:$0xf] %v452_v56  ;;  %v456_v58 = vld [vmem:[%s3648_s0 + $0x1d0] sm:$0xf]  ;;  %v458_v59 = vld [vmem:[%s3648_s0 + $0x1d8] sm:$0xf] }
  0x7b   : > { %455 = vst [vmem:[%s3653_s6 + $0xe4] sm:$0xf] %v454_v57  ;;  %457 = vst [vmem:[%s3653_s6 + $0xe8] sm:$0xf] %v456_v58  ;;  %v460_v60 = vld [vmem:[%s3648_s0 + $0x1e0] sm:$0xf] }
  0x7c   : > { %459 = vst [vmem:[%s3653_s6 + $0xec] sm:$0xf] %v458_v59  ;;  %v462_v61 = vld [vmem:[%s3648_s0 + $0x1e8] sm:$0xf]  ;;  %v464_v62 = vld [vmem:[%s3648_s0 + $0x1f0] sm:$0xf] }
  0x7d   : > { %461 = vst [vmem:[%s3653_s6 + $0xf0] sm:$0xf] %v460_v60  ;;  %463 = vst [vmem:[%s3653_s6 + $0xf4] sm:$0xf] %v462_v61  ;;  %v466_v63 = vld [vmem:[%s3648_s0 + $0x1f8] sm:$0xf] }
  0x7e   : > { %465 = vst [vmem:[%s3653_s6 + $0xf8] sm:$0xf] %v464_v62  ;;  %v468_v0 = vld [vmem:[%s3648_s0 + $0x200] sm:$0xf]  ;;  %v470_v1 = vld [vmem:[%s3648_s0 + $0x208] sm:$0xf] }
  0x7f   : > { %467 = vst [vmem:[%s3653_s6 + $0xfc] sm:$0xf] %v466_v63  ;;  %469 = vst [vmem:[%s3653_s6 + $0x100] sm:$0xf] %v468_v0  ;;  %v472_v2 = vld [vmem:[%s3648_s0 + $0x210] sm:$0xf] }
  0x80   : > { %471 = vst [vmem:[%s3653_s6 + $0x104] sm:$0xf] %v470_v1  ;;  %v474_v3 = vld [vmem:[%s3648_s0 + $0x218] sm:$0xf]  ;;  %v476_v4 = vld [vmem:[%s3648_s0 + $0x220] sm:$0xf] }
  0x81   : > { %473 = vst [vmem:[%s3653_s6 + $0x108] sm:$0xf] %v472_v2  ;;  %475 = vst [vmem:[%s3653_s6 + $0x10c] sm:$0xf] %v474_v3  ;;  %v478_v5 = vld [vmem:[%s3648_s0 + $0x228] sm:$0xf] }
  0x82   : > { %477 = vst [vmem:[%s3653_s6 + $0x110] sm:$0xf] %v476_v4  ;;  %v480_v6 = vld [vmem:[%s3648_s0 + $0x230] sm:$0xf]  ;;  %v482_v7 = vld [vmem:[%s3648_s0 + $0x238] sm:$0xf] }
  0x83   : > { %479 = vst [vmem:[%s3653_s6 + $0x114] sm:$0xf] %v478_v5  ;;  %481 = vst [vmem:[%s3653_s6 + $0x118] sm:$0xf] %v480_v6  ;;  %v484_v8 = vld [vmem:[%s3648_s0 + $0x240] sm:$0xf] }
  0x84   : > { %483 = vst [vmem:[%s3653_s6 + $0x11c] sm:$0xf] %v482_v7  ;;  %v486_v9 = vld [vmem:[%s3648_s0 + $0x248] sm:$0xf]  ;;  %v488_v10 = vld [vmem:[%s3648_s0 + $0x250] sm:$0xf] }
  0x85   : > { %485 = vst [vmem:[%s3653_s6 + $0x120] sm:$0xf] %v484_v8  ;;  %487 = vst [vmem:[%s3653_s6 + $0x124] sm:$0xf] %v486_v9  ;;  %v490_v11 = vld [vmem:[%s3648_s0 + $0x258] sm:$0xf] }
  0x86   : > { %489 = vst [vmem:[%s3653_s6 + $0x128] sm:$0xf] %v488_v10  ;;  %v492_v12 = vld [vmem:[%s3648_s0 + $0x260] sm:$0xf]  ;;  %v494_v13 = vld [vmem:[%s3648_s0 + $0x268] sm:$0xf] }
  0x87   : > { %491 = vst [vmem:[%s3653_s6 + $0x12c] sm:$0xf] %v490_v11  ;;  %493 = vst [vmem:[%s3653_s6 + $0x130] sm:$0xf] %v492_v12  ;;  %v496_v14 = vld [vmem:[%s3648_s0 + $0x270] sm:$0xf] }
  0x88   : > { %495 = vst [vmem:[%s3653_s6 + $0x134] sm:$0xf] %v494_v13  ;;  %v498_v15 = vld [vmem:[%s3648_s0 + $0x278] sm:$0xf]  ;;  %v500_v16 = vld [vmem:[%s3648_s0 + $0x280] sm:$0xf] }
  0x89   : > { %497 = vst [vmem:[%s3653_s6 + $0x138] sm:$0xf] %v496_v14  ;;  %499 = vst [vmem:[%s3653_s6 + $0x13c] sm:$0xf] %v498_v15  ;;  %v502_v17 = vld [vmem:[%s3648_s0 + $0x288] sm:$0xf] }
  0x8a   : > { %501 = vst [vmem:[%s3653_s6 + $0x140] sm:$0xf] %v500_v16  ;;  %v504_v18 = vld [vmem:[%s3648_s0 + $0x290] sm:$0xf]  ;;  %v506_v19 = vld [vmem:[%s3648_s0 + $0x298] sm:$0xf] }
  0x8b   : > { %503 = vst [vmem:[%s3653_s6 + $0x144] sm:$0xf] %v502_v17  ;;  %505 = vst [vmem:[%s3653_s6 + $0x148] sm:$0xf] %v504_v18  ;;  %v508_v20 = vld [vmem:[%s3648_s0 + $0x2a0] sm:$0xf] }
  0x8c   : > { %507 = vst [vmem:[%s3653_s6 + $0x14c] sm:$0xf] %v506_v19  ;;  %v510_v21 = vld [vmem:[%s3648_s0 + $0x2a8] sm:$0xf]  ;;  %v512_v22 = vld [vmem:[%s3648_s0 + $0x2b0] sm:$0xf] }
  0x8d   : > { %509 = vst [vmem:[%s3653_s6 + $0x150] sm:$0xf] %v508_v20  ;;  %511 = vst [vmem:[%s3653_s6 + $0x154] sm:$0xf] %v510_v21  ;;  %v514_v23 = vld [vmem:[%s3648_s0 + $0x2b8] sm:$0xf] }
  0x8e   : > { %513 = vst [vmem:[%s3653_s6 + $0x158] sm:$0xf] %v512_v22  ;;  %v516_v24 = vld [vmem:[%s3648_s0 + $0x2c0] sm:$0xf]  ;;  %v518_v25 = vld [vmem:[%s3648_s0 + $0x2c8] sm:$0xf] }
  0x8f   : > { %515 = vst [vmem:[%s3653_s6 + $0x15c] sm:$0xf] %v514_v23  ;;  %517 = vst [vmem:[%s3653_s6 + $0x160] sm:$0xf] %v516_v24  ;;  %v520_v26 = vld [vmem:[%s3648_s0 + $0x2d0] sm:$0xf] }
  0x90   : > { %519 = vst [vmem:[%s3653_s6 + $0x164] sm:$0xf] %v518_v25  ;;  %v522_v27 = vld [vmem:[%s3648_s0 + $0x2d8] sm:$0xf]  ;;  %v524_v28 = vld [vmem:[%s3648_s0 + $0x2e0] sm:$0xf] }
  0x91   : > { %521 = vst [vmem:[%s3653_s6 + $0x168] sm:$0xf] %v520_v26  ;;  %523 = vst [vmem:[%s3653_s6 + $0x16c] sm:$0xf] %v522_v27  ;;  %v526_v29 = vld [vmem:[%s3648_s0 + $0x2e8] sm:$0xf] }
  0x92   : > { %525 = vst [vmem:[%s3653_s6 + $0x170] sm:$0xf] %v524_v28  ;;  %v528_v30 = vld [vmem:[%s3648_s0 + $0x2f0] sm:$0xf]  ;;  %v530_v31 = vld [vmem:[%s3648_s0 + $0x2f8] sm:$0xf] }
  0x93   : > { %527 = vst [vmem:[%s3653_s6 + $0x174] sm:$0xf] %v526_v29  ;;  %529 = vst [vmem:[%s3653_s6 + $0x178] sm:$0xf] %v528_v30  ;;  %v532_v32 = vld [vmem:[%s3648_s0 + $0x300] sm:$0xf] }
  0x94   : > { %531 = vst [vmem:[%s3653_s6 + $0x17c] sm:$0xf] %v530_v31  ;;  %v534_v33 = vld [vmem:[%s3648_s0 + $0x308] sm:$0xf]  ;;  %v536_v34 = vld [vmem:[%s3648_s0 + $0x310] sm:$0xf] }
  0x95   : > { %533 = vst [vmem:[%s3653_s6 + $0x180] sm:$0xf] %v532_v32  ;;  %535 = vst [vmem:[%s3653_s6 + $0x184] sm:$0xf] %v534_v33  ;;  %v538_v35 = vld [vmem:[%s3648_s0 + $0x318] sm:$0xf] }
  0x96   : > { %537 = vst [vmem:[%s3653_s6 + $0x188] sm:$0xf] %v536_v34  ;;  %v540_v36 = vld [vmem:[%s3648_s0 + $0x320] sm:$0xf]  ;;  %v542_v37 = vld [vmem:[%s3648_s0 + $0x328] sm:$0xf] }
  0x97   : > { %539 = vst [vmem:[%s3653_s6 + $0x18c] sm:$0xf] %v538_v35  ;;  %541 = vst [vmem:[%s3653_s6 + $0x190] sm:$0xf] %v540_v36  ;;  %v544_v38 = vld [vmem:[%s3648_s0 + $0x330] sm:$0xf] }
  0x98   : > { %543 = vst [vmem:[%s3653_s6 + $0x194] sm:$0xf] %v542_v37  ;;  %v546_v39 = vld [vmem:[%s3648_s0 + $0x338] sm:$0xf]  ;;  %v548_v40 = vld [vmem:[%s3648_s0 + $0x340] sm:$0xf] }
  0x99   : > { %545 = vst [vmem:[%s3653_s6 + $0x198] sm:$0xf] %v544_v38  ;;  %547 = vst [vmem:[%s3653_s6 + $0x19c] sm:$0xf] %v546_v39  ;;  %v550_v41 = vld [vmem:[%s3648_s0 + $0x348] sm:$0xf] }
  0x9a   : > { %549 = vst [vmem:[%s3653_s6 + $0x1a0] sm:$0xf] %v548_v40  ;;  %v552_v42 = vld [vmem:[%s3648_s0 + $0x350] sm:$0xf]  ;;  %v554_v43 = vld [vmem:[%s3648_s0 + $0x358] sm:$0xf] }
  0x9b   : > { %551 = vst [vmem:[%s3653_s6 + $0x1a4] sm:$0xf] %v550_v41  ;;  %553 = vst [vmem:[%s3653_s6 + $0x1a8] sm:$0xf] %v552_v42  ;;  %v556_v44 = vld [vmem:[%s3648_s0 + $0x360] sm:$0xf] }
  0x9c   : > { %555 = vst [vmem:[%s3653_s6 + $0x1ac] sm:$0xf] %v554_v43  ;;  %v558_v45 = vld [vmem:[%s3648_s0 + $0x368] sm:$0xf]  ;;  %v560_v46 = vld [vmem:[%s3648_s0 + $0x370] sm:$0xf] }
  0x9d   : > { %557 = vst [vmem:[%s3653_s6 + $0x1b0] sm:$0xf] %v556_v44  ;;  %559 = vst [vmem:[%s3653_s6 + $0x1b4] sm:$0xf] %v558_v45  ;;  %v562_v47 = vld [vmem:[%s3648_s0 + $0x378] sm:$0xf] }
  0x9e   : > { %561 = vst [vmem:[%s3653_s6 + $0x1b8] sm:$0xf] %v560_v46  ;;  %v564_v48 = vld [vmem:[%s3648_s0 + $0x380] sm:$0xf]  ;;  %v566_v49 = vld [vmem:[%s3648_s0 + $0x388] sm:$0xf] }
  0x9f   : > { %563 = vst [vmem:[%s3653_s6 + $0x1bc] sm:$0xf] %v562_v47  ;;  %565 = vst [vmem:[%s3653_s6 + $0x1c0] sm:$0xf] %v564_v48  ;;  %v568_v50 = vld [vmem:[%s3648_s0 + $0x390] sm:$0xf] }
  0xa0   : > { %567 = vst [vmem:[%s3653_s6 + $0x1c4] sm:$0xf] %v566_v49  ;;  %v570_v51 = vld [vmem:[%s3648_s0 + $0x398] sm:$0xf]  ;;  %v572_v52 = vld [vmem:[%s3648_s0 + $0x3a0] sm:$0xf] }
  0xa1   : > { %569 = vst [vmem:[%s3653_s6 + $0x1c8] sm:$0xf] %v568_v50  ;;  %571 = vst [vmem:[%s3653_s6 + $0x1cc] sm:$0xf] %v570_v51  ;;  %v574_v53 = vld [vmem:[%s3648_s0 + $0x3a8] sm:$0xf] }
  0xa2   : > { %573 = vst [vmem:[%s3653_s6 + $0x1d0] sm:$0xf] %v572_v52  ;;  %v576_v54 = vld [vmem:[%s3648_s0 + $0x3b0] sm:$0xf]  ;;  %v578_v55 = vld [vmem:[%s3648_s0 + $0x3b8] sm:$0xf] }
  0xa3   : > { %575 = vst [vmem:[%s3653_s6 + $0x1d4] sm:$0xf] %v574_v53  ;;  %577 = vst [vmem:[%s3653_s6 + $0x1d8] sm:$0xf] %v576_v54  ;;  %v580_v56 = vld [vmem:[%s3648_s0 + $0x3c0] sm:$0xf] }
  0xa4   : > { %579 = vst [vmem:[%s3653_s6 + $0x1dc] sm:$0xf] %v578_v55  ;;  %v582_v57 = vld [vmem:[%s3648_s0 + $0x3c8] sm:$0xf]  ;;  %v584_v58 = vld [vmem:[%s3648_s0 + $0x3d0] sm:$0xf] }
  0xa5   : > { %581 = vst [vmem:[%s3653_s6 + $0x1e0] sm:$0xf] %v580_v56  ;;  %583 = vst [vmem:[%s3653_s6 + $0x1e4] sm:$0xf] %v582_v57  ;;  %v586_v59 = vld [vmem:[%s3648_s0 + $0x3d8] sm:$0xf] }
  0xa6   : > { %585 = vst [vmem:[%s3653_s6 + $0x1e8] sm:$0xf] %v584_v58  ;;  %v588_v60 = vld [vmem:[%s3648_s0 + $0x3e0] sm:$0xf]  ;;  %v590_v61 = vld [vmem:[%s3648_s0 + $0x3e8] sm:$0xf] }
  0xa7   : > { %587 = vst [vmem:[%s3653_s6 + $0x1ec] sm:$0xf] %v586_v59  ;;  %589 = vst [vmem:[%s3653_s6 + $0x1f0] sm:$0xf] %v588_v60  ;;  %v592_v62 = vld [vmem:[%s3648_s0 + $0x3f0] sm:$0xf] }
  0xa8   : > { %591 = vst [vmem:[%s3653_s6 + $0x1f4] sm:$0xf] %v590_v61  ;;  %v594_v63 = vld [vmem:[%s3648_s0 + $0x3f8] sm:$0xf]  ;;  %593 = vst [vmem:[%s3653_s6 + $0x1f8] sm:$0xf] %v592_v62 }
  0xa9   : > { %595 = vst [vmem:[%s3653_s6 + $0x1fc] sm:$0xf] %v594_v63 }
  0xaa PF: > { %p2664_p0 = scmp.ge.s32.totalorder %s3379_s22, 1  ;;  %p879_p1 = scmp.lt.s32.totalorder %s3379_s22, 5 }
  0xac   : > { %p880_p2 = pnand %p2664_p0, %p879_p1 }
  0xad   : > { %s886_s5 = sand.u32 (!%p880_p2), 1, %s3355_s16   ;;  %s893_s23 = sand.u32 (!%p880_p2), 1, %s3347_s14  }
  0xae   : > { %883 = sbr.rel (%p880_p2) target bundleno = 597 (0x255), region = 88  ;;  %s2665_s28 = sshll.u32 (!%p880_p2), %s886_s5, 9 }
  0xaf   : > { %s2666_s7 = sshll.u32 (!%p880_p2), %s893_s23, 9  ;;  %s919_s0 = sand.u32 (!%p880_p2), 1, %s3339_s12  }
  0xb0   : > { %p925_p3 = scmp.lt.s32.totalorder (!%p880_p2), %s3367_s19, 1  ;;  %s2667_s11 = sshll.u32 (!%p880_p2), %s919_s0, 6 }
  0xb1   : > { %s3921_s6 = scalar_lea.vmem (!%p880_p2), [#allocation3], %s2665_s28  ;;  %s3923_s1 = scalar_lea.vmem (!%p880_p2), [#allocation4], %s2666_s7 }
  0xb2   : > { %s3925_s25 = scalar_lea.vmem (!%p880_p2), [#allocation5], %s2667_s11  ;;  %p2668_p4 = scmp.ne.s32.totalorder (!%p880_p2), %s3363_s18, 0 }
  0xb5   : > { %s3915_s26 = scalar_select %p925_p3, %s3367_s19, 1 }
  0xb6   : > { %933 = sbr.rel (%p2668_p4) target bundleno = 191 (0xbf), region = 100  ;;  %v3381_v0 = vmov (!%p2668_p4), 0.0  }
  0xb7   : > { %s927_s4 = scalar_lea.vmem %s4193_s2, %s3915_s26  ;;  %934 = vst [vmem:[#allocation2] sm:$0xff] (!%p2668_p4), %v3381_v0  ;;  %935 = vst [vmem:[#allocation2 + $0x8] sm:$0xff] (!%p2668_p4), %v3381_v0 }
  0xb8   : > { %936 = vst [vmem:[#allocation2 + $0x10] sm:$0xff] (!%p2668_p4), %v3381_v0  ;;  %937 = vst [vmem:[#allocation2 + $0x18] sm:$0xff] (!%p2668_p4), %v3381_v0 }
  0xb9   : > { %938 = vst [vmem:[#allocation2 + $0x20] sm:$0xff] (!%p2668_p4), %v3381_v0  ;;  %939 = vst [vmem:[#allocation2 + $0x28] sm:$0xff] (!%p2668_p4), %v3381_v0 }
  0xba   : > { %940 = vst [vmem:[#allocation2 + $0x30] sm:$0xff] (!%p2668_p4), %v3381_v0  ;;  %941 = vst [vmem:[#allocation2 + $0x38] sm:$0xff] (!%p2668_p4), %v3381_v0 }
  0xbb   : > { %942 = vst [vmem:[#allocation2 + $0x40] sm:$0xff] (!%p2668_p4), %v3381_v0  ;;  %943 = vst [vmem:[#allocation2 + $0x48] sm:$0xff] (!%p2668_p4), %v3381_v0 }
  0xbc   : > { %944 = vst [vmem:[#allocation2 + $0x50] sm:$0xff] (!%p2668_p4), %v3381_v0  ;;  %945 = vst [vmem:[#allocation2 + $0x58] sm:$0xff] (!%p2668_p4), %v3381_v0 }
  0xbd   : > { %946 = vst [vmem:[#allocation2 + $0x60] sm:$0xff] %v3381_v0  ;;  %947 = vst [vmem:[#allocation2 + $0x68] sm:$0xff] %v3381_v0 }
  0xbe   : > { %948 = vst [vmem:[#allocation2 + $0x70] sm:$0xff] %v3381_v0  ;;  %949 = vst [vmem:[#allocation2 + $0x78] sm:$0xff] %v3381_v0 }
  0xbf PF: > { %v3229_v1 = vld [vmem:[%s3923_s1 + $0x40] sm:$0xff]   ;;  %v3233_v5 = vld [vmem:[%s3923_s1 + $0x48] sm:$0xff]   ;;  %v3237_v9 = vld [vmem:[%s3923_s1 + $0x50] sm:$0xff]   ;;  %p2797_p5 = scmp.ne.s32.totalorder %s3363_s18, 1 }
  0xc0   : > { %v3230_v2 = vld [vmem:[%s3923_s1 + $0xc0] sm:$0xff]   ;;  %2884 = vmatprep.subr.bf16.mxu0 %v3229_v1  ;;  %v3234_v6 = vld [vmem:[%s3923_s1 + $0xc8] sm:$0xff]   ;;  %v3238_v10 = vld [vmem:[%s3923_s1 + $0xd0] sm:$0xff]  }
  0xc1   : > { %v3231_v3 = vld [vmem:[%s3923_s1] sm:$0xff]   ;;  %2948 = vmatprep.subr.bf16.mxu1 %v3230_v2  ;;  %v3235_v7 = vld [vmem:[%s3923_s1 + $0x8] sm:$0xff]   ;;  %v3239_v11 = vld [vmem:[%s3923_s1 + $0x10] sm:$0xff]  }
  0xc2   : > { %v3232_v4 = vld [vmem:[%s3923_s1 + $0x80] sm:$0xff]   ;;  %2885 = vmatpush3.bf16.msra.mxu0 %v3231_v3  ;;  %v3236_v8 = vld [vmem:[%s3923_s1 + $0x88] sm:$0xff]   ;;  %v3240_v12 = vld [vmem:[%s3923_s1 + $0x90] sm:$0xff]  }
  0xc3   : > { %2949 = vmatpush3.bf16.msra.mxu1 %v3232_v4  ;;  %2886 = vmatprep.subr.bf16.mxu0 %v3233_v5  ;;  %v3241_v13 = vld [vmem:[%s3923_s1 + $0x58] sm:$0xff]   ;;  %v3245_v17 = vld [vmem:[%s3923_s1 + $0x60] sm:$0xff]   ;;  %v3249_v21 = vld [vmem:[%s3923_s1 + $0x68] sm:$0xff]  }
  0xc4   : > { %2950 = vmatprep.subr.bf16.mxu1 %v3234_v6  ;;  %v3242_v14 = vld [vmem:[%s3923_s1 + $0xd8] sm:$0xff]   ;;  %v3246_v18 = vld [vmem:[%s3923_s1 + $0xe0] sm:$0xff]   ;;  %v3250_v22 = vld [vmem:[%s3923_s1 + $0xe8] sm:$0xff]  }
  0xc5   : > { %v3243_v15 = vld [vmem:[%s3923_s1 + $0x18] sm:$0xff]   ;;  %v3247_v19 = vld [vmem:[%s3923_s1 + $0x20] sm:$0xff]   ;;  %v3251_v23 = vld [vmem:[%s3923_s1 + $0x28] sm:$0xff]  }
  0xc6   : > { %2887 = vmatpush3.bf16.msra.mxu0 %v3235_v7  ;;  %v3244_v16 = vld [vmem:[%s3923_s1 + $0x98] sm:$0xff]   ;;  %v3248_v20 = vld [vmem:[%s3923_s1 + $0xa0] sm:$0xff]   ;;  %v3252_v24 = vld [vmem:[%s3923_s1 + $0xa8] sm:$0xff]  }
  0xc7   : > { %2951 = vmatpush3.bf16.msra.mxu1 %v3236_v8  ;;  %2888 = vmatprep.subr.bf16.mxu0 %v3237_v9  ;;  %v3253_v25 = vld [vmem:[%s3923_s1 + $0x70] sm:$0xff]   ;;  %v3257_v29 = vld [vmem:[%s3923_s1 + $0x78] sm:$0xff]   ;;  %v966_v33 = vld [vmem:[%s3921_s6] sm:$0xff] }
  0xc8   : > { %2952 = vmatprep.subr.bf16.mxu1 %v3238_v10  ;;  %v3254_v26 = vld [vmem:[%s3923_s1 + $0xf0] sm:$0xff]   ;;  %v3258_v30 = vld [vmem:[%s3923_s1 + $0xf8] sm:$0xff]   ;;  %v970_v34 = vld [vmem:[%s3921_s6 + $0x20] sm:$0xff] }
  0xc9   : > { %v3255_v27 = vld [vmem:[%s3923_s1 + $0x30] sm:$0xff]   ;;  %v3259_v31 = vld [vmem:[%s3923_s1 + $0x38] sm:$0xff]   ;;  %v967_v35 = vld [vmem:[%s3921_s6 + $0x8] sm:$0xff]  ;;  %v2669_v36 = vcombine.low %v966_v33, %v970_v34  ;;  %v2670_v37 = vcombine.high %v966_v33, %v970_v34 }
  0xca   : > { %2889 = vmatpush3.bf16.msra.mxu0 %v3239_v11  ;;  %v3256_v28 = vld [vmem:[%s3923_s1 + $0xb0] sm:$0xff]   ;;  %v3260_v32 = vld [vmem:[%s3923_s1 + $0xb8] sm:$0xff]   ;;  %v971_v38 = vld [vmem:[%s3921_s6 + $0x28] sm:$0xff] }
  0xcb   : > { %2953 = vmatpush3.bf16.msra.mxu1 %v3240_v12  ;;  %2890 = vmatprep.subr.bf16.mxu0 %v3241_v13  ;;  %v2671_v39 = vcombine.low %v967_v35, %v971_v38  ;;  %v2672_v40 = vcombine.high %v967_v35, %v971_v38  ;;  %v3261_v41 = vld [vmem:[%s3923_s1 + $0x140] sm:$0xff]   ;;  %v975_v48 = vld [vmem:[%s3921_s6 + $0x48] sm:$0xff]  ;;  %v3269_v63 = vld [vmem:[%s3923_s1 + $0x150] sm:$0xff]  }
  0xcc   : > { %2954 = vmatprep.subr.bf16.mxu1 %v3242_v14  ;;  %1894 = vmatprep.mubr.bf16.mxu0 %v2670_v37  ;;  %v3262_v42 = vld [vmem:[%s3923_s1 + $0x100] sm:$0xff]   ;;  %v979_v49 = vld [vmem:[%s3921_s6 + $0x68] sm:$0xff]  ;;  %v3270_v0 = vld [vmem:[%s3923_s1 + $0x110] sm:$0xff]  }
  0xcd   : > { %1991 = vmatprep.mubr.bf16.mxu1 %v2672_v40  ;;  %v3263_v43 = vld [vmem:[%s3923_s1 + $0x1c0] sm:$0xff]   ;;  %v2680_v50 = vcombine.high %v975_v48, %v979_v49  ;;  %v3265_v51 = vld [vmem:[%s3923_s1 + $0x148] sm:$0xff]   ;;  %v2679_v54 = vcombine.low %v975_v48, %v979_v49  ;;  %v3271_v1 = vld [vmem:[%s3923_s1 + $0x1d0] sm:$0xff]  }
  0xce   : > { %2891 = vmatpush3.bf16.msra.mxu0 %v3243_v15  ;;  %v3264_v44 = vld [vmem:[%s3923_s1 + $0x180] sm:$0xff]   ;;  %v3266_v53 = vld [vmem:[%s3923_s1 + $0x108] sm:$0xff]   ;;  %v3272_v2 = vld [vmem:[%s3923_s1 + $0x190] sm:$0xff]  }
  0xcf   : > { %2955 = vmatpush3.bf16.msra.mxu1 %v3244_v16  ;;  %2892 = vmatprep.subr.bf16.mxu0 %v3245_v17  ;;  %v974_v45 = vld [vmem:[%s3921_s6 + $0x40] sm:$0xff]  ;;  %v3267_v55 = vld [vmem:[%s3923_s1 + $0x1c8] sm:$0xff]   ;;  %v3273_v11 = vld [vmem:[%s3923_s1 + $0x158] sm:$0xff]  }
  0xd0   : > { %2956 = vmatprep.subr.bf16.mxu1 %v3246_v18  ;;  %v978_v46 = vld [vmem:[%s3921_s6 + $0x60] sm:$0xff]  ;;  %v3268_v56 = vld [vmem:[%s3923_s1 + $0x188] sm:$0xff]   ;;  %v3274_v12 = vld [vmem:[%s3923_s1 + $0x118] sm:$0xff]  }
  0xd1   : > { %v2678_v47 = vcombine.high %v974_v45, %v978_v46  ;;  %v2677_v52 = vcombine.low %v974_v45, %v978_v46  ;;  %v982_v57 = vld [vmem:[%s3921_s6 + $0x80] sm:$0xff]  ;;  %v983_v59 = vld [vmem:[%s3921_s6 + $0x88] sm:$0xff]  ;;  %v3275_v13 = vld [vmem:[%s3923_s1 + $0x1d8] sm:$0xff]  }
  0xd2   : > { %2893 = vmatpush3.bf16.msra.mxu0 %v3247_v19  ;;  %v986_v58 = vld [vmem:[%s3921_s6 + $0xa0] sm:$0xff]  ;;  %v987_v60 = vld [vmem:[%s3921_s6 + $0xa8] sm:$0xff]  ;;  %v3276_v14 = vld [vmem:[%s3923_s1 + $0x198] sm:$0xff]  }
  0xd3   : > { %2957 = vmatpush3.bf16.msra.mxu1 %v3248_v20  ;;  %2894 = vmatprep.subr.bf16.mxu0 %v3249_v21  ;;  %v2686_v61 = vcombine.high %v982_v57, %v986_v58  ;;  %v2688_v62 = vcombine.high %v983_v59, %v987_v60  ;;  %v2685_v3 = vcombine.low %v982_v57, %v986_v58  ;;  %v990_v4 = vld [vmem:[%s3921_s6 + $0xc0] sm:$0xff]  ;;  %v991_v6 = vld [vmem:[%s3921_s6 + $0xc8] sm:$0xff]  ;;  %v3286_v40 = vld [vmem:[%s3923_s1 + $0x130] sm:$0xff]  }
  0xd4   : > { %2958 = vmatprep.subr.bf16.mxu1 %v3250_v22  ;;  %v994_v5 = vld [vmem:[%s3921_s6 + $0xe0] sm:$0xff]  ;;  %v2687_v7 = vcombine.low %v983_v59, %v987_v60  ;;  %v995_v9 = vld [vmem:[%s3921_s6 + $0xe8] sm:$0xff]  ;;  %v3290_v49 = vld [vmem:[%s3923_s1 + $0x138] sm:$0xff]  }
  0xd5   : > { %v2694_v8 = vcombine.high %v990_v4, %v994_v5  ;;  %v2696_v10 = vcombine.high %v991_v6, %v995_v9  ;;  %v998_v15 = vld [vmem:[%s3921_s6 + $0x100] sm:$0xff]  ;;  %v999_v17 = vld [vmem:[%s3921_s6 + $0x108] sm:$0xff]  ;;  %v2693_v20 = vcombine.low %v990_v4, %v994_v5  ;;  %v2695_v22 = vcombine.low %v991_v6, %v995_v9  ;;  %v977_v9 = vld [vmem:[%s3921_s6 + $0x58] sm:$0xff] }
  0xd6   : > { %2895 = vmatpush3.bf16.msra.mxu0 %v3251_v23  ;;  %v1002_v16 = vld [vmem:[%s3921_s6 + $0x120] sm:$0xff]  ;;  %v1003_v18 = vld [vmem:[%s3921_s6 + $0x128] sm:$0xff] }
  0xd7   : > { %2959 = vmatpush3.bf16.msra.mxu1 %v3252_v24  ;;  %2896 = vmatprep.subr.bf16.mxu0 %v3253_v25  ;;  %v3277_v19 = vld [vmem:[%s3923_s1 + $0x160] sm:$0xff]   ;;  %v2702_v23 = vcombine.high %v998_v15, %v1002_v16  ;;  %v2704_v25 = vcombine.high %v999_v17, %v1003_v18  ;;  %v3283_v33 = vld [vmem:[%s3923_s1 + $0x1e8] sm:$0xff]   ;;  %v2701_v35 = vcombine.low %v998_v15, %v1002_v16  ;;  %v984_v15 = vld [vmem:[%s3921_s6 + $0x90] sm:$0xff] }
  0xd8   : > { %2960 = vmatprep.subr.bf16.mxu1 %v3254_v26  ;;  %v3278_v21 = vld [vmem:[%s3923_s1 + $0x120] sm:$0xff]   ;;  %v3284_v34 = vld [vmem:[%s3923_s1 + $0x1a8] sm:$0xff]   ;;  %v988_v16 = vld [vmem:[%s3921_s6 + $0xb0] sm:$0xff] }
  0xd9   : > { %v3279_v24 = vld [vmem:[%s3923_s1 + $0x1e0] sm:$0xff]   ;;  %v1015_v45 = vld [vmem:[%s3921_s6 + $0x188] sm:$0xff] }
  0xda   : > { %2897 = vmatpush3.bf16.msra.mxu0 %v3255_v27  ;;  %v3280_v26 = vld [vmem:[%s3923_s1 + $0x1a0] sm:$0xff]   ;;  %v1019_v46 = vld [vmem:[%s3921_s6 + $0x1a8] sm:$0xff] }
  0xdb   : > { %2961 = vmatpush3.bf16.msra.mxu1 %v3256_v28  ;;  %2898 = vmatprep.subr.bf16.mxu0 %v3257_v29  ;;  %v1006_v27 = vld [vmem:[%s3921_s6 + $0x140] sm:$0xff]  ;;  %v3281_v29 = vld [vmem:[%s3923_s1 + $0x168] sm:$0xff]   ;;  %v2719_v60 = vcombine.low %v1015_v45, %v1019_v46 }
  0xdc   : > { %2962 = vmatprep.subr.bf16.mxu1 %v3258_v30  ;;  %v1010_v28 = vld [vmem:[%s3921_s6 + $0x160] sm:$0xff]  ;;  %v1007_v30 = vld [vmem:[%s3921_s6 + $0x148] sm:$0xff] }
  0xdd   : > { %v2710_v37 = vcombine.high %v1006_v27, %v1010_v28  ;;  %v2709_v48 = vcombine.low %v1006_v27, %v1010_v28  ;;  %v1023_v57 = vld [vmem:[%s3921_s6 + $0x1c8] sm:$0xff]  ;;  %v2689_v27 = vcombine.low %v984_v15, %v988_v16 }
  0xde   : > { %2899 = vmatpush3.bf16.msra.mxu0 %v3259_v31  ;;  %v1011_v31 = vld [vmem:[%s3921_s6 + $0x168] sm:$0xff] }
  0xdf   : > { %2963 = vmatpush3.bf16.msra.mxu1 %v3260_v32  ;;  %3012 = vmatprep.subr.bf16.mxu0 %v3261_v41  ;;  %v3282_v32 = vld [vmem:[%s3923_s1 + $0x128] sm:$0xff]   ;;  %v2712_v38 = vcombine.high %v1007_v30, %v1011_v31  ;;  %v3287_v41 = vld [vmem:[%s3923_s1 + $0x1f0] sm:$0xff]  }
  0xe0   : > { %3076 = vmatprep.subr.bf16.mxu1 %v3263_v43  ;;  %v1018_v43 = vld [vmem:[%s3921_s6 + $0x1a0] sm:$0xff]  ;;  %v1027_v58 = vld [vmem:[%s3921_s6 + $0x1e8] sm:$0xff] }
  0xe1   : > { %1895 = vmatmul.mubr.bf16.vlgmr.msra.gmra.mrb[0].mxu0 %v2669_v36  ;;  %v2703_v36 = vcombine.low %v999_v17, %v1003_v18  ;;  %v2727_v4 = vcombine.low %v1023_v57, %v1027_v58  ;;  %v985_v17 = vld [vmem:[%s3921_s6 + $0x98] sm:$0xff] }
  0xe2   : > { %1992 = vmatmul.mubr.bf16.vlgmr.msra.gmra.mrb[0].mxu1 %v2671_v39  ;;  %3013 = vmatpush3.bf16.msra.mxu0 %v3262_v42  ;;  %v3285_v39 = vld [vmem:[%s3923_s1 + $0x170] sm:$0xff]   ;;  %v1014_v42 = vld [vmem:[%s3921_s6 + $0x180] sm:$0xff]  ;;  %v989_v18 = vld [vmem:[%s3921_s6 + $0xb8] sm:$0xff] }
  0xe3   : > { %3077 = vmatpush3.bf16.msra.mxu1 %v3264_v44  ;;  %1902 = vmatprep.mubr.bf16.mxu0 %v2678_v47  ;;  %v3288_v44 = vld [vmem:[%s3923_s1 + $0x1b0] sm:$0xff]   ;;  %v3289_v47 = vld [vmem:[%s3923_s1 + $0x178] sm:$0xff]   ;;  %v2717_v59 = vcombine.low %v1014_v42, %v1018_v43  ;;  %v2691_v28 = vcombine.low %v985_v17, %v989_v18 }
  0xe4   : > { %1999 = vmatprep.mubr.bf16.mxu1 %v2680_v50  ;;  %3014 = vmatprep.subr.bf16.mxu0 %v3265_v51  ;;  %v2711_v50 = vcombine.low %v1007_v30, %v1011_v31  ;;  %v2718_v51 = vcombine.high %v1014_v42, %v1018_v43  ;;  %v1000_v31 = vld [vmem:[%s3921_s6 + $0x110] sm:$0xff]  ;;  %v1013_v42 = vld [vmem:[%s3921_s6 + $0x178] sm:$0xff] }
  0xe5   : > { %3078 = vmatprep.subr.bf16.mxu1 %v3267_v55  ;;  %v1022_v55 = vld [vmem:[%s3921_s6 + $0x1c0] sm:$0xff] }
  0xe6   : > { %3015 = vmatpush3.bf16.msra.mxu0 %v3266_v53  ;;  %v2720_v53 = vcombine.high %v1015_v45, %v1019_v46 }
  0xe7   : > { %3079 = vmatpush3.bf16.msra.mxu1 %v3268_v56  ;;  %3016 = vmatprep.subr.bf16.mxu0 %v3269_v63  ;;  %v1026_v56 = vld [vmem:[%s3921_s6 + $0x1e0] sm:$0xff]  ;;  %v968_v63 = vld [vmem:[%s3921_s6 + $0x10] sm:$0xff] }
  0xe8   : > { %3080 = vmatprep.subr.bf16.mxu1 %v3271_v1  ;;  %v969_v1 = vld [vmem:[%s3921_s6 + $0x18] sm:$0xff] }
  0xe9   : > { %1903 = vmatmul.mubr.bf16.gmra.mrb[4].mxu0 %v2677_v52  ;;  %v3291_v52 = vld [vmem:[%s3923_s1 + $0x1f8] sm:$0xff]  }
  0xea   : > { %2000 = vmatmul.mubr.bf16.gmra.mrb[4].mxu1 %v2679_v54  ;;  %1910 = vmatprep.mubr.bf16.mxu0 %v2686_v61  ;;  %v3292_v54 = vld [vmem:[%s3923_s1 + $0x1b8] sm:$0xff]   ;;  %v2726_v61 = vcombine.high %v1022_v55, %v1026_v56 }
  0xeb   : > { %2007 = vmatprep.mubr.bf16.mxu1 %v2688_v62  ;;  %3017 = vmatpush3.bf16.msra.mxu0 %v3270_v0  ;;  %v2728_v62 = vcombine.high %v1023_v57, %v1027_v58  ;;  %v972_v0 = vld [vmem:[%s3921_s6 + $0x30] sm:$0xff]  ;;  %v1025_v57 = vld [vmem:[%s3921_s6 + $0x1d8] sm:$0xff] }
  0xec   : > { %3081 = vmatpush3.bf16.msra.mxu1 %v3272_v2  ;;  %3018 = vmatprep.subr.bf16.mxu0 %v3273_v11  ;;  %v973_v2 = vld [vmem:[%s3921_s6 + $0x38] sm:$0xff]  ;;  %v2674_v5 = vcombine.high %v968_v63, %v972_v0  ;;  %v2673_v11 = vcombine.low %v968_v63, %v972_v0 }
  0xed   : > { %3082 = vmatprep.subr.bf16.mxu1 %v3275_v13  ;;  %v2676_v6 = vcombine.high %v969_v1, %v973_v2  ;;  %v1029_v58 = vld [vmem:[%s3921_s6 + $0x1f8] sm:$0xff] }
  0xee   : > { %v2731_v0 = vcombine.low %v1025_v57, %v1029_v58 }
  0xef   : > { %3019 = vmatpush3.bf16.msra.mxu0 %v3274_v12  ;;  %v2675_v12 = vcombine.low %v969_v1, %v973_v2 }
  0xf0   : > { %3083 = vmatpush3.bf16.msra.mxu1 %v3276_v14  ;;  %3020 = vmatprep.subr.bf16.mxu0 %v3277_v19 }
  0xf1   : > { %1911 = vmatmul.mubr.bf16.gmra.mrb[8].mxu0 %v2685_v3  ;;  %3084 = vmatprep.subr.bf16.mxu1 %v3279_v24  ;;  %v2725_v3 = vcombine.low %v1022_v55, %v1026_v56  ;;  %v996_v24 = vld [vmem:[%s3921_s6 + $0xf0] sm:$0xff] }
  0xf2   : > { %2008 = vmatmul.mubr.bf16.gmra.mrb[8].mxu1 %v2687_v7  ;;  %1918 = vmatprep.mubr.bf16.mxu0 %v2694_v8  ;;  %v976_v7 = vld [vmem:[%s3921_s6 + $0x50] sm:$0xff] }
  0xf3   : > { %2015 = vmatprep.mubr.bf16.mxu1 %v2696_v10  ;;  %3021 = vmatpush3.bf16.msra.mxu0 %v3278_v21  ;;  %v980_v8 = vld [vmem:[%s3921_s6 + $0x70] sm:$0xff]  ;;  %v981_v10 = vld [vmem:[%s3921_s6 + $0x78] sm:$0xff]  ;;  %v2690_v21 = vcombine.high %v984_v15, %v988_v16 }
  0xf4   : > { %3085 = vmatpush3.bf16.msra.mxu1 %v3280_v26  ;;  %3022 = vmatprep.subr.bf16.mxu0 %v3281_v29  ;;  %v2682_v13 = vcombine.high %v976_v7, %v980_v8  ;;  %v2684_v14 = vcombine.high %v977_v9, %v981_v10  ;;  %v2681_v19 = vcombine.low %v976_v7, %v980_v8  ;;  %v997_v26 = vld [vmem:[%s3921_s6 + $0xf8] sm:$0xff]  ;;  %v1024_v55 = vld [vmem:[%s3921_s6 + $0x1d0] sm:$0xff] }
  0xf5   : > { %3086 = vmatprep.subr.bf16.mxu1 %v3283_v33  ;;  %v1001_v33 = vld [vmem:[%s3921_s6 + $0x118] sm:$0xff]  ;;  %v1028_v56 = vld [vmem:[%s3921_s6 + $0x1f0] sm:$0xff] }
  0xf6   : > { %v2729_v63 = vcombine.low %v1024_v55, %v1028_v56 }
  0xf7   : > { %3023 = vmatpush3.bf16.msra.mxu0 %v3282_v32  ;;  %v1004_v32 = vld [vmem:[%s3921_s6 + $0x130] sm:$0xff] }
  0xf8   : > { %3087 = vmatpush3.bf16.msra.mxu1 %v3284_v34  ;;  %3024 = vmatprep.subr.bf16.mxu0 %v3285_v39  ;;  %v1005_v34 = vld [vmem:[%s3921_s6 + $0x138] sm:$0xff]  ;;  %v1008_v39 = vld [vmem:[%s3921_s6 + $0x150] sm:$0xff]  ;;  %v2705_v43 = vcombine.low %v1000_v31, %v1004_v32 }
  0xf9   : > { %1919 = vmatmul.mubr.bf16.gmra.mrb[12].mxu0 %v2693_v20  ;;  %3088 = vmatprep.subr.bf16.mxu1 %v3287_v41  ;;  %v2683_v20 = vcombine.low %v977_v9, %v981_v10  ;;  %v1009_v41 = vld [vmem:[%s3921_s6 + $0x158] sm:$0xff] }
  0xfa   : > { %2016 = vmatmul.mubr.bf16.gmra.mrb[12].mxu1 %v2695_v22  ;;  %1926 = vmatprep.mubr.bf16.mxu0 %v2702_v23  ;;  %v2692_v22 = vcombine.high %v985_v17, %v989_v18  ;;  %v992_v23 = vld [vmem:[%s3921_s6 + $0xd0] sm:$0xff]  ;;  %v2716_v46 = vcombine.high %v1009_v41, %v1013_v42 }
  0xfb   : > { %2023 = vmatprep.mubr.bf16.mxu1 %v2704_v25  ;;  %3025 = vmatpush3.bf16.msra.mxu0 %v3286_v40  ;;  %v993_v25 = vld [vmem:[%s3921_s6 + $0xd8] sm:$0xff]  ;;  %v2698_v29 = vcombine.high %v992_v23, %v996_v24  ;;  %v1012_v40 = vld [vmem:[%s3921_s6 + $0x170] sm:$0xff] }
  0xfc   : > { %3089 = vmatpush3.bf16.msra.mxu1 %v3288_v44  ;;  %3026 = vmatprep.subr.bf16.mxu0 %v3289_v47  ;;  %v2700_v30 = vcombine.high %v993_v25, %v997_v26  ;;  %v2707_v44 = vcombine.low %v1001_v33, %v1005_v34  ;;  %v2714_v45 = vcombine.high %v1008_v39, %v1012_v40  ;;  %v1016_v47 = vld [vmem:[%s3921_s6 + $0x190] sm:$0xff] }
  0xfd   : > { %3090 = vmatprep.subr.bf16.mxu1 %v3291_v52  ;;  %v2715_v52 = vcombine.low %v1009_v41, %v1013_v42 }
  0xff   : > { %3027 = vmatpush3.bf16.msra.mxu0 %v3290_v49  ;;  %v1017_v49 = vld [vmem:[%s3921_s6 + $0x198] sm:$0xff] }
 0x100   : > { %3091 = vmatpush3.bf16.msra.mxu1 %v3292_v54 }
 0x101   : > { %1927 = vmatmul.mubr.bf16.gmra.mrb[16].mxu0 %v2701_v35  ;;  %v2697_v35 = vcombine.low %v992_v23, %v996_v24 }
 0x102   : > { %2024 = vmatmul.mubr.bf16.gmra.mrb[16].mxu1 %v2703_v36  ;;  %1934 = vmatprep.mubr.bf16.mxu0 %v2710_v37  ;;  %v2699_v36 = vcombine.low %v993_v25, %v997_v26  ;;  %v2706_v37 = vcombine.high %v1000_v31, %v1004_v32 }
 0x103   : > { %2031 = vmatprep.mubr.bf16.mxu1 %v2712_v38  ;;  %v2708_v38 = vcombine.high %v1001_v33, %v1005_v34 }
 0x109   : > { %1935 = vmatmul.mubr.bf16.gmra.mrb[20].mxu0 %v2709_v48  ;;  %v1020_v48 = vld [vmem:[%s3921_s6 + $0x1b0] sm:$0xff] }
 0x10a   : > { %2032 = vmatmul.mubr.bf16.gmra.mrb[20].mxu1 %v2711_v50  ;;  %1942 = vmatprep.mubr.bf16.mxu0 %v2718_v51  ;;  %v1021_v50 = vld [vmem:[%s3921_s6 + $0x1b8] sm:$0xff]  ;;  %v2713_v51 = vcombine.low %v1008_v39, %v1012_v40 }
 0x10b   : > { %2039 = vmatprep.mubr.bf16.mxu1 %v2720_v53  ;;  %v2722_v53 = vcombine.high %v1016_v47, %v1020_v48  ;;  %v2724_v54 = vcombine.high %v1017_v49, %v1021_v50 }
 0x111   : > { %1943 = vmatmul.mubr.bf16.gmra.mrb[24].mxu0 %v2717_v59  ;;  %v2721_v59 = vcombine.low %v1016_v47, %v1020_v48 }
 0x112   : > { %2040 = vmatmul.mubr.bf16.gmra.mrb[24].mxu1 %v2719_v60  ;;  %1950 = vmatprep.mubr.bf16.mxu0 %v2726_v61  ;;  %v2723_v60 = vcombine.low %v1017_v49, %v1021_v50  ;;  %v2730_v61 = vcombine.high %v1024_v55, %v1028_v56 }
 0x113   : > { %2047 = vmatprep.mubr.bf16.mxu1 %v2728_v62  ;;  %v2732_v62 = vcombine.high %v1025_v57, %v1029_v58 }
 0x119   : > { %1951 = vmatmul.mubr.bf16.gmra.mrb[28].mxu0 %v2725_v3 }
 0x11a   : > { %2048 = vmatmul.mubr.bf16.gmra.mrb[28].mxu1 %v2727_v4  ;;  %2088 = vmatprep.mubr.bf16.mxu0 %v2674_v5 }
 0x11b   : > { %2185 = vmatprep.mubr.bf16.mxu1 %v2676_v6 }
 0x121   : > { %2089 = vmatmul.mubr.bf16.vlgmr.msra.gmra.mrb[32].mxu0 %v2673_v11 }
 0x122   : > { %2186 = vmatmul.mubr.bf16.vlgmr.msra.gmra.mrb[32].mxu1 %v2675_v12  ;;  %2096 = vmatprep.mubr.bf16.mxu0 %v2682_v13 }
 0x123   : > { %2193 = vmatprep.mubr.bf16.mxu1 %v2684_v14 }
 0x129   : > { %2097 = vmatmul.mubr.bf16.gmra.mrb[36].mxu0 %v2681_v19 }
 0x12a   : > { %2194 = vmatmul.mubr.bf16.gmra.mrb[36].mxu1 %v2683_v20  ;;  %2104 = vmatprep.mubr.bf16.mxu0 %v2690_v21 }
 0x12b   : > { %2201 = vmatprep.mubr.bf16.mxu1 %v2692_v22 }
 0x131   : > { %2105 = vmatmul.mubr.bf16.gmra.mrb[40].mxu0 %v2689_v27 }
 0x132   : > { %2202 = vmatmul.mubr.bf16.gmra.mrb[40].mxu1 %v2691_v28  ;;  %2112 = vmatprep.mubr.bf16.mxu0 %v2698_v29 }
 0x133   : > { %2209 = vmatprep.mubr.bf16.mxu1 %v2700_v30 }
 0x139   : > { %2113 = vmatmul.mubr.bf16.gmra.mrb[44].mxu0 %v2697_v35 }
 0x13a   : > { %2210 = vmatmul.mubr.bf16.gmra.mrb[44].mxu1 %v2699_v36  ;;  %2120 = vmatprep.mubr.bf16.mxu0 %v2706_v37 }
 0x13b   : > { %2217 = vmatprep.mubr.bf16.mxu1 %v2708_v38 }
 0x141   : > { %2121 = vmatmul.mubr.bf16.gmra.mrb[48].mxu0 %v2705_v43 }
 0x142   : > { %2218 = vmatmul.mubr.bf16.gmra.mrb[48].mxu1 %v2707_v44  ;;  %2128 = vmatprep.mubr.bf16.mxu0 %v2714_v45 }
 0x143   : > { %2225 = vmatprep.mubr.bf16.mxu1 %v2716_v46 }
 0x149   : > { %2129 = vmatmul.mubr.bf16.gmra.mrb[52].mxu0 %v2713_v51 }
 0x14a   : > { %2226 = vmatmul.mubr.bf16.gmra.mrb[52].mxu1 %v2715_v52  ;;  %2136 = vmatprep.mubr.bf16.mxu0 %v2722_v53 }
 0x14b   : > { %2233 = vmatprep.mubr.bf16.mxu1 %v2724_v54 }
 0x151   : > { %2137 = vmatmul.mubr.bf16.gmra.mrb[56].mxu0 %v2721_v59 }
 0x152   : > { %2234 = vmatmul.mubr.bf16.gmra.mrb[56].mxu1 %v2723_v60  ;;  %2144 = vmatprep.mubr.bf16.mxu0 %v2730_v61 }
 0x153   : > { %2241 = vmatprep.mubr.bf16.mxu1 %v2732_v62 }
 0x159   : > { %2145 = vmatmul.mubr.bf16.gmra.mrb[60].mxu0 %v2729_v63 }
 0x15a   : > { %2242 = vmatmul.mubr.bf16.gmra.mrb[60].mxu1 %v2731_v0 }
 0x1b4   : > { %v2900_v1 = vpop.f32.mrb[0].mxu0 }
 0x1b5   : > { %v2964_v2 = vpop.f32.mrb[0].mxu1  ;;  %v2901_v3 = vpop.f32.mrb[1].mxu0 }
 0x1b6   : > { %v2902_v4 = vadd.f32 %v2901_v3, %v2900_v1  ;;  %v2965_v5 = vpop.f32.mrb[1].mxu1  ;;  %v2903_v6 = vpop.f32.mrb[2].mxu0 }
 0x1b7   : > { %v2966_v7 = vadd.f32 %v2965_v5, %v2964_v2  ;;  %v2967_v8 = vpop.f32.mrb[2].mxu1  ;;  %v2904_v9 = vpop.f32.mrb[3].mxu0 }
 0x1b8   : > { %v2905_v10 = vadd.f32 %v2904_v9, %v2903_v6  ;;  %v2968_v11 = vpop.f32.mrb[3].mxu1 }
 0x1b9   : > { %v4056_v12 = vadd.f32 %v2966_v7, %v2902_v4  ;;  %v2969_v13 = vadd.f32 %v2968_v11, %v2967_v8 }
 0x1bb   : > { %v4058_v14 = vadd.f32 %v2969_v13, %v2905_v10 }
 0x1bc   : > { %v2906_v15 = vpop.f32.mrb[4].mxu0 }
 0x1bd   : > { %v2970_v16 = vpop.f32.mrb[4].mxu1  ;;  %v2907_v17 = vpop.f32.mrb[5].mxu0 }
 0x1be   : > { %v2908_v18 = vadd.f32 %v2907_v17, %v2906_v15  ;;  %v2971_v19 = vpop.f32.mrb[5].mxu1  ;;  %v2909_v20 = vpop.f32.mrb[6].mxu0 }
 0x1bf   : > { %v2972_v21 = vadd.f32 %v2971_v19, %v2970_v16  ;;  %v2973_v22 = vpop.f32.mrb[6].mxu1  ;;  %v2910_v23 = vpop.f32.mrb[7].mxu0 }
 0x1c0   : > { %v2911_v24 = vadd.f32 %v2910_v23, %v2909_v20  ;;  %v2974_v25 = vpop.f32.mrb[7].mxu1 }
 0x1c1   : > { %v4060_v26 = vadd.f32 %v2972_v21, %v2908_v18  ;;  %v2975_v27 = vadd.f32 %v2974_v25, %v2973_v22 }
 0x1c3   : > { %v4062_v28 = vadd.f32 %v2975_v27, %v2911_v24 }
 0x1c4   : > { %v2912_v29 = vpop.f32.mrb[8].mxu0 }
 0x1c5   : > { %v2976_v30 = vpop.f32.mrb[8].mxu1  ;;  %v2913_v31 = vpop.f32.mrb[9].mxu0 }
 0x1c6   : > { %v2914_v32 = vadd.f32 %v2913_v31, %v2912_v29  ;;  %v2977_v33 = vpop.f32.mrb[9].mxu1  ;;  %v2915_v34 = vpop.f32.mrb[10].mxu0 }
 0x1c7   : > { %v2978_v35 = vadd.f32 %v2977_v33, %v2976_v30  ;;  %v2979_v36 = vpop.f32.mrb[10].mxu1  ;;  %v2916_v37 = vpop.f32.mrb[11].mxu0 }
 0x1c8   : > { %v2917_v38 = vadd.f32 %v2916_v37, %v2915_v34  ;;  %v2980_v39 = vpop.f32.mrb[11].mxu1 }
 0x1c9   : > { %v4064_v40 = vadd.f32 %v2978_v35, %v2914_v32  ;;  %v2981_v41 = vadd.f32 %v2980_v39, %v2979_v36 }
 0x1cb   : > { %v4066_v42 = vadd.f32 %v2981_v41, %v2917_v38 }
 0x1cc   : > { %v2918_v43 = vpop.f32.mrb[12].mxu0 }
 0x1cd   : > { %v2982_v44 = vpop.f32.mrb[12].mxu1  ;;  %v2919_v45 = vpop.f32.mrb[13].mxu0 }
 0x1ce   : > { %v2920_v46 = vadd.f32 %v2919_v45, %v2918_v43  ;;  %v2983_v47 = vpop.f32.mrb[13].mxu1  ;;  %v2921_v48 = vpop.f32.mrb[14].mxu0 }
 0x1cf   : > { %v2984_v49 = vadd.f32 %v2983_v47, %v2982_v44  ;;  %v2985_v50 = vpop.f32.mrb[14].mxu1  ;;  %v2922_v51 = vpop.f32.mrb[15].mxu0 }
 0x1d0   : > { %v2923_v52 = vadd.f32 %v2922_v51, %v2921_v48  ;;  %v2986_v53 = vpop.f32.mrb[15].mxu1 }
 0x1d1   : > { %v4068_v54 = vadd.f32 %v2984_v49, %v2920_v46  ;;  %v2987_v55 = vadd.f32 %v2986_v53, %v2985_v50 }
 0x1d3   : > { %v4070_v56 = vadd.f32 %v2987_v55, %v2923_v52 }
 0x1d4   : > { %v2924_v57 = vpop.f32.mrb[16].mxu0 }
 0x1d5   : > { %v2988_v58 = vpop.f32.mrb[16].mxu1  ;;  %v2925_v59 = vpop.f32.mrb[17].mxu0 }
 0x1d6   : > { %v2926_v60 = vadd.f32 %v2925_v59, %v2924_v57  ;;  %v2989_v61 = vpop.f32.mrb[17].mxu1  ;;  %v2927_v62 = vpop.f32.mrb[18].mxu0 }
 0x1d7   : > { %v2990_v63 = vadd.f32 %v2989_v61, %v2988_v58  ;;  %v2991_v0 = vpop.f32.mrb[18].mxu1  ;;  %v2928_v1 = vpop.f32.mrb[19].mxu0 }
 0x1d8   : > { %v2929_v2 = vadd.f32 %v2928_v1, %v2927_v62  ;;  %v2992_v3 = vpop.f32.mrb[19].mxu1 }
 0x1d9   : > { %v4072_v4 = vadd.f32 %v2990_v63, %v2926_v60  ;;  %v2993_v5 = vadd.f32 %v2992_v3, %v2991_v0 }
 0x1db   : > { %v4074_v6 = vadd.f32 %v2993_v5, %v2929_v2 }
 0x1dc   : > { %v2930_v7 = vpop.f32.mrb[20].mxu0 }
 0x1dd   : > { %v2994_v8 = vpop.f32.mrb[20].mxu1  ;;  %v2931_v9 = vpop.f32.mrb[21].mxu0 }
 0x1de   : > { %v2932_v10 = vadd.f32 %v2931_v9, %v2930_v7  ;;  %v2995_v11 = vpop.f32.mrb[21].mxu1  ;;  %v2933_v13 = vpop.f32.mrb[22].mxu0  ;;  %v950_v7 = vld [vmem:[#allocation2] sm:$0xff] }
 0x1df   : > { %v2996_v15 = vadd.f32 %v2995_v11, %v2994_v8  ;;  %v2997_v16 = vpop.f32.mrb[22].mxu1  ;;  %v2934_v17 = vpop.f32.mrb[23].mxu0  ;;  %v951_v11 = vld [vmem:[#allocation2 + $0x8] sm:$0xff] }
 0x1e0   : > { %v2935_v18 = vadd.f32 %v2934_v17, %v2933_v13  ;;  %v2998_v19 = vpop.f32.mrb[23].mxu1 }
 0x1e1   : > { %v4076_v20 = vadd.f32 %v2996_v15, %v2932_v10  ;;  %v2999_v21 = vadd.f32 %v2998_v19, %v2997_v16 }
 0x1e3   : > { %v4078_v22 = vadd.f32 %v2999_v21, %v2935_v18 }
 0x1e4   : > { %v2936_v23 = vpop.f32.mrb[24].mxu0 }
 0x1e5   : > { %v3000_v24 = vpop.f32.mrb[24].mxu1  ;;  %v2937_v25 = vpop.f32.mrb[25].mxu0 }
 0x1e6   : > { %v2938_v27 = vadd.f32 %v2937_v25, %v2936_v23  ;;  %v3001_v29 = vpop.f32.mrb[25].mxu1  ;;  %v2939_v30 = vpop.f32.mrb[26].mxu0 }
 0x1e7   : > { %v3002_v31 = vadd.f32 %v3001_v29, %v3000_v24  ;;  %v3003_v32 = vpop.f32.mrb[26].mxu1  ;;  %v2940_v33 = vpop.f32.mrb[27].mxu0 }
 0x1e8   : > { %v2941_v34 = vadd.f32 %v2940_v33, %v2939_v30  ;;  %v3004_v35 = vpop.f32.mrb[27].mxu1 }
 0x1e9   : > { %v4080_v36 = vadd.f32 %v3002_v31, %v2938_v27  ;;  %v3005_v37 = vadd.f32 %v3004_v35, %v3003_v32  ;;  %v953_v35 = vld [vmem:[#allocation2 + $0x18] sm:$0xff] }
 0x1eb   : > { %v4082_v38 = vadd.f32 %v3005_v37, %v2941_v34 }
 0x1ec   : > { %v2942_v39 = vpop.f32.mrb[28].mxu0 }
 0x1ed   : > { %v3006_v41 = vpop.f32.mrb[28].mxu1  ;;  %v2943_v43 = vpop.f32.mrb[29].mxu0 }
 0x1ee   : > { %v2944_v44 = vadd.f32 %v2943_v43, %v2942_v39  ;;  %v3007_v45 = vpop.f32.mrb[29].mxu1  ;;  %v2945_v46 = vpop.f32.mrb[30].mxu0 }
 0x1ef   : > { %v3008_v47 = vadd.f32 %v3007_v45, %v3006_v41  ;;  %v3009_v48 = vpop.f32.mrb[30].mxu1  ;;  %v2946_v49 = vpop.f32.mrb[31].mxu0 }
 0x1f0   : > { %v2947_v50 = vadd.f32 %v2946_v49, %v2945_v46  ;;  %v3010_v51 = vpop.f32.mrb[31].mxu1 }
 0x1f1   : > { %v4084_v52 = vadd.f32 %v3008_v47, %v2944_v44  ;;  %v3011_v53 = vadd.f32 %v3010_v51, %v3009_v48 }
 0x1f3   : > { %v4086_v55 = vadd.f32 %v3011_v53, %v2947_v50 }
 0x1f4   : > { %v3028_v57 = vpop.f32.mrb[32].mxu0 }
 0x1f5   : > { %v3092_v58 = vpop.f32.mrb[32].mxu1  ;;  %v3029_v59 = vpop.f32.mrb[33].mxu0 }
 0x1f6   : > { %v3030_v60 = vadd.f32 %v3029_v59, %v3028_v57  ;;  %v3093_v61 = vpop.f32.mrb[33].mxu1  ;;  %v3031_v62 = vpop.f32.mrb[34].mxu0 }
 0x1f7   : > { %v3094_v63 = vadd.f32 %v3093_v61, %v3092_v58  ;;  %v3095_v0 = vpop.f32.mrb[34].mxu1  ;;  %v3032_v1 = vpop.f32.mrb[35].mxu0  ;;  %v955_v61 = vld [vmem:[#allocation2 + $0x28] sm:$0xff] }
 0x1f8   : > { %v2091_v2 = vadd.f32 %v3030_v60, %v4056_v12  ;;  %v3033_v3 = vadd.f32 %v3032_v1, %v3031_v62  ;;  %v3096_v5 = vpop.f32.mrb[35].mxu1 }
 0x1f9   : > { %v3097_v8 = vadd.f32 %v3096_v5, %v3095_v0 }
 0x1fa   : > { %v2188_v9 = vadd.f32 %v3094_v63, %v2091_v2  ;;  %v2094_v10 = vadd.f32 %v3033_v3, %v4058_v14  ;;  %v952_v14 = vld [vmem:[#allocation2 + $0x10] sm:$0xff] }
 0x1fc   : > { %v2250_v13 = vadd.f32 %v2188_v9, %v950_v7  ;;  %v2191_v15 = vadd.f32 %v3097_v8, %v2094_v10  ;;  %v3034_v16 = vpop.f32.mrb[36].mxu0 }
 0x1fd   : > { %v3098_v17 = vpop.f32.mrb[36].mxu1  ;;  %v3035_v18 = vpop.f32.mrb[37].mxu0 }
 0x1fe   : > { %2266 = vst [vmem:[#allocation2] sm:$0xff] %v2250_v13  ;;  %v2251_v19 = vadd.f32 %v2191_v15, %v951_v11  ;;  %v3036_v21 = vadd.f32 %v3035_v18, %v3034_v16  ;;  %v3099_v23 = vpop.f32.mrb[37].mxu1  ;;  %v3037_v24 = vpop.f32.mrb[38].mxu0 }
 0x1ff   : > { %v3100_v25 = vadd.f32 %v3099_v23, %v3098_v17  ;;  %v3101_v12 = vpop.f32.mrb[38].mxu1  ;;  %v3038_v27 = vpop.f32.mrb[39].mxu0 }
 0x200   : > { %2267 = vst [vmem:[#allocation2 + $0x8] sm:$0xff] %v2251_v19  ;;  %v2099_v29 = vadd.f32 %v3036_v21, %v4060_v26  ;;  %v3039_v30 = vadd.f32 %v3038_v27, %v3037_v24  ;;  %v3102_v31 = vpop.f32.mrb[39].mxu1  ;;  %v957_v19 = vld [vmem:[#allocation2 + $0x38] sm:$0xff] }
 0x201   : > { %v3103_v32 = vadd.f32 %v3102_v31, %v3101_v12 }
 0x202   : > { %v2196_v33 = vadd.f32 %v3100_v25, %v2099_v29  ;;  %v2102_v34 = vadd.f32 %v3039_v30, %v4062_v28  ;;  %v954_v28 = vld [vmem:[#allocation2 + $0x20] sm:$0xff] }
 0x204   : > { %v2252_v37 = vadd.f32 %v2196_v33, %v952_v14  ;;  %v2199_v39 = vadd.f32 %v3103_v32, %v2102_v34  ;;  %v3040_v41 = vpop.f32.mrb[40].mxu0 }
 0x205   : > { %v3104_v43 = vpop.f32.mrb[40].mxu1  ;;  %v3041_v44 = vpop.f32.mrb[41].mxu0 }
 0x206   : > { %2268 = vst [vmem:[#allocation2 + $0x10] sm:$0xff] %v2252_v37  ;;  %v2253_v45 = vadd.f32 %v2199_v39, %v953_v35  ;;  %v3042_v46 = vadd.f32 %v3041_v44, %v3040_v41  ;;  %v3105_v47 = vpop.f32.mrb[41].mxu1  ;;  %v3043_v48 = vpop.f32.mrb[42].mxu0 }
 0x207   : > { %v3106_v49 = vadd.f32 %v3105_v47, %v3104_v43  ;;  %v3107_v26 = vpop.f32.mrb[42].mxu1  ;;  %v3044_v50 = vpop.f32.mrb[43].mxu0  ;;  %v959_v43 = vld [vmem:[#allocation2 + $0x48] sm:$0xff] }
 0x208   : > { %2269 = vst [vmem:[#allocation2 + $0x18] sm:$0xff] %v2253_v45  ;;  %v2107_v51 = vadd.f32 %v3042_v46, %v4064_v40  ;;  %v3045_v53 = vadd.f32 %v3044_v50, %v3043_v48  ;;  %v3108_v57 = vpop.f32.mrb[43].mxu1 }
 0x209   : > { %v3109_v58 = vadd.f32 %v3108_v57, %v3107_v26 }
 0x20a   : > { %v2204_v59 = vadd.f32 %v3106_v49, %v2107_v51  ;;  %v2110_v60 = vadd.f32 %v3045_v53, %v4066_v42  ;;  %v956_v42 = vld [vmem:[#allocation2 + $0x30] sm:$0xff] }
 0x20c   : > { %v2254_v62 = vadd.f32 %v2204_v59, %v954_v28  ;;  %v2207_v63 = vadd.f32 %v3109_v58, %v2110_v60  ;;  %v3046_v0 = vpop.f32.mrb[44].mxu0 }
 0x20d   : > { %v3110_v1 = vpop.f32.mrb[44].mxu1  ;;  %v3047_v2 = vpop.f32.mrb[45].mxu0 }
 0x20e   : > { %2270 = vst [vmem:[#allocation2 + $0x20] sm:$0xff] %v2254_v62  ;;  %v2255_v3 = vadd.f32 %v2207_v63, %v955_v61  ;;  %v3048_v5 = vadd.f32 %v3047_v2, %v3046_v0  ;;  %v3111_v7 = vpop.f32.mrb[45].mxu1  ;;  %v3049_v8 = vpop.f32.mrb[46].mxu0  ;;  %v961_v63 = vld [vmem:[#allocation2 + $0x58] sm:$0xff] }
 0x20f   : > { %v3112_v9 = vadd.f32 %v3111_v7, %v3110_v1  ;;  %v3113_v40 = vpop.f32.mrb[46].mxu1  ;;  %v3050_v10 = vpop.f32.mrb[47].mxu0 }
 0x210   : > { %2271 = vst [vmem:[#allocation2 + $0x28] sm:$0xff] %v2255_v3  ;;  %v2115_v11 = vadd.f32 %v3048_v5, %v4068_v54  ;;  %v3051_v13 = vadd.f32 %v3050_v10, %v3049_v8  ;;  %v3114_v15 = vpop.f32.mrb[47].mxu1 }
 0x211   : > { %v3115_v16 = vadd.f32 %v3114_v15, %v3113_v40 }
 0x212   : > { %v2212_v17 = vadd.f32 %v3112_v9, %v2115_v11  ;;  %v2118_v18 = vadd.f32 %v3051_v13, %v4070_v56  ;;  %v958_v56 = vld [vmem:[#allocation2 + $0x40] sm:$0xff] }
 0x214   : > { %v2256_v21 = vadd.f32 %v2212_v17, %v956_v42  ;;  %v2215_v23 = vadd.f32 %v3115_v16, %v2118_v18  ;;  %v3052_v24 = vpop.f32.mrb[48].mxu0 }
 0x215   : > { %v3116_v25 = vpop.f32.mrb[48].mxu1  ;;  %v3053_v12 = vpop.f32.mrb[49].mxu0 }
 0x216   : > { %2272 = vst [vmem:[#allocation2 + $0x30] sm:$0xff] %v2256_v21  ;;  %v2257_v27 = vadd.f32 %v2215_v23, %v957_v19  ;;  %v3054_v29 = vadd.f32 %v3053_v12, %v3052_v24  ;;  %v3117_v30 = vpop.f32.mrb[49].mxu1  ;;  %v3055_v31 = vpop.f32.mrb[50].mxu0  ;;  %v963_v19 = vld [vmem:[#allocation2 + $0x68] sm:$0xff] }
 0x217   : > { %v3118_v14 = vadd.f32 %v3117_v30, %v3116_v25  ;;  %v3119_v54 = vpop.f32.mrb[50].mxu1  ;;  %v3056_v32 = vpop.f32.mrb[51].mxu0 }
 0x218   : > { %2273 = vst [vmem:[#allocation2 + $0x38] sm:$0xff] %v2257_v27  ;;  %v2123_v33 = vadd.f32 %v3054_v29, %v4072_v4  ;;  %v3057_v34 = vadd.f32 %v3056_v32, %v3055_v31  ;;  %v3120_v35 = vpop.f32.mrb[51].mxu1 }
 0x219   : > { %v3121_v37 = vadd.f32 %v3120_v35, %v3119_v54 }
 0x21a   : > { %v2220_v39 = vadd.f32 %v3118_v14, %v2123_v33  ;;  %v2126_v41 = vadd.f32 %v3057_v34, %v4074_v6  ;;  %v960_v6 = vld [vmem:[#allocation2 + $0x50] sm:$0xff] }
 0x21c   : > { %v2258_v44 = vadd.f32 %v2220_v39, %v958_v56  ;;  %v2223_v45 = vadd.f32 %v3121_v37, %v2126_v41  ;;  %v3058_v46 = vpop.f32.mrb[52].mxu0  ;;  %v965_v39 = vld [vmem:[#allocation2 + $0x78] sm:$0xff] }
 0x21d   : > { %v3122_v47 = vpop.f32.mrb[52].mxu1  ;;  %v3059_v48 = vpop.f32.mrb[53].mxu0 }
 0x21e   : > { %2274 = vst [vmem:[#allocation2 + $0x40] sm:$0xff] %v2258_v44  ;;  %v2259_v49 = vadd.f32 %v2223_v45, %v959_v43  ;;  %v3060_v26 = vadd.f32 %v3059_v48, %v3058_v46  ;;  %v3123_v50 = vpop.f32.mrb[53].mxu1  ;;  %v3061_v51 = vpop.f32.mrb[54].mxu0  ;;  %v2286_v45 = vld [vmem:[#allocation2] sm:$0xff] (!%p2797_p5)  ;;  %v2287_v46 = vld [vmem:[#allocation2 + $0x8] sm:$0xff] (!%p2797_p5)  ;;  %v2288_v48 = vld [vmem:[#allocation2 + $0x10] sm:$0xff] (!%p2797_p5) }
 0x21f   : > { %v3124_v53 = vadd.f32 %v3123_v50, %v3122_v47  ;;  %v3125_v4 = vpop.f32.mrb[54].mxu1  ;;  %v3062_v57 = vpop.f32.mrb[55].mxu0 }
 0x220   : > { %2275 = vst [vmem:[#allocation2 + $0x48] sm:$0xff] %v2259_v49  ;;  %v2131_v28 = vadd.f32 %v3060_v26, %v4076_v20  ;;  %v3063_v58 = vadd.f32 %v3062_v57, %v3061_v51  ;;  %v3126_v59 = vpop.f32.mrb[55].mxu1  ;;  %v2289_v49 = vld [vmem:[#allocation2 + $0x18] sm:$0xff] (!%p2797_p5)  ;;  %v2290_v26 = vld [vmem:[#allocation2 + $0x20] sm:$0xff] (!%p2797_p5)  ;;  %v2292_v57 = vld [vmem:[#allocation2 + $0x30] sm:$0xff] (!%p2797_p5) }
 0x221   : > { %v3127_v60 = vadd.f32 %v3126_v59, %v3125_v4 }
 0x222   : > { %v2228_v61 = vadd.f32 %v3124_v53, %v2131_v28  ;;  %v2134_v62 = vadd.f32 %v3063_v58, %v4078_v22  ;;  %v962_v22 = vld [vmem:[#allocation2 + $0x60] sm:$0xff]  ;;  %v2291_v53 = vld [vmem:[#allocation2 + $0x28] sm:$0xff] (!%p2797_p5)  ;;  %v2293_v28 = vld [vmem:[#allocation2 + $0x38] sm:$0xff] (!%p2797_p5) }
 0x224   : > { %v2260_v0 = vadd.f32 %v2228_v61, %v960_v6  ;;  %v2231_v1 = vadd.f32 %v3127_v60, %v2134_v62  ;;  %v3064_v2 = vpop.f32.mrb[56].mxu0 }
 0x225   : > { %v3128_v3 = vpop.f32.mrb[56].mxu1  ;;  %v3065_v5 = vpop.f32.mrb[57].mxu0  ;;  %v2294_v61 = vld [vmem:[#allocation2 + $0x40] sm:$0xff] (!%p2797_p5) }
 0x226   : > { %2276 = vst [vmem:[#allocation2 + $0x50] sm:$0xff] %v2260_v0  ;;  %v2261_v7 = vadd.f32 %v2231_v1, %v961_v63  ;;  %v3066_v8 = vadd.f32 %v3065_v5, %v3064_v2  ;;  %v3129_v9 = vpop.f32.mrb[57].mxu1  ;;  %v3067_v40 = vpop.f32.mrb[58].mxu0 }
 0x227   : > { %v3130_v10 = vadd.f32 %v3129_v9, %v3128_v3  ;;  %v3131_v20 = vpop.f32.mrb[58].mxu1  ;;  %v3068_v11 = vpop.f32.mrb[59].mxu0 }
 0x228   : > { %2277 = vst [vmem:[#allocation2 + $0x58] sm:$0xff] %v2261_v7  ;;  %v2139_v13 = vadd.f32 %v3066_v8, %v4080_v36  ;;  %v3069_v15 = vadd.f32 %v3068_v11, %v3067_v40  ;;  %v3132_v42 = vpop.f32.mrb[59].mxu1  ;;  %v2295_v8 = vld [vmem:[#allocation2 + $0x48] sm:$0xff] (!%p2797_p5) }
 0x229   : > { %v3133_v16 = vadd.f32 %v3132_v42, %v3131_v20 }
 0x22a   : > { %v2236_v17 = vadd.f32 %v3130_v10, %v2139_v13  ;;  %v2142_v18 = vadd.f32 %v3069_v15, %v4082_v38  ;;  %v964_v38 = vld [vmem:[#allocation2 + $0x70] sm:$0xff] }
 0x22c   : > { %v2262_v21 = vadd.f32 %v2236_v17, %v962_v22  ;;  %v2239_v23 = vadd.f32 %v3133_v16, %v2142_v18  ;;  %v3070_v24 = vpop.f32.mrb[60].mxu0 }
 0x22d   : > { %v3134_v25 = vpop.f32.mrb[60].mxu1  ;;  %v3071_v12 = vpop.f32.mrb[61].mxu0  ;;  %v2296_v9 = vld [vmem:[#allocation2 + $0x50] sm:$0xff] (!%p2797_p5) }
 0x22e   : > { %2278 = vst [vmem:[#allocation2 + $0x60] sm:$0xff] %v2262_v21  ;;  %v2263_v27 = vadd.f32 %v2239_v23, %v963_v19  ;;  %v3072_v29 = vadd.f32 %v3071_v12, %v3070_v24  ;;  %v3135_v30 = vpop.f32.mrb[61].mxu1  ;;  %v3073_v31 = vpop.f32.mrb[62].mxu0 }
 0x22f   : > { %v3136_v14 = vadd.f32 %v3135_v30, %v3134_v25  ;;  %v3137_v36 = vpop.f32.mrb[62].mxu1  ;;  %v3074_v54 = vpop.f32.mrb[63].mxu0  ;;  %v2297_v13 = vld [vmem:[#allocation2 + $0x58] sm:$0xff] (!%p2797_p5) }
 0x230   : > { %2279 = vst [vmem:[#allocation2 + $0x68] sm:$0xff] %v2263_v27  ;;  %v2147_v32 = vadd.f32 %v3072_v29, %v4084_v52  ;;  %v3075_v33 = vadd.f32 %v3074_v54, %v3073_v31  ;;  %v3138_v34 = vpop.f32.mrb[63].mxu1  ;;  %v4110_v52 = vld [vmem:[%s927_s4] ss:$0 sm:$0xff] (!%p2797_p5) }
 0x231   : > { %v3139_v35 = vadd.f32 %v3138_v34, %v3137_v36  ;;  %v2310_v47 = vadd.f32 (!%p2797_p5), %v4110_v52, %v2287_v46  ;;  %v2311_v50 = vadd.f32 (!%p2797_p5), %v4110_v52, %v2288_v48  ;;  %v2312_v51 = vadd.f32 (!%p2797_p5), %v4110_v52, %v2289_v49 }
 0x232   : > { %v2244_v56 = vadd.f32 %v3136_v14, %v2147_v32  ;;  %v2150_v37 = vadd.f32 %v3075_v33, %v4086_v55  ;;  %2285 = sbr.rel (%p2797_p5) target bundleno = 585 (0x249), region = 104  ;;  %v2309_v55 = vadd.f32 (!%p2797_p5), %v4110_v52, %v2286_v45  ;;  %v2313_v4 = vadd.f32 (!%p2797_p5), %v4110_v52, %v2290_v26 }
 0x233   : > { %v2326_v59 = vmul.f32 (!%p2797_p5), 0.2, %v2310_v47  ;;  %v2314_v6 = vadd.f32 (!%p2797_p5), %v4110_v52, %v2291_v53  ;;  %v2315_v60 = vadd.f32 (!%p2797_p5), %v4110_v52, %v2292_v57  ;;  %v2327_v62 = vmul.f32 (!%p2797_p5), 0.2, %v2311_v50 }
 0x234   : > { %v2264_v41 = vadd.f32 %v2244_v56, %v964_v38  ;;  %v2247_v43 = vadd.f32 %v3139_v35, %v2150_v37  ;;  %v2325_v58 = vmul.f32 (!%p2797_p5), 0.2, %v2309_v55  ;;  %v2328_v63 = vmul.f32 (!%p2797_p5), 0.2, %v2312_v51 }
 0x235   : > { %v2329_v0 = vmul.f32 (!%p2797_p5), 0.2, %v2313_v4  ;;  %v2316_v1 = vadd.f32 (!%p2797_p5), %v4110_v52, %v2293_v28  ;;  %v2342_v3 = vmax.f32 (!%p2797_p5), %v2310_v47, %v2326_v59  ;;  %v2330_v5 = vmul.f32 (!%p2797_p5), 0.2, %v2314_v6  ;;  %v2298_v15 = vld [vmem:[#allocation2 + $0x60] sm:$0xff] (!%p2797_p5) }
 0x236   : > { %2280 = vst [vmem:[#allocation2 + $0x70] sm:$0xff] %v2264_v41  ;;  %v2265_v44 = vadd.f32 %v2247_v43, %v965_v39  ;;  %v2341_v2 = vmax.f32 (!%p2797_p5), %v2309_v55, %v2325_v58  ;;  %v2331_v7 = vmul.f32 (!%p2797_p5), 0.2, %v2315_v60  ;;  %v2343_v40 = vmax.f32 (!%p2797_p5), %v2311_v50, %v2327_v62 }
 0x237   : > { %v2344_v10 = vmax.f32 (!%p2797_p5), %v2312_v51, %v2328_v63  ;;  %v2345_v20 = vmax.f32 (!%p2797_p5), %v2313_v4, %v2329_v0  ;;  %v2332_v11 = vmul.f32 (!%p2797_p5), 0.2, %v2316_v1  ;;  %v2346_v22 = vmax.f32 (!%p2797_p5), %v2314_v6, %v2330_v5  ;;  %v2299_v18 = vld [vmem:[#allocation2 + $0x68] sm:$0xff] (!%p2797_p5) }
 0x238   : > { %2281 = vst [vmem:[#allocation2 + $0x78] sm:$0xff] %v2265_v44  ;;  %v2840_v42 = vpack.c.bf16 (!%p2797_p5), %v2342_v3, %v2341_v2  ;;  %v2347_v16 = vmax.f32 (!%p2797_p5), %v2315_v60, %v2331_v7  ;;  %v2317_v17 = vadd.f32 (!%p2797_p5), %v4110_v52, %v2294_v61  ;;  %v2318_v23 = vadd.f32 (!%p2797_p5), %v4110_v52, %v2295_v8 }
 0x239   : > { %v2845_v19 = vpack.c.bf16 %v2344_v10, %v2343_v40  ;;  %v2348_v21 = vmax.f32 %v2316_v1, %v2332_v11  ;;  %v2319_v24 = vadd.f32 %v4110_v52, %v2296_v9  ;;  %v2850_v12 = vpack.c.bf16 %v2346_v22, %v2345_v20 }
 0x23a   : > { %2841 = vst [vmem:[%s3925_s25] sm:$0xff] %v2840_v42   ;;  %v2333_v27 = vmul.f32 0.2, %v2317_v17  ;;  %v2320_v29 = vadd.f32 %v4110_v52, %v2297_v13  ;;  %v2321_v30 = vadd.f32 %v4110_v52, %v2298_v15  ;;  %v2334_v36 = vmul.f32 0.2, %v2318_v23 }
 0x23b   : > { %2877 = vst [vmem:[%s3925_s25 + $0x8] sm:$0xff] %v2845_v19   ;;  %v2855_v14 = vpack.c.bf16 %v2348_v21, %v2347_v16  ;;  %v2335_v54 = vmul.f32 0.2, %v2319_v24  ;;  %v2322_v32 = vadd.f32 %v4110_v52, %v2299_v18  ;;  %2878 = vst [vmem:[%s3925_s25 + $0x10] sm:$0xff] %v2850_v12  }
 0x23c   : > { %v2349_v33 = vmax.f32 %v2317_v17, %v2333_v27  ;;  %v2336_v34 = vmul.f32 0.2, %v2320_v29  ;;  %v2337_v38 = vmul.f32 0.2, %v2321_v30  ;;  %v2350_v56 = vmax.f32 %v2318_v23, %v2334_v36 }
 0x23d   : > { %v2300_v25 = vld [vmem:[#allocation2 + $0x70] sm:$0xff]  ;;  %2879 = vst [vmem:[%s3925_s25 + $0x18] sm:$0xff] %v2855_v14   ;;  %v2351_v37 = vmax.f32 %v2319_v24, %v2335_v54  ;;  %v2338_v39 = vmul.f32 0.2, %v2322_v32 }
 0x23e   : > { %v2323_v35 = vadd.f32 %v4110_v52, %v2300_v25  ;;  %v2352_v43 = vmax.f32 %v2320_v29, %v2336_v34  ;;  %v2353_v44 = vmax.f32 %v2321_v30, %v2337_v38  ;;  %v2860_v46 = vpack.c.bf16 %v2350_v56, %v2349_v33 }
 0x23f   : > { %v2301_v31 = vld [vmem:[#allocation2 + $0x78] sm:$0xff]  ;;  %v2354_v55 = vmax.f32 %v2322_v32, %v2338_v39 }
 0x240   : > { %v2324_v41 = vadd.f32 %v4110_v52, %v2301_v31  ;;  %v2339_v45 = vmul.f32 0.2, %v2323_v35  ;;  %v2865_v48 = vpack.c.bf16 %v2352_v43, %v2351_v37  ;;  %2880 = vst [vmem:[%s3925_s25 + $0x20] sm:$0xff] %v2860_v46  }
 0x241   : > { %v2870_v26 = vpack.c.bf16 %v2354_v55, %v2353_v44 }
 0x242   : > { %v2340_v47 = vmul.f32 0.2, %v2324_v41  ;;  %v2355_v49 = vmax.f32 %v2323_v35, %v2339_v45  ;;  %2881 = vst [vmem:[%s3925_s25 + $0x28] sm:$0xff] %v2865_v48  }
 0x243   : > { %2882 = vst [vmem:[%s3925_s25 + $0x30] sm:$0xff] %v2870_v26  }
 0x244   : > { %v2356_v50 = vmax.f32 %v2324_v41, %v2340_v47 }
 0x246   : > { %v2875_v51 = vpack.c.bf16 %v2356_v50, %v2355_v49 }
 0x248   : > { %2883 = vst [vmem:[%s3925_s25 + $0x38] sm:$0xff] %v2875_v51  }
 0x249 PF: > { %2443 = sbr.rel (!%p3496_p12) target bundleno = 597 (0x255), region = 108  ;;  %s2816_s14 = sshll.u32 (%p3496_p12), %s3367_s19, 2  ;;  %v2464_v52 = vld [vmem:[%s3925_s25] sm:$0xf] (%p3496_p12)  ;;  %v2466_v53 = vld [vmem:[%s3925_s25 + $0x4] sm:$0xf] (%p3496_p12) }
 0x24a   : > { %s2448_s5 = scalar_lea.vmem (%p3496_p12), %s4194_s3, %s2816_s14  ;;  %v2468_v4 = vld [vmem:[%s3925_s25 + $0x8] sm:$0xf] (%p3496_p12)  ;;  %v2470_v57 = vld [vmem:[%s3925_s25 + $0xc] sm:$0xf] (%p3496_p12)  ;;  %v2472_v28 = vld [vmem:[%s3925_s25 + $0x10] sm:$0xf] (%p3496_p12) }
 0x24b   : > { %2465 = vst [vmem:[%s2448_s5] sm:$0xf] (%p3496_p12), %v2464_v52  ;;  %2467 = vst [vmem:[%s2448_s5 + $0x8] sm:$0xf] (%p3496_p12), %v2466_v53  ;;  %v2474_v58 = vld [vmem:[%s3925_s25 + $0x14] sm:$0xf] (%p3496_p12) }
 0x24c   : > { %2469 = vst [vmem:[%s2448_s5 + $0x10] sm:$0xf] (%p3496_p12), %v2468_v4  ;;  %2471 = vst [vmem:[%s2448_s5 + $0x18] sm:$0xf] (%p3496_p12), %v2470_v57  ;;  %v2476_v59 = vld [vmem:[%s3925_s25 + $0x18] sm:$0xf] (%p3496_p12) }
 0x24d   : > { %2473 = vst [vmem:[%s2448_s5 + $0x20] sm:$0xf] (%p3496_p12), %v2472_v28  ;;  %v2478_v6 = vld [vmem:[%s3925_s25 + $0x1c] sm:$0xf] (%p3496_p12)  ;;  %2475 = vst [vmem:[%s2448_s5 + $0x28] sm:$0xf] (%p3496_p12), %v2474_v58 }
 0x24e   : > { %2477 = vst [vmem:[%s2448_s5 + $0x30] sm:$0xf] (%p3496_p12), %v2476_v59  ;;  %2479 = vst [vmem:[%s2448_s5 + $0x38] sm:$0xf] (%p3496_p12), %v2478_v6  ;;  %v2480_v60 = vld [vmem:[%s3925_s25 + $0x20] sm:$0xf] (%p3496_p12) }
 0x24f   : > { %v2482_v61 = vld [vmem:[%s3925_s25 + $0x24] sm:$0xf] (%p3496_p12)  ;;  %v2484_v62 = vld [vmem:[%s3925_s25 + $0x28] sm:$0xf] (%p3496_p12)  ;;  %2481 = vst [vmem:[%s2448_s5 + $0x40] sm:$0xf] (%p3496_p12), %v2480_v60 }
 0x250   : > { %2483 = vst [vmem:[%s2448_s5 + $0x48] sm:$0xf] %v2482_v61  ;;  %2485 = vst [vmem:[%s2448_s5 + $0x50] sm:$0xf] %v2484_v62  ;;  %v2486_v63 = vld [vmem:[%s3925_s25 + $0x2c] sm:$0xf] }
 0x251   : > { %v2488_v0 = vld [vmem:[%s3925_s25 + $0x30] sm:$0xf]  ;;  %v2490_v1 = vld [vmem:[%s3925_s25 + $0x34] sm:$0xf]  ;;  %2487 = vst [vmem:[%s2448_s5 + $0x58] sm:$0xf] %v2486_v63 }
 0x252   : > { %2489 = vst [vmem:[%s2448_s5 + $0x60] sm:$0xf] %v2488_v0  ;;  %2491 = vst [vmem:[%s2448_s5 + $0x68] sm:$0xf] %v2490_v1  ;;  %v2492_v2 = vld [vmem:[%s3925_s25 + $0x38] sm:$0xf] }
 0x253   : > { %v2494_v3 = vld [vmem:[%s3925_s25 + $0x3c] sm:$0xf]  ;;  %2493 = vst [vmem:[%s2448_s5 + $0x70] sm:$0xf] %v2492_v2 }
 0x254   : > { %2495 = vst [vmem:[%s2448_s5 + $0x78] sm:$0xf] %v2494_v3 }
 0x255 PF: > { %s13_s22 = sadd.s32 1, %s3379_s22   ;;  %s4204_s10 = sld [smem:[#allocation6_spill]] }
 0x256   : > { %p10_p6 = scmp.ge.s32.totalorder %s13_s22, 6   ;;  %s4205_s12 = smov %s3343_s13 }
 0x257   : > { %s4206_s13 = smov %s3494_s9  ;;  %s4207_s14 = smov %s3351_s15 }
 0x258   : > { %s4208_s15 = smov %s3491_s8  ;;  %s4209_s16 = smov %s3359_s17 }
 0x259   : > { %s4210_s17 = smov %s3477_s30  ;;  %s4211_s18 = smov %s3371_s20 }
 0x25a   : > { %s4212_s19 = smov %s3375_s21  ;;  %s4213_s20 = smov %s4216_s24 }
 0x25b   : > { %s4214_s21 = smov %s4204_s10  ;;  %12 = sbr.rel (!%p10_p6) target bundleno = 9 (0x9), region = 191 }

// kernel: fc_discriminator_forward.8
= control target key start
LH: loop header
LB: loop body
LE: loop exit
PB: predicated region body
PF: predicated region fallthrough
CT: control target
= control target key end

     0   :  { %s3403_s0 = inlined_call_operand.vmem [shape: bf16[32,4096], index: 0, kind: input, shape index: {}]   ;;  %s3404_s1 = inlined_call_operand.vmem [shape: bf16[4096,512], index: 1, kind: input, shape index: {}]   ;;  %s3405_s2 = inlined_call_operand.vmem [shape: f32[1,512], index: 2, kind: input, shape index: {}]   ;;  %s3406_s3 = inlined_call_operand.vmem [shape: bf16[32,512], index: 3, kind: output, shape index: {}]  }
   0x1   :  { %3408 = sst [smem:[#allocation7_spill]] %s3403_s0 }
   0x2   :  { %3409 = sst [smem:[#allocation8_spill]] %s3404_s1 }
   0x3   :  { %s2779_s12 = smov 0   ;;  %s2781_s13 = smov 0  }
   0x4   :  { %s2783_s14 = smov 0   ;;  %s2785_s15 = smov 0  }
   0x5   :  { %s2787_s16 = smov 0   ;;  %s2789_s17 = smov 0  }
   0x6   :  { %s2791_s18 = smov 0   ;;  %s2793_s19 = smov 0  }
   0x7   :  { %s2795_s20 = smov 0   ;;  %s2797_s21 = smov 0  }
   0x8   :  { %s2799_s22 = smov 0  }
   0x9 LB: > { %s2186_s23 = sadd.s32 4294967295, %s2756_s22   ;;  %s25_s24 = sadd.s32 1, %s2748_s20  ;;  %s2756_s22 = sphi %s2799_s22, %s13_s22   ;;  %s2752_s21 = sphi %s2797_s21, %s3426_s21   ;;  %s2748_s20 = sphi %s2795_s20, %s3425_s20   ;;  %s2744_s19 = sphi %s2793_s19, %s3424_s19   ;;  %s2740_s18 = sphi %s2791_s18, %s3423_s18   ;;  %s2736_s17 = sphi %s2789_s17, %s3422_s17   ;;  %s2732_s16 = sphi %s2787_s16, %s3421_s16   ;;  %s2728_s15 = sphi %s2785_s15, %s3420_s15   ;;  %s2724_s14 = sphi %s2783_s14, %s3419_s14   ;;  %s2720_s13 = sphi %s2781_s13, %s3418_s13   ;;  %s2716_s12 = sphi %s2779_s12, %s3417_s12  }
   0xa   : > { %p26_p0 = scmp.ge.s32.totalorder %s25_s24, 4  ;;  %s28_s25 = sadd.s32 1, %s2752_s21 }
   0xb   : > { %s41_s26 = sadd.s32 1, %s2736_s17  ;;  %p48_p1 = scmp.ne.s32.totalorder %s2736_s17, %s2732_s16 }
   0xc   : > { %s3428_s24 = smov (%p26_p0, %s25_s24), 0  ;;  %s3430_s25 = smov (!%p26_p0, %s28_s25), %s2752_s21 }
   0xd   : > { %s37_s27 = ssub.s32 %s2748_s20, %s3428_s24  ;;  %p49_p2 = scmp.eq.s32.totalorder %s2756_s22, 0 }
   0xe   : > { %p30_p3 = scmp.ge.s32.totalorder %s3430_s25, 2  ;;  %p39_p4 = scmp.eq.s32.totalorder %s37_s27, 0 }
   0xf   : > { %p2846_p5 = por %p49_p2, %p48_p1  ;;  %s69_s29 = sadd.s32 1, %s2728_s15 }
  0x10   : > { %s3432_s25 = smov (%p30_p3, %s3430_s25), 0  ;;  %p76_p6 = scmp.ne.s32.totalorder %s2728_s15, %s2724_s14 }
  0x11   : > { %3411 = sst [smem:[#allocation6_spill]] %s3432_s25  ;;  %s65_s4 = ssub.s32 %s2752_s21, %s3432_s25 }
  0x12   : > { %s2854_s30 = scalar_select %p39_p4, %s2736_s17, %s41_s26  }
  0x13   : > { %s66_s5 = sor.u32 %s65_s4, %s37_s27  ;;  %p121_p7 = scmp.eq.s32.totalorder %s65_s4, 0 }
  0x14   : > { %p67_p8 = scmp.eq.s32.totalorder %s66_s5, 0  ;;  %p2860_p9 = por %p76_p6, %p49_p2 }
  0x15   : > { %s123_s7 = sadd.s32 1, %s2720_s13  ;;  %p133_p10 = scmp.ne.s32.totalorder %s2720_s13, %s2716_s12 }
  0x16   : > { %s2868_s8 = scalar_select %p67_p8, %s2728_s15, %s69_s29  }
  0x17   : > { %s2871_s9 = scalar_select %p121_p7, %s2720_s13, %s123_s7  }
  0x18   : > { %p134_p11 = scmp.eq.s32.totalorder %s2186_s23, 7  ;;  %p2189_p13 = scmp.ge.s32.totalorder %s2756_s22, 8 }
  0x1a   : > { %p2873_p12 = por %p134_p11, %p133_p10  ;;  %156 = sbr.rel (%p2189_p13) target bundleno = 125 (0x7d), region = 16 }
  0x21   : > { %159 = sbr.rel (!%p2846_p5) target bundleno = 51 (0x33), region = 20  ;;  %s161_s11 = sand.u32 (%p2846_p5), 1, %s2736_s17  }
  0x22   : > { %s2358_s26 = sshll.u32 (%p2846_p5), %s2748_s20, 5  ;;  %s2190_s27 = sshll.u32 (%p2846_p5), %s161_s11, 7 }
  0x23   : > { %s3414_s0 = sld [smem:[#allocation7_spill]] (%p2846_p5)  ;;  %s163_s23 = scalar_lea.vmem (%p2846_p5), [#allocation3], %s2190_s27 }
  0x29   : > { %s2885_s5 = scalar_lea.vmem %s3414_s0, %s2358_s26 }
  0x2a   : > { %v182_v0 = vld [vmem:[%s2885_s5] sm:$0xff]  ;;  %v184_v1 = vld [vmem:[%s2885_s5 + $0x8] sm:$0xff]  ;;  %v186_v2 = vld [vmem:[%s2885_s5 + $0x10] sm:$0xff] }
  0x2b   : > { %183 = vst [vmem:[%s163_s23] sm:$0xff] %v182_v0  ;;  %185 = vst [vmem:[%s163_s23 + $0x8] sm:$0xff] %v184_v1  ;;  %v188_v3 = vld [vmem:[%s2885_s5 + $0x18] sm:$0xff]  ;;  %v190_v4 = vld [vmem:[%s2885_s5 + $0x80] sm:$0xff] }
  0x2c   : > { %187 = vst [vmem:[%s163_s23 + $0x10] sm:$0xff] %v186_v2  ;;  %v192_v5 = vld [vmem:[%s2885_s5 + $0x88] sm:$0xff]  ;;  %189 = vst [vmem:[%s163_s23 + $0x18] sm:$0xff] %v188_v3  ;;  %v194_v6 = vld [vmem:[%s2885_s5 + $0x90] sm:$0xff] }
  0x2d   : > { %191 = vst [vmem:[%s163_s23 + $0x20] sm:$0xff] %v190_v4  ;;  %193 = vst [vmem:[%s163_s23 + $0x28] sm:$0xff] %v192_v5  ;;  %v196_v7 = vld [vmem:[%s2885_s5 + $0x98] sm:$0xff]  ;;  %v198_v8 = vld [vmem:[%s2885_s5 + $0x100] sm:$0xff] }
  0x2e   : > { %195 = vst [vmem:[%s163_s23 + $0x30] sm:$0xff] %v194_v6  ;;  %197 = vst [vmem:[%s163_s23 + $0x38] sm:$0xff] %v196_v7  ;;  %v200_v9 = vld [vmem:[%s2885_s5 + $0x108] sm:$0xff]  ;;  %v202_v10 = vld [vmem:[%s2885_s5 + $0x110] sm:$0xff] }
  0x2f   : > { %199 = vst [vmem:[%s163_s23 + $0x40] sm:$0xff] %v198_v8  ;;  %v204_v11 = vld [vmem:[%s2885_s5 + $0x118] sm:$0xff]  ;;  %201 = vst [vmem:[%s163_s23 + $0x48] sm:$0xff] %v200_v9  ;;  %v206_v12 = vld [vmem:[%s2885_s5 + $0x180] sm:$0xff] }
  0x30   : > { %203 = vst [vmem:[%s163_s23 + $0x50] sm:$0xff] %v202_v10  ;;  %205 = vst [vmem:[%s163_s23 + $0x58] sm:$0xff] %v204_v11  ;;  %v208_v13 = vld [vmem:[%s2885_s5 + $0x188] sm:$0xff]  ;;  %v210_v14 = vld [vmem:[%s2885_s5 + $0x190] sm:$0xff] }
  0x31   : > { %207 = vst [vmem:[%s163_s23 + $0x60] sm:$0xff] %v206_v12  ;;  %209 = vst [vmem:[%s163_s23 + $0x68] sm:$0xff] %v208_v13  ;;  %v212_v15 = vld [vmem:[%s2885_s5 + $0x198] sm:$0xff] }
  0x32   : > { %211 = vst [vmem:[%s163_s23 + $0x70] sm:$0xff] %v210_v14  ;;  %213 = vst [vmem:[%s163_s23 + $0x78] sm:$0xff] %v212_v15 }
  0x33 PF: > { %219 = sbr.rel (!%p2860_p9) target bundleno = 125 (0x7d), region = 43  ;;  %s221_s28 = sand.u32 (%p2860_p9), 1, %s2728_s15  }
  0x34   : > { %s2195_s7 = sshll.u32 (%p2860_p9), %s2752_s21, 1  ;;  %s2193_s11 = sshll.u32 (%p2860_p9), %s221_s28, 10 }
  0x35   : > { %s2359_s26 = sshll.u32 (%p2860_p9), %s2748_s20, 9  ;;  %s3415_s1 = sld [smem:[#allocation8_spill]] (%p2860_p9) }
  0x36   : > { %s227_s27 = sadd.s32 (%p2860_p9), %s2359_s26, %s2195_s7  ;;  %s2916_s6 = scalar_lea.vmem (%p2860_p9), [#allocation4], %s2193_s11 }
  0x37   : > { %s2197_s29 = sshll.u32 (%p2860_p9), %s227_s27, 2 }
  0x3b   : > { %s2911_s25 = scalar_lea.vmem %s3415_s1, %s2197_s29 }
  0x3c   : > { %v511_v16 = vld [vmem:[%s2911_s25] sm:$0xff]  ;;  %v513_v17 = vld [vmem:[%s2911_s25 + $0x10] sm:$0xff] }
  0x3d   : > { %v515_v18 = vld [vmem:[%s2911_s25 + $0x20] sm:$0xff]  ;;  %512 = vst [vmem:[%s2916_s6] sm:$0xff] %v511_v16  ;;  %514 = vst [vmem:[%s2916_s6 + $0x8] sm:$0xff] %v513_v17  ;;  %v517_v19 = vld [vmem:[%s2911_s25 + $0x30] sm:$0xff] }
  0x3e   : > { %516 = vst [vmem:[%s2916_s6 + $0x10] sm:$0xff] %v515_v18  ;;  %v519_v20 = vld [vmem:[%s2911_s25 + $0x40] sm:$0xff]  ;;  %v521_v21 = vld [vmem:[%s2911_s25 + $0x50] sm:$0xff]  ;;  %518 = vst [vmem:[%s2916_s6 + $0x18] sm:$0xff] %v517_v19 }
  0x3f   : > { %520 = vst [vmem:[%s2916_s6 + $0x20] sm:$0xff] %v519_v20  ;;  %522 = vst [vmem:[%s2916_s6 + $0x28] sm:$0xff] %v521_v21  ;;  %v523_v22 = vld [vmem:[%s2911_s25 + $0x60] sm:$0xff]  ;;  %v525_v23 = vld [vmem:[%s2911_s25 + $0x70] sm:$0xff] }
  0x40   : > { %v527_v24 = vld [vmem:[%s2911_s25 + $0x80] sm:$0xff]  ;;  %524 = vst [vmem:[%s2916_s6 + $0x30] sm:$0xff] %v523_v22  ;;  %526 = vst [vmem:[%s2916_s6 + $0x38] sm:$0xff] %v525_v23  ;;  %v529_v25 = vld [vmem:[%s2911_s25 + $0x90] sm:$0xff] }
  0x41   : > { %528 = vst [vmem:[%s2916_s6 + $0x40] sm:$0xff] %v527_v24  ;;  %v531_v26 = vld [vmem:[%s2911_s25 + $0xa0] sm:$0xff]  ;;  %v533_v27 = vld [vmem:[%s2911_s25 + $0xb0] sm:$0xff]  ;;  %530 = vst [vmem:[%s2916_s6 + $0x48] sm:$0xff] %v529_v25 }
  0x42   : > { %532 = vst [vmem:[%s2916_s6 + $0x50] sm:$0xff] %v531_v26  ;;  %534 = vst [vmem:[%s2916_s6 + $0x58] sm:$0xff] %v533_v27  ;;  %v535_v28 = vld [vmem:[%s2911_s25 + $0xc0] sm:$0xff]  ;;  %v537_v29 = vld [vmem:[%s2911_s25 + $0xd0] sm:$0xff] }
  0x43   : > { %v539_v30 = vld [vmem:[%s2911_s25 + $0xe0] sm:$0xff]  ;;  %536 = vst [vmem:[%s2916_s6 + $0x60] sm:$0xff] %v535_v28  ;;  %538 = vst [vmem:[%s2916_s6 + $0x68] sm:$0xff] %v537_v29  ;;  %v541_v31 = vld [vmem:[%s2911_s25 + $0xf0] sm:$0xff] }
  0x44   : > { %540 = vst [vmem:[%s2916_s6 + $0x70] sm:$0xff] %v539_v30  ;;  %v543_v32 = vld [vmem:[%s2911_s25 + $0x100] sm:$0xff]  ;;  %v545_v33 = vld [vmem:[%s2911_s25 + $0x110] sm:$0xff]  ;;  %542 = vst [vmem:[%s2916_s6 + $0x78] sm:$0xff] %v541_v31 }
  0x45   : > { %544 = vst [vmem:[%s2916_s6 + $0x80] sm:$0xff] %v543_v32  ;;  %546 = vst [vmem:[%s2916_s6 + $0x88] sm:$0xff] %v545_v33  ;;  %v547_v34 = vld [vmem:[%s2911_s25 + $0x120] sm:$0xff]  ;;  %v549_v35 = vld [vmem:[%s2911_s25 + $0x130] sm:$0xff] }
  0x46   : > { %v551_v36 = vld [vmem:[%s2911_s25 + $0x140] sm:$0xff]  ;;  %548 = vst [vmem:[%s2916_s6 + $0x90] sm:$0xff] %v547_v34  ;;  %550 = vst [vmem:[%s2916_s6 + $0x98] sm:$0xff] %v549_v35  ;;  %v553_v37 = vld [vmem:[%s2911_s25 + $0x150] sm:$0xff] }
  0x47   : > { %552 = vst [vmem:[%s2916_s6 + $0xa0] sm:$0xff] %v551_v36  ;;  %v555_v38 = vld [vmem:[%s2911_s25 + $0x160] sm:$0xff]  ;;  %v557_v39 = vld [vmem:[%s2911_s25 + $0x170] sm:$0xff]  ;;  %554 = vst [vmem:[%s2916_s6 + $0xa8] sm:$0xff] %v553_v37 }
  0x48   : > { %556 = vst [vmem:[%s2916_s6 + $0xb0] sm:$0xff] %v555_v38  ;;  %558 = vst [vmem:[%s2916_s6 + $0xb8] sm:$0xff] %v557_v39  ;;  %v559_v40 = vld [vmem:[%s2911_s25 + $0x180] sm:$0xff]  ;;  %v561_v41 = vld [vmem:[%s2911_s25 + $0x190] sm:$0xff] }
  0x49   : > { %v563_v42 = vld [vmem:[%s2911_s25 + $0x1a0] sm:$0xff]  ;;  %560 = vst [vmem:[%s2916_s6 + $0xc0] sm:$0xff] %v559_v40  ;;  %562 = vst [vmem:[%s2916_s6 + $0xc8] sm:$0xff] %v561_v41  ;;  %v565_v43 = vld [vmem:[%s2911_s25 + $0x1b0] sm:$0xff] }
  0x4a   : > { %564 = vst [vmem:[%s2916_s6 + $0xd0] sm:$0xff] %v563_v42  ;;  %v567_v44 = vld [vmem:[%s2911_s25 + $0x1c0] sm:$0xff]  ;;  %v569_v45 = vld [vmem:[%s2911_s25 + $0x1d0] sm:$0xff]  ;;  %566 = vst [vmem:[%s2916_s6 + $0xd8] sm:$0xff] %v565_v43 }
  0x4b   : > { %568 = vst [vmem:[%s2916_s6 + $0xe0] sm:$0xff] %v567_v44  ;;  %570 = vst [vmem:[%s2916_s6 + $0xe8] sm:$0xff] %v569_v45  ;;  %v571_v46 = vld [vmem:[%s2911_s25 + $0x1e0] sm:$0xff]  ;;  %v573_v47 = vld [vmem:[%s2911_s25 + $0x1f0] sm:$0xff] }
  0x4c   : > { %v575_v48 = vld [vmem:[%s2911_s25 + $0x200] sm:$0xff]  ;;  %572 = vst [vmem:[%s2916_s6 + $0xf0] sm:$0xff] %v571_v46  ;;  %574 = vst [vmem:[%s2916_s6 + $0xf8] sm:$0xff] %v573_v47  ;;  %v577_v49 = vld [vmem:[%s2911_s25 + $0x210] sm:$0xff] }
  0x4d   : > { %576 = vst [vmem:[%s2916_s6 + $0x100] sm:$0xff] %v575_v48  ;;  %v579_v50 = vld [vmem:[%s2911_s25 + $0x220] sm:$0xff]  ;;  %v581_v51 = vld [vmem:[%s2911_s25 + $0x230] sm:$0xff]  ;;  %578 = vst [vmem:[%s2916_s6 + $0x108] sm:$0xff] %v577_v49 }
  0x4e   : > { %580 = vst [vmem:[%s2916_s6 + $0x110] sm:$0xff] %v579_v50  ;;  %582 = vst [vmem:[%s2916_s6 + $0x118] sm:$0xff] %v581_v51  ;;  %v583_v52 = vld [vmem:[%s2911_s25 + $0x240] sm:$0xff]  ;;  %v585_v53 = vld [vmem:[%s2911_s25 + $0x250] sm:$0xff] }
  0x4f   : > { %v587_v54 = vld [vmem:[%s2911_s25 + $0x260] sm:$0xff]  ;;  %584 = vst [vmem:[%s2916_s6 + $0x120] sm:$0xff] %v583_v52  ;;  %586 = vst [vmem:[%s2916_s6 + $0x128] sm:$0xff] %v585_v53  ;;  %v589_v55 = vld [vmem:[%s2911_s25 + $0x270] sm:$0xff] }
  0x50   : > { %588 = vst [vmem:[%s2916_s6 + $0x130] sm:$0xff] %v587_v54  ;;  %v591_v56 = vld [vmem:[%s2911_s25 + $0x280] sm:$0xff]  ;;  %v593_v57 = vld [vmem:[%s2911_s25 + $0x290] sm:$0xff]  ;;  %590 = vst [vmem:[%s2916_s6 + $0x138] sm:$0xff] %v589_v55 }
  0x51   : > { %592 = vst [vmem:[%s2916_s6 + $0x140] sm:$0xff] %v591_v56  ;;  %594 = vst [vmem:[%s2916_s6 + $0x148] sm:$0xff] %v593_v57  ;;  %v595_v58 = vld [vmem:[%s2911_s25 + $0x2a0] sm:$0xff]  ;;  %v597_v59 = vld [vmem:[%s2911_s25 + $0x2b0] sm:$0xff] }
  0x52   : > { %v599_v60 = vld [vmem:[%s2911_s25 + $0x2c0] sm:$0xff]  ;;  %596 = vst [vmem:[%s2916_s6 + $0x150] sm:$0xff] %v595_v58  ;;  %598 = vst [vmem:[%s2916_s6 + $0x158] sm:$0xff] %v597_v59  ;;  %v601_v61 = vld [vmem:[%s2911_s25 + $0x2d0] sm:$0xff] }
  0x53   : > { %600 = vst [vmem:[%s2916_s6 + $0x160] sm:$0xff] %v599_v60  ;;  %v603_v62 = vld [vmem:[%s2911_s25 + $0x2e0] sm:$0xff]  ;;  %v605_v63 = vld [vmem:[%s2911_s25 + $0x2f0] sm:$0xff]  ;;  %602 = vst [vmem:[%s2916_s6 + $0x168] sm:$0xff] %v601_v61 }
  0x54   : > { %604 = vst [vmem:[%s2916_s6 + $0x170] sm:$0xff] %v603_v62  ;;  %606 = vst [vmem:[%s2916_s6 + $0x178] sm:$0xff] %v605_v63  ;;  %v607_v0 = vld [vmem:[%s2911_s25 + $0x300] sm:$0xff]  ;;  %v609_v1 = vld [vmem:[%s2911_s25 + $0x310] sm:$0xff] }
  0x55   : > { %v611_v2 = vld [vmem:[%s2911_s25 + $0x320] sm:$0xff]  ;;  %608 = vst [vmem:[%s2916_s6 + $0x180] sm:$0xff] %v607_v0  ;;  %610 = vst [vmem:[%s2916_s6 + $0x188] sm:$0xff] %v609_v1  ;;  %v613_v3 = vld [vmem:[%s2911_s25 + $0x330] sm:$0xff] }
  0x56   : > { %612 = vst [vmem:[%s2916_s6 + $0x190] sm:$0xff] %v611_v2  ;;  %v615_v4 = vld [vmem:[%s2911_s25 + $0x340] sm:$0xff]  ;;  %v617_v5 = vld [vmem:[%s2911_s25 + $0x350] sm:$0xff]  ;;  %614 = vst [vmem:[%s2916_s6 + $0x198] sm:$0xff] %v613_v3 }
  0x57   : > { %616 = vst [vmem:[%s2916_s6 + $0x1a0] sm:$0xff] %v615_v4  ;;  %618 = vst [vmem:[%s2916_s6 + $0x1a8] sm:$0xff] %v617_v5  ;;  %v619_v6 = vld [vmem:[%s2911_s25 + $0x360] sm:$0xff]  ;;  %v621_v7 = vld [vmem:[%s2911_s25 + $0x370] sm:$0xff] }
  0x58   : > { %v623_v8 = vld [vmem:[%s2911_s25 + $0x380] sm:$0xff]  ;;  %620 = vst [vmem:[%s2916_s6 + $0x1b0] sm:$0xff] %v619_v6  ;;  %622 = vst [vmem:[%s2916_s6 + $0x1b8] sm:$0xff] %v621_v7  ;;  %v625_v9 = vld [vmem:[%s2911_s25 + $0x390] sm:$0xff] }
  0x59   : > { %624 = vst [vmem:[%s2916_s6 + $0x1c0] sm:$0xff] %v623_v8  ;;  %v627_v10 = vld [vmem:[%s2911_s25 + $0x3a0] sm:$0xff]  ;;  %v629_v11 = vld [vmem:[%s2911_s25 + $0x3b0] sm:$0xff]  ;;  %626 = vst [vmem:[%s2916_s6 + $0x1c8] sm:$0xff] %v625_v9 }
  0x5a   : > { %628 = vst [vmem:[%s2916_s6 + $0x1d0] sm:$0xff] %v627_v10  ;;  %630 = vst [vmem:[%s2916_s6 + $0x1d8] sm:$0xff] %v629_v11  ;;  %v631_v12 = vld [vmem:[%s2911_s25 + $0x3c0] sm:$0xff]  ;;  %v633_v13 = vld [vmem:[%s2911_s25 + $0x3d0] sm:$0xff] }
  0x5b   : > { %v635_v14 = vld [vmem:[%s2911_s25 + $0x3e0] sm:$0xff]  ;;  %632 = vst [vmem:[%s2916_s6 + $0x1e0] sm:$0xff] %v631_v12  ;;  %634 = vst [vmem:[%s2916_s6 + $0x1e8] sm:$0xff] %v633_v13  ;;  %v637_v15 = vld [vmem:[%s2911_s25 + $0x3f0] sm:$0xff] }
  0x5c   : > { %636 = vst [vmem:[%s2916_s6 + $0x1f0] sm:$0xff] %v635_v14  ;;  %v639_v16 = vld [vmem:[%s2911_s25 + $0x400] sm:$0xff]  ;;  %v641_v17 = vld [vmem:[%s2911_s25 + $0x410] sm:$0xff]  ;;  %638 = vst [vmem:[%s2916_s6 + $0x1f8] sm:$0xff] %v637_v15 }
  0x5d   : > { %640 = vst [vmem:[%s2916_s6 + $0x200] sm:$0xff] %v639_v16  ;;  %642 = vst [vmem:[%s2916_s6 + $0x208] sm:$0xff] %v641_v17  ;;  %v643_v18 = vld [vmem:[%s2911_s25 + $0x420] sm:$0xff]  ;;  %v645_v19 = vld [vmem:[%s2911_s25 + $0x430] sm:$0xff] }
  0x5e   : > { %v647_v20 = vld [vmem:[%s2911_s25 + $0x440] sm:$0xff]  ;;  %644 = vst [vmem:[%s2916_s6 + $0x210] sm:$0xff] %v643_v18  ;;  %646 = vst [vmem:[%s2916_s6 + $0x218] sm:$0xff] %v645_v19  ;;  %v649_v21 = vld [vmem:[%s2911_s25 + $0x450] sm:$0xff] }
  0x5f   : > { %648 = vst [vmem:[%s2916_s6 + $0x220] sm:$0xff] %v647_v20  ;;  %v651_v22 = vld [vmem:[%s2911_s25 + $0x460] sm:$0xff]  ;;  %v653_v23 = vld [vmem:[%s2911_s25 + $0x470] sm:$0xff]  ;;  %650 = vst [vmem:[%s2916_s6 + $0x228] sm:$0xff] %v649_v21 }
  0x60   : > { %652 = vst [vmem:[%s2916_s6 + $0x230] sm:$0xff] %v651_v22  ;;  %654 = vst [vmem:[%s2916_s6 + $0x238] sm:$0xff] %v653_v23  ;;  %v655_v24 = vld [vmem:[%s2911_s25 + $0x480] sm:$0xff]  ;;  %v657_v25 = vld [vmem:[%s2911_s25 + $0x490] sm:$0xff] }
  0x61   : > { %v659_v26 = vld [vmem:[%s2911_s25 + $0x4a0] sm:$0xff]  ;;  %656 = vst [vmem:[%s2916_s6 + $0x240] sm:$0xff] %v655_v24  ;;  %658 = vst [vmem:[%s2916_s6 + $0x248] sm:$0xff] %v657_v25  ;;  %v661_v27 = vld [vmem:[%s2911_s25 + $0x4b0] sm:$0xff] }
  0x62   : > { %660 = vst [vmem:[%s2916_s6 + $0x250] sm:$0xff] %v659_v26  ;;  %v663_v28 = vld [vmem:[%s2911_s25 + $0x4c0] sm:$0xff]  ;;  %v665_v29 = vld [vmem:[%s2911_s25 + $0x4d0] sm:$0xff]  ;;  %662 = vst [vmem:[%s2916_s6 + $0x258] sm:$0xff] %v661_v27 }
  0x63   : > { %664 = vst [vmem:[%s2916_s6 + $0x260] sm:$0xff] %v663_v28  ;;  %666 = vst [vmem:[%s2916_s6 + $0x268] sm:$0xff] %v665_v29  ;;  %v667_v30 = vld [vmem:[%s2911_s25 + $0x4e0] sm:$0xff]  ;;  %v669_v31 = vld [vmem:[%s2911_s25 + $0x4f0] sm:$0xff] }
  0x64   : > { %v671_v32 = vld [vmem:[%s2911_s25 + $0x500] sm:$0xff]  ;;  %668 = vst [vmem:[%s2916_s6 + $0x270] sm:$0xff] %v667_v30  ;;  %670 = vst [vmem:[%s2916_s6 + $0x278] sm:$0xff] %v669_v31  ;;  %v673_v33 = vld [vmem:[%s2911_s25 + $0x510] sm:$0xff] }
  0x65   : > { %672 = vst [vmem:[%s2916_s6 + $0x280] sm:$0xff] %v671_v32  ;;  %v675_v34 = vld [vmem:[%s2911_s25 + $0x520] sm:$0xff]  ;;  %v677_v35 = vld [vmem:[%s2911_s25 + $0x530] sm:$0xff]  ;;  %674 = vst [vmem:[%s2916_s6 + $0x288] sm:$0xff] %v673_v33 }
  0x66   : > { %676 = vst [vmem:[%s2916_s6 + $0x290] sm:$0xff] %v675_v34  ;;  %678 = vst [vmem:[%s2916_s6 + $0x298] sm:$0xff] %v677_v35  ;;  %v679_v36 = vld [vmem:[%s2911_s25 + $0x540] sm:$0xff]  ;;  %v681_v37 = vld [vmem:[%s2911_s25 + $0x550] sm:$0xff] }
  0x67   : > { %v683_v38 = vld [vmem:[%s2911_s25 + $0x560] sm:$0xff]  ;;  %680 = vst [vmem:[%s2916_s6 + $0x2a0] sm:$0xff] %v679_v36  ;;  %682 = vst [vmem:[%s2916_s6 + $0x2a8] sm:$0xff] %v681_v37  ;;  %v685_v39 = vld [vmem:[%s2911_s25 + $0x570] sm:$0xff] }
  0x68   : > { %684 = vst [vmem:[%s2916_s6 + $0x2b0] sm:$0xff] %v683_v38  ;;  %v687_v40 = vld [vmem:[%s2911_s25 + $0x580] sm:$0xff]  ;;  %v689_v41 = vld [vmem:[%s2911_s25 + $0x590] sm:$0xff]  ;;  %686 = vst [vmem:[%s2916_s6 + $0x2b8] sm:$0xff] %v685_v39 }
  0x69   : > { %688 = vst [vmem:[%s2916_s6 + $0x2c0] sm:$0xff] %v687_v40  ;;  %690 = vst [vmem:[%s2916_s6 + $0x2c8] sm:$0xff] %v689_v41  ;;  %v691_v42 = vld [vmem:[%s2911_s25 + $0x5a0] sm:$0xff]  ;;  %v693_v43 = vld [vmem:[%s2911_s25 + $0x5b0] sm:$0xff] }
  0x6a   : > { %v695_v44 = vld [vmem:[%s2911_s25 + $0x5c0] sm:$0xff]  ;;  %692 = vst [vmem:[%s2916_s6 + $0x2d0] sm:$0xff] %v691_v42  ;;  %694 = vst [vmem:[%s2916_s6 + $0x2d8] sm:$0xff] %v693_v43  ;;  %v697_v45 = vld [vmem:[%s2911_s25 + $0x5d0] sm:$0xff] }
  0x6b   : > { %696 = vst [vmem:[%s2916_s6 + $0x2e0] sm:$0xff] %v695_v44  ;;  %v699_v46 = vld [vmem:[%s2911_s25 + $0x5e0] sm:$0xff]  ;;  %v701_v47 = vld [vmem:[%s2911_s25 + $0x5f0] sm:$0xff]  ;;  %698 = vst [vmem:[%s2916_s6 + $0x2e8] sm:$0xff] %v697_v45 }
  0x6c   : > { %700 = vst [vmem:[%s2916_s6 + $0x2f0] sm:$0xff] %v699_v46  ;;  %702 = vst [vmem:[%s2916_s6 + $0x2f8] sm:$0xff] %v701_v47  ;;  %v703_v48 = vld [vmem:[%s2911_s25 + $0x600] sm:$0xff]  ;;  %v705_v49 = vld [vmem:[%s2911_s25 + $0x610] sm:$0xff] }
  0x6d   : > { %v707_v50 = vld [vmem:[%s2911_s25 + $0x620] sm:$0xff]  ;;  %704 = vst [vmem:[%s2916_s6 + $0x300] sm:$0xff] %v703_v48  ;;  %706 = vst [vmem:[%s2916_s6 + $0x308] sm:$0xff] %v705_v49  ;;  %v709_v51 = vld [vmem:[%s2911_s25 + $0x630] sm:$0xff] }
  0x6e   : > { %708 = vst [vmem:[%s2916_s6 + $0x310] sm:$0xff] %v707_v50  ;;  %v711_v52 = vld [vmem:[%s2911_s25 + $0x640] sm:$0xff]  ;;  %v713_v53 = vld [vmem:[%s2911_s25 + $0x650] sm:$0xff]  ;;  %710 = vst [vmem:[%s2916_s6 + $0x318] sm:$0xff] %v709_v51 }
  0x6f   : > { %712 = vst [vmem:[%s2916_s6 + $0x320] sm:$0xff] %v711_v52  ;;  %714 = vst [vmem:[%s2916_s6 + $0x328] sm:$0xff] %v713_v53  ;;  %v715_v54 = vld [vmem:[%s2911_s25 + $0x660] sm:$0xff]  ;;  %v717_v55 = vld [vmem:[%s2911_s25 + $0x670] sm:$0xff] }
  0x70   : > { %v719_v56 = vld [vmem:[%s2911_s25 + $0x680] sm:$0xff]  ;;  %716 = vst [vmem:[%s2916_s6 + $0x330] sm:$0xff] %v715_v54  ;;  %718 = vst [vmem:[%s2916_s6 + $0x338] sm:$0xff] %v717_v55  ;;  %v721_v57 = vld [vmem:[%s2911_s25 + $0x690] sm:$0xff] }
  0x71   : > { %720 = vst [vmem:[%s2916_s6 + $0x340] sm:$0xff] %v719_v56  ;;  %v723_v58 = vld [vmem:[%s2911_s25 + $0x6a0] sm:$0xff]  ;;  %v725_v59 = vld [vmem:[%s2911_s25 + $0x6b0] sm:$0xff]  ;;  %722 = vst [vmem:[%s2916_s6 + $0x348] sm:$0xff] %v721_v57 }
  0x72   : > { %724 = vst [vmem:[%s2916_s6 + $0x350] sm:$0xff] %v723_v58  ;;  %726 = vst [vmem:[%s2916_s6 + $0x358] sm:$0xff] %v725_v59  ;;  %v727_v60 = vld [vmem:[%s2911_s25 + $0x6c0] sm:$0xff]  ;;  %v729_v61 = vld [vmem:[%s2911_s25 + $0x6d0] sm:$0xff] }
  0x73   : > { %v731_v62 = vld [vmem:[%s2911_s25 + $0x6e0] sm:$0xff]  ;;  %728 = vst [vmem:[%s2916_s6 + $0x360] sm:$0xff] %v727_v60  ;;  %730 = vst [vmem:[%s2916_s6 + $0x368] sm:$0xff] %v729_v61  ;;  %v733_v63 = vld [vmem:[%s2911_s25 + $0x6f0] sm:$0xff] }
  0x74   : > { %732 = vst [vmem:[%s2916_s6 + $0x370] sm:$0xff] %v731_v62  ;;  %v735_v0 = vld [vmem:[%s2911_s25 + $0x700] sm:$0xff]  ;;  %v737_v1 = vld [vmem:[%s2911_s25 + $0x710] sm:$0xff]  ;;  %734 = vst [vmem:[%s2916_s6 + $0x378] sm:$0xff] %v733_v63 }
  0x75   : > { %736 = vst [vmem:[%s2916_s6 + $0x380] sm:$0xff] %v735_v0  ;;  %738 = vst [vmem:[%s2916_s6 + $0x388] sm:$0xff] %v737_v1  ;;  %v739_v2 = vld [vmem:[%s2911_s25 + $0x720] sm:$0xff]  ;;  %v741_v3 = vld [vmem:[%s2911_s25 + $0x730] sm:$0xff] }
  0x76   : > { %v743_v4 = vld [vmem:[%s2911_s25 + $0x740] sm:$0xff]  ;;  %740 = vst [vmem:[%s2916_s6 + $0x390] sm:$0xff] %v739_v2  ;;  %742 = vst [vmem:[%s2916_s6 + $0x398] sm:$0xff] %v741_v3  ;;  %v745_v5 = vld [vmem:[%s2911_s25 + $0x750] sm:$0xff] }
  0x77   : > { %744 = vst [vmem:[%s2916_s6 + $0x3a0] sm:$0xff] %v743_v4  ;;  %v747_v6 = vld [vmem:[%s2911_s25 + $0x760] sm:$0xff]  ;;  %v749_v7 = vld [vmem:[%s2911_s25 + $0x770] sm:$0xff]  ;;  %746 = vst [vmem:[%s2916_s6 + $0x3a8] sm:$0xff] %v745_v5 }
  0x78   : > { %748 = vst [vmem:[%s2916_s6 + $0x3b0] sm:$0xff] %v747_v6  ;;  %750 = vst [vmem:[%s2916_s6 + $0x3b8] sm:$0xff] %v749_v7  ;;  %v751_v8 = vld [vmem:[%s2911_s25 + $0x780] sm:$0xff]  ;;  %v753_v9 = vld [vmem:[%s2911_s25 + $0x790] sm:$0xff] }
  0x79   : > { %v755_v10 = vld [vmem:[%s2911_s25 + $0x7a0] sm:$0xff]  ;;  %752 = vst [vmem:[%s2916_s6 + $0x3c0] sm:$0xff] %v751_v8  ;;  %754 = vst [vmem:[%s2916_s6 + $0x3c8] sm:$0xff] %v753_v9  ;;  %v757_v11 = vld [vmem:[%s2911_s25 + $0x7b0] sm:$0xff] }
  0x7a   : > { %756 = vst [vmem:[%s2916_s6 + $0x3d0] sm:$0xff] %v755_v10  ;;  %v759_v12 = vld [vmem:[%s2911_s25 + $0x7c0] sm:$0xff]  ;;  %v761_v13 = vld [vmem:[%s2911_s25 + $0x7d0] sm:$0xff]  ;;  %758 = vst [vmem:[%s2916_s6 + $0x3d8] sm:$0xff] %v757_v11 }
  0x7b   : > { %760 = vst [vmem:[%s2916_s6 + $0x3e0] sm:$0xff] %v759_v12  ;;  %762 = vst [vmem:[%s2916_s6 + $0x3e8] sm:$0xff] %v761_v13  ;;  %v763_v14 = vld [vmem:[%s2911_s25 + $0x7e0] sm:$0xff]  ;;  %v765_v15 = vld [vmem:[%s2911_s25 + $0x7f0] sm:$0xff] }
  0x7c   : > { %764 = vst [vmem:[%s2916_s6 + $0x3f0] sm:$0xff] %v763_v14  ;;  %766 = vst [vmem:[%s2916_s6 + $0x3f8] sm:$0xff] %v765_v15 }
  0x7d PF: > { %p2198_p0 = scmp.ge.s32.totalorder %s2756_s22, 1  ;;  %p779_p1 = scmp.lt.s32.totalorder %s2756_s22, 9 }
  0x7f   : > { %p780_p2 = pnand %p2198_p0, %p779_p1 }
  0x80   : > { %s786_s0 = sand.u32 (!%p780_p2), 1, %s2732_s16   ;;  %s793_s5 = sand.u32 (!%p780_p2), 1, %s2724_s14  }
  0x81   : > { %783 = sbr.rel (%p780_p2) target bundleno = 525 (0x20d), region = 85  ;;  %s2199_s23 = sshll.u32 (!%p780_p2), %s786_s0, 7 }
  0x82   : > { %s2200_s28 = sshll.u32 (!%p780_p2), %s793_s5, 10  ;;  %s820_s7 = sand.u32 (!%p780_p2), 1, %s2716_s12  }
  0x83   : > { %s2202_s25 = sshll.u32 (!%p780_p2), %s2744_s19, 1  ;;  %s2201_s11 = sshll.u32 (!%p780_p2), %s820_s7, 5 }
  0x84   : > { %p828_p3 = scmp.lt.s32.totalorder (!%p780_p2), %s2202_s25, 3  ;;  %s3183_s4 = scalar_lea.vmem (!%p780_p2), [#allocation3], %s2199_s23 }
  0x85   : > { %s3185_s6 = scalar_lea.vmem (!%p780_p2), [#allocation4], %s2200_s28  ;;  %s3187_s1 = scalar_lea.vmem (!%p780_p2), [#allocation5], %s2201_s11 }
  0x86   : > { %p2203_p4 = scmp.ne.s32.totalorder (!%p780_p2), %s2740_s18, 0 }
  0x88   : > { %s3434_s25 = smov (!%p828_p3, %s2202_s25), 3  ;;  %837 = sbr.rel (%p2203_p4) target bundleno = 143 (0x8f), region = 97 }
  0x89   : > { %s830_s29 = scalar_lea.vmem %s3405_s2, %s3434_s25  ;;  %v2758_v16 = vmov (!%p2203_p4), 0.0  }
  0x8a   : > { %838 = vst [vmem:[#allocation2] sm:$0xff] (!%p2203_p4), %v2758_v16  ;;  %839 = vst [vmem:[#allocation2 + $0x8] sm:$0xff] (!%p2203_p4), %v2758_v16 }
  0x8b   : > { %840 = vst [vmem:[#allocation2 + $0x10] sm:$0xff] (!%p2203_p4), %v2758_v16  ;;  %841 = vst [vmem:[#allocation2 + $0x18] sm:$0xff] (!%p2203_p4), %v2758_v16 }
  0x8c   : > { %842 = vst [vmem:[#allocation2 + $0x20] sm:$0xff] (!%p2203_p4), %v2758_v16  ;;  %843 = vst [vmem:[#allocation2 + $0x28] sm:$0xff] (!%p2203_p4), %v2758_v16 }
  0x8d   : > { %844 = vst [vmem:[#allocation2 + $0x30] sm:$0xff] (!%p2203_p4), %v2758_v16  ;;  %845 = vst [vmem:[#allocation2 + $0x38] sm:$0xff] (!%p2203_p4), %v2758_v16 }
  0x8f PF: > { %v2478_v17 = vld [vmem:[%s3185_s6 + $0x4] ss:$8 sps:$4 sm:$0xff]   ;;  %v2482_v19 = vld [vmem:[%s3185_s6] ss:$8 sps:$4 sm:$0xff]   ;;  %v2484_v21 = vld [vmem:[%s3185_s6 + $0x14] ss:$8 sps:$4 sm:$0xff]  }
  0x90   : > { %v2480_v18 = vld [vmem:[%s3185_s6 + $0x204] ss:$8 sps:$4 sm:$0xff]   ;;  %1718 = vmatprep.subr.bf16.mxu1 %v2478_v17  ;;  %v2483_v20 = vld [vmem:[%s3185_s6 + $0x200] ss:$8 sps:$4 sm:$0xff]   ;;  %v2486_v22 = vld [vmem:[%s3185_s6 + $0x214] ss:$8 sps:$4 sm:$0xff]  }
  0x91   : > { %1824 = vmatprep.subr.bf16.mxu0 %v2480_v18  ;;  %1719 = vmatpush1.bf16.msra.mxu1 %v2482_v19  ;;  %v2488_v23 = vld [vmem:[%s3185_s6 + $0x10] ss:$8 sps:$4 sm:$0xff]   ;;  %v2490_v25 = vld [vmem:[%s3185_s6 + $0x24] ss:$8 sps:$4 sm:$0xff]   ;;  %v2494_v27 = vld [vmem:[%s3185_s6 + $0x20] ss:$8 sps:$4 sm:$0xff]  }
  0x92   : > { %1825 = vmatpush1.bf16.msra.mxu0 %v2483_v20  ;;  %1720 = vmatprep.subr.bf16.mxu1 %v2484_v21  ;;  %v2489_v24 = vld [vmem:[%s3185_s6 + $0x210] ss:$8 sps:$4 sm:$0xff]   ;;  %v2492_v26 = vld [vmem:[%s3185_s6 + $0x224] ss:$8 sps:$4 sm:$0xff]   ;;  %v2495_v28 = vld [vmem:[%s3185_s6 + $0x220] ss:$8 sps:$4 sm:$0xff]  }
  0x93   : > { %1826 = vmatprep.subr.bf16.mxu0 %v2486_v22  ;;  %v2496_v29 = vld [vmem:[%s3185_s6 + $0x34] ss:$8 sps:$4 sm:$0xff]   ;;  %v2500_v31 = vld [vmem:[%s3185_s6 + $0x30] ss:$8 sps:$4 sm:$0xff]   ;;  %v2502_v33 = vld [vmem:[%s3185_s6 + $0x44] ss:$8 sps:$4 sm:$0xff]  }
  0x94   : > { %v2498_v30 = vld [vmem:[%s3185_s6 + $0x234] ss:$8 sps:$4 sm:$0xff]   ;;  %v2501_v32 = vld [vmem:[%s3185_s6 + $0x230] ss:$8 sps:$4 sm:$0xff]   ;;  %v2504_v34 = vld [vmem:[%s3185_s6 + $0x244] ss:$8 sps:$4 sm:$0xff]  }
  0x95   : > { %1721 = vmatpush1.bf16.msra.mxu1 %v2488_v23  ;;  %v2506_v35 = vld [vmem:[%s3185_s6 + $0x40] ss:$8 sps:$4 sm:$0xff]   ;;  %v2508_v37 = vld [vmem:[%s3185_s6 + $0x54] ss:$8 sps:$4 sm:$0xff]   ;;  %v2512_v39 = vld [vmem:[%s3185_s6 + $0x50] ss:$8 sps:$4 sm:$0xff]  }
  0x96   : > { %1827 = vmatpush1.bf16.msra.mxu0 %v2489_v24  ;;  %1722 = vmatprep.subr.bf16.mxu1 %v2490_v25  ;;  %v2507_v36 = vld [vmem:[%s3185_s6 + $0x240] ss:$8 sps:$4 sm:$0xff]   ;;  %v2510_v38 = vld [vmem:[%s3185_s6 + $0x254] ss:$8 sps:$4 sm:$0xff]   ;;  %v2513_v40 = vld [vmem:[%s3185_s6 + $0x250] ss:$8 sps:$4 sm:$0xff]  }
  0x97   : > { %1828 = vmatprep.subr.bf16.mxu0 %v2492_v26  ;;  %v2514_v41 = vld [vmem:[%s3185_s6 + $0x64] ss:$8 sps:$4 sm:$0xff]   ;;  %v2518_v43 = vld [vmem:[%s3185_s6 + $0x60] ss:$8 sps:$4 sm:$0xff]   ;;  %v2520_v45 = vld [vmem:[%s3185_s6 + $0x74] ss:$8 sps:$4 sm:$0xff]  }
  0x98   : > { %v2516_v42 = vld [vmem:[%s3185_s6 + $0x264] ss:$8 sps:$4 sm:$0xff]   ;;  %v2519_v44 = vld [vmem:[%s3185_s6 + $0x260] ss:$8 sps:$4 sm:$0xff]   ;;  %v2522_v46 = vld [vmem:[%s3185_s6 + $0x274] ss:$8 sps:$4 sm:$0xff]  }
  0x99   : > { %1723 = vmatpush1.bf16.msra.mxu1 %v2494_v27  ;;  %v2524_v47 = vld [vmem:[%s3185_s6 + $0x70] ss:$8 sps:$4 sm:$0xff]   ;;  %v2526_v49 = vld [vmem:[%s3185_s6 + $0x84] ss:$8 sps:$4 sm:$0xff]   ;;  %v2530_v51 = vld [vmem:[%s3185_s6 + $0x80] ss:$8 sps:$4 sm:$0xff]  }
  0x9a   : > { %1829 = vmatpush1.bf16.msra.mxu0 %v2495_v28  ;;  %1724 = vmatprep.subr.bf16.mxu1 %v2496_v29  ;;  %v2525_v48 = vld [vmem:[%s3185_s6 + $0x270] ss:$8 sps:$4 sm:$0xff]   ;;  %v2528_v50 = vld [vmem:[%s3185_s6 + $0x284] ss:$8 sps:$4 sm:$0xff]   ;;  %v2531_v52 = vld [vmem:[%s3185_s6 + $0x280] ss:$8 sps:$4 sm:$0xff]  }
  0x9b   : > { %1830 = vmatprep.subr.bf16.mxu0 %v2498_v30  ;;  %v2532_v53 = vld [vmem:[%s3185_s6 + $0x94] ss:$8 sps:$4 sm:$0xff]   ;;  %v2536_v55 = vld [vmem:[%s3185_s6 + $0x90] ss:$8 sps:$4 sm:$0xff]   ;;  %v2538_v57 = vld [vmem:[%s3185_s6 + $0xa4] ss:$8 sps:$4 sm:$0xff]  }
  0x9c   : > { %v2534_v54 = vld [vmem:[%s3185_s6 + $0x294] ss:$8 sps:$4 sm:$0xff]   ;;  %v2537_v56 = vld [vmem:[%s3185_s6 + $0x290] ss:$8 sps:$4 sm:$0xff]   ;;  %v2540_v58 = vld [vmem:[%s3185_s6 + $0x2a4] ss:$8 sps:$4 sm:$0xff]  }
  0x9d   : > { %1725 = vmatpush1.bf16.msra.mxu1 %v2500_v31  ;;  %v2542_v59 = vld [vmem:[%s3185_s6 + $0xa0] ss:$8 sps:$4 sm:$0xff]   ;;  %v2544_v61 = vld [vmem:[%s3185_s6 + $0xb4] ss:$8 sps:$4 sm:$0xff]   ;;  %v2548_v63 = vld [vmem:[%s3185_s6 + $0xb0] ss:$8 sps:$4 sm:$0xff]  }
  0x9e   : > { %1831 = vmatpush1.bf16.msra.mxu0 %v2501_v32  ;;  %1726 = vmatprep.subr.bf16.mxu1 %v2502_v33  ;;  %v2543_v60 = vld [vmem:[%s3185_s6 + $0x2a0] ss:$8 sps:$4 sm:$0xff]   ;;  %v2546_v62 = vld [vmem:[%s3185_s6 + $0x2b4] ss:$8 sps:$4 sm:$0xff]   ;;  %v2549_v0 = vld [vmem:[%s3185_s6 + $0x2b0] ss:$8 sps:$4 sm:$0xff]  }
  0x9f   : > { %1832 = vmatprep.subr.bf16.mxu0 %v2504_v34  ;;  %v854_v1 = vld [vmem:[%s3183_s4] sm:$0xff]  ;;  %v856_v6 = vld [vmem:[%s3183_s4 + $0x10] sm:$0xff]  ;;  %p2348_p5 = scmp.ne.s32.totalorder %s2740_s18, 3 }
  0xa0   : > { %v858_v2 = vld [vmem:[%s3183_s4 + $0x20] sm:$0xff]  ;;  %v860_v7 = vld [vmem:[%s3183_s4 + $0x30] sm:$0xff] }
  0xa1   : > { %1727 = vmatpush1.bf16.msra.mxu1 %v2506_v35  ;;  %v2550_v3 = vld [vmem:[%s3185_s6 + $0xc4] ss:$8 sps:$4 sm:$0xff]   ;;  %v2205_v5 = vcombine.high %v854_v1, %v858_v2  ;;  %v2209_v8 = vcombine.high %v856_v6, %v860_v7  ;;  %v2554_v9 = vld [vmem:[%s3185_s6 + $0xc0] ss:$8 sps:$4 sm:$0xff]   ;;  %v2556_v11 = vld [vmem:[%s3185_s6 + $0xd4] ss:$8 sps:$4 sm:$0xff]   ;;  %v2204_v25 = vcombine.low %v854_v1, %v858_v2  ;;  %v2208_v27 = vcombine.low %v856_v6, %v860_v7 }
  0xa2   : > { %1833 = vmatpush1.bf16.msra.mxu0 %v2507_v36  ;;  %1728 = vmatprep.subr.bf16.mxu1 %v2508_v37  ;;  %v2552_v4 = vld [vmem:[%s3185_s6 + $0x2c4] ss:$8 sps:$4 sm:$0xff]   ;;  %v2555_v10 = vld [vmem:[%s3185_s6 + $0x2c0] ss:$8 sps:$4 sm:$0xff]   ;;  %v2558_v12 = vld [vmem:[%s3185_s6 + $0x2d4] ss:$8 sps:$4 sm:$0xff]  }
  0xa3   : > { %1834 = vmatprep.subr.bf16.mxu0 %v2510_v38  ;;  %1750 = vmatprep.mubr.bf16.mxu1 %v2205_v5  ;;  %v2560_v13 = vld [vmem:[%s3185_s6 + $0xd0] ss:$8 sps:$4 sm:$0xff]   ;;  %v2562_v15 = vld [vmem:[%s3185_s6 + $0xe4] ss:$8 sps:$4 sm:$0xff]   ;;  %v2566_v17 = vld [vmem:[%s3185_s6 + $0xe0] ss:$8 sps:$4 sm:$0xff]  }
  0xa4   : > { %1856 = vmatprep.mubr.bf16.mxu0 %v2209_v8  ;;  %v2561_v14 = vld [vmem:[%s3185_s6 + $0x2d0] ss:$8 sps:$4 sm:$0xff]   ;;  %v2564_v16 = vld [vmem:[%s3185_s6 + $0x2e4] ss:$8 sps:$4 sm:$0xff]   ;;  %v2567_v18 = vld [vmem:[%s3185_s6 + $0x2e0] ss:$8 sps:$4 sm:$0xff]  }
  0xa5   : > { %1729 = vmatpush1.bf16.msra.mxu1 %v2512_v39  ;;  %v2568_v19 = vld [vmem:[%s3185_s6 + $0xf4] ss:$8 sps:$4 sm:$0xff]   ;;  %v2572_v21 = vld [vmem:[%s3185_s6 + $0xf0] ss:$8 sps:$4 sm:$0xff]   ;;  %v2576_v23 = vld [vmem:[%s3185_s6 + $0x104] ss:$8 sps:$4 sm:$0xff]  }
  0xa6   : > { %1835 = vmatpush1.bf16.msra.mxu0 %v2513_v40  ;;  %1730 = vmatprep.subr.bf16.mxu1 %v2514_v41  ;;  %v2570_v20 = vld [vmem:[%s3185_s6 + $0x2f4] ss:$8 sps:$4 sm:$0xff]   ;;  %v2573_v22 = vld [vmem:[%s3185_s6 + $0x2f0] ss:$8 sps:$4 sm:$0xff]   ;;  %v2579_v24 = vld [vmem:[%s3185_s6 + $0x304] ss:$8 sps:$4 sm:$0xff]  }
  0xa7   : > { %1836 = vmatprep.subr.bf16.mxu0 %v2516_v42  ;;  %v2574_v26 = vld [vmem:[%s3185_s6 + $0x100] ss:$8 sps:$4 sm:$0xff]   ;;  %v2582_v29 = vld [vmem:[%s3185_s6 + $0x114] ss:$8 sps:$4 sm:$0xff]   ;;  %v2580_v31 = vld [vmem:[%s3185_s6 + $0x110] ss:$8 sps:$4 sm:$0xff]  }
  0xa8   : > { %v2577_v28 = vld [vmem:[%s3185_s6 + $0x300] ss:$8 sps:$4 sm:$0xff]   ;;  %v2585_v30 = vld [vmem:[%s3185_s6 + $0x314] ss:$8 sps:$4 sm:$0xff]   ;;  %v2583_v32 = vld [vmem:[%s3185_s6 + $0x310] ss:$8 sps:$4 sm:$0xff]  }
  0xa9   : > { %1731 = vmatpush1.bf16.msra.mxu1 %v2518_v43  ;;  %v2588_v33 = vld [vmem:[%s3185_s6 + $0x124] ss:$8 sps:$4 sm:$0xff]   ;;  %v2586_v35 = vld [vmem:[%s3185_s6 + $0x120] ss:$8 sps:$4 sm:$0xff]   ;;  %v2594_v37 = vld [vmem:[%s3185_s6 + $0x134] ss:$8 sps:$4 sm:$0xff]  }
  0xaa   : > { %1837 = vmatpush1.bf16.msra.mxu0 %v2519_v44  ;;  %1732 = vmatprep.subr.bf16.mxu1 %v2520_v45  ;;  %v2591_v34 = vld [vmem:[%s3185_s6 + $0x324] ss:$8 sps:$4 sm:$0xff]   ;;  %v2589_v36 = vld [vmem:[%s3185_s6 + $0x320] ss:$8 sps:$4 sm:$0xff]   ;;  %v2597_v38 = vld [vmem:[%s3185_s6 + $0x334] ss:$8 sps:$4 sm:$0xff]  }
  0xab   : > { %1838 = vmatprep.subr.bf16.mxu0 %v2522_v46  ;;  %v2592_v39 = vld [vmem:[%s3185_s6 + $0x130] ss:$8 sps:$4 sm:$0xff]   ;;  %v2600_v41 = vld [vmem:[%s3185_s6 + $0x144] ss:$8 sps:$4 sm:$0xff]   ;;  %v2598_v43 = vld [vmem:[%s3185_s6 + $0x140] ss:$8 sps:$4 sm:$0xff]  }
  0xac   : > { %v2595_v40 = vld [vmem:[%s3185_s6 + $0x330] ss:$8 sps:$4 sm:$0xff]   ;;  %v2603_v42 = vld [vmem:[%s3185_s6 + $0x344] ss:$8 sps:$4 sm:$0xff]   ;;  %v2601_v44 = vld [vmem:[%s3185_s6 + $0x340] ss:$8 sps:$4 sm:$0xff]  }
  0xad   : > { %1733 = vmatpush1.bf16.msra.mxu1 %v2524_v47  ;;  %v2606_v45 = vld [vmem:[%s3185_s6 + $0x154] ss:$8 sps:$4 sm:$0xff]   ;;  %v862_v47 = vld [vmem:[%s3183_s4 + $0x40] sm:$0xff]  ;;  %v2616_v5 = vld [vmem:[%s3185_s6 + $0x170] ss:$8 sps:$4 sm:$0xff]  }
  0xae   : > { %1839 = vmatpush1.bf16.msra.mxu0 %v2525_v48  ;;  %1734 = vmatprep.subr.bf16.mxu1 %v2526_v49  ;;  %v2609_v46 = vld [vmem:[%s3185_s6 + $0x354] ss:$8 sps:$4 sm:$0xff]   ;;  %v866_v48 = vld [vmem:[%s3183_s4 + $0x60] sm:$0xff]  ;;  %v2619_v6 = vld [vmem:[%s3185_s6 + $0x370] ss:$8 sps:$4 sm:$0xff]  }
  0xaf   : > { %1840 = vmatprep.subr.bf16.mxu0 %v2528_v50  ;;  %v2213_v49 = vcombine.high %v862_v47, %v866_v48  ;;  %v864_v50 = vld [vmem:[%s3183_s4 + $0x50] sm:$0xff]  ;;  %v2624_v7 = vld [vmem:[%s3185_s6 + $0x184] ss:$8 sps:$4 sm:$0xff]  }
  0xb0   : > { %v2621_v1 = vld [vmem:[%s3185_s6 + $0x374] ss:$8 sps:$4 sm:$0xff]   ;;  %v2627_v8 = vld [vmem:[%s3185_s6 + $0x384] ss:$8 sps:$4 sm:$0xff]  }
  0xb1   : > { %1735 = vmatpush1.bf16.msra.mxu1 %v2530_v51  ;;  %v868_v51 = vld [vmem:[%s3183_s4 + $0x70] sm:$0xff] }
  0xb2   : > { %1841 = vmatpush1.bf16.msra.mxu0 %v2531_v52  ;;  %1736 = vmatprep.subr.bf16.mxu1 %v2532_v53  ;;  %v2604_v52 = vld [vmem:[%s3185_s6 + $0x150] ss:$8 sps:$4 sm:$0xff]  }
  0xb3   : > { %1842 = vmatprep.subr.bf16.mxu0 %v2534_v54  ;;  %v2607_v53 = vld [vmem:[%s3185_s6 + $0x350] ss:$8 sps:$4 sm:$0xff]   ;;  %v2217_v54 = vcombine.high %v864_v50, %v868_v51 }
  0xb5   : > { %1737 = vmatpush1.bf16.msra.mxu1 %v2536_v55  ;;  %v2212_v55 = vcombine.low %v862_v47, %v866_v48 }
  0xb6   : > { %1843 = vmatpush1.bf16.msra.mxu0 %v2537_v56  ;;  %1738 = vmatprep.subr.bf16.mxu1 %v2538_v57  ;;  %v2216_v56 = vcombine.low %v864_v50, %v868_v51  ;;  %v2612_v57 = vld [vmem:[%s3185_s6 + $0x164] ss:$8 sps:$4 sm:$0xff]  }
  0xb7   : > { %1844 = vmatprep.subr.bf16.mxu0 %v2540_v58  ;;  %v2615_v58 = vld [vmem:[%s3185_s6 + $0x364] ss:$8 sps:$4 sm:$0xff]  }
  0xb8   : > { %v846_v50 = vld [vmem:[#allocation2] sm:$0xff] }
  0xb9   : > { %1739 = vmatpush1.bf16.msra.mxu1 %v2542_v59  ;;  %v2610_v59 = vld [vmem:[%s3185_s6 + $0x160] ss:$8 sps:$4 sm:$0xff]  }
  0xba   : > { %1845 = vmatpush1.bf16.msra.mxu0 %v2543_v60  ;;  %1740 = vmatprep.subr.bf16.mxu1 %v2544_v61  ;;  %v2613_v60 = vld [vmem:[%s3185_s6 + $0x360] ss:$8 sps:$4 sm:$0xff]  }
  0xbb   : > { %1846 = vmatprep.subr.bf16.mxu0 %v2546_v62  ;;  %v3291_v61 = vld [vmem:[%s3183_s4 + $0x8] sm:$0xff] }
  0xbc   : > { %v3294_v62 = vld [vmem:[%s3183_s4 + $0x28] sm:$0xff] }
  0xbd   : > { %1741 = vmatpush1.bf16.msra.mxu1 %v2548_v63  ;;  %v3297_v63 = vld [vmem:[%s3183_s4 + $0x18] sm:$0xff]  ;;  %v2207_v2 = vcombine.high %v3291_v61, %v3294_v62 }
  0xbe   : > { %1847 = vmatpush1.bf16.msra.mxu0 %v2549_v0  ;;  %1742 = vmatprep.subr.bf16.mxu1 %v2550_v3  ;;  %v2618_v0 = vld [vmem:[%s3185_s6 + $0x174] ss:$8 sps:$4 sm:$0xff]  }
  0xbf   : > { %1848 = vmatprep.subr.bf16.mxu0 %v2552_v4  ;;  %v3304_v3 = vld [vmem:[%s3183_s4 + $0x38] sm:$0xff] }
  0xc0   : > { %v2211_v4 = vcombine.high %v3297_v63, %v3304_v3 }
  0xc1   : > { %1743 = vmatpush1.bf16.msra.mxu1 %v2554_v9  ;;  %v2622_v9 = vld [vmem:[%s3185_s6 + $0x180] ss:$8 sps:$4 sm:$0xff]  }
  0xc2   : > { %1849 = vmatpush1.bf16.msra.mxu0 %v2555_v10  ;;  %1744 = vmatprep.subr.bf16.mxu1 %v2556_v11  ;;  %v2625_v10 = vld [vmem:[%s3185_s6 + $0x380] ss:$8 sps:$4 sm:$0xff]   ;;  %v2630_v11 = vld [vmem:[%s3185_s6 + $0x194] ss:$8 sps:$4 sm:$0xff]  }
  0xc3   : > { %1850 = vmatprep.subr.bf16.mxu0 %v2558_v12  ;;  %v2633_v12 = vld [vmem:[%s3185_s6 + $0x394] ss:$8 sps:$4 sm:$0xff]  }
  0xc5   : > { %1745 = vmatpush1.bf16.msra.mxu1 %v2560_v13  ;;  %v2628_v13 = vld [vmem:[%s3185_s6 + $0x190] ss:$8 sps:$4 sm:$0xff]  }
  0xc6   : > { %1851 = vmatpush1.bf16.msra.mxu0 %v2561_v14  ;;  %1746 = vmatprep.subr.bf16.mxu1 %v2562_v15  ;;  %v2631_v14 = vld [vmem:[%s3185_s6 + $0x390] ss:$8 sps:$4 sm:$0xff]   ;;  %v2636_v15 = vld [vmem:[%s3185_s6 + $0x1a4] ss:$8 sps:$4 sm:$0xff]  }
  0xc7   : > { %1852 = vmatprep.subr.bf16.mxu0 %v2564_v16  ;;  %v2639_v16 = vld [vmem:[%s3185_s6 + $0x3a4] ss:$8 sps:$4 sm:$0xff]  }
  0xc9   : > { %1747 = vmatpush1.bf16.msra.mxu1 %v2566_v17  ;;  %v2634_v17 = vld [vmem:[%s3185_s6 + $0x1a0] ss:$8 sps:$4 sm:$0xff]  }
  0xca   : > { %1853 = vmatpush1.bf16.msra.mxu0 %v2567_v18  ;;  %1748 = vmatprep.subr.bf16.mxu1 %v2568_v19  ;;  %v2637_v18 = vld [vmem:[%s3185_s6 + $0x3a0] ss:$8 sps:$4 sm:$0xff]   ;;  %v2642_v19 = vld [vmem:[%s3185_s6 + $0x1b4] ss:$8 sps:$4 sm:$0xff]  }
  0xcb   : > { %1854 = vmatprep.subr.bf16.mxu0 %v2570_v20  ;;  %v2645_v20 = vld [vmem:[%s3185_s6 + $0x3b4] ss:$8 sps:$4 sm:$0xff]  }
  0xcd   : > { %1749 = vmatpush1.bf16.msra.mxu1 %v2572_v21  ;;  %v2640_v21 = vld [vmem:[%s3185_s6 + $0x1b0] ss:$8 sps:$4 sm:$0xff]  }
  0xce   : > { %1855 = vmatpush1.bf16.msra.mxu0 %v2573_v22  ;;  %1771 = vmatprep.subr.bf16.mxu1 %v2576_v23  ;;  %v2643_v22 = vld [vmem:[%s3185_s6 + $0x3b0] ss:$8 sps:$4 sm:$0xff]   ;;  %v2648_v23 = vld [vmem:[%s3185_s6 + $0x1c4] ss:$8 sps:$4 sm:$0xff]  }
  0xcf   : > { %1877 = vmatprep.subr.bf16.mxu0 %v2579_v24  ;;  %v2651_v24 = vld [vmem:[%s3185_s6 + $0x3c4] ss:$8 sps:$4 sm:$0xff]  }
  0xd0   : > { %1751 = vmatmul.mubr.bf16.vlgmr.msra.gmra.mrb[0].mxu1 %v2204_v25  ;;  %v2646_v25 = vld [vmem:[%s3185_s6 + $0x1c0] ss:$8 sps:$4 sm:$0xff]  }
  0xd1   : > { %1857 = vmatmul.mubr.bf16.vlgmr.msra.gmra.mrb[0].mxu0 %v2208_v27  ;;  %1772 = vmatpush1.bf16.msra.mxu1 %v2574_v26  ;;  %v2649_v26 = vld [vmem:[%s3185_s6 + $0x3c0] ss:$8 sps:$4 sm:$0xff]   ;;  %v2654_v27 = vld [vmem:[%s3185_s6 + $0x1d4] ss:$8 sps:$4 sm:$0xff]  }
  0xd2   : > { %1878 = vmatpush1.bf16.msra.mxu0 %v2577_v28  ;;  %1773 = vmatprep.subr.bf16.mxu1 %v2582_v29  ;;  %v2657_v28 = vld [vmem:[%s3185_s6 + $0x3d4] ss:$8 sps:$4 sm:$0xff]   ;;  %v2652_v29 = vld [vmem:[%s3185_s6 + $0x1d0] ss:$8 sps:$4 sm:$0xff]  }
  0xd3   : > { %1879 = vmatprep.subr.bf16.mxu0 %v2585_v30  ;;  %1760 = vmatprep.mubr.bf16.mxu1 %v2213_v49  ;;  %v2655_v30 = vld [vmem:[%s3185_s6 + $0x3d0] ss:$8 sps:$4 sm:$0xff]  }
  0xd4   : > { %1866 = vmatprep.mubr.bf16.mxu0 %v2217_v54  ;;  %v847_v54 = vld [vmem:[#allocation2 + $0x8] sm:$0xff] }
  0xd5   : > { %1774 = vmatpush1.bf16.msra.mxu1 %v2580_v31  ;;  %v2660_v31 = vld [vmem:[%s3185_s6 + $0x1e4] ss:$8 sps:$4 sm:$0xff]  }
  0xd6   : > { %1880 = vmatpush1.bf16.msra.mxu0 %v2583_v32  ;;  %1775 = vmatprep.subr.bf16.mxu1 %v2588_v33  ;;  %v2663_v32 = vld [vmem:[%s3185_s6 + $0x3e4] ss:$8 sps:$4 sm:$0xff]   ;;  %v2658_v33 = vld [vmem:[%s3185_s6 + $0x1e0] ss:$8 sps:$4 sm:$0xff]  }
  0xd7   : > { %1881 = vmatprep.subr.bf16.mxu0 %v2591_v34  ;;  %v2661_v34 = vld [vmem:[%s3185_s6 + $0x3e0] ss:$8 sps:$4 sm:$0xff]  }
  0xd8   : > { %1761 = vmatmul.mubr.bf16.gmra.mrb[4].mxu1 %v2212_v55 }
  0xd9   : > { %1776 = vmatpush1.bf16.msra.mxu1 %v2586_v35  ;;  %1867 = vmatmul.mubr.bf16.gmra.mrb[4].mxu0 %v2216_v56  ;;  %v2666_v35 = vld [vmem:[%s3185_s6 + $0x1f4] ss:$8 sps:$4 sm:$0xff]  }
  0xda   : > { %1882 = vmatpush1.bf16.msra.mxu0 %v2589_v36  ;;  %1777 = vmatprep.subr.bf16.mxu1 %v2594_v37  ;;  %v2669_v36 = vld [vmem:[%s3185_s6 + $0x3f4] ss:$8 sps:$4 sm:$0xff]   ;;  %v2664_v37 = vld [vmem:[%s3185_s6 + $0x1f0] ss:$8 sps:$4 sm:$0xff]  }
  0xdb   : > { %1883 = vmatprep.subr.bf16.mxu0 %v2597_v38  ;;  %1803 = vmatprep.mubr.bf16.mxu1 %v2207_v2  ;;  %v2667_v38 = vld [vmem:[%s3185_s6 + $0x3f0] ss:$8 sps:$4 sm:$0xff]  }
  0xdc   : > { %1909 = vmatprep.mubr.bf16.mxu0 %v2211_v4 }
  0xdd   : > { %1778 = vmatpush1.bf16.msra.mxu1 %v2592_v39  ;;  %v863_v39 = vld [vmem:[%s3183_s4 + $0x48] sm:$0xff] }
  0xde   : > { %1884 = vmatpush1.bf16.msra.mxu0 %v2595_v40  ;;  %1779 = vmatprep.subr.bf16.mxu1 %v2600_v41  ;;  %v867_v40 = vld [vmem:[%s3183_s4 + $0x68] sm:$0xff]  ;;  %v865_v41 = vld [vmem:[%s3183_s4 + $0x58] sm:$0xff] }
  0xdf   : > { %1885 = vmatprep.subr.bf16.mxu0 %v2603_v42  ;;  %v869_v42 = vld [vmem:[%s3183_s4 + $0x78] sm:$0xff]  ;;  %v2214_v47 = vcombine.low %v863_v39, %v867_v40 }
  0xe0   : > { %v2218_v48 = vcombine.low %v865_v41, %v869_v42 }
  0xe1   : > { %1780 = vmatpush1.bf16.msra.mxu1 %v2598_v43  ;;  %v2206_v43 = vcombine.low %v3291_v61, %v3294_v62 }
  0xe2   : > { %1886 = vmatpush1.bf16.msra.mxu0 %v2601_v44  ;;  %1781 = vmatprep.subr.bf16.mxu1 %v2606_v45  ;;  %v2210_v44 = vcombine.low %v3297_v63, %v3304_v3  ;;  %v2215_v45 = vcombine.high %v863_v39, %v867_v40  ;;  %v849_v63 = vld [vmem:[#allocation2 + $0x18] sm:$0xff] }
  0xe3   : > { %1887 = vmatprep.subr.bf16.mxu0 %v2609_v46  ;;  %v2219_v46 = vcombine.high %v865_v41, %v869_v42 }
  0xe5   : > { %1782 = vmatpush1.bf16.msra.mxu1 %v2604_v52 }
  0xe6   : > { %1888 = vmatpush1.bf16.msra.mxu0 %v2607_v53  ;;  %1783 = vmatprep.subr.bf16.mxu1 %v2612_v57 }
  0xe7   : > { %1889 = vmatprep.subr.bf16.mxu0 %v2615_v58  ;;  %v848_v58 = vld [vmem:[#allocation2 + $0x10] sm:$0xff] }
  0xe9   : > { %1784 = vmatpush1.bf16.msra.mxu1 %v2610_v59 }
  0xea   : > { %1890 = vmatpush1.bf16.msra.mxu0 %v2613_v60  ;;  %1785 = vmatprep.subr.bf16.mxu1 %v2618_v0 }
  0xeb   : > { %1891 = vmatprep.subr.bf16.mxu0 %v2621_v1 }
  0xed   : > { %1786 = vmatpush1.bf16.msra.mxu1 %v2616_v5 }
  0xee   : > { %1892 = vmatpush1.bf16.msra.mxu0 %v2619_v6  ;;  %1787 = vmatprep.subr.bf16.mxu1 %v2624_v7  ;;  %v850_v6 = vld [vmem:[#allocation2 + $0x20] sm:$0xff] }
  0xef   : > { %1893 = vmatprep.subr.bf16.mxu0 %v2627_v8 }
  0xf1   : > { %1788 = vmatpush1.bf16.msra.mxu1 %v2622_v9 }
  0xf2   : > { %1894 = vmatpush1.bf16.msra.mxu0 %v2625_v10  ;;  %1789 = vmatprep.subr.bf16.mxu1 %v2630_v11  ;;  %v851_v10 = vld [vmem:[#allocation2 + $0x28] sm:$0xff] }
  0xf3   : > { %1895 = vmatprep.subr.bf16.mxu0 %v2633_v12 }
  0xf5   : > { %1790 = vmatpush1.bf16.msra.mxu1 %v2628_v13 }
  0xf6   : > { %1896 = vmatpush1.bf16.msra.mxu0 %v2631_v14  ;;  %1791 = vmatprep.subr.bf16.mxu1 %v2636_v15  ;;  %v852_v14 = vld [vmem:[#allocation2 + $0x30] sm:$0xff] }
  0xf7   : > { %1897 = vmatprep.subr.bf16.mxu0 %v2639_v16 }
  0xf9   : > { %1792 = vmatpush1.bf16.msra.mxu1 %v2634_v17 }
  0xfa   : > { %1898 = vmatpush1.bf16.msra.mxu0 %v2637_v18  ;;  %1793 = vmatprep.subr.bf16.mxu1 %v2642_v19  ;;  %v853_v19 = vld [vmem:[#allocation2 + $0x38] sm:$0xff] }
  0xfb   : > { %1899 = vmatprep.subr.bf16.mxu0 %v2645_v20 }
  0xfd   : > { %1794 = vmatpush1.bf16.msra.mxu1 %v2640_v21 }
  0xfe   : > { %1900 = vmatpush1.bf16.msra.mxu0 %v2643_v22  ;;  %1795 = vmatprep.subr.bf16.mxu1 %v2648_v23 }
  0xff   : > { %1901 = vmatprep.subr.bf16.mxu0 %v2651_v24 }
 0x101   : > { %1796 = vmatpush1.bf16.msra.mxu1 %v2646_v25  ;;  %v1960_v25 = vlaneseq (!%p2348_p5) }
 0x102   : > { %1902 = vmatpush1.bf16.msra.mxu0 %v2649_v26  ;;  %1797 = vmatprep.subr.bf16.mxu1 %v2654_v27  ;;  %v1958_v27 = vld [vmem:[%s830_s29] sm:$0x3] (!%p2348_p5) }
 0x103   : > { %1903 = vmatprep.subr.bf16.mxu0 %v2657_v28  ;;  %v1961_v26 = vshrl.u32 (!%p2348_p5), %v1960_v25, 7 }
 0x105   : > { %1798 = vmatpush1.bf16.msra.mxu1 %v2652_v29 }
 0x106   : > { %1904 = vmatpush1.bf16.msra.mxu0 %v2655_v30  ;;  %1799 = vmatprep.subr.bf16.mxu1 %v2660_v31  ;;  %v1962_v30 = vsub.s32 (!%p2348_p5), 0, %v1961_v26  ;;  %v1966_v31 = vsub.s32 (!%p2348_p5), 1, %v1961_v26 }
 0x107   : > { %1905 = vmatprep.subr.bf16.mxu0 %v2663_v32 }
 0x109   : > { %1800 = vmatpush1.bf16.msra.mxu1 %v2658_v33 }
 0x10a   : > { %1906 = vmatpush1.bf16.msra.mxu0 %v2661_v34  ;;  %1801 = vmatprep.subr.bf16.mxu1 %v2666_v35  ;;  %v1963_v35 = vrot.slane (!%p2348_p5), %v1958_v27, %v1962_v30 }
 0x10b   : > { %1907 = vmatprep.subr.bf16.mxu0 %v2669_v36  ;;  %v1967_v36 = vrot.slane (!%p2348_p5), %v1958_v27, %v1966_v31 }
 0x10d   : > { %1802 = vmatpush1.bf16.msra.mxu1 %v2664_v37 }
 0x10e   : > { %1908 = vmatpush1.bf16.msra.mxu0 %v2667_v38 }
 0x110   : > { %1804 = vmatmul.mubr.bf16.vlgmr.msra.gmra.mrb[0].mxu1 %v2206_v43 }
 0x111   : > { %1910 = vmatmul.mubr.bf16.vlgmr.msra.gmra.mrb[0].mxu0 %v2210_v44  ;;  %1813 = vmatprep.mubr.bf16.mxu1 %v2215_v45 }
 0x112   : > { %1919 = vmatprep.mubr.bf16.mxu0 %v2219_v46 }
 0x118   : > { %1814 = vmatmul.mubr.bf16.gmra.mrb[4].mxu1 %v2214_v47 }
 0x119   : > { %1920 = vmatmul.mubr.bf16.gmra.mrb[4].mxu0 %v2218_v48 }
 0x1e3   : > { %v1805_v49 = vpop.f32.mrb[0].mxu1 }
 0x1e4   : > { %v1911_v51 = vpop.f32.mrb[0].mxu0  ;;  %v1807_v53 = vpop.f32.mrb[1].mxu1 }
 0x1e5   : > { %v2365_v52 = vadd.f32 %v1911_v51, %v1805_v49  ;;  %v1913_v55 = vpop.f32.mrb[1].mxu0  ;;  %v1809_v57 = vpop.f32.mrb[2].mxu1 }
 0x1e6   : > { %v2366_v56 = vadd.f32 %v1913_v55, %v1807_v53  ;;  %v1915_v59 = vpop.f32.mrb[2].mxu0  ;;  %v1811_v62 = vpop.f32.mrb[3].mxu1 }
 0x1e7   : > { %v1930_v60 = vadd.f32 %v2365_v52, %v846_v50  ;;  %v2367_v61 = vadd.f32 %v1915_v59, %v1809_v57  ;;  %v1917_v0 = vpop.f32.mrb[3].mxu0 }
 0x1e8   : > { %v1931_v1 = vadd.f32 %v2366_v56, %v847_v54  ;;  %v2368_v2 = vadd.f32 %v1917_v0, %v1811_v62 }
 0x1e9   : > { %1938 = vst [vmem:[#allocation2] sm:$0xff] %v1930_v60  ;;  %v1932_v3 = vadd.f32 %v2367_v61, %v848_v58 }
 0x1ea   : > { %1939 = vst [vmem:[#allocation2 + $0x8] sm:$0xff] %v1931_v1  ;;  %v1933_v4 = vadd.f32 %v2368_v2, %v849_v63 }
 0x1eb   : > { %1940 = vst [vmem:[#allocation2 + $0x10] sm:$0xff] %v1932_v3  ;;  %v1815_v5 = vpop.f32.mrb[4].mxu1 }
 0x1ec   : > { %1941 = vst [vmem:[#allocation2 + $0x18] sm:$0xff] %v1933_v4  ;;  %v1921_v7 = vpop.f32.mrb[4].mxu0  ;;  %v1817_v9 = vpop.f32.mrb[5].mxu1 }
 0x1ed   : > { %v2369_v8 = vadd.f32 %v1921_v7, %v1815_v5  ;;  %v1923_v11 = vpop.f32.mrb[5].mxu0  ;;  %v1819_v13 = vpop.f32.mrb[6].mxu1 }
 0x1ee   : > { %v2370_v12 = vadd.f32 %v1923_v11, %v1817_v9  ;;  %v1925_v15 = vpop.f32.mrb[6].mxu0  ;;  %v1821_v18 = vpop.f32.mrb[7].mxu1  ;;  %1949 = sbr.rel (%p2348_p5) target bundleno = 517 (0x205), region = 101 }
 0x1ef   : > { %v1934_v16 = vadd.f32 %v2369_v8, %v850_v6  ;;  %v2371_v17 = vadd.f32 %v1925_v15, %v1819_v13  ;;  %v1927_v20 = vpop.f32.mrb[7].mxu0 }
 0x1f0   : > { %v1935_v21 = vadd.f32 %v2370_v12, %v851_v10  ;;  %v2372_v22 = vadd.f32 %v1927_v20, %v1821_v18  ;;  %v1950_v28 = vld [vmem:[#allocation2] sm:$0xff] (!%p2348_p5) }
 0x1f1   : > { %1942 = vst [vmem:[#allocation2 + $0x20] sm:$0xff] %v1934_v16  ;;  %v1936_v23 = vadd.f32 %v2371_v17, %v852_v14  ;;  %v1951_v29 = vld [vmem:[#allocation2 + $0x8] sm:$0xff] (!%p2348_p5)  ;;  %v1970_v40 = vadd.f32 (!%p2348_p5), %v1963_v35, %v1950_v28 }
 0x1f2   : > { %1943 = vst [vmem:[#allocation2 + $0x28] sm:$0xff] %v1935_v21  ;;  %v1937_v24 = vadd.f32 %v2372_v22, %v853_v19  ;;  %v1952_v32 = vld [vmem:[#allocation2 + $0x10] sm:$0xff] (!%p2348_p5)  ;;  %v1971_v41 = vadd.f32 (!%p2348_p5), %v1967_v36, %v1951_v29 }
 0x1f3   : > { %1944 = vst [vmem:[#allocation2 + $0x30] sm:$0xff] %v1936_v23  ;;  %v1953_v33 = vld [vmem:[#allocation2 + $0x18] sm:$0xff] (!%p2348_p5)  ;;  %v1972_v42 = vadd.f32 (!%p2348_p5), %v1963_v35, %v1952_v32  ;;  %v1978_v48 = vmul.f32 (!%p2348_p5), 0.2, %v1970_v40 }
 0x1f4   : > { %1945 = vst [vmem:[#allocation2 + $0x38] sm:$0xff] %v1937_v24  ;;  %v1973_v43 = vadd.f32 (!%p2348_p5), %v1967_v36, %v1953_v33  ;;  %v1979_v49 = vmul.f32 (!%p2348_p5), 0.2, %v1971_v41 }
 0x1f5   : > { %v1980_v50 = vmul.f32 0.2, %v1972_v42  ;;  %v1986_v54 = vmax.f32 %v1970_v40, %v1978_v48 }
 0x1f6   : > { %v1981_v51 = vmul.f32 0.2, %v1973_v43  ;;  %v1987_v55 = vmax.f32 %v1971_v41, %v1979_v49 }
 0x1f7   : > { %v1988_v56 = vmax.f32 %v1972_v42, %v1980_v50 }
 0x1f8   : > { %v1954_v34 = vld [vmem:[#allocation2 + $0x20] sm:$0xff]  ;;  %v1989_v58 = vmax.f32 %v1973_v43, %v1981_v51  ;;  %v2360_v62 = vpack.c.bf16 %v1987_v55, %v1986_v54 }
 0x1f9   : > { %v1955_v37 = vld [vmem:[#allocation2 + $0x28] sm:$0xff]  ;;  %v1974_v44 = vadd.f32 %v1963_v35, %v1954_v34 }
 0x1fa   : > { %v1956_v38 = vld [vmem:[#allocation2 + $0x30] sm:$0xff]  ;;  %v1975_v45 = vadd.f32 %v1967_v36, %v1955_v37  ;;  %v2361_v0 = vpack.c.bf16 %v1989_v58, %v1988_v56  ;;  %2018 = vst [vmem:[%s3187_s1] sm:$0xff] %v2360_v62 }
 0x1fb   : > { %v1957_v39 = vld [vmem:[#allocation2 + $0x38] sm:$0xff]  ;;  %v1976_v46 = vadd.f32 %v1963_v35, %v1956_v38  ;;  %v1982_v52 = vmul.f32 0.2, %v1974_v44 }
 0x1fc   : > { %v1977_v47 = vadd.f32 %v1967_v36, %v1957_v39  ;;  %v1983_v53 = vmul.f32 0.2, %v1975_v45  ;;  %2019 = vst [vmem:[%s3187_s1 + $0x8] sm:$0xff] %v2361_v0 }
 0x1fd   : > { %v1984_v57 = vmul.f32 0.2, %v1976_v46  ;;  %v1990_v59 = vmax.f32 %v1974_v44, %v1982_v52 }
 0x1fe   : > { %v1991_v60 = vmax.f32 %v1975_v45, %v1983_v53  ;;  %v1985_v61 = vmul.f32 0.2, %v1977_v47 }
 0x1ff   : > { %v1992_v63 = vmax.f32 %v1976_v46, %v1984_v57 }
 0x200   : > { %v2362_v1 = vpack.c.bf16 %v1991_v60, %v1990_v59  ;;  %v1993_v2 = vmax.f32 %v1977_v47, %v1985_v61 }
 0x202   : > { %2020 = vst [vmem:[%s3187_s1 + $0x10] sm:$0xff] %v2362_v1  ;;  %v2363_v3 = vpack.c.bf16 %v1993_v2, %v1992_v63 }
 0x204   : > { %2021 = vst [vmem:[%s3187_s1 + $0x18] sm:$0xff] %v2363_v3 }
 0x205 PF: > { %2028 = sbr.rel (!%p2873_p12) target bundleno = 525 (0x20d), region = 105  ;;  %s2364_s16 = sshll.u32 (%p2873_p12), %s2744_s19, 3  ;;  %v2068_v4 = vld [vmem:[%s3187_s1] sm:$0xff] (%p2873_p12)  ;;  %v2070_v5 = vld [vmem:[%s3187_s1 + $0x8] sm:$0xff] (%p2873_p12) }
 0x206   : > { %s2034_s5 = scalar_lea.vmem (%p2873_p12), %s3406_s3, %s2364_s16 }
 0x207   : > { %2069 = vst [vmem:[%s2034_s5] sm:$0xff] (%p2873_p12), %v2068_v4  ;;  %2071 = vst [vmem:[%s2034_s5 + $0x10] sm:$0xff] (%p2873_p12), %v2070_v5 }
 0x209   : > { %v2072_v6 = vld [vmem:[%s3187_s1 + $0x10] sm:$0xff] (%p2873_p12) }
 0x20a   : > { %2073 = vst [vmem:[%s2034_s5 + $0x20] sm:$0xff] (%p2873_p12), %v2072_v6 }
 0x20b   : > { %v2074_v7 = vld [vmem:[%s3187_s1 + $0x18] sm:$0xff] (%p2873_p12) }
 0x20c   : > { %2075 = vst [vmem:[%s2034_s5 + $0x30] sm:$0xff] %v2074_v7 }
 0x20d PF: > { %s13_s22 = sadd.s32 1, %s2756_s22   ;;  %s3416_s10 = sld [smem:[#allocation6_spill]] }
 0x20e   : > { %p10_p6 = scmp.ge.s32.totalorder %s13_s22, 10   ;;  %s3417_s12 = smov %s2720_s13 }
 0x20f   : > { %s3418_s13 = smov %s2871_s9  ;;  %s3419_s14 = smov %s2728_s15 }
 0x210   : > { %s3420_s15 = smov %s2868_s8  ;;  %s3421_s16 = smov %s2736_s17 }
 0x211   : > { %s3422_s17 = smov %s2854_s30  ;;  %s3423_s18 = smov %s2748_s20 }
 0x212   : > { %s3424_s19 = smov %s2752_s21  ;;  %s3425_s20 = smov %s3428_s24 }
 0x213   : > { %s3426_s21 = smov %s3416_s10  ;;  %12 = sbr.rel (!%p10_p6) target bundleno = 9 (0x9), region = 185 }

// kernel: fc_discriminator_forward.9
= control target key start
LH: loop header
LB: loop body
LE: loop exit
PB: predicated region body
PF: predicated region fallthrough
CT: control target
= control target key end

     0   :  { %s1408_s12 = smov 0   ;;  %s1410_s13 = smov 0   ;;  %s1525_s0 = inlined_call_operand.vmem [shape: bf16[8,8192], index: 0, kind: input, shape index: {}]   ;;  %s1526_s1 = inlined_call_operand.vmem [shape: bf16[8192,128], index: 1, kind: input, shape index: {}]   ;;  %s1527_s2 = inlined_call_operand.vmem [shape: f32[1,128], index: 2, kind: input, shape index: {}]   ;;  %s1528_s3 = inlined_call_operand.vmem [shape: f32[8,128], index: 3, kind: output, shape index: {}]  }
   0x1   :  { %s1412_s14 = smov 0  }
   0x2 LB: > { %s25_s15 = sadd.s32 1, %s1381_s13  ;;  %p1095_p0 = scmp.ge.s32.totalorder %s1385_s14, 1  ;;  %s1385_s14 = sphi %s1412_s14, %s13_s14   ;;  %s1381_s13 = sphi %s1410_s13, %s1530_s13   ;;  %s1377_s12 = sphi %s1408_s12, %s1529_s12  }
   0x3   : > { %p26_p1 = scmp.ge.s32.totalorder %s25_s15, 8  ;;  %p189_p2 = scmp.lt.s32.totalorder %s1385_s14, 9 }
   0x5   : > { %s1532_s15 = smov (%p26_p1, %s25_s15), 0  ;;  %p190_p3 = pnand %p1095_p0, %p189_p2 }
   0x6   : > { %s1096_s16 = sshll.u32 (!%p190_p3), %s1377_s12, 3  ;;  %s1098_s17 = sshll.u32 (!%p190_p3), %s1377_s12, 7 }
   0x7   : > { %193 = sbr.rel (%p190_p3) target bundleno = 322 (0x142), region = 32  ;;  %p233_p4 = scmp.lt.s32.totalorder (!%p190_p3), %s1096_s16, 63 }
   0x8   : > { %p241_p5 = scmp.lt.s32.totalorder (!%p190_p3), %s1098_s17, 1023  ;;  %p1100_p6 = scmp.ne.s32.totalorder (!%p190_p3), %s1377_s12, 0 }
   0xe   : > { %s1534_s16 = smov (!%p233_p4, %s1096_s16), 63  ;;  %s1536_s17 = smov (!%p241_p5, %s1098_s17), 1023 }
   0xf   : > { %s1097_s18 = sshll.u32 %s1534_s16, 2  ;;  %s1099_s22 = sshll.u32 %s1536_s17, 2  ;;  %v1387_v0 = vmov (!%p1100_p6), 0.0  }
  0x10   : > { %s1433_s21 = scalar_lea.vmem %s1525_s0, %s1097_s18  ;;  %s1438_s25 = scalar_lea.vmem %s1526_s1, %s1099_s22  ;;  %264 = vst [vmem:[#allocation2] sm:$0xff] (!%p1100_p6), %v1387_v0 }
  0x11   : > { %263 = sbr.rel (%p1100_p6) target bundleno = 24 (0x18), region = 36 }
  0x18 PF: > { %v1291_v1 = vld [vmem:[%s1438_s25 + $0x40] sm:$0xff]   ;;  %v1295_v5 = vld [vmem:[%s1438_s25 + $0x48] sm:$0xff]   ;;  %v1299_v9 = vld [vmem:[%s1438_s25 + $0x50] sm:$0xff]   ;;  %p1173_p7 = scmp.ne.s32.totalorder %s1377_s12, 7 }
  0x19   : > { %v1292_v2 = vld [vmem:[%s1438_s25 + $0xc0] sm:$0xff]   ;;  %1178 = vmatprep.subr.bf16.mxu0 %v1291_v1  ;;  %v1296_v6 = vld [vmem:[%s1438_s25 + $0xc8] sm:$0xff]   ;;  %v1300_v10 = vld [vmem:[%s1438_s25 + $0xd0] sm:$0xff]  }
  0x1a   : > { %v1293_v3 = vld [vmem:[%s1438_s25] sm:$0xff]   ;;  %1200 = vmatprep.subr.bf16.mxu1 %v1292_v2  ;;  %v1297_v7 = vld [vmem:[%s1438_s25 + $0x8] sm:$0xff]   ;;  %v1301_v11 = vld [vmem:[%s1438_s25 + $0x10] sm:$0xff]  }
  0x1b   : > { %v1294_v4 = vld [vmem:[%s1438_s25 + $0x80] sm:$0xff]   ;;  %1179 = vmatpush3.bf16.msra.mxu0 %v1293_v3  ;;  %v1298_v8 = vld [vmem:[%s1438_s25 + $0x88] sm:$0xff]   ;;  %v1302_v12 = vld [vmem:[%s1438_s25 + $0x90] sm:$0xff]  }
  0x1c   : > { %1201 = vmatpush3.bf16.msra.mxu1 %v1294_v4  ;;  %1180 = vmatprep.subr.bf16.mxu0 %v1295_v5  ;;  %v1303_v13 = vld [vmem:[%s1438_s25 + $0x58] sm:$0xff]   ;;  %v1307_v17 = vld [vmem:[%s1438_s25 + $0x60] sm:$0xff]   ;;  %v1311_v21 = vld [vmem:[%s1438_s25 + $0x68] sm:$0xff]  }
  0x1d   : > { %1202 = vmatprep.subr.bf16.mxu1 %v1296_v6  ;;  %v1304_v14 = vld [vmem:[%s1438_s25 + $0xd8] sm:$0xff]   ;;  %v1308_v18 = vld [vmem:[%s1438_s25 + $0xe0] sm:$0xff]   ;;  %v1312_v22 = vld [vmem:[%s1438_s25 + $0xe8] sm:$0xff]  }
  0x1e   : > { %v1305_v15 = vld [vmem:[%s1438_s25 + $0x18] sm:$0xff]   ;;  %v1309_v19 = vld [vmem:[%s1438_s25 + $0x20] sm:$0xff]   ;;  %v1313_v23 = vld [vmem:[%s1438_s25 + $0x28] sm:$0xff]  }
  0x1f   : > { %1181 = vmatpush3.bf16.msra.mxu0 %v1297_v7  ;;  %v1306_v16 = vld [vmem:[%s1438_s25 + $0x98] sm:$0xff]   ;;  %v1310_v20 = vld [vmem:[%s1438_s25 + $0xa0] sm:$0xff]   ;;  %v1314_v24 = vld [vmem:[%s1438_s25 + $0xa8] sm:$0xff]  }
  0x20   : > { %1203 = vmatpush3.bf16.msra.mxu1 %v1298_v8  ;;  %1182 = vmatprep.subr.bf16.mxu0 %v1299_v9  ;;  %v1315_v25 = vld [vmem:[%s1438_s25 + $0x70] sm:$0xff]   ;;  %v1319_v29 = vld [vmem:[%s1438_s25 + $0x78] sm:$0xff]   ;;  %v266_v33 = vld [vmem:[%s1433_s21] sm:$0xff] }
  0x21   : > { %1204 = vmatprep.subr.bf16.mxu1 %v1300_v10  ;;  %v1316_v26 = vld [vmem:[%s1438_s25 + $0xf0] sm:$0xff]   ;;  %v1320_v30 = vld [vmem:[%s1438_s25 + $0xf8] sm:$0xff]   ;;  %v267_v34 = vld [vmem:[%s1433_s21 + $0x8] sm:$0xff]  ;;  %v1101_v35 = vcombine.low %v266_v33, %v266_v33  ;;  %v1102_v36 = vcombine.high %v266_v33, %v266_v33 }
  0x22   : > { %v1317_v27 = vld [vmem:[%s1438_s25 + $0x30] sm:$0xff]   ;;  %v1321_v31 = vld [vmem:[%s1438_s25 + $0x38] sm:$0xff]   ;;  %v1103_v37 = vcombine.low %v267_v34, %v267_v34  ;;  %v1104_v38 = vcombine.high %v267_v34, %v267_v34  ;;  %v1327_v39 = vld [vmem:[%s1438_s25 + $0x140] sm:$0xff]  }
  0x23   : > { %1183 = vmatpush3.bf16.msra.mxu0 %v1301_v11  ;;  %v1318_v28 = vld [vmem:[%s1438_s25 + $0xb0] sm:$0xff]   ;;  %v1322_v32 = vld [vmem:[%s1438_s25 + $0xb8] sm:$0xff]   ;;  %v1328_v40 = vld [vmem:[%s1438_s25 + $0x1c0] sm:$0xff]   ;;  %842 = vmatprep.mubr.bf16.mxu0 %v1102_v36 }
  0x24   : > { %1205 = vmatpush3.bf16.msra.mxu1 %v1302_v12  ;;  %1184 = vmatprep.subr.bf16.mxu0 %v1303_v13  ;;  %v1329_v41 = vld [vmem:[%s1438_s25 + $0x100] sm:$0xff]   ;;  %v1331_v43 = vld [vmem:[%s1438_s25 + $0x148] sm:$0xff]   ;;  %v1335_v47 = vld [vmem:[%s1438_s25 + $0x150] sm:$0xff]  }
  0x25   : > { %1206 = vmatprep.subr.bf16.mxu1 %v1304_v14  ;;  %882 = vmatprep.mubr.bf16.mxu1 %v1104_v38  ;;  %v1330_v42 = vld [vmem:[%s1438_s25 + $0x180] sm:$0xff]   ;;  %v1332_v44 = vld [vmem:[%s1438_s25 + $0x1c8] sm:$0xff]   ;;  %v1336_v48 = vld [vmem:[%s1438_s25 + $0x1d0] sm:$0xff]  }
  0x26   : > { %v1333_v45 = vld [vmem:[%s1438_s25 + $0x108] sm:$0xff]   ;;  %v1337_v49 = vld [vmem:[%s1438_s25 + $0x110] sm:$0xff]   ;;  %v1339_v51 = vld [vmem:[%s1438_s25 + $0x158] sm:$0xff]  }
  0x27   : > { %1185 = vmatpush3.bf16.msra.mxu0 %v1305_v15  ;;  %v1334_v46 = vld [vmem:[%s1438_s25 + $0x188] sm:$0xff]   ;;  %v1338_v50 = vld [vmem:[%s1438_s25 + $0x190] sm:$0xff]   ;;  %v1340_v52 = vld [vmem:[%s1438_s25 + $0x1d8] sm:$0xff]  }
  0x28   : > { %1207 = vmatpush3.bf16.msra.mxu1 %v1306_v16  ;;  %1186 = vmatprep.subr.bf16.mxu0 %v1307_v17  ;;  %v1341_v53 = vld [vmem:[%s1438_s25 + $0x118] sm:$0xff]   ;;  %v1343_v55 = vld [vmem:[%s1438_s25 + $0x160] sm:$0xff]   ;;  %v1347_v59 = vld [vmem:[%s1438_s25 + $0x168] sm:$0xff]  }
  0x29   : > { %1208 = vmatprep.subr.bf16.mxu1 %v1308_v18  ;;  %v1342_v54 = vld [vmem:[%s1438_s25 + $0x198] sm:$0xff]   ;;  %v1344_v56 = vld [vmem:[%s1438_s25 + $0x1e0] sm:$0xff]   ;;  %v1348_v60 = vld [vmem:[%s1438_s25 + $0x1e8] sm:$0xff]  }
  0x2a   : > { %v1345_v57 = vld [vmem:[%s1438_s25 + $0x120] sm:$0xff]   ;;  %v1349_v61 = vld [vmem:[%s1438_s25 + $0x128] sm:$0xff]   ;;  %v1351_v63 = vld [vmem:[%s1438_s25 + $0x170] sm:$0xff]  }
  0x2b   : > { %1187 = vmatpush3.bf16.msra.mxu0 %v1309_v19  ;;  %v1346_v58 = vld [vmem:[%s1438_s25 + $0x1a0] sm:$0xff]   ;;  %v1350_v62 = vld [vmem:[%s1438_s25 + $0x1a8] sm:$0xff]   ;;  %v1352_v0 = vld [vmem:[%s1438_s25 + $0x1f0] sm:$0xff]  }
  0x2c   : > { %1209 = vmatpush3.bf16.msra.mxu1 %v1310_v20  ;;  %1188 = vmatprep.subr.bf16.mxu0 %v1311_v21  ;;  %v1353_v1 = vld [vmem:[%s1438_s25 + $0x130] sm:$0xff]   ;;  %v1355_v3 = vld [vmem:[%s1438_s25 + $0x178] sm:$0xff]  }
  0x2d   : > { %1210 = vmatprep.subr.bf16.mxu1 %v1312_v22  ;;  %v1354_v2 = vld [vmem:[%s1438_s25 + $0x1b0] sm:$0xff]   ;;  %v1356_v4 = vld [vmem:[%s1438_s25 + $0x1f8] sm:$0xff]  }
  0x2e   : > { %v1357_v5 = vld [vmem:[%s1438_s25 + $0x138] sm:$0xff]   ;;  %v268_v7 = vld [vmem:[%s1433_s21 + $0x10] sm:$0xff] }
  0x2f   : > { %1189 = vmatpush3.bf16.msra.mxu0 %v1313_v23  ;;  %v1358_v6 = vld [vmem:[%s1438_s25 + $0x1b8] sm:$0xff]   ;;  %v1105_v8 = vcombine.low %v268_v7, %v268_v7  ;;  %v1106_v9 = vcombine.high %v268_v7, %v268_v7 }
  0x30   : > { %1211 = vmatpush3.bf16.msra.mxu1 %v1314_v24  ;;  %1190 = vmatprep.subr.bf16.mxu0 %v1315_v25  ;;  %v269_v10 = vld [vmem:[%s1433_s21 + $0x18] sm:$0xff] }
  0x31   : > { %1212 = vmatprep.subr.bf16.mxu1 %v1316_v26  ;;  %v1107_v11 = vcombine.low %v269_v10, %v269_v10  ;;  %v1108_v12 = vcombine.high %v269_v10, %v269_v10 }
  0x33   : > { %1191 = vmatpush3.bf16.msra.mxu0 %v1317_v27 }
  0x34   : > { %1213 = vmatpush3.bf16.msra.mxu1 %v1318_v28  ;;  %1192 = vmatprep.subr.bf16.mxu0 %v1319_v29 }
  0x35   : > { %1214 = vmatprep.subr.bf16.mxu1 %v1320_v30 }
  0x37   : > { %1193 = vmatpush3.bf16.msra.mxu0 %v1321_v31 }
  0x38   : > { %1215 = vmatpush3.bf16.msra.mxu1 %v1322_v32  ;;  %1222 = vmatprep.subr.bf16.mxu0 %v1327_v39  ;;  %v1174_v39 = vld [vmem:[%s1527_s2] ss:$0 sm:$0xff] (!%p1173_p7) }
  0x39   : > { %1244 = vmatprep.subr.bf16.mxu1 %v1328_v40 }
  0x3a   : > { %843 = vmatmul.mubr.bf16.vlgmr.msra.gmra.mrb[0].mxu0 %v1101_v35  ;;  %v265_v35 = vld [vmem:[#allocation2] sm:$0xff] }
  0x3b   : > { %883 = vmatmul.mubr.bf16.vlgmr.msra.gmra.mrb[0].mxu1 %v1103_v37  ;;  %1223 = vmatpush3.bf16.msra.mxu0 %v1329_v41 }
  0x3c   : > { %1245 = vmatpush3.bf16.msra.mxu1 %v1330_v42  ;;  %1224 = vmatprep.subr.bf16.mxu0 %v1331_v43 }
  0x3d   : > { %1246 = vmatprep.subr.bf16.mxu1 %v1332_v44  ;;  %922 = vmatprep.mubr.bf16.mxu0 %v1106_v9 }
  0x3e   : > { %962 = vmatprep.mubr.bf16.mxu1 %v1108_v12 }
  0x3f   : > { %1225 = vmatpush3.bf16.msra.mxu0 %v1333_v45 }
  0x40   : > { %1247 = vmatpush3.bf16.msra.mxu1 %v1334_v46  ;;  %1226 = vmatprep.subr.bf16.mxu0 %v1335_v47 }
  0x41   : > { %1248 = vmatprep.subr.bf16.mxu1 %v1336_v48 }
  0x43   : > { %1227 = vmatpush3.bf16.msra.mxu0 %v1337_v49 }
  0x44   : > { %1249 = vmatpush3.bf16.msra.mxu1 %v1338_v50  ;;  %1228 = vmatprep.subr.bf16.mxu0 %v1339_v51 }
  0x45   : > { %1250 = vmatprep.subr.bf16.mxu1 %v1340_v52 }
  0x47   : > { %1229 = vmatpush3.bf16.msra.mxu0 %v1341_v53 }
  0x48   : > { %1251 = vmatpush3.bf16.msra.mxu1 %v1342_v54  ;;  %1230 = vmatprep.subr.bf16.mxu0 %v1343_v55 }
  0x49   : > { %1252 = vmatprep.subr.bf16.mxu1 %v1344_v56 }
  0x4b   : > { %1231 = vmatpush3.bf16.msra.mxu0 %v1345_v57 }
  0x4c   : > { %1253 = vmatpush3.bf16.msra.mxu1 %v1346_v58  ;;  %1232 = vmatprep.subr.bf16.mxu0 %v1347_v59 }
  0x4d   : > { %1254 = vmatprep.subr.bf16.mxu1 %v1348_v60 }
  0x4f   : > { %1233 = vmatpush3.bf16.msra.mxu0 %v1349_v61 }
  0x50   : > { %1255 = vmatpush3.bf16.msra.mxu1 %v1350_v62  ;;  %1234 = vmatprep.subr.bf16.mxu0 %v1351_v63 }
  0x51   : > { %1256 = vmatprep.subr.bf16.mxu1 %v1352_v0 }
  0x53   : > { %1235 = vmatpush3.bf16.msra.mxu0 %v1353_v1 }
  0x54   : > { %1257 = vmatpush3.bf16.msra.mxu1 %v1354_v2  ;;  %1236 = vmatprep.subr.bf16.mxu0 %v1355_v3 }
  0x55   : > { %1258 = vmatprep.subr.bf16.mxu1 %v1356_v4 }
  0x57   : > { %1237 = vmatpush3.bf16.msra.mxu0 %v1357_v5 }
  0x58   : > { %1259 = vmatpush3.bf16.msra.mxu1 %v1358_v6 }
  0x5a   : > { %923 = vmatmul.mubr.bf16.vlgmr.msra.gmra.mrb[4].mxu0 %v1105_v8 }
  0x5b   : > { %963 = vmatmul.mubr.bf16.vlgmr.msra.gmra.mrb[4].mxu1 %v1107_v11 }
 0x10d   : > { %v1194_v13 = vpop.f32.mrb[0].mxu0 }
 0x10e   : > { %v1216_v14 = vpop.f32.mrb[0].mxu1  ;;  %v1195_v15 = vpop.f32.mrb[1].mxu0 }
 0x10f   : > { %v1217_v16 = vpop.f32.mrb[1].mxu1  ;;  %v1196_v17 = vadd.f32 %v1195_v15, %v1194_v13  ;;  %v1197_v19 = vpop.f32.mrb[2].mxu0 }
 0x110   : > { %v1218_v18 = vadd.f32 %v1217_v16, %v1216_v14  ;;  %v1219_v20 = vpop.f32.mrb[2].mxu1  ;;  %v1198_v21 = vpop.f32.mrb[3].mxu0 }
 0x111   : > { %v1220_v22 = vpop.f32.mrb[3].mxu1 }
 0x112   : > { %v885_v23 = vadd.f32 %v1218_v18, %v1196_v17 }
 0x12d   : > { %v1238_v24 = vpop.f32.mrb[4].mxu0 }
 0x12e   : > { %v1260_v25 = vpop.f32.mrb[4].mxu1  ;;  %v1239_v26 = vpop.f32.mrb[5].mxu0 }
 0x12f   : > { %v1261_v27 = vpop.f32.mrb[5].mxu1  ;;  %v1240_v28 = vadd.f32 %v1239_v26, %v1238_v24  ;;  %v1241_v30 = vpop.f32.mrb[6].mxu0 }
 0x130   : > { %v1262_v29 = vadd.f32 %v1261_v27, %v1260_v25  ;;  %v1263_v31 = vpop.f32.mrb[6].mxu1  ;;  %v1242_v32 = vpop.f32.mrb[7].mxu0 }
 0x131   : > { %v1264_v33 = vpop.f32.mrb[7].mxu1  ;;  %v925_v34 = vadd.f32 %v1240_v28, %v885_v23  ;;  %975 = sbr.rel (%p1173_p7) target bundleno = 322 (0x142), region = 40 }
 0x133   : > { %v965_v36 = vadd.f32 %v1262_v29, %v925_v34 }
 0x135   : > { %v970_v37 = vadd.f32 %v965_v36, %v265_v35 }
 0x137   : > { %971 = vst [vmem:[#allocation2] sm:$0xff] %v970_v37 }
 0x13e   : > { %v976_v38 = vld [vmem:[#allocation2] sm:$0xff] }
 0x13f   : > { %v984_v40 = vadd.f32 %v1174_v39, %v976_v38 }
 0x141   : > { %985 = vst [vmem:[%s1528_s3] sm:$0xff] %v984_v40 }
 0x142 PF: > { %s13_s14 = sadd.s32 1, %s1385_s14   ;;  %s1529_s12 = smov %s1381_s13 }
 0x143   : > { %p10_p8 = scmp.ge.s32.totalorder %s13_s14, 10   ;;  %s1530_s13 = smov %s1532_s15 }
 0x145   :  { %12 = sbr.rel (!%p10_p8) target bundleno = 2 (0x2), region = 76 }

</bundles_post_ra>
